<compile_context>
chip_gen: v6e
topology: v6e:2x2x1
jax: 0.10.0
libtpu: 0.0.40
codegen_flags: <defaults>
</compile_context>

<pallas_src>
import math

import jax
import jax.numpy as jnp
from jax import lax
from jax.experimental import pallas as pl
from jax.experimental.pallas import tpu as pltpu

EPS = 1e-8


def _loop(n, body, carry, unroll=4):
    """Run body(t, carry) -> carry for t in [0, n).  Fully Python-unrolled for
    small static n (straight-line code, static ref indices); fori_loop with a
    modest unroll factor otherwise (bounded live ranges)."""
    if n <= 16:
        for t in range(n):
            carry = body(t, carry)
        return carry
    return lax.fori_loop(0, n, body, carry, unroll=unroll)


# ---------------------------------------------------------------------------
# Kernel 1: bidirectional LSTM over the inter-chunk axis + fused output Linear
#           + per-lane (sum, sumsq) partial statistics for gLN.
#
# Per grid step (one 128-wide tile of the flattened B*K lane axis):
#   x_ref    : (S, F, TN)   time-major input, (b*K + k) on lanes
#   wih_ref  : (8H, F)      [wih_fwd ; wih_bwd]      (PyTorch gate order i|f|g|o)
#   whh_ref  : (8H, 2H)     block-diag [[whh_fwd, 0], [0, whh_bwd]]
#   b_ref    : (8H, 1)      [b_ih_fwd + b_hh_fwd ; b_ih_bwd + b_hh_bwd]
#   wfc_ref  : (F, 2H)      fc weight (fwd half | bwd half)
#   bfc_ref  : (F, 1)       fc bias
#   y_ref    : (S, F, TN)   fc output
#   sum_ref  : (1, TN)      per-lane sum   of y over (S, F)   (gLN partials)
#   sumsq_ref: (1, TN)      per-lane sumsq of y over (S, F)
#   scratch  : ih fwd/bwd gate pre-activations, h fwd/bwd histories
# ---------------------------------------------------------------------------
def lstm_fc_kernel(x_ref, wih_ref, whh_ref, b_ref, wfc_ref, bfc_ref,
                   y_ref, sum_ref, sumsq_ref,
                   ihf_ref, ihb_ref, hf_ref, hb_ref):
    S, Fdim, TN = x_ref.shape
    H = hf_ref.shape[1]
    H4 = 4 * H

    # ---- Phase 1: input->gate projections for all timesteps (off the serial
    # h->h chain).  Bias broadcast hoisted out of every loop.
    wih = wih_ref[...]                                       # (8H, F)
    bias = jnp.broadcast_to(b_ref[...], (2 * H4, TN))        # (8H, TN)

    def pre_body(t, c):
        g = jnp.dot(wih, x_ref[t], preferred_element_type=jnp.float32) + bias
        ihf_ref[t] = g[:H4]                                  # fwd gates, time t
        ihb_ref[t] = g[H4:]                                  # bwd gates, time t
        return c

    _loop(S, pre_body, 0)

    # ---- Phase 2: forward and backward recurrences, interleaved (2x ILP on
    # the latency-bound chain), one fused block-diagonal MXU push per step.
    whh = whh_ref[...]                                       # (8H, 2H)

    def rec_body(it, carry):
        h_cat, c_f, c_b = carry
        t_f = it
        t_b = S - 1 - it
        rec = jnp.dot(whh, h_cat, preferred_element_type=jnp.float32)  # (8H, TN)
        g_f = ihf_ref[t_f] + rec[:H4]
        g_b = ihb_ref[t_b] + rec[H4:]

        # PyTorch gate order i, f, g, o; H is a multiple of 8 -> aligned slices.
        i_f = jax.nn.sigmoid(g_f[0:H])
        f_f = jax.nn.sigmoid(g_f[H:2 * H])
        z_f = jnp.tanh(g_f[2 * H:3 * H])
        o_f = jax.nn.sigmoid(g_f[3 * H:4 * H])
        c_f = f_f * c_f + i_f * z_f
        h_f = o_f * jnp.tanh(c_f)

        i_b = jax.nn.sigmoid(g_b[0:H])
        f_b = jax.nn.sigmoid(g_b[H:2 * H])
        z_b = jnp.tanh(g_b[2 * H:3 * H])
        o_b = jax.nn.sigmoid(g_b[3 * H:4 * H])
        c_b = f_b * c_b + i_b * z_b
        h_b = o_b * jnp.tanh(c_b)

        hf_ref[t_f] = h_f
        hb_ref[t_b] = h_b
        h_cat = jnp.concatenate([h_f, h_b], axis=0)          # (2H, TN)
        return h_cat, c_f, c_b

    carry0 = (jnp.zeros((2 * H, TN), jnp.float32),
              jnp.zeros((H, TN), jnp.float32),
              jnp.zeros((H, TN), jnp.float32))
    _loop(S, rec_body, carry0, unroll=2)

    # ---- Phase 3: output Linear over the buffered hidden states + per-lane
    # partial sums for gLN (computed while y is still in vregs).
    wfc = wfc_ref[...]                                       # (F, 2H)
    bfc = jnp.broadcast_to(bfc_ref[...], (Fdim, TN))         # (F, TN)

    def fc_body(t, carry):
        s1, s2 = carry
        h_cat = jnp.concatenate([hf_ref[t], hb_ref[t]], axis=0)     # (2H, TN)
        y_t = jnp.dot(wfc, h_cat, preferred_element_type=jnp.float32) + bfc
        y_ref[t] = y_t
        s1 = s1 + jnp.sum(y_t, axis=0, keepdims=True)
        s2 = s2 + jnp.sum(y_t * y_t, axis=0, keepdims=True)
        return s1, s2

    zero = jnp.zeros((1, TN), jnp.float32)
    s1, s2 = _loop(S, fc_body, (zero, zero))
    sum_ref[...] = s1
    sumsq_ref[...] = s2


# ---------------------------------------------------------------------------
# Kernel 2: gLN apply (per-batch mean/rstd pre-broadcast to per-lane scalars)
#           + per-feature affine + residual.  Tiled, lane-dense, elementwise.
#   y_ref, res_ref, o_ref : (TS, F, TN)
#   gamma/beta            : (F, 1)
#   mean/rstd             : (1, TN)   per-lane (= per-batch, repeated over K)
# ---------------------------------------------------------------------------
def gln_residual_kernel(y_ref, res_ref, gamma_ref, beta_ref,
                        mean_ref, rstd_ref, o_ref):
    _, Fdim, TN = y_ref.shape
    g = gamma_ref[...].reshape(1, Fdim, 1)
    bt = beta_ref[...].reshape(1, Fdim, 1)
    mu = mean_ref[...].reshape(1, 1, TN)
    rs = rstd_ref[...].reshape(1, 1, TN)
    o_ref[...] = (y_ref[...] - mu) * rs * g + bt + res_ref[...]


# ---------------------------------------------------------------------------
# Wrapper
# ---------------------------------------------------------------------------
def _vmem_capacity_bytes():
    try:
        return int(pltpu.get_tpu_info().vmem_capacity_bytes)
    except Exception:
        return 64 * 1024 * 1024          # conservative fallback (v7x per-TC)


def _pick_tile_n(N, S, F, H, budget_bytes):
    """Largest 128-multiple lane tile whose per-step VMEM footprint fits."""
    if N <= 128:
        return int(N)                    # full last dim is always a legal block
    # x + y blocks (double-buffered) + ih/h scratches, f32, per lane column:
    per_lane = 4 * (4 * S * F + 10 * S * H)
    tile = (budget_bytes // max(per_lane, 1)) // 128 * 128
    # TODO(synk): if even a 128-lane tile exceeds the budget (very large S),
    # chunk the ih/hist scratches over S instead of dropping below 128 lanes.
    return int(max(128, min(tile, 128 * (N // 128))))


def _pick_tile_s(S, F, TN, budget_bytes):
    per_row = 6 * F * TN * 4             # y + res + out blocks, double-buffered
    return int(max(1, min(S, budget_bytes // max(per_row, 1))))


def inter_chunk_rnn(x, params):
    """x: (B, F, S, K) float32 -> (B, F, S, K) float32."""
    B, F, S, K = x.shape
    H = params["whh_f"].shape[1]
    N = B * K

    # Pack weights: forward rows then backward rows; block-diagonal recurrent
    # weight so both directions share one MXU push per step.
    wih = jnp.concatenate([params["wih_f"], params["wih_b"]], axis=0)     # (8H, F)
    zblk = jnp.zeros((4 * H, H), jnp.float32)
    whh = jnp.concatenate(
        [jnp.concatenate([params["whh_f"], zblk], axis=1),
         jnp.concatenate([zblk, params["whh_b"]], axis=1)], axis=0)       # (8H, 2H)
    b = jnp.concatenate([params["b_f"], params["b_b"]], axis=0)           # (8H, 1)
    wfc = jnp.concatenate([params["wfc_f"], params["wfc_b"]], axis=1)     # (F, 2H)

    # (B, F, S, K) -> (S, F, B*K): LSTM batch (b*K + k) becomes the lane axis.
    x_seq = jnp.transpose(x, (2, 1, 0, 3)).reshape(S, F, N)

    cap = _vmem_capacity_bytes()
    tile_n = _pick_tile_n(N, S, F, H, cap // 3)
    n_tiles = pl.cdiv(N, tile_n)
    # TODO(synk): when B*K <= 128 there is only one lane tile, so on v7x one of
    # the two TensorCores idles for kernel 1; sub-128 lane splits are not legal
    # BlockSpec blocks, so this needs an explicit core_map split if it matters.

    def wspec(shape):
        return pl.BlockSpec(shape, lambda n: tuple(0 for _ in shape))

    y_seq, lane_sum, lane_sumsq = pl.pallas_call(
        lstm_fc_kernel,
        out_shape=(
            jax.ShapeDtypeStruct((S, F, N), jnp.float32),
            jax.ShapeDtypeStruct((1, N), jnp.float32),
            jax.ShapeDtypeStruct((1, N), jnp.float32),
        ),
        grid=(n_tiles,),
        in_specs=[
            pl.BlockSpec((S, F, tile_n), lambda n: (0, 0, n)),
            wspec((8 * H, F)),
            wspec((8 * H, 2 * H)),
            wspec((8 * H, 1)),
            wspec((F, 2 * H)),
            wspec((F, 1)),
        ],
        out_specs=(
            pl.BlockSpec((S, F, tile_n), lambda n: (0, 0, n)),
            pl.BlockSpec((1, tile_n), lambda n: (0, n)),
            pl.BlockSpec((1, tile_n), lambda n: (0, n)),
        ),
        scratch_shapes=[
            pltpu.VMEM((S, 4 * H, tile_n), jnp.float32),   # ih gates, forward
            pltpu.VMEM((S, 4 * H, tile_n), jnp.float32),   # ih gates, backward
            pltpu.VMEM((S, H, tile_n), jnp.float32),       # h history, forward
            pltpu.VMEM((S, H, tile_n), jnp.float32),       # h history, backward
        ],
        compiler_params=pltpu.CompilerParams(
            dimension_semantics=("parallel",),
            vmem_limit_bytes=(2 * cap) // 3,
        ),
    )(x_seq, wih, whh, b, wfc, params["bfc"])

    # Per-batch gLN statistics from the per-lane partial sums (B*K scalars;
    # tiny wrapper XLA reductions), then re-broadcast to per-lane scalars.
    cnt = jnp.float32(F * S * K)
    bsum = jnp.sum(lane_sum.reshape(B, K), axis=1)
    bsq = jnp.sum(lane_sumsq.reshape(B, K), axis=1)
    mean_b = bsum / cnt
    var_b = jnp.maximum(bsq / cnt - mean_b * mean_b, 0.0)
    rstd_b = lax.rsqrt(var_b + EPS)
    mean_lane = jnp.repeat(mean_b, K).reshape(1, N)
    rstd_lane = jnp.repeat(rstd_b, K).reshape(1, N)

    # Kernel 2: normalize + affine + residual.  Residual re-uses x_seq (already
    # materialized for kernel 1), so no extra transpose round trip.
    tile_n2 = N if N <= 128 else 128
    n_tiles2 = pl.cdiv(N, tile_n2)
    tile_s = _pick_tile_s(S, F, tile_n2, max(cap // 16, 2 * 1024 * 1024))
    n_stiles = pl.cdiv(S, tile_s)

    out_seq = pl.pallas_call(
        gln_residual_kernel,
        out_shape=jax.ShapeDtypeStruct((S, F, N), jnp.float32),
        grid=(n_stiles, n_tiles2),
        in_specs=[
            pl.BlockSpec((tile_s, F, tile_n2), lambda si, ni: (si, 0, ni)),
            pl.BlockSpec((tile_s, F, tile_n2), lambda si, ni: (si, 0, ni)),
            pl.BlockSpec((F, 1), lambda si, ni: (0, 0)),
            pl.BlockSpec((F, 1), lambda si, ni: (0, 0)),
            pl.BlockSpec((1, tile_n2), lambda si, ni: (0, ni)),
            pl.BlockSpec((1, tile_n2), lambda si, ni: (0, ni)),
        ],
        out_specs=pl.BlockSpec((tile_s, F, tile_n2), lambda si, ni: (si, 0, ni)),
        compiler_params=pltpu.CompilerParams(
            dimension_semantics=("parallel", "parallel"),
            vmem_limit_bytes=max(cap // 2, 8 * 1024 * 1024),
        ),
    )(y_seq, x_seq, params["gamma"], params["beta"], mean_lane, rstd_lane)

    # (S, F, B*K) -> (B, F, S, K): module output layout (wrapper XLA transpose,
    # instead of masked sub-128-lane kernel stores).
    return jnp.transpose(out_seq.reshape(S, F, B, K), (2, 1, 0, 3))


# ---------------------------------------------------------------------------
# Pure-JAX reference (mirrors the PyTorch forward), for validation.
# ---------------------------------------------------------------------------
def inter_chunk_rnn_ref(x, params):
    B, F, S, K = x.shape
    H = params["whh_f"].shape[1]
    hp = lax.Precision.HIGHEST

    xs = jnp.transpose(x, (0, 3, 2, 1)).reshape(B * K, S, F)     # (N, S, F)
    xt = jnp.transpose(xs, (1, 0, 2))                            # (S, N, F)
    N = B * K
    h0 = jnp.zeros((N, H), jnp.float32)
    c0 = jnp.zeros((N, H), jnp.float32)

    def make_step(wih, whh, b):
        def step(carry, x_t):
            h, c = carry
            gates = (jnp.einsum("nf,gf->ng", x_t, wih, precision=hp)
                     + jnp.einsum("nh,gh->ng", h, whh, precision=hp)
                     + b[:, 0])
            i = jax.nn.sigmoid(gates[:, 0:H])
            f = jax.nn.sigmoid(gates[:, H:2 * H])
            g = jnp.tanh(gates[:, 2 * H:3 * H])
            o = jax.nn.sigmoid(gates[:, 3 * H:4 * H])
            c = f * c + i * g
            h = o * jnp.tanh(c)
            return (h, c), h
        return step

    _, hf = lax.scan(make_step(params["wih_f"], params["whh_f"], params["b_f"]),
                     (h0, c0), xt)
    _, hb = lax.scan(make_step(params["wih_b"], params["whh_b"], params["b_b"]),
                     (h0, c0), xt, reverse=True)

    y = (jnp.einsum("snh,fh->snf", hf, params["wfc_f"], precision=hp)
         + jnp.einsum("snh,fh->snf", hb, params["wfc_b"], precision=hp)
         + params["bfc"][:, 0])                                  # (S, N, F)
    y = jnp.transpose(y.reshape(S, B, K, F), (1, 3, 0, 2))       # (B, F, S, K)
    y2 = y.reshape(B, F, S * K)
    mean = jnp.mean(y2, axis=(1, 2), keepdims=True)
    var = jnp.mean(jnp.square(y2 - mean), axis=(1, 2), keepdims=True)
    yn = (y2 - mean) * lax.rsqrt(var + EPS)
    yn = yn * params["gamma"][None] + params["beta"][None]
    return yn.reshape(B, F, S, K) + x


# ---------------------------------------------------------------------------
# Deterministic parameter init (mimics PyTorch defaults: U(-1/sqrt(fan), +))
# ---------------------------------------------------------------------------
def init_params(key, num_features, hidden_channels):
    F, H = num_features, hidden_channels
    ks = jax.random.split(key, 10)
    s_rnn = 1.0 / math.sqrt(H)
    s_fc = 1.0 / math.sqrt(2 * H)

    def u(k, shape, s):
        return jax.random.uniform(k, shape, jnp.float32, -s, s)

    wih_f = u(ks[0], (4 * H, F), s_rnn)
    whh_f = u(ks[1], (4 * H, H), s_rnn)
    b_f = u(ks[2], (4 * H,), s_rnn) + u(ks[3], (4 * H,), s_rnn)
    wih_b = u(ks[4], (4 * H, F), s_rnn)
    whh_b = u(ks[5], (4 * H, H), s_rnn)
    b_b = u(ks[6], (4 * H,), s_rnn) + u(ks[7], (4 * H,), s_rnn)
    wfc = u(ks[8], (F, 2 * H), s_fc)
    bfc = u(ks[9], (F,), s_fc)
    gamma = jnp.ones((F,), jnp.float32)
    beta = jnp.zeros((F,), jnp.float32)

    return {
        "wih_f": wih_f,                    # (4H, F)
        "whh_f": whh_f,                    # (4H, H)
        "b_f": b_f[:, None],               # (4H, 1)  b_ih + b_hh
        "wih_b": wih_b,
        "whh_b": whh_b,
        "b_b": b_b[:, None],
        "wfc_f": wfc[:, :H],               # (F, H)  forward half of fc weight
        "wfc_b": wfc[:, H:],               # (F, H)  backward half
        "bfc": bfc[:, None],               # (F, 1)
        "gamma": gamma[:, None],           # (F, 1)
        "beta": beta[:, None],             # (F, 1)
    }


if __name__ == "__main__":
    # batch, num_features, inter_length, chunk_size  (B*K = 128 -> full lane tile)
    B, F, S, K = 2, 16, 8, 64
    H = 32                                 # hidden_channels

    key = jax.random.PRNGKey(0)
    k_x, k_p = jax.random.split(key)
    x = jax.random.normal(k_x, (B, F, S, K), jnp.float32)
    params = init_params(k_p, F, H)

    fn = jax.jit(inter_chunk_rnn)
    out = jax.block_until_ready(fn(x, params))

    assert out.shape == (B, F, S, K) and out.dtype == jnp.float32

    ref = jax.block_until_ready(inter_chunk_rnn_ref(x, params))
    max_err = float(jnp.max(jnp.abs(out - ref)))
    # Expected ~1e-5; headroom for MXU default-precision f32 matmul passes.
    assert max_err < 5e-3, f"max abs error vs reference: {max_err}"

    print("KERNEL_OK")
</pallas_src>

<mosaic_0001>
module attributes {stable_mosaic.version = 11 : i64} {
  func.func @gln_residual_kernel(%arg0: i32, %arg1: i32, %arg2: memref<8x16x128xf32, #tpu.memory_space<vmem>>, %arg3: memref<8x16x128xf32, #tpu.memory_space<vmem>>, %arg4: memref<16x1xf32, #tpu.memory_space<vmem>>, %arg5: memref<16x1xf32, #tpu.memory_space<vmem>>, %arg6: memref<1x128xf32, #tpu.memory_space<vmem>>, %arg7: memref<1x128xf32, #tpu.memory_space<vmem>>, %arg8: memref<8x16x128xf32, #tpu.memory_space<vmem>>) attributes {dimension_semantics = [#tpu.dimension_semantics<parallel>, #tpu.dimension_semantics<parallel>], iteration_bounds = array<i64: 1, 1>, scalar_prefetch = 0 : i64, scratch_operands = 0 : i64, tpu.core_type = #tpu.core_type<tc>, window_params = [{transform_indices = @transform_0, window_bounds = array<i64: 8, 16, 128>}, {transform_indices = @transform_1, window_bounds = array<i64: 8, 16, 128>}, {pipeline_mode = #tpu.pipeline_mode<synchronous>, transform_indices = @transform_2, window_bounds = array<i64: 16, 1>}, {pipeline_mode = #tpu.pipeline_mode<synchronous>, transform_indices = @transform_3, window_bounds = array<i64: 16, 1>}, {transform_indices = @transform_4, window_bounds = array<i64: 1, 128>}, {transform_indices = @transform_5, window_bounds = array<i64: 1, 128>}, {transform_indices = @transform_6, window_bounds = array<i64: 8, 16, 128>}]} {
    %c0 = arith.constant 0 : index
    %c0_0 = arith.constant 0 : index
    %0 = vector.load %arg4[%c0, %c0_0] : memref<16x1xf32, #tpu.memory_space<vmem>>, vector<16x1xf32>
    %1 = vector.shape_cast %0 : vector<16x1xf32> to vector<1x16x1xf32>
    %c0_1 = arith.constant 0 : index
    %c0_2 = arith.constant 0 : index
    %2 = vector.load %arg5[%c0_1, %c0_2] : memref<16x1xf32, #tpu.memory_space<vmem>>, vector<16x1xf32>
    %3 = vector.shape_cast %2 : vector<16x1xf32> to vector<1x16x1xf32>
    %c0_3 = arith.constant 0 : index
    %c0_4 = arith.constant 0 : index
    %4 = vector.load %arg6[%c0_3, %c0_4] : memref<1x128xf32, #tpu.memory_space<vmem>>, vector<1x128xf32>
    %5 = vector.shape_cast %4 : vector<1x128xf32> to vector<1x1x128xf32>
    %c0_5 = arith.constant 0 : index
    %c0_6 = arith.constant 0 : index
    %6 = vector.load %arg7[%c0_5, %c0_6] : memref<1x128xf32, #tpu.memory_space<vmem>>, vector<1x128xf32>
    %7 = vector.shape_cast %6 : vector<1x128xf32> to vector<1x1x128xf32>
    %c0_7 = arith.constant 0 : index
    %c0_8 = arith.constant 0 : index
    %c0_9 = arith.constant 0 : index
    %8 = vector.load %arg2[%c0_7, %c0_8, %c0_9] : memref<8x16x128xf32, #tpu.memory_space<vmem>>, vector<8x16x128xf32>
    %9 = vector.broadcast %5 : vector<1x1x128xf32> to vector<8x16x128xf32>
    %10 = arith.subf %8, %9 : vector<8x16x128xf32>
    %11 = vector.broadcast %7 : vector<1x1x128xf32> to vector<8x16x128xf32>
    %12 = arith.mulf %10, %11 : vector<8x16x128xf32>
    %13 = vector.broadcast %1 : vector<1x16x1xf32> to vector<8x16x128xf32>
    %14 = arith.mulf %12, %13 : vector<8x16x128xf32>
    %15 = vector.broadcast %3 : vector<1x16x1xf32> to vector<8x16x128xf32>
    %16 = arith.addf %14, %15 : vector<8x16x128xf32>
    %c0_10 = arith.constant 0 : index
    %c0_11 = arith.constant 0 : index
    %c0_12 = arith.constant 0 : index
    %17 = vector.load %arg3[%c0_10, %c0_11, %c0_12] : memref<8x16x128xf32, #tpu.memory_space<vmem>>, vector<8x16x128xf32>
    %18 = arith.addf %16, %17 : vector<8x16x128xf32>
    %c0_13 = arith.constant 0 : index
    %c0_14 = arith.constant 0 : index
    %c0_15 = arith.constant 0 : index
    %19 = vector.load %arg8[%c0_13, %c0_14, %c0_15] : memref<8x16x128xf32, #tpu.memory_space<vmem>>, vector<8x16x128xf32>
    tpu.vector_store %arg8[%c0_13, %c0_14, %c0_15], %18 {strides = array<i32>} : memref<8x16x128xf32, #tpu.memory_space<vmem>>, vector<8x16x128xf32>,
    return
  }
  func.func @transform_0(%arg0: i32, %arg1: i32) -> (i32, i32, i32) {
    %c0_i32 = arith.constant 0 : i32
    %c0_i32_0 = arith.constant 0 : i32
    return %arg0, %c0_i32, %arg1 : i32, i32, i32
  }
  func.func @transform_1(%arg0: i32, %arg1: i32) -> (i32, i32, i32) {
    %c0_i32 = arith.constant 0 : i32
    %c0_i32_0 = arith.constant 0 : i32
    return %arg0, %c0_i32, %arg1 : i32, i32, i32
  }
  func.func @transform_2(%arg0: i32, %arg1: i32) -> (i32, i32) {
    %c0_i32 = arith.constant 0 : i32
    %c0_i32_0 = arith.constant 0 : i32
    %c0_i32_1 = arith.constant 0 : i32
    return %c0_i32, %c0_i32_0 : i32, i32
  }
  func.func @transform_3(%arg0: i32, %arg1: i32) -> (i32, i32) {
    %c0_i32 = arith.constant 0 : i32
    %c0_i32_0 = arith.constant 0 : i32
    %c0_i32_1 = arith.constant 0 : i32
    return %c0_i32, %c0_i32_0 : i32, i32
  }
  func.func @transform_4(%arg0: i32, %arg1: i32) -> (i32, i32) {
    %c0_i32 = arith.constant 0 : i32
    %c0_i32_0 = arith.constant 0 : i32
    return %c0_i32, %arg1 : i32, i32
  }
  func.func @transform_5(%arg0: i32, %arg1: i32) -> (i32, i32) {
    %c0_i32 = arith.constant 0 : i32
    %c0_i32_0 = arith.constant 0 : i32
    return %c0_i32, %arg1 : i32, i32
  }
  func.func @transform_6(%arg0: i32, %arg1: i32) -> (i32, i32, i32) {
    %c0_i32 = arith.constant 0 : i32
    %c0_i32_0 = arith.constant 0 : i32
    return %arg0, %c0_i32, %arg1 : i32, i32, i32
  }
}

module attributes {stable_mosaic.version = 11 : i64} {
  func.func @lstm_fc_kernel(%arg0: i32, %arg1: memref<8x16x128xf32, #tpu.memory_space<vmem>>, %arg2: memref<256x16xf32, #tpu.memory_space<vmem>>, %arg3: memref<256x64xf32, #tpu.memory_space<vmem>>, %arg4: memref<256x1xf32, #tpu.memory_space<vmem>>, %arg5: memref<16x64xf32, #tpu.memory_space<vmem>>, %arg6: memref<16x1xf32, #tpu.memory_space<vmem>>, %arg7: memref<8x16x128xf32, #tpu.memory_space<vmem>>, %arg8: memref<1x128xf32, #tpu.memory_space<vmem>>, %arg9: memref<1x128xf32, #tpu.memory_space<vmem>>, %arg10: memref<8x128x128xf32, #tpu.memory_space<vmem>>, %arg11: memref<8x128x128xf32, #tpu.memory_space<vmem>>, %arg12: memref<8x32x128xf32, #tpu.memory_space<vmem>>, %arg13: memref<8x32x128xf32, #tpu.memory_space<vmem>>) attributes {dimension_semantics = [#tpu.dimension_semantics<parallel>], iteration_bounds = array<i64: 1>, scalar_prefetch = 0 : i64, scratch_operands = 4 : i64, tpu.core_type = #tpu.core_type<tc>, window_params = [{transform_indices = @transform_0, window_bounds = array<i64: 8, 16, 128>}, {pipeline_mode = #tpu.pipeline_mode<synchronous>, transform_indices = @transform_1, window_bounds = array<i64: 256, 16>}, {pipeline_mode = #tpu.pipeline_mode<synchronous>, transform_indices = @transform_2, window_bounds = array<i64: 256, 64>}, {pipeline_mode = #tpu.pipeline_mode<synchronous>, transform_indices = @transform_3, window_bounds = array<i64: 256, 1>}, {pipeline_mode = #tpu.pipeline_mode<synchronous>, transform_indices = @transform_4, window_bounds = array<i64: 16, 64>}, {pipeline_mode = #tpu.pipeline_mode<synchronous>, transform_indices = @transform_5, window_bounds = array<i64: 16, 1>}, {transform_indices = @transform_6, window_bounds = array<i64: 8, 16, 128>}, {transform_indices = @transform_7, window_bounds = array<i64: 1, 128>}, {transform_indices = @transform_8, window_bounds = array<i64: 1, 128>}]} {
    %c0 = arith.constant 0 : index
    %c0_0 = arith.constant 0 : index
    %0 = vector.load %arg2[%c0, %c0_0] : memref<256x16xf32, #tpu.memory_space<vmem>>, vector<256x16xf32>
    %c0_1 = arith.constant 0 : index
    %c0_2 = arith.constant 0 : index
    %1 = vector.load %arg4[%c0_1, %c0_2] : memref<256x1xf32, #tpu.memory_space<vmem>>, vector<256x1xf32>
    %2 = vector.shape_cast %1 : vector<256x1xf32> to vector<256x1xf32>
    %3 = vector.broadcast %2 : vector<256x1xf32> to vector<256x128xf32>
    %c0_3 = arith.constant 0 : index
    %c0_4 = arith.constant 0 : index
    %c0_5 = arith.constant 0 : index
    %4 = vector.load %arg1[%c0_3, %c0_4, %c0_5] : memref<8x16x128xf32, #tpu.memory_space<vmem>>, vector<1x16x128xf32>
    %5 = vector.shape_cast %4 : vector<1x16x128xf32> to vector<16x128xf32>
    %cst = arith.constant dense<0.000000e+00> : vector<256x128xf32>
    %6 = tpu.matmul %0, %5, %cst {dimension_numbers = #tpu.dot_dimension_numbers<[1], [0], [0], [1], [0, 0, 1, 1], [], []>} : vector<256x16xf32>, vector<16x128xf32>, vector<256x128xf32> -> vector<256x128xf32>
    %7 = arith.addf %6, %3 : vector<256x128xf32>
    %8 = vector.extract_strided_slice %7 {offsets = [0, 0], sizes = [128, 128], strides = [1, 1]} : vector<256x128xf32> to vector<128x128xf32>
    %c0_6 = arith.constant 0 : index
    %c0_7 = arith.constant 0 : index
    %c0_8 = arith.constant 0 : index
    %9 = vector.load %arg10[%c0_6, %c0_7, %c0_8] : memref<8x128x128xf32, #tpu.memory_space<vmem>>, vector<1x128x128xf32>
    %10 = vector.shape_cast %9 : vector<1x128x128xf32> to vector<128x128xf32>
    %11 = vector.shape_cast %8 : vector<128x128xf32> to vector<1x128x128xf32>
    tpu.vector_store %arg10[%c0_6, %c0_7, %c0_8], %11 {strides = array<i32>} : memref<8x128x128xf32, #tpu.memory_space<vmem>>, vector<1x128x128xf32>,
    %12 = vector.extract_strided_slice %7 {offsets = [128, 0], sizes = [128, 128], strides = [1, 1]} : vector<256x128xf32> to vector<128x128xf32>
    %c0_9 = arith.constant 0 : index
    %c0_10 = arith.constant 0 : index
    %c0_11 = arith.constant 0 : index
    %13 = vector.load %arg11[%c0_9, %c0_10, %c0_11] : memref<8x128x128xf32, #tpu.memory_space<vmem>>, vector<1x128x128xf32>
    %14 = vector.shape_cast %13 : vector<1x128x128xf32> to vector<128x128xf32>
    %15 = vector.shape_cast %12 : vector<128x128xf32> to vector<1x128x128xf32>
    tpu.vector_store %arg11[%c0_9, %c0_10, %c0_11], %15 {strides = array<i32>} : memref<8x128x128xf32, #tpu.memory_space<vmem>>, vector<1x128x128xf32>,
    %c1 = arith.constant 1 : index
    %c0_12 = arith.constant 0 : index
    %c0_13 = arith.constant 0 : index
    %16 = vector.load %arg1[%c1, %c0_12, %c0_13] : memref<8x16x128xf32, #tpu.memory_space<vmem>>, vector<1x16x128xf32>
    %17 = vector.shape_cast %16 : vector<1x16x128xf32> to vector<16x128xf32>
    %cst_14 = arith.constant dense<0.000000e+00> : vector<256x128xf32>
    %18 = tpu.matmul %0, %17, %cst_14 {dimension_numbers = #tpu.dot_dimension_numbers<[1], [0], [0], [1], [0, 0, 1, 1], [], []>} : vector<256x16xf32>, vector<16x128xf32>, vector<256x128xf32> -> vector<256x128xf32>
    %19 = arith.addf %18, %3 : vector<256x128xf32>
    %20 = vector.extract_strided_slice %19 {offsets = [0, 0], sizes = [128, 128], strides = [1, 1]} : vector<256x128xf32> to vector<128x128xf32>
    %c1_15 = arith.constant 1 : index
    %c0_16 = arith.constant 0 : index
    %c0_17 = arith.constant 0 : index
    %21 = vector.load %arg10[%c1_15, %c0_16, %c0_17] : memref<8x128x128xf32, #tpu.memory_space<vmem>>, vector<1x128x128xf32>
    %22 = vector.shape_cast %21 : vector<1x128x128xf32> to vector<128x128xf32>
    %23 = vector.shape_cast %20 : vector<128x128xf32> to vector<1x128x128xf32>
    tpu.vector_store %arg10[%c1_15, %c0_16, %c0_17], %23 {strides = array<i32>} : memref<8x128x128xf32, #tpu.memory_space<vmem>>, vector<1x128x128xf32>,
    %24 = vector.extract_strided_slice %19 {offsets = [128, 0], sizes = [128, 128], strides = [1, 1]} : vector<256x128xf32> to vector<128x128xf32>
    %c1_18 = arith.constant 1 : index
    %c0_19 = arith.constant 0 : index
    %c0_20 = arith.constant 0 : index
    %25 = vector.load %arg11[%c1_18, %c0_19, %c0_20] : memref<8x128x128xf32, #tpu.memory_space<vmem>>, vector<1x128x128xf32>
    %26 = vector.shape_cast %25 : vector<1x128x128xf32> to vector<128x128xf32>
    %27 = vector.shape_cast %24 : vector<128x128xf32> to vector<1x128x128xf32>
    tpu.vector_store %arg11[%c1_18, %c0_19, %c0_20], %27 {strides = array<i32>} : memref<8x128x128xf32, #tpu.memory_space<vmem>>, vector<1x128x128xf32>,
    %c2 = arith.constant 2 : index
    %c0_21 = arith.constant 0 : index
    %c0_22 = arith.constant 0 : index
    %28 = vector.load %arg1[%c2, %c0_21, %c0_22] : memref<8x16x128xf32, #tpu.memory_space<vmem>>, vector<1x16x128xf32>
    %29 = vector.shape_cast %28 : vector<1x16x128xf32> to vector<16x128xf32>
    %cst_23 = arith.constant dense<0.000000e+00> : vector<256x128xf32>
    %30 = tpu.matmul %0, %29, %cst_23 {dimension_numbers = #tpu.dot_dimension_numbers<[1], [0], [0], [1], [0, 0, 1, 1], [], []>} : vector<256x16xf32>, vector<16x128xf32>, vector<256x128xf32> -> vector<256x128xf32>
    %31 = arith.addf %30, %3 : vector<256x128xf32>
    %32 = vector.extract_strided_slice %31 {offsets = [0, 0], sizes = [128, 128], strides = [1, 1]} : vector<256x128xf32> to vector<128x128xf32>
    %c2_24 = arith.constant 2 : index
    %c0_25 = arith.constant 0 : index
    %c0_26 = arith.constant 0 : index
    %33 = vector.load %arg10[%c2_24, %c0_25, %c0_26] : memref<8x128x128xf32, #tpu.memory_space<vmem>>, vector<1x128x128xf32>
    %34 = vector.shape_cast %33 : vector<1x128x128xf32> to vector<128x128xf32>
    %35 = vector.shape_cast %32 : vector<128x128xf32> to vector<1x128x128xf32>
    tpu.vector_store %arg10[%c2_24, %c0_25, %c0_26], %35 {strides = array<i32>} : memref<8x128x128xf32, #tpu.memory_space<vmem>>, vector<1x128x128xf32>,
    %36 = vector.extract_strided_slice %31 {offsets = [128, 0], sizes = [128, 128], strides = [1, 1]} : vector<256x128xf32> to vector<128x128xf32>
    %c2_27 = arith.constant 2 : index
    %c0_28 = arith.constant 0 : index
    %c0_29 = arith.constant 0 : index
    %37 = vector.load %arg11[%c2_27, %c0_28, %c0_29] : memref<8x128x128xf32, #tpu.memory_space<vmem>>, vector<1x128x128xf32>
    %38 = vector.shape_cast %37 : vector<1x128x128xf32> to vector<128x128xf32>
    %39 = vector.shape_cast %36 : vector<128x128xf32> to vector<1x128x128xf32>
    tpu.vector_store %arg11[%c2_27, %c0_28, %c0_29], %39 {strides = array<i32>} : memref<8x128x128xf32, #tpu.memory_space<vmem>>, vector<1x128x128xf32>,
    %c3 = arith.constant 3 : index
    %c0_30 = arith.constant 0 : index
    %c0_31 = arith.constant 0 : index
    %40 = vector.load %arg1[%c3, %c0_30, %c0_31] : memref<8x16x128xf32, #tpu.memory_space<vmem>>, vector<1x16x128xf32>
    %41 = vector.shape_cast %40 : vector<1x16x128xf32> to vector<16x128xf32>
    %cst_32 = arith.constant dense<0.000000e+00> : vector<256x128xf32>
    %42 = tpu.matmul %0, %41, %cst_32 {dimension_numbers = #tpu.dot_dimension_numbers<[1], [0], [0], [1], [0, 0, 1, 1], [], []>} : vector<256x16xf32>, vector<16x128xf32>, vector<256x128xf32> -> vector<256x128xf32>
    %43 = arith.addf %42, %3 : vector<256x128xf32>
    %44 = vector.extract_strided_slice %43 {offsets = [0, 0], sizes = [128, 128], strides = [1, 1]} : vector<256x128xf32> to vector<128x128xf32>
    %c3_33 = arith.constant 3 : index
    %c0_34 = arith.constant 0 : index
    %c0_35 = arith.constant 0 : index
    %45 = vector.load %arg10[%c3_33, %c0_34, %c0_35] : memref<8x128x128xf32, #tpu.memory_space<vmem>>, vector<1x128x128xf32>
    %46 = vector.shape_cast %45 : vector<1x128x128xf32> to vector<128x128xf32>
    %47 = vector.shape_cast %44 : vector<128x128xf32> to vector<1x128x128xf32>
    tpu.vector_store %arg10[%c3_33, %c0_34, %c0_35], %47 {strides = array<i32>} : memref<8x128x128xf32, #tpu.memory_space<vmem>>, vector<1x128x128xf32>,
    %48 = vector.extract_strided_slice %43 {offsets = [128, 0], sizes = [128, 128], strides = [1, 1]} : vector<256x128xf32> to vector<128x128xf32>
    %c3_36 = arith.constant 3 : index
    %c0_37 = arith.constant 0 : index
    %c0_38 = arith.constant 0 : index
    %49 = vector.load %arg11[%c3_36, %c0_37, %c0_38] : memref<8x128x128xf32, #tpu.memory_space<vmem>>, vector<1x128x128xf32>
    %50 = vector.shape_cast %49 : vector<1x128x128xf32> to vector<128x128xf32>
    %51 = vector.shape_cast %48 : vector<128x128xf32> to vector<1x128x128xf32>
    tpu.vector_store %arg11[%c3_36, %c0_37, %c0_38], %51 {strides = array<i32>} : memref<8x128x128xf32, #tpu.memory_space<vmem>>, vector<1x128x128xf32>,
    %c4 = arith.constant 4 : index
    %c0_39 = arith.constant 0 : index
    %c0_40 = arith.constant 0 : index
    %52 = vector.load %arg1[%c4, %c0_39, %c0_40] : memref<8x16x128xf32, #tpu.memory_space<vmem>>, vector<1x16x128xf32>
    %53 = vector.shape_cast %52 : vector<1x16x128xf32> to vector<16x128xf32>
    %cst_41 = arith.constant dense<0.000000e+00> : vector<256x128xf32>
    %54 = tpu.matmul %0, %53, %cst_41 {dimension_numbers = #tpu.dot_dimension_numbers<[1], [0], [0], [1], [0, 0, 1, 1], [], []>} : vector<256x16xf32>, vector<16x128xf32>, vector<256x128xf32> -> vector<256x128xf32>
    %55 = arith.addf %54, %3 : vector<256x128xf32>
    %56 = vector.extract_strided_slice %55 {offsets = [0, 0], sizes = [128, 128], strides = [1, 1]} : vector<256x128xf32> to vector<128x128xf32>
    %c4_42 = arith.constant 4 : index
    %c0_43 = arith.constant 0 : index
    %c0_44 = arith.constant 0 : index
    %57 = vector.load %arg10[%c4_42, %c0_43, %c0_44] : memref<8x128x128xf32, #tpu.memory_space<vmem>>, vector<1x128x128xf32>
    %58 = vector.shape_cast %57 : vector<1x128x128xf32> to vector<128x128xf32>
    %59 = vector.shape_cast %56 : vector<128x128xf32> to vector<1x128x128xf32>
    tpu.vector_store %arg10[%c4_42, %c0_43, %c0_44], %59 {strides = array<i32>} : memref<8x128x128xf32, #tpu.memory_space<vmem>>, vector<1x128x128xf32>,
    %60 = vector.extract_strided_slice %55 {offsets = [128, 0], sizes = [128, 128], strides = [1, 1]} : vector<256x128xf32> to vector<128x128xf32>
    %c4_45 = arith.constant 4 : index
    %c0_46 = arith.constant 0 : index
    %c0_47 = arith.constant 0 : index
    %61 = vector.load %arg11[%c4_45, %c0_46, %c0_47] : memref<8x128x128xf32, #tpu.memory_space<vmem>>, vector<1x128x128xf32>
    %62 = vector.shape_cast %61 : vector<1x128x128xf32> to vector<128x128xf32>
    %63 = vector.shape_cast %60 : vector<128x128xf32> to vector<1x128x128xf32>
    tpu.vector_store %arg11[%c4_45, %c0_46, %c0_47], %63 {strides = array<i32>} : memref<8x128x128xf32, #tpu.memory_space<vmem>>, vector<1x128x128xf32>,
    %c5 = arith.constant 5 : index
    %c0_48 = arith.constant 0 : index
    %c0_49 = arith.constant 0 : index
    %64 = vector.load %arg1[%c5, %c0_48, %c0_49] : memref<8x16x128xf32, #tpu.memory_space<vmem>>, vector<1x16x128xf32>
    %65 = vector.shape_cast %64 : vector<1x16x128xf32> to vector<16x128xf32>
    %cst_50 = arith.constant dense<0.000000e+00> : vector<256x128xf32>
    %66 = tpu.matmul %0, %65, %cst_50 {dimension_numbers = #tpu.dot_dimension_numbers<[1], [0], [0], [1], [0, 0, 1, 1], [], []>} : vector<256x16xf32>, vector<16x128xf32>, vector<256x128xf32> -> vector<256x128xf32>
    %67 = arith.addf %66, %3 : vector<256x128xf32>
    %68 = vector.extract_strided_slice %67 {offsets = [0, 0], sizes = [128, 128], strides = [1, 1]} : vector<256x128xf32> to vector<128x128xf32>
    %c5_51 = arith.constant 5 : index
    %c0_52 = arith.constant 0 : index
    %c0_53 = arith.constant 0 : index
    %69 = vector.load %arg10[%c5_51, %c0_52, %c0_53] : memref<8x128x128xf32, #tpu.memory_space<vmem>>, vector<1x128x128xf32>
    %70 = vector.shape_cast %69 : vector<1x128x128xf32> to vector<128x128xf32>
    %71 = vector.shape_cast %68 : vector<128x128xf32> to vector<1x128x128xf32>
    tpu.vector_store %arg10[%c5_51, %c0_52, %c0_53], %71 {strides = array<i32>} : memref<8x128x128xf32, #tpu.memory_space<vmem>>, vector<1x128x128xf32>,
    %72 = vector.extract_strided_slice %67 {offsets = [128, 0], sizes = [128, 128], strides = [1, 1]} : vector<256x128xf32> to vector<128x128xf32>
    %c5_54 = arith.constant 5 : index
    %c0_55 = arith.constant 0 : index
    %c0_56 = arith.constant 0 : index
    %73 = vector.load %arg11[%c5_54, %c0_55, %c0_56] : memref<8x128x128xf32, #tpu.memory_space<vmem>>, vector<1x128x128xf32>
    %74 = vector.shape_cast %73 : vector<1x128x128xf32> to vector<128x128xf32>
    %75 = vector.shape_cast %72 : vector<128x128xf32> to vector<1x128x128xf32>
    tpu.vector_store %arg11[%c5_54, %c0_55, %c0_56], %75 {strides = array<i32>} : memref<8x128x128xf32, #tpu.memory_space<vmem>>, vector<1x128x128xf32>,
    %c6 = arith.constant 6 : index
    %c0_57 = arith.constant 0 : index
    %c0_58 = arith.constant 0 : index
    %76 = vector.load %arg1[%c6, %c0_57, %c0_58] : memref<8x16x128xf32, #tpu.memory_space<vmem>>, vector<1x16x128xf32>
    %77 = vector.shape_cast %76 : vector<1x16x128xf32> to vector<16x128xf32>
    %cst_59 = arith.constant dense<0.000000e+00> : vector<256x128xf32>
    %78 = tpu.matmul %0, %77, %cst_59 {dimension_numbers = #tpu.dot_dimension_numbers<[1], [0], [0], [1], [0, 0, 1, 1], [], []>} : vector<256x16xf32>, vector<16x128xf32>, vector<256x128xf32> -> vector<256x128xf32>
    %79 = arith.addf %78, %3 : vector<256x128xf32>
    %80 = vector.extract_strided_slice %79 {offsets = [0, 0], sizes = [128, 128], strides = [1, 1]} : vector<256x128xf32> to vector<128x128xf32>
    %c6_60 = arith.constant 6 : index
    %c0_61 = arith.constant 0 : index
    %c0_62 = arith.constant 0 : index
    %81 = vector.load %arg10[%c6_60, %c0_61, %c0_62] : memref<8x128x128xf32, #tpu.memory_space<vmem>>, vector<1x128x128xf32>
    %82 = vector.shape_cast %81 : vector<1x128x128xf32> to vector<128x128xf32>
    %83 = vector.shape_cast %80 : vector<128x128xf32> to vector<1x128x128xf32>
    tpu.vector_store %arg10[%c6_60, %c0_61, %c0_62], %83 {strides = array<i32>} : memref<8x128x128xf32, #tpu.memory_space<vmem>>, vector<1x128x128xf32>,
    %84 = vector.extract_strided_slice %79 {offsets = [128, 0], sizes = [128, 128], strides = [1, 1]} : vector<256x128xf32> to vector<128x128xf32>
    %c6_63 = arith.constant 6 : index
    %c0_64 = arith.constant 0 : index
    %c0_65 = arith.constant 0 : index
    %85 = vector.load %arg11[%c6_63, %c0_64, %c0_65] : memref<8x128x128xf32, #tpu.memory_space<vmem>>, vector<1x128x128xf32>
    %86 = vector.shape_cast %85 : vector<1x128x128xf32> to vector<128x128xf32>
    %87 = vector.shape_cast %84 : vector<128x128xf32> to vector<1x128x128xf32>
    tpu.vector_store %arg11[%c6_63, %c0_64, %c0_65], %87 {strides = array<i32>} : memref<8x128x128xf32, #tpu.memory_space<vmem>>, vector<1x128x128xf32>,
    %c7 = arith.constant 7 : index
    %c0_66 = arith.constant 0 : index
    %c0_67 = arith.constant 0 : index
    %88 = vector.load %arg1[%c7, %c0_66, %c0_67] : memref<8x16x128xf32, #tpu.memory_space<vmem>>, vector<1x16x128xf32>
    %89 = vector.shape_cast %88 : vector<1x16x128xf32> to vector<16x128xf32>
    %cst_68 = arith.constant dense<0.000000e+00> : vector<256x128xf32>
    %90 = tpu.matmul %0, %89, %cst_68 {dimension_numbers = #tpu.dot_dimension_numbers<[1], [0], [0], [1], [0, 0, 1, 1], [], []>} : vector<256x16xf32>, vector<16x128xf32>, vector<256x128xf32> -> vector<256x128xf32>
    %91 = arith.addf %90, %3 : vector<256x128xf32>
    %92 = vector.extract_strided_slice %91 {offsets = [0, 0], sizes = [128, 128], strides = [1, 1]} : vector<256x128xf32> to vector<128x128xf32>
    %c7_69 = arith.constant 7 : index
    %c0_70 = arith.constant 0 : index
    %c0_71 = arith.constant 0 : index
    %93 = vector.load %arg10[%c7_69, %c0_70, %c0_71] : memref<8x128x128xf32, #tpu.memory_space<vmem>>, vector<1x128x128xf32>
    %94 = vector.shape_cast %93 : vector<1x128x128xf32> to vector<128x128xf32>
    %95 = vector.shape_cast %92 : vector<128x128xf32> to vector<1x128x128xf32>
    tpu.vector_store %arg10[%c7_69, %c0_70, %c0_71], %95 {strides = array<i32>} : memref<8x128x128xf32, #tpu.memory_space<vmem>>, vector<1x128x128xf32>,
    %96 = vector.extract_strided_slice %91 {offsets = [128, 0], sizes = [128, 128], strides = [1, 1]} : vector<256x128xf32> to vector<128x128xf32>
    %c7_72 = arith.constant 7 : index
    %c0_73 = arith.constant 0 : index
    %c0_74 = arith.constant 0 : index
    %97 = vector.load %arg11[%c7_72, %c0_73, %c0_74] : memref<8x128x128xf32, #tpu.memory_space<vmem>>, vector<1x128x128xf32>
    %98 = vector.shape_cast %97 : vector<1x128x128xf32> to vector<128x128xf32>
    %99 = vector.shape_cast %96 : vector<128x128xf32> to vector<1x128x128xf32>
    tpu.vector_store %arg11[%c7_72, %c0_73, %c0_74], %99 {strides = array<i32>} : memref<8x128x128xf32, #tpu.memory_space<vmem>>, vector<1x128x128xf32>,
    %c0_75 = arith.constant 0 : index
    %c0_76 = arith.constant 0 : index
    %100 = vector.load %arg3[%c0_75, %c0_76] : memref<256x64xf32, #tpu.memory_space<vmem>>, vector<256x64xf32>
    %cst_77 = arith.constant 0.000000e+00 : f32
    %101 = vector.broadcast %cst_77 : f32 to vector<64x128xf32>
    %cst_78 = arith.constant 0.000000e+00 : f32
    %102 = vector.broadcast %cst_78 : f32 to vector<32x128xf32>
    %cst_79 = arith.constant 0.000000e+00 : f32
    %103 = vector.broadcast %cst_79 : f32 to vector<32x128xf32>
    %cst_80 = arith.constant dense<0.000000e+00> : vector<256x128xf32>
    %104 = tpu.matmul %100, %101, %cst_80 {dimension_numbers = #tpu.dot_dimension_numbers<[1], [0], [0], [1], [0, 0, 1, 1], [], []>} : vector<256x64xf32>, vector<64x128xf32>, vector<256x128xf32> -> vector<256x128xf32>
    %c0_81 = arith.constant 0 : index
    %c0_82 = arith.constant 0 : index
    %c0_83 = arith.constant 0 : index
    %105 = vector.load %arg10[%c0_81, %c0_82, %c0_83] : memref<8x128x128xf32, #tpu.memory_space<vmem>>, vector<1x128x128xf32>
    %106 = vector.shape_cast %105 : vector<1x128x128xf32> to vector<128x128xf32>
    %107 = vector.extract_strided_slice %104 {offsets = [0, 0], sizes = [128, 128], strides = [1, 1]} : vector<256x128xf32> to vector<128x128xf32>
    %108 = arith.addf %106, %107 : vector<128x128xf32>
    %c7_84 = arith.constant 7 : index
    %c0_85 = arith.constant 0 : index
    %c0_86 = arith.constant 0 : index
    %109 = vector.load %arg11[%c7_84, %c0_85, %c0_86] : memref<8x128x128xf32, #tpu.memory_space<vmem>>, vector<1x128x128xf32>
    %110 = vector.shape_cast %109 : vector<1x128x128xf32> to vector<128x128xf32>
    %111 = vector.extract_strided_slice %104 {offsets = [128, 0], sizes = [128, 128], strides = [1, 1]} : vector<256x128xf32> to vector<128x128xf32>
    %112 = arith.addf %110, %111 : vector<128x128xf32>
    %113 = vector.extract_strided_slice %108 {offsets = [0, 0], sizes = [32, 128], strides = [1, 1]} : vector<128x128xf32> to vector<32x128xf32>
    %114 = arith.negf %113 : vector<32x128xf32>
    %115 = math.exp %114 : vector<32x128xf32>
    %cst_87 = arith.constant 1.000000e+00 : f32
    %116 = vector.broadcast %cst_87 : f32 to vector<32x128xf32>
    %117 = arith.addf %116, %115 : vector<32x128xf32>
    %118 = arith.divf %116, %117 : vector<32x128xf32>
    %119 = vector.extract_strided_slice %108 {offsets = [32, 0], sizes = [32, 128], strides = [1, 1]} : vector<128x128xf32> to vector<32x128xf32>
    %120 = arith.negf %119 : vector<32x128xf32>
    %121 = math.exp %120 : vector<32x128xf32>
    %cst_88 = arith.constant 1.000000e+00 : f32
    %122 = vector.broadcast %cst_88 : f32 to vector<32x128xf32>
    %123 = arith.addf %122, %121 : vector<32x128xf32>
    %124 = arith.divf %122, %123 : vector<32x128xf32>
    %125 = vector.extract_strided_slice %108 {offsets = [64, 0], sizes = [32, 128], strides = [1, 1]} : vector<128x128xf32> to vector<32x128xf32>
    %126 = math.tanh %125 : vector<32x128xf32>
    %127 = vector.extract_strided_slice %108 {offsets = [96, 0], sizes = [32, 128], strides = [1, 1]} : vector<128x128xf32> to vector<32x128xf32>
    %128 = arith.negf %127 : vector<32x128xf32>
    %129 = math.exp %128 : vector<32x128xf32>
    %cst_89 = arith.constant 1.000000e+00 : f32
    %130 = vector.broadcast %cst_89 : f32 to vector<32x128xf32>
    %131 = arith.addf %130, %129 : vector<32x128xf32>
    %132 = arith.divf %130, %131 : vector<32x128xf32>
    %133 = arith.mulf %124, %102 : vector<32x128xf32>
    %134 = arith.mulf %118, %126 : vector<32x128xf32>
    %135 = arith.addf %133, %134 : vector<32x128xf32>
    %136 = math.tanh %135 : vector<32x128xf32>
    %137 = arith.mulf %132, %136 : vector<32x128xf32>
    %138 = vector.extract_strided_slice %112 {offsets = [0, 0], sizes = [32, 128], strides = [1, 1]} : vector<128x128xf32> to vector<32x128xf32>
    %139 = arith.negf %138 : vector<32x128xf32>
    %140 = math.exp %139 : vector<32x128xf32>
    %cst_90 = arith.constant 1.000000e+00 : f32
    %141 = vector.broadcast %cst_90 : f32 to vector<32x128xf32>
    %142 = arith.addf %141, %140 : vector<32x128xf32>
    %143 = arith.divf %141, %142 : vector<32x128xf32>
    %144 = vector.extract_strided_slice %112 {offsets = [32, 0], sizes = [32, 128], strides = [1, 1]} : vector<128x128xf32> to vector<32x128xf32>
    %145 = arith.negf %144 : vector<32x128xf32>
    %146 = math.exp %145 : vector<32x128xf32>
    %cst_91 = arith.constant 1.000000e+00 : f32
    %147 = vector.broadcast %cst_91 : f32 to vector<32x128xf32>
    %148 = arith.addf %147, %146 : vector<32x128xf32>
    %149 = arith.divf %147, %148 : vector<32x128xf32>
    %150 = vector.extract_strided_slice %112 {offsets = [64, 0], sizes = [32, 128], strides = [1, 1]} : vector<128x128xf32> to vector<32x128xf32>
    %151 = math.tanh %150 : vector<32x128xf32>
    %152 = vector.extract_strided_slice %112 {offsets = [96, 0], sizes = [32, 128], strides = [1, 1]} : vector<128x128xf32> to vector<32x128xf32>
    %153 = arith.negf %152 : vector<32x128xf32>
    %154 = math.exp %153 : vector<32x128xf32>
    %cst_92 = arith.constant 1.000000e+00 : f32
    %155 = vector.broadcast %cst_92 : f32 to vector<32x128xf32>
    %156 = arith.addf %155, %154 : vector<32x128xf32>
    %157 = arith.divf %155, %156 : vector<32x128xf32>
    %158 = arith.mulf %149, %103 : vector<32x128xf32>
    %159 = arith.mulf %143, %151 : vector<32x128xf32>
    %160 = arith.addf %158, %159 : vector<32x128xf32>
    %161 = math.tanh %160 : vector<32x128xf32>
    %162 = arith.mulf %157, %161 : vector<32x128xf32>
    %c0_93 = arith.constant 0 : index
    %c0_94 = arith.constant 0 : index
    %c0_95 = arith.constant 0 : index
    %163 = vector.load %arg12[%c0_93, %c0_94, %c0_95] : memref<8x32x128xf32, #tpu.memory_space<vmem>>, vector<1x32x128xf32>
    %164 = vector.shape_cast %163 : vector<1x32x128xf32> to vector<32x128xf32>
    %165 = vector.shape_cast %137 : vector<32x128xf32> to vector<1x32x128xf32>
    tpu.vector_store %arg12[%c0_93, %c0_94, %c0_95], %165 {strides = array<i32>} : memref<8x32x128xf32, #tpu.memory_space<vmem>>, vector<1x32x128xf32>,
    %c7_96 = arith.constant 7 : index
    %c0_97 = arith.constant 0 : index
    %c0_98 = arith.constant 0 : index
    %166 = vector.load %arg13[%c7_96, %c0_97, %c0_98] : memref<8x32x128xf32, #tpu.memory_space<vmem>>, vector<1x32x128xf32>
    %167 = vector.shape_cast %166 : vector<1x32x128xf32> to vector<32x128xf32>
    %168 = vector.shape_cast %162 : vector<32x128xf32> to vector<1x32x128xf32>
    tpu.vector_store %arg13[%c7_96, %c0_97, %c0_98], %168 {strides = array<i32>} : memref<8x32x128xf32, #tpu.memory_space<vmem>>, vector<1x32x128xf32>,
    %169 = tpu.concatenate %137, %162 in 0 : vector<32x128xf32>, vector<32x128xf32> -> vector<64x128xf32>
    %cst_99 = arith.constant dense<0.000000e+00> : vector<256x128xf32>
    %170 = tpu.matmul %100, %169, %cst_99 {dimension_numbers = #tpu.dot_dimension_numbers<[1], [0], [0], [1], [0, 0, 1, 1], [], []>} : vector<256x64xf32>, vector<64x128xf32>, vector<256x128xf32> -> vector<256x128xf32>
    %c1_100 = arith.constant 1 : index
    %c0_101 = arith.constant 0 : index
    %c0_102 = arith.constant 0 : index
    %171 = vector.load %arg10[%c1_100, %c0_101, %c0_102] : memref<8x128x128xf32, #tpu.memory_space<vmem>>, vector<1x128x128xf32>
    %172 = vector.shape_cast %171 : vector<1x128x128xf32> to vector<128x128xf32>
    %173 = vector.extract_strided_slice %170 {offsets = [0, 0], sizes = [128, 128], strides = [1, 1]} : vector<256x128xf32> to vector<128x128xf32>
    %174 = arith.addf %172, %173 : vector<128x128xf32>
    %c6_103 = arith.constant 6 : index
    %c0_104 = arith.constant 0 : index
    %c0_105 = arith.constant 0 : index
    %175 = vector.load %arg11[%c6_103, %c0_104, %c0_105] : memref<8x128x128xf32, #tpu.memory_space<vmem>>, vector<1x128x128xf32>
    %176 = vector.shape_cast %175 : vector<1x128x128xf32> to vector<128x128xf32>
    %177 = vector.extract_strided_slice %170 {offsets = [128, 0], sizes = [128, 128], strides = [1, 1]} : vector<256x128xf32> to vector<128x128xf32>
    %178 = arith.addf %176, %177 : vector<128x128xf32>
    %179 = vector.extract_strided_slice %174 {offsets = [0, 0], sizes = [32, 128], strides = [1, 1]} : vector<128x128xf32> to vector<32x128xf32>
    %180 = arith.negf %179 : vector<32x128xf32>
    %181 = math.exp %180 : vector<32x128xf32>
    %cst_106 = arith.constant 1.000000e+00 : f32
    %182 = vector.broadcast %cst_106 : f32 to vector<32x128xf32>
    %183 = arith.addf %182, %181 : vector<32x128xf32>
    %184 = arith.divf %182, %183 : vector<32x128xf32>
    %185 = vector.extract_strided_slice %174 {offsets = [32, 0], sizes = [32, 128], strides = [1, 1]} : vector<128x128xf32> to vector<32x128xf32>
    %186 = arith.negf %185 : vector<32x128xf32>
    %187 = math.exp %186 : vector<32x128xf32>
    %cst_107 = arith.constant 1.000000e+00 : f32
    %188 = vector.broadcast %cst_107 : f32 to vector<32x128xf32>
    %189 = arith.addf %188, %187 : vector<32x128xf32>
    %190 = arith.divf %188, %189 : vector<32x128xf32>
    %191 = vector.extract_strided_slice %174 {offsets = [64, 0], sizes = [32, 128], strides = [1, 1]} : vector<128x128xf32> to vector<32x128xf32>
    %192 = math.tanh %191 : vector<32x128xf32>
    %193 = vector.extract_strided_slice %174 {offsets = [96, 0], sizes = [32, 128], strides = [1, 1]} : vector<128x128xf32> to vector<32x128xf32>
    %194 = arith.negf %193 : vector<32x128xf32>
    %195 = math.exp %194 : vector<32x128xf32>
    %cst_108 = arith.constant 1.000000e+00 : f32
    %196 = vector.broadcast %cst_108 : f32 to vector<32x128xf32>
    %197 = arith.addf %196, %195 : vector<32x128xf32>
    %198 = arith.divf %196, %197 : vector<32x128xf32>
    %199 = arith.mulf %190, %135 : vector<32x128xf32>
    %200 = arith.mulf %184, %192 : vector<32x128xf32>
    %201 = arith.addf %199, %200 : vector<32x128xf32>
    %202 = math.tanh %201 : vector<32x128xf32>
    %203 = arith.mulf %198, %202 : vector<32x128xf32>
    %204 = vector.extract_strided_slice %178 {offsets = [0, 0], sizes = [32, 128], strides = [1, 1]} : vector<128x128xf32> to vector<32x128xf32>
    %205 = arith.negf %204 : vector<32x128xf32>
    %206 = math.exp %205 : vector<32x128xf32>
    %cst_109 = arith.constant 1.000000e+00 : f32
    %207 = vector.broadcast %cst_109 : f32 to vector<32x128xf32>
    %208 = arith.addf %207, %206 : vector<32x128xf32>
    %209 = arith.divf %207, %208 : vector<32x128xf32>
    %210 = vector.extract_strided_slice %178 {offsets = [32, 0], sizes = [32, 128], strides = [1, 1]} : vector<128x128xf32> to vector<32x128xf32>
    %211 = arith.negf %210 : vector<32x128xf32>
    %212 = math.exp %211 : vector<32x128xf32>
    %cst_110 = arith.constant 1.000000e+00 : f32
    %213 = vector.broadcast %cst_110 : f32 to vector<32x128xf32>
    %214 = arith.addf %213, %212 : vector<32x128xf32>
    %215 = arith.divf %213, %214 : vector<32x128xf32>
    %216 = vector.extract_strided_slice %178 {offsets = [64, 0], sizes = [32, 128], strides = [1, 1]} : vector<128x128xf32> to vector<32x128xf32>
    %217 = math.tanh %216 : vector<32x128xf32>
    %218 = vector.extract_strided_slice %178 {offsets = [96, 0], sizes = [32, 128], strides = [1, 1]} : vector<128x128xf32> to vector<32x128xf32>
    %219 = arith.negf %218 : vector<32x128xf32>
    %220 = math.exp %219 : vector<32x128xf32>
    %cst_111 = arith.constant 1.000000e+00 : f32
    %221 = vector.broadcast %cst_111 : f32 to vector<32x128xf32>
    %222 = arith.addf %221, %220 : vector<32x128xf32>
    %223 = arith.divf %221, %222 : vector<32x128xf32>
    %224 = arith.mulf %215, %160 : vector<32x128xf32>
    %225 = arith.mulf %209, %217 : vector<32x128xf32>
    %226 = arith.addf %224, %225 : vector<32x128xf32>
    %227 = math.tanh %226 : vector<32x128xf32>
    %228 = arith.mulf %223, %227 : vector<32x128xf32>
    %c1_112 = arith.constant 1 : index
    %c0_113 = arith.constant 0 : index
    %c0_114 = arith.constant 0 : index
    %229 = vector.load %arg12[%c1_112, %c0_113, %c0_114] : memref<8x32x128xf32, #tpu.memory_space<vmem>>, vector<1x32x128xf32>
    %230 = vector.shape_cast %229 : vector<1x32x128xf32> to vector<32x128xf32>
    %231 = vector.shape_cast %203 : vector<32x128xf32> to vector<1x32x128xf32>
    tpu.vector_store %arg12[%c1_112, %c0_113, %c0_114], %231 {strides = array<i32>} : memref<8x32x128xf32, #tpu.memory_space<vmem>>, vector<1x32x128xf32>,
    %c6_115 = arith.constant 6 : index
    %c0_116 = arith.constant 0 : index
    %c0_117 = arith.constant 0 : index
    %232 = vector.load %arg13[%c6_115, %c0_116, %c0_117] : memref<8x32x128xf32, #tpu.memory_space<vmem>>, vector<1x32x128xf32>
    %233 = vector.shape_cast %232 : vector<1x32x128xf32> to vector<32x128xf32>
    %234 = vector.shape_cast %228 : vector<32x128xf32> to vector<1x32x128xf32>
    tpu.vector_store %arg13[%c6_115, %c0_116, %c0_117], %234 {strides = array<i32>} : memref<8x32x128xf32, #tpu.memory_space<vmem>>, vector<1x32x128xf32>,
    %235 = tpu.concatenate %203, %228 in 0 : vector<32x128xf32>, vector<32x128xf32> -> vector<64x128xf32>
    %cst_118 = arith.constant dense<0.000000e+00> : vector<256x128xf32>
    %236 = tpu.matmul %100, %235, %cst_118 {dimension_numbers = #tpu.dot_dimension_numbers<[1], [0], [0], [1], [0, 0, 1, 1], [], []>} : vector<256x64xf32>, vector<64x128xf32>, vector<256x128xf32> -> vector<256x128xf32>
    %c2_119 = arith.constant 2 : index
    %c0_120 = arith.constant 0 : index
    %c0_121 = arith.constant 0 : index
    %237 = vector.load %arg10[%c2_119, %c0_120, %c0_121] : memref<8x128x128xf32, #tpu.memory_space<vmem>>, vector<1x128x128xf32>
    %238 = vector.shape_cast %237 : vector<1x128x128xf32> to vector<128x128xf32>
    %239 = vector.extract_strided_slice %236 {offsets = [0, 0], sizes = [128, 128], strides = [1, 1]} : vector<256x128xf32> to vector<128x128xf32>
    %240 = arith.addf %238, %239 : vector<128x128xf32>
    %c5_122 = arith.constant 5 : index
    %c0_123 = arith.constant 0 : index
    %c0_124 = arith.constant 0 : index
    %241 = vector.load %arg11[%c5_122, %c0_123, %c0_124] : memref<8x128x128xf32, #tpu.memory_space<vmem>>, vector<1x128x128xf32>
    %242 = vector.shape_cast %241 : vector<1x128x128xf32> to vector<128x128xf32>
    %243 = vector.extract_strided_slice %236 {offsets = [128, 0], sizes = [128, 128], strides = [1, 1]} : vector<256x128xf32> to vector<128x128xf32>
    %244 = arith.addf %242, %243 : vector<128x128xf32>
    %245 = vector.extract_strided_slice %240 {offsets = [0, 0], sizes = [32, 128], strides = [1, 1]} : vector<128x128xf32> to vector<32x128xf32>
    %246 = arith.negf %245 : vector<32x128xf32>
    %247 = math.exp %246 : vector<32x128xf32>
    %cst_125 = arith.constant 1.000000e+00 : f32
    %248 = vector.broadcast %cst_125 : f32 to vector<32x128xf32>
    %249 = arith.addf %248, %247 : vector<32x128xf32>
    %250 = arith.divf %248, %249 : vector<32x128xf32>
    %251 = vector.extract_strided_slice %240 {offsets = [32, 0], sizes = [32, 128], strides = [1, 1]} : vector<128x128xf32> to vector<32x128xf32>
    %252 = arith.negf %251 : vector<32x128xf32>
    %253 = math.exp %252 : vector<32x128xf32>
    %cst_126 = arith.constant 1.000000e+00 : f32
    %254 = vector.broadcast %cst_126 : f32 to vector<32x128xf32>
    %255 = arith.addf %254, %253 : vector<32x128xf32>
    %256 = arith.divf %254, %255 : vector<32x128xf32>
    %257 = vector.extract_strided_slice %240 {offsets = [64, 0], sizes = [32, 128], strides = [1, 1]} : vector<128x128xf32> to vector<32x128xf32>
    %258 = math.tanh %257 : vector<32x128xf32>
    %259 = vector.extract_strided_slice %240 {offsets = [96, 0], sizes = [32, 128], strides = [1, 1]} : vector<128x128xf32> to vector<32x128xf32>
    %260 = arith.negf %259 : vector<32x128xf32>
    %261 = math.exp %260 : vector<32x128xf32>
    %cst_127 = arith.constant 1.000000e+00 : f32
    %262 = vector.broadcast %cst_127 : f32 to vector<32x128xf32>
    %263 = arith.addf %262, %261 : vector<32x128xf32>
    %264 = arith.divf %262, %263 : vector<32x128xf32>
    %265 = arith.mulf %256, %201 : vector<32x128xf32>
    %266 = arith.mulf %250, %258 : vector<32x128xf32>
    %267 = arith.addf %265, %266 : vector<32x128xf32>
    %268 = math.tanh %267 : vector<32x128xf32>
    %269 = arith.mulf %264, %268 : vector<32x128xf32>
    %270 = vector.extract_strided_slice %244 {offsets = [0, 0], sizes = [32, 128], strides = [1, 1]} : vector<128x128xf32> to vector<32x128xf32>
    %271 = arith.negf %270 : vector<32x128xf32>
    %272 = math.exp %271 : vector<32x128xf32>
    %cst_128 = arith.constant 1.000000e+00 : f32
    %273 = vector.broadcast %cst_128 : f32 to vector<32x128xf32>
    %274 = arith.addf %273, %272 : vector<32x128xf32>
    %275 = arith.divf %273, %274 : vector<32x128xf32>
    %276 = vector.extract_strided_slice %244 {offsets = [32, 0], sizes = [32, 128], strides = [1, 1]} : vector<128x128xf32> to vector<32x128xf32>
    %277 = arith.negf %276 : vector<32x128xf32>
    %278 = math.exp %277 : vector<32x128xf32>
    %cst_129 = arith.constant 1.000000e+00 : f32
    %279 = vector.broadcast %cst_129 : f32 to vector<32x128xf32>
    %280 = arith.addf %279, %278 : vector<32x128xf32>
    %281 = arith.divf %279, %280 : vector<32x128xf32>
    %282 = vector.extract_strided_slice %244 {offsets = [64, 0], sizes = [32, 128], strides = [1, 1]} : vector<128x128xf32> to vector<32x128xf32>
    %283 = math.tanh %282 : vector<32x128xf32>
    %284 = vector.extract_strided_slice %244 {offsets = [96, 0], sizes = [32, 128], strides = [1, 1]} : vector<128x128xf32> to vector<32x128xf32>
    %285 = arith.negf %284 : vector<32x128xf32>
    %286 = math.exp %285 : vector<32x128xf32>
    %cst_130 = arith.constant 1.000000e+00 : f32
    %287 = vector.broadcast %cst_130 : f32 to vector<32x128xf32>
    %288 = arith.addf %287, %286 : vector<32x128xf32>
    %289 = arith.divf %287, %288 : vector<32x128xf32>
    %290 = arith.mulf %281, %226 : vector<32x128xf32>
    %291 = arith.mulf %275, %283 : vector<32x128xf32>
    %292 = arith.addf %290, %291 : vector<32x128xf32>
    %293 = math.tanh %292 : vector<32x128xf32>
    %294 = arith.mulf %289, %293 : vector<32x128xf32>
    %c2_131 = arith.constant 2 : index
    %c0_132 = arith.constant 0 : index
    %c0_133 = arith.constant 0 : index
    %295 = vector.load %arg12[%c2_131, %c0_132, %c0_133] : memref<8x32x128xf32, #tpu.memory_space<vmem>>, vector<1x32x128xf32>
    %296 = vector.shape_cast %295 : vector<1x32x128xf32> to vector<32x128xf32>
    %297 = vector.shape_cast %269 : vector<32x128xf32> to vector<1x32x128xf32>
    tpu.vector_store %arg12[%c2_131, %c0_132, %c0_133], %297 {strides = array<i32>} : memref<8x32x128xf32, #tpu.memory_space<vmem>>, vector<1x32x128xf32>,
    %c5_134 = arith.constant 5 : index
    %c0_135 = arith.constant 0 : index
    %c0_136 = arith.constant 0 : index
    %298 = vector.load %arg13[%c5_134, %c0_135, %c0_136] : memref<8x32x128xf32, #tpu.memory_space<vmem>>, vector<1x32x128xf32>
    %299 = vector.shape_cast %298 : vector<1x32x128xf32> to vector<32x128xf32>
    %300 = vector.shape_cast %294 : vector<32x128xf32> to vector<1x32x128xf32>
    tpu.vector_store %arg13[%c5_134, %c0_135, %c0_136], %300 {strides = array<i32>} : memref<8x32x128xf32, #tpu.memory_space<vmem>>, vector<1x32x128xf32>,
    %301 = tpu.concatenate %269, %294 in 0 : vector<32x128xf32>, vector<32x128xf32> -> vector<64x128xf32>
    %cst_137 = arith.constant dense<0.000000e+00> : vector<256x128xf32>
    %302 = tpu.matmul %100, %301, %cst_137 {dimension_numbers = #tpu.dot_dimension_numbers<[1], [0], [0], [1], [0, 0, 1, 1], [], []>} : vector<256x64xf32>, vector<64x128xf32>, vector<256x128xf32> -> vector<256x128xf32>
    %c3_138 = arith.constant 3 : index
    %c0_139 = arith.constant 0 : index
    %c0_140 = arith.constant 0 : index
    %303 = vector.load %arg10[%c3_138, %c0_139, %c0_140] : memref<8x128x128xf32, #tpu.memory_space<vmem>>, vector<1x128x128xf32>
    %304 = vector.shape_cast %303 : vector<1x128x128xf32> to vector<128x128xf32>
    %305 = vector.extract_strided_slice %302 {offsets = [0, 0], sizes = [128, 128], strides = [1, 1]} : vector<256x128xf32> to vector<128x128xf32>
    %306 = arith.addf %304, %305 : vector<128x128xf32>
    %c4_141 = arith.constant 4 : index
    %c0_142 = arith.constant 0 : index
    %c0_143 = arith.constant 0 : index
    %307 = vector.load %arg11[%c4_141, %c0_142, %c0_143] : memref<8x128x128xf32, #tpu.memory_space<vmem>>, vector<1x128x128xf32>
    %308 = vector.shape_cast %307 : vector<1x128x128xf32> to vector<128x128xf32>
    %309 = vector.extract_strided_slice %302 {offsets = [128, 0], sizes = [128, 128], strides = [1, 1]} : vector<256x128xf32> to vector<128x128xf32>
    %310 = arith.addf %308, %309 : vector<128x128xf32>
    %311 = vector.extract_strided_slice %306 {offsets = [0, 0], sizes = [32, 128], strides = [1, 1]} : vector<128x128xf32> to vector<32x128xf32>
    %312 = arith.negf %311 : vector<32x128xf32>
    %313 = math.exp %312 : vector<32x128xf32>
    %cst_144 = arith.constant 1.000000e+00 : f32
    %314 = vector.broadcast %cst_144 : f32 to vector<32x128xf32>
    %315 = arith.addf %314, %313 : vector<32x128xf32>
    %316 = arith.divf %314, %315 : vector<32x128xf32>
    %317 = vector.extract_strided_slice %306 {offsets = [32, 0], sizes = [32, 128], strides = [1, 1]} : vector<128x128xf32> to vector<32x128xf32>
    %318 = arith.negf %317 : vector<32x128xf32>
    %319 = math.exp %318 : vector<32x128xf32>
    %cst_145 = arith.constant 1.000000e+00 : f32
    %320 = vector.broadcast %cst_145 : f32 to vector<32x128xf32>
    %321 = arith.addf %320, %319 : vector<32x128xf32>
    %322 = arith.divf %320, %321 : vector<32x128xf32>
    %323 = vector.extract_strided_slice %306 {offsets = [64, 0], sizes = [32, 128], strides = [1, 1]} : vector<128x128xf32> to vector<32x128xf32>
    %324 = math.tanh %323 : vector<32x128xf32>
    %325 = vector.extract_strided_slice %306 {offsets = [96, 0], sizes = [32, 128], strides = [1, 1]} : vector<128x128xf32> to vector<32x128xf32>
    %326 = arith.negf %325 : vector<32x128xf32>
    %327 = math.exp %326 : vector<32x128xf32>
    %cst_146 = arith.constant 1.000000e+00 : f32
    %328 = vector.broadcast %cst_146 : f32 to vector<32x128xf32>
    %329 = arith.addf %328, %327 : vector<32x128xf32>
    %330 = arith.divf %328, %329 : vector<32x128xf32>
    %331 = arith.mulf %322, %267 : vector<32x128xf32>
    %332 = arith.mulf %316, %324 : vector<32x128xf32>
    %333 = arith.addf %331, %332 : vector<32x128xf32>
    %334 = math.tanh %333 : vector<32x128xf32>
    %335 = arith.mulf %330, %334 : vector<32x128xf32>
    %336 = vector.extract_strided_slice %310 {offsets = [0, 0], sizes = [32, 128], strides = [1, 1]} : vector<128x128xf32> to vector<32x128xf32>
    %337 = arith.negf %336 : vector<32x128xf32>
    %338 = math.exp %337 : vector<32x128xf32>
    %cst_147 = arith.constant 1.000000e+00 : f32
    %339 = vector.broadcast %cst_147 : f32 to vector<32x128xf32>
    %340 = arith.addf %339, %338 : vector<32x128xf32>
    %341 = arith.divf %339, %340 : vector<32x128xf32>
    %342 = vector.extract_strided_slice %310 {offsets = [32, 0], sizes = [32, 128], strides = [1, 1]} : vector<128x128xf32> to vector<32x128xf32>
    %343 = arith.negf %342 : vector<32x128xf32>
    %344 = math.exp %343 : vector<32x128xf32>
    %cst_148 = arith.constant 1.000000e+00 : f32
    %345 = vector.broadcast %cst_148 : f32 to vector<32x128xf32>
    %346 = arith.addf %345, %344 : vector<32x128xf32>
    %347 = arith.divf %345, %346 : vector<32x128xf32>
    %348 = vector.extract_strided_slice %310 {offsets = [64, 0], sizes = [32, 128], strides = [1, 1]} : vector<128x128xf32> to vector<32x128xf32>
    %349 = math.tanh %348 : vector<32x128xf32>
    %350 = vector.extract_strided_slice %310 {offsets = [96, 0], sizes = [32, 128], strides = [1, 1]} : vector<128x128xf32> to vector<32x128xf32>
    %351 = arith.negf %350 : vector<32x128xf32>
    %352 = math.exp %351 : vector<32x128xf32>
    %cst_149 = arith.constant 1.000000e+00 : f32
    %353 = vector.broadcast %cst_149 : f32 to vector<32x128xf32>
    %354 = arith.addf %353, %352 : vector<32x128xf32>
    %355 = arith.divf %353, %354 : vector<32x128xf32>
    %356 = arith.mulf %347, %292 : vector<32x128xf32>
    %357 = arith.mulf %341, %349 : vector<32x128xf32>
    %358 = arith.addf %356, %357 : vector<32x128xf32>
    %359 = math.tanh %358 : vector<32x128xf32>
    %360 = arith.mulf %355, %359 : vector<32x128xf32>
    %c3_150 = arith.constant 3 : index
    %c0_151 = arith.constant 0 : index
    %c0_152 = arith.constant 0 : index
    %361 = vector.load %arg12[%c3_150, %c0_151, %c0_152] : memref<8x32x128xf32, #tpu.memory_space<vmem>>, vector<1x32x128xf32>
    %362 = vector.shape_cast %361 : vector<1x32x128xf32> to vector<32x128xf32>
    %363 = vector.shape_cast %335 : vector<32x128xf32> to vector<1x32x128xf32>
    tpu.vector_store %arg12[%c3_150, %c0_151, %c0_152], %363 {strides = array<i32>} : memref<8x32x128xf32, #tpu.memory_space<vmem>>, vector<1x32x128xf32>,
    %c4_153 = arith.constant 4 : index
    %c0_154 = arith.constant 0 : index
    %c0_155 = arith.constant 0 : index
    %364 = vector.load %arg13[%c4_153, %c0_154, %c0_155] : memref<8x32x128xf32, #tpu.memory_space<vmem>>, vector<1x32x128xf32>
    %365 = vector.shape_cast %364 : vector<1x32x128xf32> to vector<32x128xf32>
    %366 = vector.shape_cast %360 : vector<32x128xf32> to vector<1x32x128xf32>
    tpu.vector_store %arg13[%c4_153, %c0_154, %c0_155], %366 {strides = array<i32>} : memref<8x32x128xf32, #tpu.memory_space<vmem>>, vector<1x32x128xf32>,
    %367 = tpu.concatenate %335, %360 in 0 : vector<32x128xf32>, vector<32x128xf32> -> vector<64x128xf32>
    %cst_156 = arith.constant dense<0.000000e+00> : vector<256x128xf32>
    %368 = tpu.matmul %100, %367, %cst_156 {dimension_numbers = #tpu.dot_dimension_numbers<[1], [0], [0], [1], [0, 0, 1, 1], [], []>} : vector<256x64xf32>, vector<64x128xf32>, vector<256x128xf32> -> vector<256x128xf32>
    %c4_157 = arith.constant 4 : index
    %c0_158 = arith.constant 0 : index
    %c0_159 = arith.constant 0 : index
    %369 = vector.load %arg10[%c4_157, %c0_158, %c0_159] : memref<8x128x128xf32, #tpu.memory_space<vmem>>, vector<1x128x128xf32>
    %370 = vector.shape_cast %369 : vector<1x128x128xf32> to vector<128x128xf32>
    %371 = vector.extract_strided_slice %368 {offsets = [0, 0], sizes = [128, 128], strides = [1, 1]} : vector<256x128xf32> to vector<128x128xf32>
    %372 = arith.addf %370, %371 : vector<128x128xf32>
    %c3_160 = arith.constant 3 : index
    %c0_161 = arith.constant 0 : index
    %c0_162 = arith.constant 0 : index
    %373 = vector.load %arg11[%c3_160, %c0_161, %c0_162] : memref<8x128x128xf32, #tpu.memory_space<vmem>>, vector<1x128x128xf32>
    %374 = vector.shape_cast %373 : vector<1x128x128xf32> to vector<128x128xf32>
    %375 = vector.extract_strided_slice %368 {offsets = [128, 0], sizes = [128, 128], strides = [1, 1]} : vector<256x128xf32> to vector<128x128xf32>
    %376 = arith.addf %374, %375 : vector<128x128xf32>
    %377 = vector.extract_strided_slice %372 {offsets = [0, 0], sizes = [32, 128], strides = [1, 1]} : vector<128x128xf32> to vector<32x128xf32>
    %378 = arith.negf %377 : vector<32x128xf32>
    %379 = math.exp %378 : vector<32x128xf32>
    %cst_163 = arith.constant 1.000000e+00 : f32
    %380 = vector.broadcast %cst_163 : f32 to vector<32x128xf32>
    %381 = arith.addf %380, %379 : vector<32x128xf32>
    %382 = arith.divf %380, %381 : vector<32x128xf32>
    %383 = vector.extract_strided_slice %372 {offsets = [32, 0], sizes = [32, 128], strides = [1, 1]} : vector<128x128xf32> to vector<32x128xf32>
    %384 = arith.negf %383 : vector<32x128xf32>
    %385 = math.exp %384 : vector<32x128xf32>
    %cst_164 = arith.constant 1.000000e+00 : f32
    %386 = vector.broadcast %cst_164 : f32 to vector<32x128xf32>
    %387 = arith.addf %386, %385 : vector<32x128xf32>
    %388 = arith.divf %386, %387 : vector<32x128xf32>
    %389 = vector.extract_strided_slice %372 {offsets = [64, 0], sizes = [32, 128], strides = [1, 1]} : vector<128x128xf32> to vector<32x128xf32>
    %390 = math.tanh %389 : vector<32x128xf32>
    %391 = vector.extract_strided_slice %372 {offsets = [96, 0], sizes = [32, 128], strides = [1, 1]} : vector<128x128xf32> to vector<32x128xf32>
    %392 = arith.negf %391 : vector<32x128xf32>
    %393 = math.exp %392 : vector<32x128xf32>
    %cst_165 = arith.constant 1.000000e+00 : f32
    %394 = vector.broadcast %cst_165 : f32 to vector<32x128xf32>
    %395 = arith.addf %394, %393 : vector<32x128xf32>
    %396 = arith.divf %394, %395 : vector<32x128xf32>
    %397 = arith.mulf %388, %333 : vector<32x128xf32>
    %398 = arith.mulf %382, %390 : vector<32x128xf32>
    %399 = arith.addf %397, %398 : vector<32x128xf32>
    %400 = math.tanh %399 : vector<32x128xf32>
    %401 = arith.mulf %396, %400 : vector<32x128xf32>
    %402 = vector.extract_strided_slice %376 {offsets = [0, 0], sizes = [32, 128], strides = [1, 1]} : vector<128x128xf32> to vector<32x128xf32>
    %403 = arith.negf %402 : vector<32x128xf32>
    %404 = math.exp %403 : vector<32x128xf32>
    %cst_166 = arith.constant 1.000000e+00 : f32
    %405 = vector.broadcast %cst_166 : f32 to vector<32x128xf32>
    %406 = arith.addf %405, %404 : vector<32x128xf32>
    %407 = arith.divf %405, %406 : vector<32x128xf32>
    %408 = vector.extract_strided_slice %376 {offsets = [32, 0], sizes = [32, 128], strides = [1, 1]} : vector<128x128xf32> to vector<32x128xf32>
    %409 = arith.negf %408 : vector<32x128xf32>
    %410 = math.exp %409 : vector<32x128xf32>
    %cst_167 = arith.constant 1.000000e+00 : f32
    %411 = vector.broadcast %cst_167 : f32 to vector<32x128xf32>
    %412 = arith.addf %411, %410 : vector<32x128xf32>
    %413 = arith.divf %411, %412 : vector<32x128xf32>
    %414 = vector.extract_strided_slice %376 {offsets = [64, 0], sizes = [32, 128], strides = [1, 1]} : vector<128x128xf32> to vector<32x128xf32>
    %415 = math.tanh %414 : vector<32x128xf32>
    %416 = vector.extract_strided_slice %376 {offsets = [96, 0], sizes = [32, 128], strides = [1, 1]} : vector<128x128xf32> to vector<32x128xf32>
    %417 = arith.negf %416 : vector<32x128xf32>
    %418 = math.exp %417 : vector<32x128xf32>
    %cst_168 = arith.constant 1.000000e+00 : f32
    %419 = vector.broadcast %cst_168 : f32 to vector<32x128xf32>
    %420 = arith.addf %419, %418 : vector<32x128xf32>
    %421 = arith.divf %419, %420 : vector<32x128xf32>
    %422 = arith.mulf %413, %358 : vector<32x128xf32>
    %423 = arith.mulf %407, %415 : vector<32x128xf32>
    %424 = arith.addf %422, %423 : vector<32x128xf32>
    %425 = math.tanh %424 : vector<32x128xf32>
    %426 = arith.mulf %421, %425 : vector<32x128xf32>
    %c4_169 = arith.constant 4 : index
    %c0_170 = arith.constant 0 : index
    %c0_171 = arith.constant 0 : index
    %427 = vector.load %arg12[%c4_169, %c0_170, %c0_171] : memref<8x32x128xf32, #tpu.memory_space<vmem>>, vector<1x32x128xf32>
    %428 = vector.shape_cast %427 : vector<1x32x128xf32> to vector<32x128xf32>
    %429 = vector.shape_cast %401 : vector<32x128xf32> to vector<1x32x128xf32>
    tpu.vector_store %arg12[%c4_169, %c0_170, %c0_171], %429 {strides = array<i32>} : memref<8x32x128xf32, #tpu.memory_space<vmem>>, vector<1x32x128xf32>,
    %c3_172 = arith.constant 3 : index
    %c0_173 = arith.constant 0 : index
    %c0_174 = arith.constant 0 : index
    %430 = vector.load %arg13[%c3_172, %c0_173, %c0_174] : memref<8x32x128xf32, #tpu.memory_space<vmem>>, vector<1x32x128xf32>
    %431 = vector.shape_cast %430 : vector<1x32x128xf32> to vector<32x128xf32>
    %432 = vector.shape_cast %426 : vector<32x128xf32> to vector<1x32x128xf32>
    tpu.vector_store %arg13[%c3_172, %c0_173, %c0_174], %432 {strides = array<i32>} : memref<8x32x128xf32, #tpu.memory_space<vmem>>, vector<1x32x128xf32>,
    %433 = tpu.concatenate %401, %426 in 0 : vector<32x128xf32>, vector<32x128xf32> -> vector<64x128xf32>
    %cst_175 = arith.constant dense<0.000000e+00> : vector<256x128xf32>
    %434 = tpu.matmul %100, %433, %cst_175 {dimension_numbers = #tpu.dot_dimension_numbers<[1], [0], [0], [1], [0, 0, 1, 1], [], []>} : vector<256x64xf32>, vector<64x128xf32>, vector<256x128xf32> -> vector<256x128xf32>
    %c5_176 = arith.constant 5 : index
    %c0_177 = arith.constant 0 : index
    %c0_178 = arith.constant 0 : index
    %435 = vector.load %arg10[%c5_176, %c0_177, %c0_178] : memref<8x128x128xf32, #tpu.memory_space<vmem>>, vector<1x128x128xf32>
    %436 = vector.shape_cast %435 : vector<1x128x128xf32> to vector<128x128xf32>
    %437 = vector.extract_strided_slice %434 {offsets = [0, 0], sizes = [128, 128], strides = [1, 1]} : vector<256x128xf32> to vector<128x128xf32>
    %438 = arith.addf %436, %437 : vector<128x128xf32>
    %c2_179 = arith.constant 2 : index
    %c0_180 = arith.constant 0 : index
    %c0_181 = arith.constant 0 : index
    %439 = vector.load %arg11[%c2_179, %c0_180, %c0_181] : memref<8x128x128xf32, #tpu.memory_space<vmem>>, vector<1x128x128xf32>
    %440 = vector.shape_cast %439 : vector<1x128x128xf32> to vector<128x128xf32>
    %441 = vector.extract_strided_slice %434 {offsets = [128, 0], sizes = [128, 128], strides = [1, 1]} : vector<256x128xf32> to vector<128x128xf32>
    %442 = arith.addf %440, %441 : vector<128x128xf32>
    %443 = vector.extract_strided_slice %438 {offsets = [0, 0], sizes = [32, 128], strides = [1, 1]} : vector<128x128xf32> to vector<32x128xf32>
    %444 = arith.negf %443 : vector<32x128xf32>
    %445 = math.exp %444 : vector<32x128xf32>
    %cst_182 = arith.constant 1.000000e+00 : f32
    %446 = vector.broadcast %cst_182 : f32 to vector<32x128xf32>
    %447 = arith.addf %446, %445 : vector<32x128xf32>
    %448 = arith.divf %446, %447 : vector<32x128xf32>
    %449 = vector.extract_strided_slice %438 {offsets = [32, 0], sizes = [32, 128], strides = [1, 1]} : vector<128x128xf32> to vector<32x128xf32>
    %450 = arith.negf %449 : vector<32x128xf32>
    %451 = math.exp %450 : vector<32x128xf32>
    %cst_183 = arith.constant 1.000000e+00 : f32
    %452 = vector.broadcast %cst_183 : f32 to vector<32x128xf32>
    %453 = arith.addf %452, %451 : vector<32x128xf32>
    %454 = arith.divf %452, %453 : vector<32x128xf32>
    %455 = vector.extract_strided_slice %438 {offsets = [64, 0], sizes = [32, 128], strides = [1, 1]} : vector<128x128xf32> to vector<32x128xf32>
    %456 = math.tanh %455 : vector<32x128xf32>
    %457 = vector.extract_strided_slice %438 {offsets = [96, 0], sizes = [32, 128], strides = [1, 1]} : vector<128x128xf32> to vector<32x128xf32>
    %458 = arith.negf %457 : vector<32x128xf32>
    %459 = math.exp %458 : vector<32x128xf32>
    %cst_184 = arith.constant 1.000000e+00 : f32
    %460 = vector.broadcast %cst_184 : f32 to vector<32x128xf32>
    %461 = arith.addf %460, %459 : vector<32x128xf32>
    %462 = arith.divf %460, %461 : vector<32x128xf32>
    %463 = arith.mulf %454, %399 : vector<32x128xf32>
    %464 = arith.mulf %448, %456 : vector<32x128xf32>
    %465 = arith.addf %463, %464 : vector<32x128xf32>
    %466 = math.tanh %465 : vector<32x128xf32>
    %467 = arith.mulf %462, %466 : vector<32x128xf32>
    %468 = vector.extract_strided_slice %442 {offsets = [0, 0], sizes = [32, 128], strides = [1, 1]} : vector<128x128xf32> to vector<32x128xf32>
    %469 = arith.negf %468 : vector<32x128xf32>
    %470 = math.exp %469 : vector<32x128xf32>
    %cst_185 = arith.constant 1.000000e+00 : f32
    %471 = vector.broadcast %cst_185 : f32 to vector<32x128xf32>
    %472 = arith.addf %471, %470 : vector<32x128xf32>
    %473 = arith.divf %471, %472 : vector<32x128xf32>
    %474 = vector.extract_strided_slice %442 {offsets = [32, 0], sizes = [32, 128], strides = [1, 1]} : vector<128x128xf32> to vector<32x128xf32>
    %475 = arith.negf %474 : vector<32x128xf32>
    %476 = math.exp %475 : vector<32x128xf32>
    %cst_186 = arith.constant 1.000000e+00 : f32
    %477 = vector.broadcast %cst_186 : f32 to vector<32x128xf32>
    %478 = arith.addf %477, %476 : vector<32x128xf32>
    %479 = arith.divf %477, %478 : vector<32x128xf32>
    %480 = vector.extract_strided_slice %442 {offsets = [64, 0], sizes = [32, 128], strides = [1, 1]} : vector<128x128xf32> to vector<32x128xf32>
    %481 = math.tanh %480 : vector<32x128xf32>
    %482 = vector.extract_strided_slice %442 {offsets = [96, 0], sizes = [32, 128], strides = [1, 1]} : vector<128x128xf32> to vector<32x128xf32>
    %483 = arith.negf %482 : vector<32x128xf32>
    %484 = math.exp %483 : vector<32x128xf32>
    %cst_187 = arith.constant 1.000000e+00 : f32
    %485 = vector.broadcast %cst_187 : f32 to vector<32x128xf32>
    %486 = arith.addf %485, %484 : vector<32x128xf32>
    %487 = arith.divf %485, %486 : vector<32x128xf32>
    %488 = arith.mulf %479, %424 : vector<32x128xf32>
    %489 = arith.mulf %473, %481 : vector<32x128xf32>
    %490 = arith.addf %488, %489 : vector<32x128xf32>
    %491 = math.tanh %490 : vector<32x128xf32>
    %492 = arith.mulf %487, %491 : vector<32x128xf32>
    %c5_188 = arith.constant 5 : index
    %c0_189 = arith.constant 0 : index
    %c0_190 = arith.constant 0 : index
    %493 = vector.load %arg12[%c5_188, %c0_189, %c0_190] : memref<8x32x128xf32, #tpu.memory_space<vmem>>, vector<1x32x128xf32>
    %494 = vector.shape_cast %493 : vector<1x32x128xf32> to vector<32x128xf32>
    %495 = vector.shape_cast %467 : vector<32x128xf32> to vector<1x32x128xf32>
    tpu.vector_store %arg12[%c5_188, %c0_189, %c0_190], %495 {strides = array<i32>} : memref<8x32x128xf32, #tpu.memory_space<vmem>>, vector<1x32x128xf32>,
    %c2_191 = arith.constant 2 : index
    %c0_192 = arith.constant 0 : index
    %c0_193 = arith.constant 0 : index
    %496 = vector.load %arg13[%c2_191, %c0_192, %c0_193] : memref<8x32x128xf32, #tpu.memory_space<vmem>>, vector<1x32x128xf32>
    %497 = vector.shape_cast %496 : vector<1x32x128xf32> to vector<32x128xf32>
    %498 = vector.shape_cast %492 : vector<32x128xf32> to vector<1x32x128xf32>
    tpu.vector_store %arg13[%c2_191, %c0_192, %c0_193], %498 {strides = array<i32>} : memref<8x32x128xf32, #tpu.memory_space<vmem>>, vector<1x32x128xf32>,
    %499 = tpu.concatenate %467, %492 in 0 : vector<32x128xf32>, vector<32x128xf32> -> vector<64x128xf32>
    %cst_194 = arith.constant dense<0.000000e+00> : vector<256x128xf32>
    %500 = tpu.matmul %100, %499, %cst_194 {dimension_numbers = #tpu.dot_dimension_numbers<[1], [0], [0], [1], [0, 0, 1, 1], [], []>} : vector<256x64xf32>, vector<64x128xf32>, vector<256x128xf32> -> vector<256x128xf32>
    %c6_195 = arith.constant 6 : index
    %c0_196 = arith.constant 0 : index
    %c0_197 = arith.constant 0 : index
    %501 = vector.load %arg10[%c6_195, %c0_196, %c0_197] : memref<8x128x128xf32, #tpu.memory_space<vmem>>, vector<1x128x128xf32>
    %502 = vector.shape_cast %501 : vector<1x128x128xf32> to vector<128x128xf32>
    %503 = vector.extract_strided_slice %500 {offsets = [0, 0], sizes = [128, 128], strides = [1, 1]} : vector<256x128xf32> to vector<128x128xf32>
    %504 = arith.addf %502, %503 : vector<128x128xf32>
    %c1_198 = arith.constant 1 : index
    %c0_199 = arith.constant 0 : index
    %c0_200 = arith.constant 0 : index
    %505 = vector.load %arg11[%c1_198, %c0_199, %c0_200] : memref<8x128x128xf32, #tpu.memory_space<vmem>>, vector<1x128x128xf32>
    %506 = vector.shape_cast %505 : vector<1x128x128xf32> to vector<128x128xf32>
    %507 = vector.extract_strided_slice %500 {offsets = [128, 0], sizes = [128, 128], strides = [1, 1]} : vector<256x128xf32> to vector<128x128xf32>
    %508 = arith.addf %506, %507 : vector<128x128xf32>
    %509 = vector.extract_strided_slice %504 {offsets = [0, 0], sizes = [32, 128], strides = [1, 1]} : vector<128x128xf32> to vector<32x128xf32>
    %510 = arith.negf %509 : vector<32x128xf32>
    %511 = math.exp %510 : vector<32x128xf32>
    %cst_201 = arith.constant 1.000000e+00 : f32
    %512 = vector.broadcast %cst_201 : f32 to vector<32x128xf32>
    %513 = arith.addf %512, %511 : vector<32x128xf32>
    %514 = arith.divf %512, %513 : vector<32x128xf32>
    %515 = vector.extract_strided_slice %504 {offsets = [32, 0], sizes = [32, 128], strides = [1, 1]} : vector<128x128xf32> to vector<32x128xf32>
    %516 = arith.negf %515 : vector<32x128xf32>
    %517 = math.exp %516 : vector<32x128xf32>
    %cst_202 = arith.constant 1.000000e+00 : f32
    %518 = vector.broadcast %cst_202 : f32 to vector<32x128xf32>
    %519 = arith.addf %518, %517 : vector<32x128xf32>
    %520 = arith.divf %518, %519 : vector<32x128xf32>
    %521 = vector.extract_strided_slice %504 {offsets = [64, 0], sizes = [32, 128], strides = [1, 1]} : vector<128x128xf32> to vector<32x128xf32>
    %522 = math.tanh %521 : vector<32x128xf32>
    %523 = vector.extract_strided_slice %504 {offsets = [96, 0], sizes = [32, 128], strides = [1, 1]} : vector<128x128xf32> to vector<32x128xf32>
    %524 = arith.negf %523 : vector<32x128xf32>
    %525 = math.exp %524 : vector<32x128xf32>
    %cst_203 = arith.constant 1.000000e+00 : f32
    %526 = vector.broadcast %cst_203 : f32 to vector<32x128xf32>
    %527 = arith.addf %526, %525 : vector<32x128xf32>
    %528 = arith.divf %526, %527 : vector<32x128xf32>
    %529 = arith.mulf %520, %465 : vector<32x128xf32>
    %530 = arith.mulf %514, %522 : vector<32x128xf32>
    %531 = arith.addf %529, %530 : vector<32x128xf32>
    %532 = math.tanh %531 : vector<32x128xf32>
    %533 = arith.mulf %528, %532 : vector<32x128xf32>
    %534 = vector.extract_strided_slice %508 {offsets = [0, 0], sizes = [32, 128], strides = [1, 1]} : vector<128x128xf32> to vector<32x128xf32>
    %535 = arith.negf %534 : vector<32x128xf32>
    %536 = math.exp %535 : vector<32x128xf32>
    %cst_204 = arith.constant 1.000000e+00 : f32
    %537 = vector.broadcast %cst_204 : f32 to vector<32x128xf32>
    %538 = arith.addf %537, %536 : vector<32x128xf32>
    %539 = arith.divf %537, %538 : vector<32x128xf32>
    %540 = vector.extract_strided_slice %508 {offsets = [32, 0], sizes = [32, 128], strides = [1, 1]} : vector<128x128xf32> to vector<32x128xf32>
    %541 = arith.negf %540 : vector<32x128xf32>
    %542 = math.exp %541 : vector<32x128xf32>
    %cst_205 = arith.constant 1.000000e+00 : f32
    %543 = vector.broadcast %cst_205 : f32 to vector<32x128xf32>
    %544 = arith.addf %543, %542 : vector<32x128xf32>
    %545 = arith.divf %543, %544 : vector<32x128xf32>
    %546 = vector.extract_strided_slice %508 {offsets = [64, 0], sizes = [32, 128], strides = [1, 1]} : vector<128x128xf32> to vector<32x128xf32>
    %547 = math.tanh %546 : vector<32x128xf32>
    %548 = vector.extract_strided_slice %508 {offsets = [96, 0], sizes = [32, 128], strides = [1, 1]} : vector<128x128xf32> to vector<32x128xf32>
    %549 = arith.negf %548 : vector<32x128xf32>
    %550 = math.exp %549 : vector<32x128xf32>
    %cst_206 = arith.constant 1.000000e+00 : f32
    %551 = vector.broadcast %cst_206 : f32 to vector<32x128xf32>
    %552 = arith.addf %551, %550 : vector<32x128xf32>
    %553 = arith.divf %551, %552 : vector<32x128xf32>
    %554 = arith.mulf %545, %490 : vector<32x128xf32>
    %555 = arith.mulf %539, %547 : vector<32x128xf32>
    %556 = arith.addf %554, %555 : vector<32x128xf32>
    %557 = math.tanh %556 : vector<32x128xf32>
    %558 = arith.mulf %553, %557 : vector<32x128xf32>
    %c6_207 = arith.constant 6 : index
    %c0_208 = arith.constant 0 : index
    %c0_209 = arith.constant 0 : index
    %559 = vector.load %arg12[%c6_207, %c0_208, %c0_209] : memref<8x32x128xf32, #tpu.memory_space<vmem>>, vector<1x32x128xf32>
    %560 = vector.shape_cast %559 : vector<1x32x128xf32> to vector<32x128xf32>
    %561 = vector.shape_cast %533 : vector<32x128xf32> to vector<1x32x128xf32>
    tpu.vector_store %arg12[%c6_207, %c0_208, %c0_209], %561 {strides = array<i32>} : memref<8x32x128xf32, #tpu.memory_space<vmem>>, vector<1x32x128xf32>,
    %c1_210 = arith.constant 1 : index
    %c0_211 = arith.constant 0 : index
    %c0_212 = arith.constant 0 : index
    %562 = vector.load %arg13[%c1_210, %c0_211, %c0_212] : memref<8x32x128xf32, #tpu.memory_space<vmem>>, vector<1x32x128xf32>
    %563 = vector.shape_cast %562 : vector<1x32x128xf32> to vector<32x128xf32>
    %564 = vector.shape_cast %558 : vector<32x128xf32> to vector<1x32x128xf32>
    tpu.vector_store %arg13[%c1_210, %c0_211, %c0_212], %564 {strides = array<i32>} : memref<8x32x128xf32, #tpu.memory_space<vmem>>, vector<1x32x128xf32>,
    %565 = tpu.concatenate %533, %558 in 0 : vector<32x128xf32>, vector<32x128xf32> -> vector<64x128xf32>
    %cst_213 = arith.constant dense<0.000000e+00> : vector<256x128xf32>
    %566 = tpu.matmul %100, %565, %cst_213 {dimension_numbers = #tpu.dot_dimension_numbers<[1], [0], [0], [1], [0, 0, 1, 1], [], []>} : vector<256x64xf32>, vector<64x128xf32>, vector<256x128xf32> -> vector<256x128xf32>
    %c7_214 = arith.constant 7 : index
    %c0_215 = arith.constant 0 : index
    %c0_216 = arith.constant 0 : index
    %567 = vector.load %arg10[%c7_214, %c0_215, %c0_216] : memref<8x128x128xf32, #tpu.memory_space<vmem>>, vector<1x128x128xf32>
    %568 = vector.shape_cast %567 : vector<1x128x128xf32> to vector<128x128xf32>
    %569 = vector.extract_strided_slice %566 {offsets = [0, 0], sizes = [128, 128], strides = [1, 1]} : vector<256x128xf32> to vector<128x128xf32>
    %570 = arith.addf %568, %569 : vector<128x128xf32>
    %c0_217 = arith.constant 0 : index
    %c0_218 = arith.constant 0 : index
    %c0_219 = arith.constant 0 : index
    %571 = vector.load %arg11[%c0_217, %c0_218, %c0_219] : memref<8x128x128xf32, #tpu.memory_space<vmem>>, vector<1x128x128xf32>
    %572 = vector.shape_cast %571 : vector<1x128x128xf32> to vector<128x128xf32>
    %573 = vector.extract_strided_slice %566 {offsets = [128, 0], sizes = [128, 128], strides = [1, 1]} : vector<256x128xf32> to vector<128x128xf32>
    %574 = arith.addf %572, %573 : vector<128x128xf32>
    %575 = vector.extract_strided_slice %570 {offsets = [0, 0], sizes = [32, 128], strides = [1, 1]} : vector<128x128xf32> to vector<32x128xf32>
    %576 = arith.negf %575 : vector<32x128xf32>
    %577 = math.exp %576 : vector<32x128xf32>
    %cst_220 = arith.constant 1.000000e+00 : f32
    %578 = vector.broadcast %cst_220 : f32 to vector<32x128xf32>
    %579 = arith.addf %578, %577 : vector<32x128xf32>
    %580 = arith.divf %578, %579 : vector<32x128xf32>
    %581 = vector.extract_strided_slice %570 {offsets = [32, 0], sizes = [32, 128], strides = [1, 1]} : vector<128x128xf32> to vector<32x128xf32>
    %582 = arith.negf %581 : vector<32x128xf32>
    %583 = math.exp %582 : vector<32x128xf32>
    %cst_221 = arith.constant 1.000000e+00 : f32
    %584 = vector.broadcast %cst_221 : f32 to vector<32x128xf32>
    %585 = arith.addf %584, %583 : vector<32x128xf32>
    %586 = arith.divf %584, %585 : vector<32x128xf32>
    %587 = vector.extract_strided_slice %570 {offsets = [64, 0], sizes = [32, 128], strides = [1, 1]} : vector<128x128xf32> to vector<32x128xf32>
    %588 = math.tanh %587 : vector<32x128xf32>
    %589 = vector.extract_strided_slice %570 {offsets = [96, 0], sizes = [32, 128], strides = [1, 1]} : vector<128x128xf32> to vector<32x128xf32>
    %590 = arith.negf %589 : vector<32x128xf32>
    %591 = math.exp %590 : vector<32x128xf32>
    %cst_222 = arith.constant 1.000000e+00 : f32
    %592 = vector.broadcast %cst_222 : f32 to vector<32x128xf32>
    %593 = arith.addf %592, %591 : vector<32x128xf32>
    %594 = arith.divf %592, %593 : vector<32x128xf32>
    %595 = arith.mulf %586, %531 : vector<32x128xf32>
    %596 = arith.mulf %580, %588 : vector<32x128xf32>
    %597 = arith.addf %595, %596 : vector<32x128xf32>
    %598 = math.tanh %597 : vector<32x128xf32>
    %599 = arith.mulf %594, %598 : vector<32x128xf32>
    %600 = vector.extract_strided_slice %574 {offsets = [0, 0], sizes = [32, 128], strides = [1, 1]} : vector<128x128xf32> to vector<32x128xf32>
    %601 = arith.negf %600 : vector<32x128xf32>
    %602 = math.exp %601 : vector<32x128xf32>
    %cst_223 = arith.constant 1.000000e+00 : f32
    %603 = vector.broadcast %cst_223 : f32 to vector<32x128xf32>
    %604 = arith.addf %603, %602 : vector<32x128xf32>
    %605 = arith.divf %603, %604 : vector<32x128xf32>
    %606 = vector.extract_strided_slice %574 {offsets = [32, 0], sizes = [32, 128], strides = [1, 1]} : vector<128x128xf32> to vector<32x128xf32>
    %607 = arith.negf %606 : vector<32x128xf32>
    %608 = math.exp %607 : vector<32x128xf32>
    %cst_224 = arith.constant 1.000000e+00 : f32
    %609 = vector.broadcast %cst_224 : f32 to vector<32x128xf32>
    %610 = arith.addf %609, %608 : vector<32x128xf32>
    %611 = arith.divf %609, %610 : vector<32x128xf32>
    %612 = vector.extract_strided_slice %574 {offsets = [64, 0], sizes = [32, 128], strides = [1, 1]} : vector<128x128xf32> to vector<32x128xf32>
    %613 = math.tanh %612 : vector<32x128xf32>
    %614 = vector.extract_strided_slice %574 {offsets = [96, 0], sizes = [32, 128], strides = [1, 1]} : vector<128x128xf32> to vector<32x128xf32>
    %615 = arith.negf %614 : vector<32x128xf32>
    %616 = math.exp %615 : vector<32x128xf32>
    %cst_225 = arith.constant 1.000000e+00 : f32
    %617 = vector.broadcast %cst_225 : f32 to vector<32x128xf32>
    %618 = arith.addf %617, %616 : vector<32x128xf32>
    %619 = arith.divf %617, %618 : vector<32x128xf32>
    %620 = arith.mulf %611, %556 : vector<32x128xf32>
    %621 = arith.mulf %605, %613 : vector<32x128xf32>
    %622 = arith.addf %620, %621 : vector<32x128xf32>
    %623 = math.tanh %622 : vector<32x128xf32>
    %624 = arith.mulf %619, %623 : vector<32x128xf32>
    %c7_226 = arith.constant 7 : index
    %c0_227 = arith.constant 0 : index
    %c0_228 = arith.constant 0 : index
    %625 = vector.load %arg12[%c7_226, %c0_227, %c0_228] : memref<8x32x128xf32, #tpu.memory_space<vmem>>, vector<1x32x128xf32>
    %626 = vector.shape_cast %625 : vector<1x32x128xf32> to vector<32x128xf32>
    %627 = vector.shape_cast %599 : vector<32x128xf32> to vector<1x32x128xf32>
    tpu.vector_store %arg12[%c7_226, %c0_227, %c0_228], %627 {strides = array<i32>} : memref<8x32x128xf32, #tpu.memory_space<vmem>>, vector<1x32x128xf32>,
    %c0_229 = arith.constant 0 : index
    %c0_230 = arith.constant 0 : index
    %c0_231 = arith.constant 0 : index
    %628 = vector.load %arg13[%c0_229, %c0_230, %c0_231] : memref<8x32x128xf32, #tpu.memory_space<vmem>>, vector<1x32x128xf32>
    %629 = vector.shape_cast %628 : vector<1x32x128xf32> to vector<32x128xf32>
    %630 = vector.shape_cast %624 : vector<32x128xf32> to vector<1x32x128xf32>
    tpu.vector_store %arg13[%c0_229, %c0_230, %c0_231], %630 {strides = array<i32>} : memref<8x32x128xf32, #tpu.memory_space<vmem>>, vector<1x32x128xf32>,
    %c0_232 = arith.constant 0 : index
    %c0_233 = arith.constant 0 : index
    %631 = vector.load %arg5[%c0_232, %c0_233] : memref<16x64xf32, #tpu.memory_space<vmem>>, vector<16x64xf32>
    %c0_234 = arith.constant 0 : index
    %c0_235 = arith.constant 0 : index
    %632 = vector.load %arg6[%c0_234, %c0_235] : memref<16x1xf32, #tpu.memory_space<vmem>>, vector<16x1xf32>
    %633 = vector.shape_cast %632 : vector<16x1xf32> to vector<16x1xf32>
    %634 = vector.broadcast %633 : vector<16x1xf32> to vector<16x128xf32>
    %cst_236 = arith.constant 0.000000e+00 : f32
    %635 = vector.broadcast %cst_236 : f32 to vector<1x128xf32>
    %c0_237 = arith.constant 0 : index
    %c0_238 = arith.constant 0 : index
    %c0_239 = arith.constant 0 : index
    %636 = vector.load %arg12[%c0_237, %c0_238, %c0_239] : memref<8x32x128xf32, #tpu.memory_space<vmem>>, vector<1x32x128xf32>
    %637 = vector.shape_cast %636 : vector<1x32x128xf32> to vector<32x128xf32>
    %c0_240 = arith.constant 0 : index
    %c0_241 = arith.constant 0 : index
    %c0_242 = arith.constant 0 : index
    %638 = vector.load %arg13[%c0_240, %c0_241, %c0_242] : memref<8x32x128xf32, #tpu.memory_space<vmem>>, vector<1x32x128xf32>
    %639 = vector.shape_cast %638 : vector<1x32x128xf32> to vector<32x128xf32>
    %640 = tpu.concatenate %637, %639 in 0 : vector<32x128xf32>, vector<32x128xf32> -> vector<64x128xf32>
    %cst_243 = arith.constant dense<0.000000e+00> : vector<16x128xf32>
    %641 = tpu.matmul %631, %640, %cst_243 {dimension_numbers = #tpu.dot_dimension_numbers<[1], [0], [0], [1], [0, 0, 1, 1], [], []>} : vector<16x64xf32>, vector<64x128xf32>, vector<16x128xf32> -> vector<16x128xf32>
    %642 = arith.addf %641, %634 : vector<16x128xf32>
    %c0_244 = arith.constant 0 : index
    %c0_245 = arith.constant 0 : index
    %c0_246 = arith.constant 0 : index
    %643 = vector.load %arg7[%c0_244, %c0_245, %c0_246] : memref<8x16x128xf32, #tpu.memory_space<vmem>>, vector<1x16x128xf32>
    %644 = vector.shape_cast %643 : vector<1x16x128xf32> to vector<16x128xf32>
    %645 = vector.shape_cast %642 : vector<16x128xf32> to vector<1x16x128xf32>
    tpu.vector_store %arg7[%c0_244, %c0_245, %c0_246], %645 {strides = array<i32>} : memref<8x16x128xf32, #tpu.memory_space<vmem>>, vector<1x16x128xf32>,
    %cst_247 = arith.constant dense<0.000000e+00> : vector<128xf32>
    %646 = vector.multi_reduction <add>, %642, %cst_247 [0] : vector<16x128xf32> to vector<128xf32>
    %647 = vector.shape_cast %646 : vector<128xf32> to vector<1x128xf32>
    %648 = arith.addf %635, %647 : vector<1x128xf32>
    %649 = arith.mulf %642, %642 : vector<16x128xf32>
    %cst_248 = arith.constant dense<0.000000e+00> : vector<128xf32>
    %650 = vector.multi_reduction <add>, %649, %cst_248 [0] : vector<16x128xf32> to vector<128xf32>
    %651 = vector.shape_cast %650 : vector<128xf32> to vector<1x128xf32>
    %652 = arith.addf %635, %651 : vector<1x128xf32>
    %c1_249 = arith.constant 1 : index
    %c0_250 = arith.constant 0 : index
    %c0_251 = arith.constant 0 : index
    %653 = vector.load %arg12[%c1_249, %c0_250, %c0_251] : memref<8x32x128xf32, #tpu.memory_space<vmem>>, vector<1x32x128xf32>
    %654 = vector.shape_cast %653 : vector<1x32x128xf32> to vector<32x128xf32>
    %c1_252 = arith.constant 1 : index
    %c0_253 = arith.constant 0 : index
    %c0_254 = arith.constant 0 : index
    %655 = vector.load %arg13[%c1_252, %c0_253, %c0_254] : memref<8x32x128xf32, #tpu.memory_space<vmem>>, vector<1x32x128xf32>
    %656 = vector.shape_cast %655 : vector<1x32x128xf32> to vector<32x128xf32>
    %657 = tpu.concatenate %654, %656 in 0 : vector<32x128xf32>, vector<32x128xf32> -> vector<64x128xf32>
    %cst_255 = arith.constant dense<0.000000e+00> : vector<16x128xf32>
    %658 = tpu.matmul %631, %657, %cst_255 {dimension_numbers = #tpu.dot_dimension_numbers<[1], [0], [0], [1], [0, 0, 1, 1], [], []>} : vector<16x64xf32>, vector<64x128xf32>, vector<16x128xf32> -> vector<16x128xf32>
    %659 = arith.addf %658, %634 : vector<16x128xf32>
    %c1_256 = arith.constant 1 : index
    %c0_257 = arith.constant 0 : index
    %c0_258 = arith.constant 0 : index
    %660 = vector.load %arg7[%c1_256, %c0_257, %c0_258] : memref<8x16x128xf32, #tpu.memory_space<vmem>>, vector<1x16x128xf32>
    %661 = vector.shape_cast %660 : vector<1x16x128xf32> to vector<16x128xf32>
    %662 = vector.shape_cast %659 : vector<16x128xf32> to vector<1x16x128xf32>
    tpu.vector_store %arg7[%c1_256, %c0_257, %c0_258], %662 {strides = array<i32>} : memref<8x16x128xf32, #tpu.memory_space<vmem>>, vector<1x16x128xf32>,
    %cst_259 = arith.constant dense<0.000000e+00> : vector<128xf32>
    %663 = vector.multi_reduction <add>, %659, %cst_259 [0] : vector<16x128xf32> to vector<128xf32>
    %664 = vector.shape_cast %663 : vector<128xf32> to vector<1x128xf32>
    %665 = arith.addf %648, %664 : vector<1x128xf32>
    %666 = arith.mulf %659, %659 : vector<16x128xf32>
    %cst_260 = arith.constant dense<0.000000e+00> : vector<128xf32>
    %667 = vector.multi_reduction <add>, %666, %cst_260 [0] : vector<16x128xf32> to vector<128xf32>
    %668 = vector.shape_cast %667 : vector<128xf32> to vector<1x128xf32>
    %669 = arith.addf %652, %668 : vector<1x128xf32>
    %c2_261 = arith.constant 2 : index
    %c0_262 = arith.constant 0 : index
    %c0_263 = arith.constant 0 : index
    %670 = vector.load %arg12[%c2_261, %c0_262, %c0_263] : memref<8x32x128xf32, #tpu.memory_space<vmem>>, vector<1x32x128xf32>
    %671 = vector.shape_cast %670 : vector<1x32x128xf32> to vector<32x128xf32>
    %c2_264 = arith.constant 2 : index
    %c0_265 = arith.constant 0 : index
    %c0_266 = arith.constant 0 : index
    %672 = vector.load %arg13[%c2_264, %c0_265, %c0_266] : memref<8x32x128xf32, #tpu.memory_space<vmem>>, vector<1x32x128xf32>
    %673 = vector.shape_cast %672 : vector<1x32x128xf32> to vector<32x128xf32>
    %674 = tpu.concatenate %671, %673 in 0 : vector<32x128xf32>, vector<32x128xf32> -> vector<64x128xf32>
    %cst_267 = arith.constant dense<0.000000e+00> : vector<16x128xf32>
    %675 = tpu.matmul %631, %674, %cst_267 {dimension_numbers = #tpu.dot_dimension_numbers<[1], [0], [0], [1], [0, 0, 1, 1], [], []>} : vector<16x64xf32>, vector<64x128xf32>, vector<16x128xf32> -> vector<16x128xf32>
    %676 = arith.addf %675, %634 : vector<16x128xf32>
    %c2_268 = arith.constant 2 : index
    %c0_269 = arith.constant 0 : index
    %c0_270 = arith.constant 0 : index
    %677 = vector.load %arg7[%c2_268, %c0_269, %c0_270] : memref<8x16x128xf32, #tpu.memory_space<vmem>>, vector<1x16x128xf32>
    %678 = vector.shape_cast %677 : vector<1x16x128xf32> to vector<16x128xf32>
    %679 = vector.shape_cast %676 : vector<16x128xf32> to vector<1x16x128xf32>
    tpu.vector_store %arg7[%c2_268, %c0_269, %c0_270], %679 {strides = array<i32>} : memref<8x16x128xf32, #tpu.memory_space<vmem>>, vector<1x16x128xf32>,
    %cst_271 = arith.constant dense<0.000000e+00> : vector<128xf32>
    %680 = vector.multi_reduction <add>, %676, %cst_271 [0] : vector<16x128xf32> to vector<128xf32>
    %681 = vector.shape_cast %680 : vector<128xf32> to vector<1x128xf32>
    %682 = arith.addf %665, %681 : vector<1x128xf32>
    %683 = arith.mulf %676, %676 : vector<16x128xf32>
    %cst_272 = arith.constant dense<0.000000e+00> : vector<128xf32>
    %684 = vector.multi_reduction <add>, %683, %cst_272 [0] : vector<16x128xf32> to vector<128xf32>
    %685 = vector.shape_cast %684 : vector<128xf32> to vector<1x128xf32>
    %686 = arith.addf %669, %685 : vector<1x128xf32>
    %c3_273 = arith.constant 3 : index
    %c0_274 = arith.constant 0 : index
    %c0_275 = arith.constant 0 : index
    %687 = vector.load %arg12[%c3_273, %c0_274, %c0_275] : memref<8x32x128xf32, #tpu.memory_space<vmem>>, vector<1x32x128xf32>
    %688 = vector.shape_cast %687 : vector<1x32x128xf32> to vector<32x128xf32>
    %c3_276 = arith.constant 3 : index
    %c0_277 = arith.constant 0 : index
    %c0_278 = arith.constant 0 : index
    %689 = vector.load %arg13[%c3_276, %c0_277, %c0_278] : memref<8x32x128xf32, #tpu.memory_space<vmem>>, vector<1x32x128xf32>
    %690 = vector.shape_cast %689 : vector<1x32x128xf32> to vector<32x128xf32>
    %691 = tpu.concatenate %688, %690 in 0 : vector<32x128xf32>, vector<32x128xf32> -> vector<64x128xf32>
    %cst_279 = arith.constant dense<0.000000e+00> : vector<16x128xf32>
    %692 = tpu.matmul %631, %691, %cst_279 {dimension_numbers = #tpu.dot_dimension_numbers<[1], [0], [0], [1], [0, 0, 1, 1], [], []>} : vector<16x64xf32>, vector<64x128xf32>, vector<16x128xf32> -> vector<16x128xf32>
    %693 = arith.addf %692, %634 : vector<16x128xf32>
    %c3_280 = arith.constant 3 : index
    %c0_281 = arith.constant 0 : index
    %c0_282 = arith.constant 0 : index
    %694 = vector.load %arg7[%c3_280, %c0_281, %c0_282] : memref<8x16x128xf32, #tpu.memory_space<vmem>>, vector<1x16x128xf32>
    %695 = vector.shape_cast %694 : vector<1x16x128xf32> to vector<16x128xf32>
    %696 = vector.shape_cast %693 : vector<16x128xf32> to vector<1x16x128xf32>
    tpu.vector_store %arg7[%c3_280, %c0_281, %c0_282], %696 {strides = array<i32>} : memref<8x16x128xf32, #tpu.memory_space<vmem>>, vector<1x16x128xf32>,
    %cst_283 = arith.constant dense<0.000000e+00> : vector<128xf32>
    %697 = vector.multi_reduction <add>, %693, %cst_283 [0] : vector<16x128xf32> to vector<128xf32>
    %698 = vector.shape_cast %697 : vector<128xf32> to vector<1x128xf32>
    %699 = arith.addf %682, %698 : vector<1x128xf32>
    %700 = arith.mulf %693, %693 : vector<16x128xf32>
    %cst_284 = arith.constant dense<0.000000e+00> : vector<128xf32>
    %701 = vector.multi_reduction <add>, %700, %cst_284 [0] : vector<16x128xf32> to vector<128xf32>
    %702 = vector.shape_cast %701 : vector<128xf32> to vector<1x128xf32>
    %703 = arith.addf %686, %702 : vector<1x128xf32>
    %c4_285 = arith.constant 4 : index
    %c0_286 = arith.constant 0 : index
    %c0_287 = arith.constant 0 : index
    %704 = vector.load %arg12[%c4_285, %c0_286, %c0_287] : memref<8x32x128xf32, #tpu.memory_space<vmem>>, vector<1x32x128xf32>
    %705 = vector.shape_cast %704 : vector<1x32x128xf32> to vector<32x128xf32>
    %c4_288 = arith.constant 4 : index
    %c0_289 = arith.constant 0 : index
    %c0_290 = arith.constant 0 : index
    %706 = vector.load %arg13[%c4_288, %c0_289, %c0_290] : memref<8x32x128xf32, #tpu.memory_space<vmem>>, vector<1x32x128xf32>
    %707 = vector.shape_cast %706 : vector<1x32x128xf32> to vector<32x128xf32>
    %708 = tpu.concatenate %705, %707 in 0 : vector<32x128xf32>, vector<32x128xf32> -> vector<64x128xf32>
    %cst_291 = arith.constant dense<0.000000e+00> : vector<16x128xf32>
    %709 = tpu.matmul %631, %708, %cst_291 {dimension_numbers = #tpu.dot_dimension_numbers<[1], [0], [0], [1], [0, 0, 1, 1], [], []>} : vector<16x64xf32>, vector<64x128xf32>, vector<16x128xf32> -> vector<16x128xf32>
    %710 = arith.addf %709, %634 : vector<16x128xf32>
    %c4_292 = arith.constant 4 : index
    %c0_293 = arith.constant 0 : index
    %c0_294 = arith.constant 0 : index
    %711 = vector.load %arg7[%c4_292, %c0_293, %c0_294] : memref<8x16x128xf32, #tpu.memory_space<vmem>>, vector<1x16x128xf32>
    %712 = vector.shape_cast %711 : vector<1x16x128xf32> to vector<16x128xf32>
    %713 = vector.shape_cast %710 : vector<16x128xf32> to vector<1x16x128xf32>
    tpu.vector_store %arg7[%c4_292, %c0_293, %c0_294], %713 {strides = array<i32>} : memref<8x16x128xf32, #tpu.memory_space<vmem>>, vector<1x16x128xf32>,
    %cst_295 = arith.constant dense<0.000000e+00> : vector<128xf32>
    %714 = vector.multi_reduction <add>, %710, %cst_295 [0] : vector<16x128xf32> to vector<128xf32>
    %715 = vector.shape_cast %714 : vector<128xf32> to vector<1x128xf32>
    %716 = arith.addf %699, %715 : vector<1x128xf32>
    %717 = arith.mulf %710, %710 : vector<16x128xf32>
    %cst_296 = arith.constant dense<0.000000e+00> : vector<128xf32>
    %718 = vector.multi_reduction <add>, %717, %cst_296 [0] : vector<16x128xf32> to vector<128xf32>
    %719 = vector.shape_cast %718 : vector<128xf32> to vector<1x128xf32>
    %720 = arith.addf %703, %719 : vector<1x128xf32>
    %c5_297 = arith.constant 5 : index
    %c0_298 = arith.constant 0 : index
    %c0_299 = arith.constant 0 : index
    %721 = vector.load %arg12[%c5_297, %c0_298, %c0_299] : memref<8x32x128xf32, #tpu.memory_space<vmem>>, vector<1x32x128xf32>
    %722 = vector.shape_cast %721 : vector<1x32x128xf32> to vector<32x128xf32>
    %c5_300 = arith.constant 5 : index
    %c0_301 = arith.constant 0 : index
    %c0_302 = arith.constant 0 : index
    %723 = vector.load %arg13[%c5_300, %c0_301, %c0_302] : memref<8x32x128xf32, #tpu.memory_space<vmem>>, vector<1x32x128xf32>
    %724 = vector.shape_cast %723 : vector<1x32x128xf32> to vector<32x128xf32>
    %725 = tpu.concatenate %722, %724 in 0 : vector<32x128xf32>, vector<32x128xf32> -> vector<64x128xf32>
    %cst_303 = arith.constant dense<0.000000e+00> : vector<16x128xf32>
    %726 = tpu.matmul %631, %725, %cst_303 {dimension_numbers = #tpu.dot_dimension_numbers<[1], [0], [0], [1], [0, 0, 1, 1], [], []>} : vector<16x64xf32>, vector<64x128xf32>, vector<16x128xf32> -> vector<16x128xf32>
    %727 = arith.addf %726, %634 : vector<16x128xf32>
    %c5_304 = arith.constant 5 : index
    %c0_305 = arith.constant 0 : index
    %c0_306 = arith.constant 0 : index
    %728 = vector.load %arg7[%c5_304, %c0_305, %c0_306] : memref<8x16x128xf32, #tpu.memory_space<vmem>>, vector<1x16x128xf32>
    %729 = vector.shape_cast %728 : vector<1x16x128xf32> to vector<16x128xf32>
    %730 = vector.shape_cast %727 : vector<16x128xf32> to vector<1x16x128xf32>
    tpu.vector_store %arg7[%c5_304, %c0_305, %c0_306], %730 {strides = array<i32>} : memref<8x16x128xf32, #tpu.memory_space<vmem>>, vector<1x16x128xf32>,
    %cst_307 = arith.constant dense<0.000000e+00> : vector<128xf32>
    %731 = vector.multi_reduction <add>, %727, %cst_307 [0] : vector<16x128xf32> to vector<128xf32>
    %732 = vector.shape_cast %731 : vector<128xf32> to vector<1x128xf32>
    %733 = arith.addf %716, %732 : vector<1x128xf32>
    %734 = arith.mulf %727, %727 : vector<16x128xf32>
    %cst_308 = arith.constant dense<0.000000e+00> : vector<128xf32>
    %735 = vector.multi_reduction <add>, %734, %cst_308 [0] : vector<16x128xf32> to vector<128xf32>
    %736 = vector.shape_cast %735 : vector<128xf32> to vector<1x128xf32>
    %737 = arith.addf %720, %736 : vector<1x128xf32>
    %c6_309 = arith.constant 6 : index
    %c0_310 = arith.constant 0 : index
    %c0_311 = arith.constant 0 : index
    %738 = vector.load %arg12[%c6_309, %c0_310, %c0_311] : memref<8x32x128xf32, #tpu.memory_space<vmem>>, vector<1x32x128xf32>
    %739 = vector.shape_cast %738 : vector<1x32x128xf32> to vector<32x128xf32>
    %c6_312 = arith.constant 6 : index
    %c0_313 = arith.constant 0 : index
    %c0_314 = arith.constant 0 : index
    %740 = vector.load %arg13[%c6_312, %c0_313, %c0_314] : memref<8x32x128xf32, #tpu.memory_space<vmem>>, vector<1x32x128xf32>
    %741 = vector.shape_cast %740 : vector<1x32x128xf32> to vector<32x128xf32>
    %742 = tpu.concatenate %739, %741 in 0 : vector<32x128xf32>, vector<32x128xf32> -> vector<64x128xf32>
    %cst_315 = arith.constant dense<0.000000e+00> : vector<16x128xf32>
    %743 = tpu.matmul %631, %742, %cst_315 {dimension_numbers = #tpu.dot_dimension_numbers<[1], [0], [0], [1], [0, 0, 1, 1], [], []>} : vector<16x64xf32>, vector<64x128xf32>, vector<16x128xf32> -> vector<16x128xf32>
    %744 = arith.addf %743, %634 : vector<16x128xf32>
    %c6_316 = arith.constant 6 : index
    %c0_317 = arith.constant 0 : index
    %c0_318 = arith.constant 0 : index
    %745 = vector.load %arg7[%c6_316, %c0_317, %c0_318] : memref<8x16x128xf32, #tpu.memory_space<vmem>>, vector<1x16x128xf32>
    %746 = vector.shape_cast %745 : vector<1x16x128xf32> to vector<16x128xf32>
    %747 = vector.shape_cast %744 : vector<16x128xf32> to vector<1x16x128xf32>
    tpu.vector_store %arg7[%c6_316, %c0_317, %c0_318], %747 {strides = array<i32>} : memref<8x16x128xf32, #tpu.memory_space<vmem>>, vector<1x16x128xf32>,
    %cst_319 = arith.constant dense<0.000000e+00> : vector<128xf32>
    %748 = vector.multi_reduction <add>, %744, %cst_319 [0] : vector<16x128xf32> to vector<128xf32>
    %749 = vector.shape_cast %748 : vector<128xf32> to vector<1x128xf32>
    %750 = arith.addf %733, %749 : vector<1x128xf32>
    %751 = arith.mulf %744, %744 : vector<16x128xf32>
    %cst_320 = arith.constant dense<0.000000e+00> : vector<128xf32>
    %752 = vector.multi_reduction <add>, %751, %cst_320 [0] : vector<16x128xf32> to vector<128xf32>
    %753 = vector.shape_cast %752 : vector<128xf32> to vector<1x128xf32>
    %754 = arith.addf %737, %753 : vector<1x128xf32>
    %c7_321 = arith.constant 7 : index
    %c0_322 = arith.constant 0 : index
    %c0_323 = arith.constant 0 : index
    %755 = vector.load %arg12[%c7_321, %c0_322, %c0_323] : memref<8x32x128xf32, #tpu.memory_space<vmem>>, vector<1x32x128xf32>
    %756 = vector.shape_cast %755 : vector<1x32x128xf32> to vector<32x128xf32>
    %c7_324 = arith.constant 7 : index
    %c0_325 = arith.constant 0 : index
    %c0_326 = arith.constant 0 : index
    %757 = vector.load %arg13[%c7_324, %c0_325, %c0_326] : memref<8x32x128xf32, #tpu.memory_space<vmem>>, vector<1x32x128xf32>
    %758 = vector.shape_cast %757 : vector<1x32x128xf32> to vector<32x128xf32>
    %759 = tpu.concatenate %756, %758 in 0 : vector<32x128xf32>, vector<32x128xf32> -> vector<64x128xf32>
    %cst_327 = arith.constant dense<0.000000e+00> : vector<16x128xf32>
    %760 = tpu.matmul %631, %759, %cst_327 {dimension_numbers = #tpu.dot_dimension_numbers<[1], [0], [0], [1], [0, 0, 1, 1], [], []>} : vector<16x64xf32>, vector<64x128xf32>, vector<16x128xf32> -> vector<16x128xf32>
    %761 = arith.addf %760, %634 : vector<16x128xf32>
    %c7_328 = arith.constant 7 : index
    %c0_329 = arith.constant 0 : index
    %c0_330 = arith.constant 0 : index
    %762 = vector.load %arg7[%c7_328, %c0_329, %c0_330] : memref<8x16x128xf32, #tpu.memory_space<vmem>>, vector<1x16x128xf32>
    %763 = vector.shape_cast %762 : vector<1x16x128xf32> to vector<16x128xf32>
    %764 = vector.shape_cast %761 : vector<16x128xf32> to vector<1x16x128xf32>
    tpu.vector_store %arg7[%c7_328, %c0_329, %c0_330], %764 {strides = array<i32>} : memref<8x16x128xf32, #tpu.memory_space<vmem>>, vector<1x16x128xf32>,
    %cst_331 = arith.constant dense<0.000000e+00> : vector<128xf32>
    %765 = vector.multi_reduction <add>, %761, %cst_331 [0] : vector<16x128xf32> to vector<128xf32>
    %766 = vector.shape_cast %765 : vector<128xf32> to vector<1x128xf32>
    %767 = arith.addf %750, %766 : vector<1x128xf32>
    %768 = arith.mulf %761, %761 : vector<16x128xf32>
    %cst_332 = arith.constant dense<0.000000e+00> : vector<128xf32>
    %769 = vector.multi_reduction <add>, %768, %cst_332 [0] : vector<16x128xf32> to vector<128xf32>
    %770 = vector.shape_cast %769 : vector<128xf32> to vector<1x128xf32>
    %771 = arith.addf %754, %770 : vector<1x128xf32>
    %c0_333 = arith.constant 0 : index
    %c0_334 = arith.constant 0 : index
    %772 = vector.load %arg8[%c0_333, %c0_334] : memref<1x128xf32, #tpu.memory_space<vmem>>, vector<1x128xf32>
    tpu.vector_store %arg8[%c0_333, %c0_334], %767 {strides = array<i32>} : memref<1x128xf32, #tpu.memory_space<vmem>>, vector<1x128xf32>,
    %c0_335 = arith.constant 0 : index
    %c0_336 = arith.constant 0 : index
    %773 = vector.load %arg9[%c0_335, %c0_336] : memref<1x128xf32, #tpu.memory_space<vmem>>, vector<1x128xf32>
    tpu.vector_store %arg9[%c0_335, %c0_336], %771 {strides = array<i32>} : memref<1x128xf32, #tpu.memory_space<vmem>>, vector<1x128xf32>,
    return
  }
  func.func @transform_0(%arg0: i32) -> (i32, i32, i32) {
    %c0_i32 = arith.constant 0 : i32
    %c0_i32_0 = arith.constant 0 : i32
    %c0_i32_1 = arith.constant 0 : i32
    return %c0_i32, %c0_i32_0, %arg0 : i32, i32, i32
  }
  func.func @transform_1(%arg0: i32) -> (i32, i32) {
    %c0_i32 = arith.constant 0 : i32
    %c0_i32_0 = arith.constant 0 : i32
    %c0_i32_1 = arith.constant 0 : i32
    return %c0_i32, %c0_i32_0 : i32, i32
  }
  func.func @transform_2(%arg0: i32) -> (i32, i32) {
    %c0_i32 = arith.constant 0 : i32
    %c0_i32_0 = arith.constant 0 : i32
    %c0_i32_1 = arith.constant 0 : i32
    return %c0_i32, %c0_i32_0 : i32, i32
  }
  func.func @transform_3(%arg0: i32) -> (i32, i32) {
    %c0_i32 = arith.constant 0 : i32
    %c0_i32_0 = arith.constant 0 : i32
    %c0_i32_1 = arith.constant 0 : i32
    return %c0_i32, %c0_i32_0 : i32, i32
  }
  func.func @transform_4(%arg0: i32) -> (i32, i32) {
    %c0_i32 = arith.constant 0 : i32
    %c0_i32_0 = arith.constant 0 : i32
    %c0_i32_1 = arith.constant 0 : i32
    return %c0_i32, %c0_i32_0 : i32, i32
  }
  func.func @transform_5(%arg0: i32) -> (i32, i32) {
    %c0_i32 = arith.constant 0 : i32
    %c0_i32_0 = arith.constant 0 : i32
    %c0_i32_1 = arith.constant 0 : i32
    return %c0_i32, %c0_i32_0 : i32, i32
  }
  func.func @transform_6(%arg0: i32) -> (i32, i32, i32) {
    %c0_i32 = arith.constant 0 : i32
    %c0_i32_0 = arith.constant 0 : i32
    %c0_i32_1 = arith.constant 0 : i32
    return %c0_i32, %c0_i32_0, %arg0 : i32, i32, i32
  }
  func.func @transform_7(%arg0: i32) -> (i32, i32) {
    %c0_i32 = arith.constant 0 : i32
    %c0_i32_0 = arith.constant 0 : i32
    return %c0_i32, %arg0 : i32, i32
  }
  func.func @transform_8(%arg0: i32) -> (i32, i32) {
    %c0_i32 = arith.constant 0 : i32
    %c0_i32_0 = arith.constant 0 : i32
    return %c0_i32, %arg0 : i32, i32
  }
}

</mosaic_0001>

<bundles_post_ra>
// kernel: inter_chunk_rnn.3
= control target key start
LH: loop header
LB: loop body
LE: loop exit
PB: predicated region body
PF: predicated region fallthrough
CT: control target
= control target key end

     0   :  { %v198_v0 = vmov 0   ;;  %s396_s3 = inlined_call_operand.vmem [shape: f32[16,1], index: 3, kind: input, shape index: {}]   ;;  %s397_s2 = inlined_call_operand.vmem [shape: f32[16,1], index: 2, kind: input, shape index: {}]   ;;  %s398_s4 = inlined_call_operand.vmem [shape: f32[1,128], index: 4, kind: input, shape index: {}]   ;;  %s399_s0 = inlined_call_operand.vmem [shape: f32[8,16,128], index: 0, kind: input, shape index: {}]   ;;  %s400_s5 = inlined_call_operand.vmem [shape: f32[1,128], index: 5, kind: input, shape index: {}]   ;;  %s401_s1 = inlined_call_operand.vmem [shape: f32[8,16,128], index: 1, kind: input, shape index: {}]   ;;  %s402_s6 = inlined_call_operand.vmem [shape: f32[8,16,128], index: 6, kind: output, shape index: {}]  }
   0x1   :  { %197 = vset.pattern.permute.xlu1 %v198_v0  ;;  %196 = vset.pattern.permute.xlu0 %v198_v0  ;;  %v25_v1 = vld [vmem:[%s396_s3] sm:$0xff]  ;;  %v26_v3 = vld [vmem:[%s396_s3 + $0x8] sm:$0xff]  ;;  %v31_v7 = vld [vmem:[%s399_s0 + $0x10] sm:$0xff] }
   0x2   :  { %v23_v2 = vld [vmem:[%s397_s2] sm:$0xff]  ;;  %117 = vperm.xlu1 %197, %v25_v1   ;;  %v24_v4 = vld [vmem:[%s397_s2 + $0x8] sm:$0xff]  ;;  %v35_v9 = vld [vmem:[%s399_s0 + $0x30] sm:$0xff] }
   0x3   :  { %91 = vperm.xlu0 %196, %v23_v2   ;;  %v193_v5 = vld [vmem:[%s398_s4] ss:$0 sm:$0xff]  ;;  %v39_v11 = vld [vmem:[%s399_s0 + $0x50] sm:$0xff]  ;;  %v30_v14 = vld [vmem:[%s399_s0 + $0x8] sm:$0xff] }
   0x4   :  { %v29_v6 = vld [vmem:[%s399_s0] sm:$0xff]  ;;  %v43_v13 = vld [vmem:[%s399_s0 + $0x70] sm:$0xff]  ;;  %v32_v15 = vld [vmem:[%s399_s0 + $0x18] sm:$0xff]  ;;  %v53_v20 = vsub.f32 %v31_v7, %v193_v5  ;;  %v57_v22 = vsub.f32 %v35_v9, %v193_v5  ;;  %v61_v28 = vsub.f32 %v39_v11, %v193_v5  ;;  %v52_v31 = vsub.f32 %v30_v14, %v193_v5 }
   0x5   :  { %v33_v8 = vld [vmem:[%s399_s0 + $0x20] sm:$0xff]  ;;  %v34_v16 = vld [vmem:[%s399_s0 + $0x28] sm:$0xff]  ;;  %v36_v17 = vld [vmem:[%s399_s0 + $0x38] sm:$0xff]  ;;  %v51_v19 = vsub.f32 %v29_v6, %v193_v5  ;;  %v65_v30 = vsub.f32 %v43_v13, %v193_v5  ;;  %v54_v32 = vsub.f32 %v32_v15, %v193_v5 }
   0x6   :  { %122 = vperm.xlu1 %197, %v26_v3   ;;  %v37_v10 = vld [vmem:[%s399_s0 + $0x40] sm:$0xff]  ;;  %v38_v18 = vld [vmem:[%s399_s0 + $0x48] sm:$0xff]  ;;  %v55_v21 = vsub.f32 %v33_v8, %v193_v5  ;;  %v40_v23 = vld [vmem:[%s399_s0 + $0x58] sm:$0xff]  ;;  %v56_v33 = vsub.f32 %v34_v16, %v193_v5  ;;  %v58_v34 = vsub.f32 %v36_v17, %v193_v5 }
   0x7   :  { %96 = vperm.xlu0 %196, %v24_v4   ;;  %v41_v12 = vld [vmem:[%s399_s0 + $0x60] sm:$0xff]  ;;  %v42_v24 = vld [vmem:[%s399_s0 + $0x68] sm:$0xff]  ;;  %v44_v25 = vld [vmem:[%s399_s0 + $0x78] sm:$0xff]  ;;  %v59_v27 = vsub.f32 %v37_v10, %v193_v5  ;;  %v60_v35 = vsub.f32 %v38_v18, %v193_v5  ;;  %v62_v36 = vsub.f32 %v40_v23, %v193_v5 }
   0x8   :  { %v194_v26 = vld [vmem:[%s400_s5] ss:$0 sm:$0xff]  ;;  %v63_v29 = vsub.f32 %v41_v12, %v193_v5  ;;  %v64_v37 = vsub.f32 %v42_v24, %v193_v5  ;;  %v66_v38 = vsub.f32 %v44_v25, %v193_v5  ;;  %v143_v61 = vld [vmem:[%s401_s1 + $0x10] sm:$0xff] }
   0x9   :  { %v73_v39 = vmul.f32 %v194_v26, %v51_v19  ;;  %v75_v40 = vmul.f32 %v194_v26, %v53_v20  ;;  %v77_v41 = vmul.f32 %v194_v26, %v55_v21  ;;  %v79_v42 = vmul.f32 %v194_v26, %v57_v22  ;;  %v141_v60 = vld [vmem:[%s401_s1] sm:$0xff]  ;;  %v147_v4 = vld [vmem:[%s401_s1 + $0x30] sm:$0xff] }
   0xa   :  { %v81_v43 = vmul.f32 %v194_v26, %v59_v27  ;;  %v83_v44 = vmul.f32 %v194_v26, %v61_v28  ;;  %v85_v45 = vmul.f32 %v194_v26, %v63_v29  ;;  %v87_v46 = vmul.f32 %v194_v26, %v65_v30  ;;  %v145_v3 = vld [vmem:[%s401_s1 + $0x20] sm:$0xff]  ;;  %v151_v10 = vld [vmem:[%s401_s1 + $0x50] sm:$0xff]  ;;  %v142_v30 = vld [vmem:[%s401_s1 + $0x8] sm:$0xff] }
   0xb   :  { %v74_v47 = vmul.f32 %v194_v26, %v52_v31  ;;  %v76_v48 = vmul.f32 %v194_v26, %v54_v32  ;;  %v78_v49 = vmul.f32 %v194_v26, %v56_v33  ;;  %v80_v50 = vmul.f32 %v194_v26, %v58_v34  ;;  %v149_v5 = vld [vmem:[%s401_s1 + $0x40] sm:$0xff]  ;;  %v155_v12 = vld [vmem:[%s401_s1 + $0x70] sm:$0xff]  ;;  %v144_v31 = vld [vmem:[%s401_s1 + $0x18] sm:$0xff] }
   0xc   :  { %v82_v52 = vmul.f32 %v194_v26, %v60_v35  ;;  %v84_v53 = vmul.f32 %v194_v26, %v62_v36  ;;  %v86_v54 = vmul.f32 %v194_v26, %v64_v37  ;;  %v88_v55 = vmul.f32 %v194_v26, %v66_v38  ;;  %v153_v11 = vld [vmem:[%s401_s1 + $0x60] sm:$0xff]  ;;  %v146_v37 = vld [vmem:[%s401_s1 + $0x28] sm:$0xff]  ;;  %v148_v38 = vld [vmem:[%s401_s1 + $0x38] sm:$0xff] }
  0x7d   :  { %v118_v62 = vpop.permute.xlu1 %117 }
  0x7e   :  { %v92_v51 = vpop.permute.xlu0 %91 }
  0x7f   :  { %v99_v56 = vmul.f32 %v92_v51, %v73_v39  ;;  %v101_v57 = vmul.f32 %v92_v51, %v75_v40  ;;  %v103_v58 = vmul.f32 %v92_v51, %v77_v41  ;;  %v105_v59 = vmul.f32 %v92_v51, %v79_v42  ;;  %v150_v39 = vld [vmem:[%s401_s1 + $0x48] sm:$0xff] }
  0x80   :  { %v107_v63 = vmul.f32 %v92_v51, %v81_v43  ;;  %v109_v0 = vmul.f32 %v92_v51, %v83_v44  ;;  %v111_v1 = vmul.f32 %v92_v51, %v85_v45  ;;  %v113_v2 = vmul.f32 %v92_v51, %v87_v46  ;;  %v152_v44 = vld [vmem:[%s401_s1 + $0x58] sm:$0xff]  ;;  %v154_v45 = vld [vmem:[%s401_s1 + $0x68] sm:$0xff] }
  0x81   :  { %v125_v6 = vadd.f32 %v118_v62, %v99_v56  ;;  %v127_v7 = vadd.f32 %v118_v62, %v101_v57  ;;  %v129_v8 = vadd.f32 %v118_v62, %v103_v58  ;;  %v131_v9 = vadd.f32 %v118_v62, %v105_v59  ;;  %v123_v32 = vpop.permute.xlu1 %122  ;;  %v156_v46 = vld [vmem:[%s401_s1 + $0x78] sm:$0xff] }
  0x82   :  { %v133_v13 = vadd.f32 %v118_v62, %v107_v63  ;;  %v135_v14 = vadd.f32 %v118_v62, %v109_v0  ;;  %v137_v15 = vadd.f32 %v118_v62, %v111_v1  ;;  %v139_v16 = vadd.f32 %v118_v62, %v113_v2  ;;  %v97_v17 = vpop.permute.xlu0 %96 }
  0x83   :  { %v157_v18 = vadd.f32 %v141_v60, %v125_v6  ;;  %v159_v19 = vadd.f32 %v143_v61, %v127_v7  ;;  %v161_v20 = vadd.f32 %v145_v3, %v129_v8  ;;  %v163_v21 = vadd.f32 %v147_v4, %v131_v9 }
  0x84   :  { %v165_v22 = vadd.f32 %v149_v5, %v133_v13  ;;  %v167_v23 = vadd.f32 %v151_v10, %v135_v14  ;;  %v169_v24 = vadd.f32 %v153_v11, %v137_v15  ;;  %v171_v25 = vadd.f32 %v155_v12, %v139_v16 }
  0x85   :  { %173 = vst [vmem:[%s402_s6] sm:$0xff] %v157_v18  ;;  %175 = vst [vmem:[%s402_s6 + $0x10] sm:$0xff] %v159_v19  ;;  %v100_v26 = vmul.f32 %v97_v17, %v74_v47  ;;  %v102_v27 = vmul.f32 %v97_v17, %v76_v48  ;;  %v104_v28 = vmul.f32 %v97_v17, %v78_v49 }
  0x86   :  { %177 = vst [vmem:[%s402_s6 + $0x20] sm:$0xff] %v161_v20  ;;  %179 = vst [vmem:[%s402_s6 + $0x30] sm:$0xff] %v163_v21  ;;  %v106_v29 = vmul.f32 %v97_v17, %v80_v50  ;;  %v108_v33 = vmul.f32 %v97_v17, %v82_v52  ;;  %v110_v34 = vmul.f32 %v97_v17, %v84_v53 }
  0x87   :  { %181 = vst [vmem:[%s402_s6 + $0x40] sm:$0xff] %v165_v22  ;;  %183 = vst [vmem:[%s402_s6 + $0x50] sm:$0xff] %v167_v23  ;;  %v112_v35 = vmul.f32 %v97_v17, %v86_v54  ;;  %v114_v36 = vmul.f32 %v97_v17, %v88_v55  ;;  %v126_v40 = vadd.f32 %v123_v32, %v100_v26 }
  0x88   :  { %185 = vst [vmem:[%s402_s6 + $0x60] sm:$0xff] %v169_v24  ;;  %187 = vst [vmem:[%s402_s6 + $0x70] sm:$0xff] %v171_v25  ;;  %v128_v41 = vadd.f32 %v123_v32, %v102_v27  ;;  %v130_v42 = vadd.f32 %v123_v32, %v104_v28  ;;  %v132_v43 = vadd.f32 %v123_v32, %v106_v29 }
  0x89   :  { %v134_v47 = vadd.f32 %v123_v32, %v108_v33  ;;  %v136_v48 = vadd.f32 %v123_v32, %v110_v34  ;;  %v138_v49 = vadd.f32 %v123_v32, %v112_v35  ;;  %v140_v50 = vadd.f32 %v123_v32, %v114_v36 }
  0x8a   :  { %v158_v51 = vadd.f32 %v142_v30, %v126_v40  ;;  %v160_v52 = vadd.f32 %v144_v31, %v128_v41  ;;  %v162_v53 = vadd.f32 %v146_v37, %v130_v42  ;;  %v164_v54 = vadd.f32 %v148_v38, %v132_v43 }
  0x8b   :  { %v166_v55 = vadd.f32 %v150_v39, %v134_v47  ;;  %v168_v56 = vadd.f32 %v152_v44, %v136_v48  ;;  %v170_v57 = vadd.f32 %v154_v45, %v138_v49  ;;  %v172_v58 = vadd.f32 %v156_v46, %v140_v50 }
  0x8c   :  { %174 = vst [vmem:[%s402_s6 + $0x8] sm:$0xff] %v158_v51  ;;  %176 = vst [vmem:[%s402_s6 + $0x18] sm:$0xff] %v160_v52 }
  0x8d   :  { %178 = vst [vmem:[%s402_s6 + $0x28] sm:$0xff] %v162_v53  ;;  %180 = vst [vmem:[%s402_s6 + $0x38] sm:$0xff] %v164_v54 }
  0x8e   :  { %182 = vst [vmem:[%s402_s6 + $0x48] sm:$0xff] %v166_v55  ;;  %184 = vst [vmem:[%s402_s6 + $0x58] sm:$0xff] %v168_v56 }
  0x8f   :  { %186 = vst [vmem:[%s402_s6 + $0x68] sm:$0xff] %v170_v57  ;;  %188 = vst [vmem:[%s402_s6 + $0x78] sm:$0xff] %v172_v58 }

// kernel: inter_chunk_rnn.2
= control target key start
LH: loop header
LB: loop body
LE: loop exit
PB: predicated region body
PF: predicated region fallthrough
CT: control target
= control target key end

     0   :  { %vm252_vm0 = vcmask 130048   ;;  %v10995_v3 = vmov 0   ;;  %vm2472_vm1 = vcmask 523264   ;;  %s14901_s0 = inlined_call_operand.vmem [shape: f32[8,16,128], index: 0, kind: input, shape index: {}]   ;;  %s14902_s1 = inlined_call_operand.vmem [shape: f32[256,16], index: 1, kind: input, shape index: {}]   ;;  %s14903_s3 = inlined_call_operand.vmem [shape: f32[256,1], index: 3, kind: input, shape index: {}]   ;;  %s14904_s5 = inlined_call_operand.vmem [shape: f32[16,1], index: 5, kind: input, shape index: {}]   ;;  %s14905_s2 = inlined_call_operand.vmem [shape: f32[256,64], index: 2, kind: input, shape index: {}]   ;;  %s14906_s4 = inlined_call_operand.vmem [shape: f32[16,64], index: 4, kind: input, shape index: {}]   ;;  %s14907_s6 = inlined_call_operand.vmem [shape: f32[8,16,128], index: 6, kind: output, shape index: {0}]   ;;  %s14908_s7 = inlined_call_operand.vmem [shape: f32[1,128], index: 7, kind: output, shape index: {1}]   ;;  %s14909_s8 = inlined_call_operand.vmem [shape: f32[1,128], index: 8, kind: output, shape index: {2}]  }
   0x1   :  { %v251_v0 = vld [vmem:[%s14901_s0 + $0x8] sm:$0xff]  ;;  %v250_v1 = vld [vmem:[%s14901_s0] sm:$0xff]  ;;  %9841 = vset.pattern.permute.xlu0 %v10995_v3  ;;  %9842 = vset.pattern.permute.xlu1 %v10995_v3  ;;  %v11065_v5 = vld [vmem:[%s14902_s1 + $0x10] sm:$0xff] }
   0x2   :  { %v11051_v2 = vld [vmem:[%s14902_s1] sm:$0xff]  ;;  %8773 = vmatprep.subr.mxu0 %v251_v0  ;;  %v11058_v4 = vld [vmem:[%s14902_s1 + $0x8] sm:$0xff]  ;;  %v7393_v6 = vld [vmem:[%s14901_s0 + $0x18] sm:$0xff] }
   0x3   :  { %8777 = vmatprep.mubr.msk.f32.mxu0 %vm252_vm0, %v11051_v2  ;;  %8774 = vmatpush3.msra.mxu0 %v251_v0  ;;  %v7392_v7 = vld [vmem:[%s14901_s0 + $0x10] sm:$0xff]  ;;  %v11080_v8 = vld [vmem:[%s14902_s1 + $0x18] sm:$0xff]  ;;  %v11088_v10 = vld [vmem:[%s14902_s1 + $0x20] sm:$0xff] }
   0x4   :  { %8829 = vmatprep.mubr.msk.f32.mxu1 %vm252_vm0, %v11051_v2  ;;  %8775 = vmatprep.subr.mxu0 %v250_v1  ;;  %v77_v9 = vld [vmem:[%s14903_s3 + $0x98] sm:$0xff]  ;;  %v76_v12 = vld [vmem:[%s14903_s3 + $0x90] sm:$0xff]  ;;  %v11107_v13 = vld [vmem:[%s14902_s1 + $0x28] sm:$0xff] }
   0x5   :  { %8776 = vmatpush3.msra.mxu0 %v250_v1  ;;  %8825 = vmatprep.subr.mxu1 %v7393_v6  ;;  %v81_v11 = vld [vmem:[%s14903_s3 + $0xb8] sm:$0xff]  ;;  %v11112_v14 = vld [vmem:[%s14902_s1 + $0x30] sm:$0xff]  ;;  %v75_v16 = vld [vmem:[%s14903_s3 + $0x88] sm:$0xff] }
   0x6   :  { %8778 = vmatmul.mubr.msk.f32.vlgmr.msra.gmra.mxu0 %vm252_vm0, %v11058_v4  ;;  %8826 = vmatpush3.msra.mxu1 %v7393_v6  ;;  %v80_v15 = vld [vmem:[%s14903_s3 + $0xb0] sm:$0xff]  ;;  %v7427_v17 = vld [vmem:[%s14901_s0 + $0x28] sm:$0xff]  ;;  %v11134_v18 = vld [vmem:[%s14902_s1 + $0x38] sm:$0xff] }
   0x7   :  { %8780 = vmatprep.mubr.msk.f32.mxu0 %vm252_vm0, %v11065_v5  ;;  %8827 = vmatprep.subr.mxu1 %v7392_v7  ;;  %v11139_v19 = vld [vmem:[%s14902_s1 + $0x40] sm:$0xff]  ;;  %v79_v20 = vld [vmem:[%s14903_s3 + $0xa8] sm:$0xff]  ;;  %v11166_v24 = vld [vmem:[%s14902_s1 + $0x50] sm:$0xff] }
   0x8   :  { %8828 = vmatpush3.msra.mxu1 %v7392_v7  ;;  %187 = vperm.xlu0 %9841, %v77_v9   ;;  %v74_v21 = vld [vmem:[%s14903_s3 + $0x80] sm:$0xff]  ;;  %v11161_v23 = vld [vmem:[%s14902_s1 + $0x48] sm:$0xff]  ;;  %v61_v26 = vld [vmem:[%s14903_s3 + $0x18] sm:$0xff] }
   0x9   :  { %8830 = vmatmul.mubr.msk.f32.vlgmr.msra.gmra.mxu1 %vm252_vm0, %v11058_v4  ;;  %182 = vperm.xlu1 %9842, %v76_v12   ;;  %v7426_v22 = vld [vmem:[%s14901_s0 + $0x20] sm:$0xff]  ;;  %v7461_v27 = vld [vmem:[%s14901_s0 + $0x38] sm:$0xff]  ;;  %v60_v31 = vld [vmem:[%s14903_s3 + $0x10] sm:$0xff] }
   0xa   :  { %8781 = vmatmul.mubr.msk.f32.gmra.mxu0 %vm252_vm0, %v11080_v8  ;;  %8832 = vmatprep.mubr.msk.f32.mxu1 %vm252_vm0, %v11065_v5  ;;  %v78_v25 = vld [vmem:[%s14903_s3 + $0xa0] sm:$0xff]  ;;  %v11188_v28 = vld [vmem:[%s14902_s1 + $0x58] sm:$0xff]  ;;  %v7460_v32 = vld [vmem:[%s14901_s0 + $0x30] sm:$0xff] }
   0xb   :  { %8783 = vmatprep.mubr.msk.f32.mxu0 %vm252_vm0, %v11088_v10  ;;  %8877 = vmatprep.subr.mxu0 %v7427_v17  ;;  %v11193_v29 = vld [vmem:[%s14902_s1 + $0x60] sm:$0xff]  ;;  %v65_v30 = vld [vmem:[%s14903_s3 + $0x38] sm:$0xff]  ;;  %v11215_v33 = vld [vmem:[%s14902_s1 + $0x68] sm:$0xff] }
   0xc   :  { %207 = vperm.xlu0 %9841, %v81_v11   ;;  %8878 = vmatpush3.msra.mxu0 %v7427_v17  ;;  %v11220_v34 = vld [vmem:[%s14902_s1 + $0x70] sm:$0xff]  ;;  %v59_v36 = vld [vmem:[%s14903_s3 + $0x8] sm:$0xff]  ;;  %v11244_v38 = vld [vmem:[%s14902_s1 + $0x78] sm:$0xff] }
   0xd   :  { %8833 = vmatmul.mubr.msk.f32.gmra.mxu1 %vm252_vm0, %v11080_v8  ;;  %202 = vperm.xlu1 %9842, %v80_v15   ;;  %v64_v35 = vld [vmem:[%s14903_s3 + $0x30] sm:$0xff]  ;;  %v11237_v37 = vld [vmem:[%s14901_s0 + $0x48] sm:$0xff]  ;;  %v11249_v39 = vld [vmem:[%s14902_s1 + $0x80] sm:$0xff] }
   0xe   :  { %8784 = vmatmul.mubr.msk.f32.gmra.mxu0 %vm252_vm0, %v11107_v13  ;;  %8835 = vmatprep.mubr.msk.f32.mxu1 %vm252_vm0, %v11088_v10  ;;  %v63_v40 = vld [vmem:[%s14903_s3 + $0x28] sm:$0xff]  ;;  %v58_v41 = vld [vmem:[%s14903_s3] sm:$0xff]  ;;  %v11263_v42 = vld [vmem:[%s14901_s0 + $0x58] sm:$0xff] }
   0xf   :  { %8786 = vmatprep.mubr.msk.f32.mxu0 %vm252_vm0, %v11112_v14  ;;  %8879 = vmatprep.subr.mxu0 %v7426_v22  ;;  %v11274_v43 = vld [vmem:[%s14902_s1 + $0x88] sm:$0xff]  ;;  %v11279_v44 = vld [vmem:[%s14902_s1 + $0x90] sm:$0xff]  ;;  %v62_v45 = vld [vmem:[%s14903_s3 + $0x20] sm:$0xff] }
  0x10   :  { %177 = vperm.xlu0 %9841, %v75_v16   ;;  %8880 = vmatpush3.msra.mxu0 %v7426_v22  ;;  %v85_v46 = vld [vmem:[%s14903_s3 + $0xd8] sm:$0xff]  ;;  %v11304_v48 = vld [vmem:[%s14902_s1 + $0xa0] sm:$0xff]  ;;  %v84_v50 = vld [vmem:[%s14903_s3 + $0xd0] sm:$0xff] }
  0x11   :  { %8836 = vmatmul.mubr.msk.f32.gmra.mxu1 %vm252_vm0, %v11107_v13  ;;  %197 = vperm.xlu1 %9842, %v79_v20   ;;  %v11299_v47 = vld [vmem:[%s14902_s1 + $0x98] sm:$0xff]  ;;  %v11323_v51 = vld [vmem:[%s14902_s1 + $0xa8] sm:$0xff]  ;;  %v11328_v52 = vld [vmem:[%s14902_s1 + $0xb0] sm:$0xff] }
  0x12   :  { %8787 = vmatmul.mubr.msk.f32.gmra.mxu0 %vm252_vm0, %v11134_v18  ;;  %8838 = vmatprep.mubr.msk.f32.mxu1 %vm252_vm0, %v11112_v14  ;;  %v89_v49 = vld [vmem:[%s14903_s3 + $0xf8] sm:$0xff]  ;;  %v88_v53 = vld [vmem:[%s14903_s3 + $0xf0] sm:$0xff]  ;;  %v83_v54 = vld [vmem:[%s14903_s3 + $0xc8] sm:$0xff] }
  0x13   :  { %8789 = vmatprep.mubr.msk.f32.mxu0 %vm252_vm0, %v11139_v19  ;;  %8929 = vmatprep.subr.mxu1 %v7461_v27  ;;  %v11347_v55 = vld [vmem:[%s14902_s1 + $0xb8] sm:$0xff]  ;;  %v11352_v56 = vld [vmem:[%s14902_s1 + $0xc0] sm:$0xff]  ;;  %v87_v57 = vld [vmem:[%s14903_s3 + $0xe8] sm:$0xff] }
  0x14   :  { %172 = vperm.xlu0 %9841, %v74_v21   ;;  %8930 = vmatpush3.msra.mxu1 %v7461_v27  ;;  %v82_v58 = vld [vmem:[%s14903_s3 + $0xc0] sm:$0xff]  ;;  %v11371_v59 = vld [vmem:[%s14902_s1 + $0xc8] sm:$0xff]  ;;  %v11376_v60 = vld [vmem:[%s14902_s1 + $0xd0] sm:$0xff] }
  0x15   :  { %8839 = vmatmul.mubr.msk.f32.gmra.mxu1 %vm252_vm0, %v11134_v18  ;;  %192 = vperm.xlu1 %9842, %v78_v25   ;;  %v86_v61 = vld [vmem:[%s14903_s3 + $0xe0] sm:$0xff]  ;;  %v69_v62 = vld [vmem:[%s14903_s3 + $0x58] sm:$0xff]  ;;  %v68_v3 = vld [vmem:[%s14903_s3 + $0x50] sm:$0xff] }
  0x16   :  { %8790 = vmatmul.mubr.msk.f32.gmra.mxu0 %vm252_vm0, %v11161_v23  ;;  %8841 = vmatprep.mubr.msk.f32.mxu1 %vm252_vm0, %v11139_v19  ;;  %v11395_v63 = vld [vmem:[%s14902_s1 + $0xd8] sm:$0xff]  ;;  %v11400_v0 = vld [vmem:[%s14902_s1 + $0xe0] sm:$0xff]  ;;  %v11419_v6 = vld [vmem:[%s14902_s1 + $0xe8] sm:$0xff] }
  0x17   :  { %8792 = vmatprep.mubr.msk.f32.mxu0 %vm252_vm0, %v11166_v24  ;;  %8931 = vmatprep.subr.mxu1 %v7460_v32  ;;  %v73_v1 = vld [vmem:[%s14903_s3 + $0x78] sm:$0xff]  ;;  %v11424_v7 = vld [vmem:[%s14902_s1 + $0xf0] sm:$0xff]  ;;  %v67_v11 = vld [vmem:[%s14903_s3 + $0x48] sm:$0xff] }
  0x18   :  { %107 = vperm.xlu0 %9841, %v61_v26   ;;  %8932 = vmatpush3.msra.mxu1 %v7460_v32  ;;  %v72_v9 = vld [vmem:[%s14903_s3 + $0x70] sm:$0xff]  ;;  %v11443_v12 = vld [vmem:[%s14902_s1 + $0xf8] sm:$0xff]  ;;  %v71_v15 = vld [vmem:[%s14903_s3 + $0x68] sm:$0xff] }
  0x19   :  { %8842 = vmatmul.mubr.msk.f32.gmra.mxu1 %vm252_vm0, %v11161_v23  ;;  %127 = vperm.xlu1 %9842, %v65_v30   ;;  %v66_v16 = vld [vmem:[%s14903_s3 + $0x40] sm:$0xff]  ;;  %v11479_v21 = vld [vmem:[%s14901_s0 + $0x68] sm:$0xff]  ;;  %v7528_v22 = vld [vmem:[%s14901_s0 + $0x50] sm:$0xff]  ;;  %v10996_v30 = vmov 0.0  }
  0x1a   :  { %8793 = vmatmul.mubr.msk.f32.gmra.mxu0 %vm252_vm0, %v11188_v28  ;;  %8844 = vmatprep.mubr.msk.f32.mxu1 %vm252_vm0, %v11166_v24  ;;  %v70_v17 = vld [vmem:[%s14903_s3 + $0x60] sm:$0xff]  ;;  %v11505_v25 = vld [vmem:[%s14901_s0 + $0x78] sm:$0xff]  ;;  %v7596_v27 = vld [vmem:[%s14901_s0 + $0x70] sm:$0xff] }
  0x1b   :  { %8795 = vmatprep.mubr.msk.f32.mxu0 %vm252_vm0, %v11193_v29  ;;  %8981 = vmatprep.subr.mxu0 %v11237_v37  ;;  %v7494_v20 = vld [vmem:[%s14901_s0 + $0x40] sm:$0xff] }
  0x1c   :  { %102 = vperm.xlu0 %9841, %v60_v31   ;;  %9033 = vmatprep.subr.mxu1 %v11263_v42  ;;  %v7562_v26 = vld [vmem:[%s14901_s0 + $0x60] sm:$0xff] }
  0x1d   :  { %8845 = vmatmul.mubr.msk.f32.gmra.mxu1 %vm252_vm0, %v11188_v28  ;;  %122 = vperm.xlu1 %9842, %v64_v35  }
  0x1e   :  { %8796 = vmatmul.mubr.msk.f32.gmra.mxu0 %vm252_vm0, %v11215_v33  ;;  %8847 = vmatprep.mubr.msk.f32.mxu1 %vm252_vm0, %v11193_v29 }
  0x1f   :  { %8798 = vmatprep.mubr.msk.f32.mxu0 %vm252_vm0, %v11220_v34 }
  0x20   :  { %97 = vperm.xlu0 %9841, %v59_v36  }
  0x21   :  { %8848 = vmatmul.mubr.msk.f32.gmra.mxu1 %vm252_vm0, %v11215_v33  ;;  %117 = vperm.xlu1 %9842, %v63_v40  }
  0x22   :  { %8799 = vmatmul.mubr.msk.f32.gmra.mxu0 %vm252_vm0, %v11244_v38  ;;  %8850 = vmatprep.mubr.msk.f32.mxu1 %vm252_vm0, %v11220_v34 }
  0x23   :  { %8801 = vmatprep.mubr.msk.f32.mxu0 %vm252_vm0, %v11249_v39 }
  0x24   :  { %92 = vperm.xlu0 %9841, %v58_v41  }
  0x25   :  { %8851 = vmatmul.mubr.msk.f32.gmra.mxu1 %vm252_vm0, %v11244_v38  ;;  %112 = vperm.xlu1 %9842, %v62_v45  }
  0x26   :  { %8802 = vmatmul.mubr.msk.f32.gmra.mxu0 %vm252_vm0, %v11274_v43  ;;  %8853 = vmatprep.mubr.msk.f32.mxu1 %vm252_vm0, %v11249_v39 }
  0x27   :  { %8804 = vmatprep.mubr.msk.f32.mxu0 %vm252_vm0, %v11279_v44 }
  0x28   :  { %227 = vperm.xlu0 %9841, %v85_v46  }
  0x29   :  { %8854 = vmatmul.mubr.msk.f32.gmra.mxu1 %vm252_vm0, %v11274_v43  ;;  %247 = vperm.xlu1 %9842, %v89_v49  }
  0x2a   :  { %8805 = vmatmul.mubr.msk.f32.gmra.mxu0 %vm252_vm0, %v11299_v47  ;;  %8856 = vmatprep.mubr.msk.f32.mxu1 %vm252_vm0, %v11279_v44 }
  0x2b   :  { %8807 = vmatprep.mubr.msk.f32.mxu0 %vm252_vm0, %v11304_v48 }
  0x2c   :  { %222 = vperm.xlu0 %9841, %v84_v50   ;;  %v6498_v50 = vld [vmem:[%s14904_s5 + $0x8] sm:$0xff] }
  0x2d   :  { %8857 = vmatmul.mubr.msk.f32.gmra.mxu1 %vm252_vm0, %v11299_v47  ;;  %242 = vperm.xlu1 %9842, %v88_v53  }
  0x2e   :  { %8808 = vmatmul.mubr.msk.f32.gmra.mxu0 %vm252_vm0, %v11323_v51  ;;  %8859 = vmatprep.mubr.msk.f32.mxu1 %vm252_vm0, %v11304_v48 }
  0x2f   :  { %8810 = vmatprep.mubr.msk.f32.mxu0 %vm252_vm0, %v11328_v52 }
  0x30   :  { %217 = vperm.xlu0 %9841, %v83_v54  }
  0x31   :  { %8860 = vmatmul.mubr.msk.f32.gmra.mxu1 %vm252_vm0, %v11323_v51  ;;  %237 = vperm.xlu1 %9842, %v87_v57  }
  0x32   :  { %8811 = vmatmul.mubr.msk.f32.gmra.mxu0 %vm252_vm0, %v11347_v55  ;;  %8862 = vmatprep.mubr.msk.f32.mxu1 %vm252_vm0, %v11328_v52 }
  0x33   :  { %8813 = vmatprep.mubr.msk.f32.mxu0 %vm252_vm0, %v11352_v56 }
  0x34   :  { %212 = vperm.xlu0 %9841, %v82_v58  }
  0x35   :  { %8863 = vmatmul.mubr.msk.f32.gmra.mxu1 %vm252_vm0, %v11347_v55  ;;  %232 = vperm.xlu1 %9842, %v86_v61  }
  0x36   :  { %8814 = vmatmul.mubr.msk.f32.gmra.mxu0 %vm252_vm0, %v11371_v59  ;;  %8865 = vmatprep.mubr.msk.f32.mxu1 %vm252_vm0, %v11352_v56 }
  0x37   :  { %8816 = vmatprep.mubr.msk.f32.mxu0 %vm252_vm0, %v11376_v60 }
  0x38   :  { %147 = vperm.xlu0 %9841, %v69_v62  }
  0x39   :  { %8866 = vmatmul.mubr.msk.f32.gmra.mxu1 %vm252_vm0, %v11371_v59  ;;  %167 = vperm.xlu1 %9842, %v73_v1  }
  0x3a   :  { %8817 = vmatmul.mubr.msk.f32.gmra.mxu0 %vm252_vm0, %v11395_v63  ;;  %8868 = vmatprep.mubr.msk.f32.mxu1 %vm252_vm0, %v11376_v60 }
  0x3b   :  { %8819 = vmatprep.mubr.msk.f32.mxu0 %vm252_vm0, %v11400_v0 }
  0x3c   :  { %142 = vperm.xlu0 %9841, %v68_v3  }
  0x3d   :  { %8869 = vmatmul.mubr.msk.f32.gmra.mxu1 %vm252_vm0, %v11395_v63  ;;  %162 = vperm.xlu1 %9842, %v72_v9  }
  0x3e   :  { %8820 = vmatmul.mubr.msk.f32.gmra.mxu0 %vm252_vm0, %v11419_v6  ;;  %8871 = vmatprep.mubr.msk.f32.mxu1 %vm252_vm0, %v11400_v0 }
  0x3f   :  { %8822 = vmatprep.mubr.msk.f32.mxu0 %vm252_vm0, %v11424_v7 }
  0x40   :  { %137 = vperm.xlu0 %9841, %v67_v11  }
  0x41   :  { %8872 = vmatmul.mubr.msk.f32.gmra.mxu1 %vm252_vm0, %v11419_v6  ;;  %157 = vperm.xlu1 %9842, %v71_v15  }
  0x42   :  { %8823 = vmatmul.mubr.msk.f32.gmra.mxu0 %vm252_vm0, %v11443_v12  ;;  %8874 = vmatprep.mubr.msk.f32.mxu1 %vm252_vm0, %v11424_v7 }
  0x43   :  { %8881 = vmatprep.mubr.msk.f32.mxu0 %vm252_vm0, %v11051_v2 }
  0x44   :  { %132 = vperm.xlu0 %9841, %v66_v16  }
  0x45   :  { %8875 = vmatmul.mubr.msk.f32.gmra.mxu1 %vm252_vm0, %v11443_v12  ;;  %152 = vperm.xlu1 %9842, %v70_v17  }
  0x46   :  { %8882 = vmatmul.mubr.msk.f32.vlgmr.msra.gmra.mxu0 %vm252_vm0, %v11058_v4  ;;  %8933 = vmatprep.mubr.msk.f32.mxu1 %vm252_vm0, %v11051_v2 }
  0x47   :  { %8884 = vmatprep.mubr.msk.f32.mxu0 %vm252_vm0, %v11065_v5  ;;  %8982 = vmatpush3.msra.mxu0 %v11237_v37 }
  0x48   :  { %8983 = vmatprep.subr.mxu0 %v7494_v20 }
  0x49   :  { %8934 = vmatmul.mubr.msk.f32.vlgmr.msra.gmra.mxu1 %vm252_vm0, %v11058_v4  ;;  %8984 = vmatpush3.msra.mxu0 %v7494_v20 }
  0x4a   :  { %8885 = vmatmul.mubr.msk.f32.gmra.mxu0 %vm252_vm0, %v11080_v8  ;;  %8936 = vmatprep.mubr.msk.f32.mxu1 %vm252_vm0, %v11065_v5 }
  0x4b   :  { %8887 = vmatprep.mubr.msk.f32.mxu0 %vm252_vm0, %v11088_v10  ;;  %9034 = vmatpush3.msra.mxu1 %v11263_v42 }
  0x4c   :  { %9085 = vmatprep.subr.mxu0 %v11479_v21  ;;  %9035 = vmatprep.subr.mxu1 %v7528_v22 }
  0x4d   :  { %8937 = vmatmul.mubr.msk.f32.gmra.mxu1 %vm252_vm0, %v11080_v8  ;;  %6506 = vperm.xlu1 %9842, %v6498_v50  }
  0x4e   :  { %8888 = vmatmul.mubr.msk.f32.gmra.mxu0 %vm252_vm0, %v11107_v13  ;;  %8939 = vmatprep.mubr.msk.f32.mxu1 %vm252_vm0, %v11088_v10 }
  0x4f   :  { %8890 = vmatprep.mubr.msk.f32.mxu0 %vm252_vm0, %v11112_v14  ;;  %9036 = vmatpush3.msra.mxu1 %v7528_v22 }
  0x50   :  { %9137 = vmatprep.subr.mxu1 %v11505_v25 }
  0x51   :  { %8940 = vmatmul.mubr.msk.f32.gmra.mxu1 %vm252_vm0, %v11107_v13 }
  0x52   :  { %8891 = vmatmul.mubr.msk.f32.gmra.mxu0 %vm252_vm0, %v11134_v18  ;;  %8942 = vmatprep.mubr.msk.f32.mxu1 %vm252_vm0, %v11112_v14 }
  0x53   :  { %8893 = vmatprep.mubr.msk.f32.mxu0 %vm252_vm0, %v11139_v19 }
  0x55   :  { %8943 = vmatmul.mubr.msk.f32.gmra.mxu1 %vm252_vm0, %v11134_v18 }
  0x56   :  { %8894 = vmatmul.mubr.msk.f32.gmra.mxu0 %vm252_vm0, %v11161_v23  ;;  %8945 = vmatprep.mubr.msk.f32.mxu1 %vm252_vm0, %v11139_v19 }
  0x57   :  { %8896 = vmatprep.mubr.msk.f32.mxu0 %vm252_vm0, %v11166_v24 }
  0x59   :  { %8946 = vmatmul.mubr.msk.f32.gmra.mxu1 %vm252_vm0, %v11161_v23 }
  0x5a   :  { %8897 = vmatmul.mubr.msk.f32.gmra.mxu0 %vm252_vm0, %v11188_v28  ;;  %8948 = vmatprep.mubr.msk.f32.mxu1 %vm252_vm0, %v11166_v24 }
  0x5b   :  { %8899 = vmatprep.mubr.msk.f32.mxu0 %vm252_vm0, %v11193_v29 }
  0x5d   :  { %8949 = vmatmul.mubr.msk.f32.gmra.mxu1 %vm252_vm0, %v11188_v28 }
  0x5e   :  { %8900 = vmatmul.mubr.msk.f32.gmra.mxu0 %vm252_vm0, %v11215_v33  ;;  %8951 = vmatprep.mubr.msk.f32.mxu1 %vm252_vm0, %v11193_v29 }
  0x5f   :  { %8902 = vmatprep.mubr.msk.f32.mxu0 %vm252_vm0, %v11220_v34 }
  0x61   :  { %8952 = vmatmul.mubr.msk.f32.gmra.mxu1 %vm252_vm0, %v11215_v33 }
  0x62   :  { %8903 = vmatmul.mubr.msk.f32.gmra.mxu0 %vm252_vm0, %v11244_v38  ;;  %8954 = vmatprep.mubr.msk.f32.mxu1 %vm252_vm0, %v11220_v34 }
  0x63   :  { %8905 = vmatprep.mubr.msk.f32.mxu0 %vm252_vm0, %v11249_v39 }
  0x65   :  { %8955 = vmatmul.mubr.msk.f32.gmra.mxu1 %vm252_vm0, %v11244_v38 }
  0x66   :  { %8906 = vmatmul.mubr.msk.f32.gmra.mxu0 %vm252_vm0, %v11274_v43  ;;  %8957 = vmatprep.mubr.msk.f32.mxu1 %vm252_vm0, %v11249_v39 }
  0x67   :  { %8908 = vmatprep.mubr.msk.f32.mxu0 %vm252_vm0, %v11279_v44 }
  0x69   :  { %8958 = vmatmul.mubr.msk.f32.gmra.mxu1 %vm252_vm0, %v11274_v43 }
  0x6a   :  { %8909 = vmatmul.mubr.msk.f32.gmra.mxu0 %vm252_vm0, %v11299_v47  ;;  %8960 = vmatprep.mubr.msk.f32.mxu1 %vm252_vm0, %v11279_v44 }
  0x6b   :  { %8911 = vmatprep.mubr.msk.f32.mxu0 %vm252_vm0, %v11304_v48 }
  0x6d   :  { %8961 = vmatmul.mubr.msk.f32.gmra.mxu1 %vm252_vm0, %v11299_v47 }
  0x6e   :  { %8912 = vmatmul.mubr.msk.f32.gmra.mxu0 %vm252_vm0, %v11323_v51  ;;  %8963 = vmatprep.mubr.msk.f32.mxu1 %vm252_vm0, %v11304_v48 }
  0x6f   :  { %8914 = vmatprep.mubr.msk.f32.mxu0 %vm252_vm0, %v11328_v52 }
  0x71   :  { %8964 = vmatmul.mubr.msk.f32.gmra.mxu1 %vm252_vm0, %v11323_v51 }
  0x72   :  { %8915 = vmatmul.mubr.msk.f32.gmra.mxu0 %vm252_vm0, %v11347_v55  ;;  %8966 = vmatprep.mubr.msk.f32.mxu1 %vm252_vm0, %v11328_v52 }
  0x73   :  { %8917 = vmatprep.mubr.msk.f32.mxu0 %vm252_vm0, %v11352_v56 }
  0x75   :  { %8967 = vmatmul.mubr.msk.f32.gmra.mxu1 %vm252_vm0, %v11347_v55 }
  0x76   :  { %8918 = vmatmul.mubr.msk.f32.gmra.mxu0 %vm252_vm0, %v11371_v59  ;;  %8969 = vmatprep.mubr.msk.f32.mxu1 %vm252_vm0, %v11352_v56 }
  0x77   :  { %8920 = vmatprep.mubr.msk.f32.mxu0 %vm252_vm0, %v11376_v60 }
  0x79   :  { %8970 = vmatmul.mubr.msk.f32.gmra.mxu1 %vm252_vm0, %v11371_v59 }
  0x7a   :  { %8921 = vmatmul.mubr.msk.f32.gmra.mxu0 %vm252_vm0, %v11395_v63  ;;  %8972 = vmatprep.mubr.msk.f32.mxu1 %vm252_vm0, %v11376_v60 }
  0x7b   :  { %8923 = vmatprep.mubr.msk.f32.mxu0 %vm252_vm0, %v11400_v0 }
  0x7d   :  { %8973 = vmatmul.mubr.msk.f32.gmra.mxu1 %vm252_vm0, %v11395_v63 }
  0x7e   :  { %8924 = vmatmul.mubr.msk.f32.gmra.mxu0 %vm252_vm0, %v11419_v6  ;;  %8975 = vmatprep.mubr.msk.f32.mxu1 %vm252_vm0, %v11400_v0 }
  0x7f   :  { %8926 = vmatprep.mubr.msk.f32.mxu0 %vm252_vm0, %v11424_v7 }
  0x81   :  { %8976 = vmatmul.mubr.msk.f32.gmra.mxu1 %vm252_vm0, %v11419_v6 }
  0x82   :  { %8927 = vmatmul.mubr.msk.f32.gmra.mxu0 %vm252_vm0, %v11443_v12  ;;  %8978 = vmatprep.mubr.msk.f32.mxu1 %vm252_vm0, %v11424_v7 }
  0x83   :  { %8985 = vmatprep.mubr.msk.f32.mxu0 %vm252_vm0, %v11051_v2 }
  0x85   :  { %8979 = vmatmul.mubr.msk.f32.gmra.mxu1 %vm252_vm0, %v11443_v12 }
  0x86   :  { %8986 = vmatmul.mubr.msk.f32.vlgmr.msra.gmra.mxu0 %vm252_vm0, %v11058_v4  ;;  %9037 = vmatprep.mubr.msk.f32.mxu1 %vm252_vm0, %v11051_v2 }
  0x87   :  { %8988 = vmatprep.mubr.msk.f32.mxu0 %vm252_vm0, %v11065_v5  ;;  %9086 = vmatpush3.msra.mxu0 %v11479_v21 }
  0x88   :  { %9087 = vmatprep.subr.mxu0 %v7562_v26 }
  0x89   :  { %9038 = vmatmul.mubr.msk.f32.vlgmr.msra.gmra.mxu1 %vm252_vm0, %v11058_v4  ;;  %9088 = vmatpush3.msra.mxu0 %v7562_v26 }
  0x8a   :  { %8989 = vmatmul.mubr.msk.f32.gmra.mxu0 %vm252_vm0, %v11080_v8  ;;  %9040 = vmatprep.mubr.msk.f32.mxu1 %vm252_vm0, %v11065_v5 }
  0x8b   :  { %8991 = vmatprep.mubr.msk.f32.mxu0 %vm252_vm0, %v11088_v10  ;;  %9138 = vmatpush3.msra.mxu1 %v11505_v25 }
  0x8c   :  { %9139 = vmatprep.subr.mxu1 %v7596_v27  ;;  %9189 = vmatprep.subr.mxu0 %v10996_v30 }
  0x8d   :  { %9041 = vmatmul.mubr.msk.f32.gmra.mxu1 %vm252_vm0, %v11080_v8 }
  0x8e   :  { %8992 = vmatmul.mubr.msk.f32.gmra.mxu0 %vm252_vm0, %v11107_v13  ;;  %9043 = vmatprep.mubr.msk.f32.mxu1 %vm252_vm0, %v11088_v10 }
  0x8f   :  { %8994 = vmatprep.mubr.msk.f32.mxu0 %vm252_vm0, %v11112_v14  ;;  %9140 = vmatpush3.msra.mxu1 %v7596_v27 }
  0x91   :  { %9044 = vmatmul.mubr.msk.f32.gmra.mxu1 %vm252_vm0, %v11107_v13 }
  0x92   :  { %8995 = vmatmul.mubr.msk.f32.gmra.mxu0 %vm252_vm0, %v11134_v18  ;;  %9046 = vmatprep.mubr.msk.f32.mxu1 %vm252_vm0, %v11112_v14 }
  0x93   :  { %8997 = vmatprep.mubr.msk.f32.mxu0 %vm252_vm0, %v11139_v19 }
  0x95   :  { %9047 = vmatmul.mubr.msk.f32.gmra.mxu1 %vm252_vm0, %v11134_v18 }
  0x96   :  { %8998 = vmatmul.mubr.msk.f32.gmra.mxu0 %vm252_vm0, %v11161_v23  ;;  %9049 = vmatprep.mubr.msk.f32.mxu1 %vm252_vm0, %v11139_v19 }
  0x97   :  { %9000 = vmatprep.mubr.msk.f32.mxu0 %vm252_vm0, %v11166_v24 }
  0x99   :  { %9050 = vmatmul.mubr.msk.f32.gmra.mxu1 %vm252_vm0, %v11161_v23 }
  0x9a   :  { %9001 = vmatmul.mubr.msk.f32.gmra.mxu0 %vm252_vm0, %v11188_v28  ;;  %9052 = vmatprep.mubr.msk.f32.mxu1 %vm252_vm0, %v11166_v24 }
  0x9b   :  { %9003 = vmatprep.mubr.msk.f32.mxu0 %vm252_vm0, %v11193_v29 }
  0x9d   :  { %9053 = vmatmul.mubr.msk.f32.gmra.mxu1 %vm252_vm0, %v11188_v28 }
  0x9e   :  { %9004 = vmatmul.mubr.msk.f32.gmra.mxu0 %vm252_vm0, %v11215_v33  ;;  %9055 = vmatprep.mubr.msk.f32.mxu1 %vm252_vm0, %v11193_v29 }
  0x9f   :  { %9006 = vmatprep.mubr.msk.f32.mxu0 %vm252_vm0, %v11220_v34 }
  0xa1   :  { %9056 = vmatmul.mubr.msk.f32.gmra.mxu1 %vm252_vm0, %v11215_v33 }
  0xa2   :  { %9007 = vmatmul.mubr.msk.f32.gmra.mxu0 %vm252_vm0, %v11244_v38  ;;  %9058 = vmatprep.mubr.msk.f32.mxu1 %vm252_vm0, %v11220_v34 }
  0xa3   :  { %9009 = vmatprep.mubr.msk.f32.mxu0 %vm252_vm0, %v11249_v39 }
  0xa5   :  { %9059 = vmatmul.mubr.msk.f32.gmra.mxu1 %vm252_vm0, %v11244_v38 }
  0xa6   :  { %9010 = vmatmul.mubr.msk.f32.gmra.mxu0 %vm252_vm0, %v11274_v43  ;;  %9061 = vmatprep.mubr.msk.f32.mxu1 %vm252_vm0, %v11249_v39 }
  0xa7   :  { %9012 = vmatprep.mubr.msk.f32.mxu0 %vm252_vm0, %v11279_v44 }
  0xa9   :  { %9062 = vmatmul.mubr.msk.f32.gmra.mxu1 %vm252_vm0, %v11274_v43 }
  0xaa   :  { %9013 = vmatmul.mubr.msk.f32.gmra.mxu0 %vm252_vm0, %v11299_v47  ;;  %9064 = vmatprep.mubr.msk.f32.mxu1 %vm252_vm0, %v11279_v44 }
  0xab   :  { %9015 = vmatprep.mubr.msk.f32.mxu0 %vm252_vm0, %v11304_v48 }
  0xad   :  { %9065 = vmatmul.mubr.msk.f32.gmra.mxu1 %vm252_vm0, %v11299_v47 }
  0xae   :  { %9016 = vmatmul.mubr.msk.f32.gmra.mxu0 %vm252_vm0, %v11323_v51  ;;  %9067 = vmatprep.mubr.msk.f32.mxu1 %vm252_vm0, %v11304_v48 }
  0xaf   :  { %9018 = vmatprep.mubr.msk.f32.mxu0 %vm252_vm0, %v11328_v52 }
  0xb1   :  { %9068 = vmatmul.mubr.msk.f32.gmra.mxu1 %vm252_vm0, %v11323_v51 }
  0xb2   :  { %9019 = vmatmul.mubr.msk.f32.gmra.mxu0 %vm252_vm0, %v11347_v55  ;;  %9070 = vmatprep.mubr.msk.f32.mxu1 %vm252_vm0, %v11328_v52 }
  0xb3   :  { %9021 = vmatprep.mubr.msk.f32.mxu0 %vm252_vm0, %v11352_v56 }
  0xb5   :  { %9071 = vmatmul.mubr.msk.f32.gmra.mxu1 %vm252_vm0, %v11347_v55 }
  0xb6   :  { %9022 = vmatmul.mubr.msk.f32.gmra.mxu0 %vm252_vm0, %v11371_v59  ;;  %9073 = vmatprep.mubr.msk.f32.mxu1 %vm252_vm0, %v11352_v56 }
  0xb7   :  { %9024 = vmatprep.mubr.msk.f32.mxu0 %vm252_vm0, %v11376_v60 }
  0xb9   :  { %9074 = vmatmul.mubr.msk.f32.gmra.mxu1 %vm252_vm0, %v11371_v59 }
  0xba   :  { %9025 = vmatmul.mubr.msk.f32.gmra.mxu0 %vm252_vm0, %v11395_v63  ;;  %9076 = vmatprep.mubr.msk.f32.mxu1 %vm252_vm0, %v11376_v60 }
  0xbb   :  { %9027 = vmatprep.mubr.msk.f32.mxu0 %vm252_vm0, %v11400_v0 }
  0xbd   :  { %9077 = vmatmul.mubr.msk.f32.gmra.mxu1 %vm252_vm0, %v11395_v63 }
  0xbe   :  { %9028 = vmatmul.mubr.msk.f32.gmra.mxu0 %vm252_vm0, %v11419_v6  ;;  %9079 = vmatprep.mubr.msk.f32.mxu1 %vm252_vm0, %v11400_v0 }
  0xbf   :  { %9030 = vmatprep.mubr.msk.f32.mxu0 %vm252_vm0, %v11424_v7 }
  0xc1   :  { %9080 = vmatmul.mubr.msk.f32.gmra.mxu1 %vm252_vm0, %v11419_v6 }
  0xc2   :  { %9031 = vmatmul.mubr.msk.f32.gmra.mxu0 %vm252_vm0, %v11443_v12  ;;  %9082 = vmatprep.mubr.msk.f32.mxu1 %vm252_vm0, %v11424_v7 }
  0xc3   :  { %9089 = vmatprep.mubr.msk.f32.mxu0 %vm252_vm0, %v11051_v2 }
  0xc5   :  { %9083 = vmatmul.mubr.msk.f32.gmra.mxu1 %vm252_vm0, %v11443_v12 }
  0xc6   :  { %v11749_v31 = vpop.f32.mrf.mxu0  ;;  %9090 = vmatmul.mubr.msk.f32.vlgmr.msra.gmra.mxu0 %vm252_vm0, %v11058_v4  ;;  %9141 = vmatprep.mubr.msk.f32.mxu1 %vm252_vm0, %v11051_v2 }
  0xc7   :  { %9092 = vmatprep.mubr.msk.f32.mxu0 %vm252_vm0, %v11065_v5  ;;  %9190 = vmatpush3.msra.mxu0 %v10996_v30 }
  0xc8   :  { %v11758_v32 = vpop.f32.mrf.mxu0 }
  0xc9   :  { %v11760_v35 = vpop.f32.mrf.mxu1  ;;  %9142 = vmatmul.mubr.msk.f32.vlgmr.msra.gmra.mxu1 %vm252_vm0, %v11058_v4 }
  0xca   :  { %v11764_v36 = vpop.f32.mrf.mxu0  ;;  %9093 = vmatmul.mubr.msk.f32.gmra.mxu0 %vm252_vm0, %v11080_v8  ;;  %9144 = vmatprep.mubr.msk.f32.mxu1 %vm252_vm0, %v11065_v5 }
  0xcb   :  { %9095 = vmatprep.mubr.msk.f32.mxu0 %vm252_vm0, %v11088_v10  ;;  %v11772_v2 = vpop.f32.mrf.mxu1 }
  0xcc   :  { %v11774_v37 = vpop.f32.mrf.mxu0 }
  0xcd   :  { %v11776_v40 = vpop.f32.mrf.mxu1  ;;  %9145 = vmatmul.mubr.msk.f32.gmra.mxu1 %vm252_vm0, %v11080_v8 }
  0xce   :  { %v11780_v4 = vpop.f32.mrf.mxu0  ;;  %9096 = vmatmul.mubr.msk.f32.gmra.mxu0 %vm252_vm0, %v11107_v13  ;;  %9147 = vmatprep.mubr.msk.f32.mxu1 %vm252_vm0, %v11088_v10 }
  0xcf   :  { %9098 = vmatprep.mubr.msk.f32.mxu0 %vm252_vm0, %v11112_v14  ;;  %v11788_v5 = vpop.f32.mrf.mxu1 }
  0xd0   :  { %v11790_v41 = vpop.f32.mrf.mxu0 }
  0xd1   :  { %v11792_v42 = vpop.f32.mrf.mxu1  ;;  %9148 = vmatmul.mubr.msk.f32.gmra.mxu1 %vm252_vm0, %v11107_v13 }
  0xd2   :  { %v11796_v8 = vpop.f32.mrf.mxu0  ;;  %9099 = vmatmul.mubr.msk.f32.gmra.mxu0 %vm252_vm0, %v11134_v18  ;;  %9150 = vmatprep.mubr.msk.f32.mxu1 %vm252_vm0, %v11112_v14 }
  0xd3   :  { %9101 = vmatprep.mubr.msk.f32.mxu0 %vm252_vm0, %v11139_v19  ;;  %v11804_v10 = vpop.f32.mrf.mxu1 }
  0xd4   :  { %15143 = vst [vmem:[#allocation6_spill] sm:$0xff] %v11804_v10  ;;  %v11806_v45 = vpop.f32.mrf.mxu0 }
  0xd5   :  { %v11808_v46 = vpop.f32.mrf.mxu1  ;;  %9151 = vmatmul.mubr.msk.f32.gmra.mxu1 %vm252_vm0, %v11134_v18  ;;  %v6497_v18 = vld [vmem:[%s14904_s5] sm:$0xff] }
  0xd6   :  { %15144 = vst [vmem:[#allocation7_spill] sm:$0xff] %v11808_v46  ;;  %v11812_v13 = vpop.f32.mrf.mxu0  ;;  %9102 = vmatmul.mubr.msk.f32.gmra.mxu0 %vm252_vm0, %v11161_v23  ;;  %9153 = vmatprep.mubr.msk.f32.mxu1 %vm252_vm0, %v11139_v19 }
  0xd7   :  { %9104 = vmatprep.mubr.msk.f32.mxu0 %vm252_vm0, %v11166_v24  ;;  %v11820_v14 = vpop.f32.mrf.mxu1  ;;  %6501 = vperm.xlu0 %9841, %v6497_v18   ;;  %v11993_v18 = vld [vmem:[%s14905_s2] sm:$0xff] }
  0xd8   :  { %15145 = vst [vmem:[#allocation8_spill] sm:$0xff] %v11820_v14  ;;  %v11822_v49 = vpop.f32.mrf.mxu0 }
  0xd9   :  { %v11830_v53 = vpop.f32.mrf.mxu1  ;;  %9154 = vmatmul.mubr.msk.f32.gmra.mxu1 %vm252_vm0, %v11161_v23 }
  0xda   :  { %15146 = vst [vmem:[#allocation9_spill] sm:$0xff] %v11830_v53  ;;  %v11834_v19 = vpop.f32.mrf.mxu0  ;;  %9105 = vmatmul.mubr.msk.f32.gmra.mxu0 %vm252_vm0, %v11188_v28  ;;  %9156 = vmatprep.mubr.msk.f32.mxu1 %vm252_vm0, %v11166_v24 }
  0xdb   :  { %9107 = vmatprep.mubr.msk.f32.mxu0 %vm252_vm0, %v11193_v29  ;;  %v11842_v54 = vpop.f32.mrf.mxu1 }
  0xdc   :  { %15147 = vst [vmem:[#allocation10_spill] sm:$0xff] %v11842_v54  ;;  %v11844_v57 = vpop.f32.mrf.mxu0 }
  0xdd   :  { %v11846_v58 = vpop.f32.mrf.mxu1  ;;  %9157 = vmatmul.mubr.msk.f32.gmra.mxu1 %vm252_vm0, %v11188_v28 }
  0xde   :  { %15148 = vst [vmem:[#allocation11_spill] sm:$0xff] %v11846_v58  ;;  %v11850_v23 = vpop.f32.mrf.mxu0  ;;  %9108 = vmatmul.mubr.msk.f32.gmra.mxu0 %vm252_vm0, %v11215_v33  ;;  %9159 = vmatprep.mubr.msk.f32.mxu1 %vm252_vm0, %v11193_v29 }
  0xdf   :  { %9110 = vmatprep.mubr.msk.f32.mxu0 %vm252_vm0, %v11220_v34  ;;  %v11858_v24 = vpop.f32.mrf.mxu1 }
  0xe0   :  { %15149 = vst [vmem:[#allocation12_spill] sm:$0xff] %v11858_v24  ;;  %v11860_v61 = vpop.f32.mrf.mxu0 }
  0xe1   :  { %v11862_v62 = vpop.f32.mrf.mxu1  ;;  %9160 = vmatmul.mubr.msk.f32.gmra.mxu1 %vm252_vm0, %v11215_v33 }
  0xe2   :  { %15150 = vst [vmem:[#allocation13_spill] sm:$0xff] %v11862_v62  ;;  %v11866_v28 = vpop.f32.mrf.mxu0  ;;  %9111 = vmatmul.mubr.msk.f32.gmra.mxu0 %vm252_vm0, %v11244_v38  ;;  %9162 = vmatprep.mubr.msk.f32.mxu1 %vm252_vm0, %v11220_v34 }
  0xe3   :  { %9113 = vmatprep.mubr.msk.f32.mxu0 %vm252_vm0, %v11249_v39  ;;  %v11874_v29 = vpop.f32.mrf.mxu1 }
  0xe4   :  { %15151 = vst [vmem:[#allocation14_spill] sm:$0xff] %v11874_v29  ;;  %v11876_v1 = vpop.f32.mrf.mxu0 }
  0xe5   :  { %v11878_v3 = vpop.f32.mrf.mxu1  ;;  %9163 = vmatmul.mubr.msk.f32.gmra.mxu1 %vm252_vm0, %v11244_v38 }
  0xe6   :  { %15152 = vst [vmem:[#allocation15_spill] sm:$0xff] %v11878_v3  ;;  %v11882_v33 = vpop.f32.mrf.mxu0  ;;  %9114 = vmatmul.mubr.msk.f32.gmra.mxu0 %vm252_vm0, %v11274_v43  ;;  %9165 = vmatprep.mubr.msk.f32.mxu1 %vm252_vm0, %v11249_v39 }
  0xe7   :  { %15153 = vst [vmem:[#allocation16_spill] sm:$0xff] %v11882_v33  ;;  %9116 = vmatprep.mubr.msk.f32.mxu0 %vm252_vm0, %v11279_v44  ;;  %v11890_v34 = vpop.f32.mrf.mxu1 }
  0xe8   :  { %15154 = vst [vmem:[#allocation17_spill] sm:$0xff] %v11890_v34  ;;  %v11892_v9 = vpop.f32.mrf.mxu0 }
  0xe9   :  { %15155 = vst [vmem:[#allocation18_spill] sm:$0xff] %v11892_v9  ;;  %v11894_v11 = vpop.f32.mrf.mxu1  ;;  %9166 = vmatmul.mubr.msk.f32.gmra.mxu1 %vm252_vm0, %v11274_v43  ;;  %v2448_v9 = vld [vmem:[%s14905_s2 + $0x40] sm:$0xff] }
  0xea   :  { %15156 = vst [vmem:[#allocation19_spill] sm:$0xff] %v11894_v11  ;;  %v11898_v38 = vpop.f32.mrf.mxu0  ;;  %9117 = vmatmul.mubr.msk.f32.gmra.mxu0 %vm252_vm0, %v11299_v47  ;;  %9168 = vmatprep.mubr.msk.f32.mxu1 %vm252_vm0, %v11279_v44 }
  0xeb   :  { %15157 = vst [vmem:[#allocation20_spill] sm:$0xff] %v11898_v38  ;;  %9119 = vmatprep.mubr.msk.f32.mxu0 %vm252_vm0, %v11304_v48  ;;  %v11906_v39 = vpop.f32.mrf.mxu1 }
  0xec   :  { %15158 = vst [vmem:[#allocation21_spill] sm:$0xff] %v11906_v39  ;;  %v11908_v15 = vpop.f32.mrf.mxu0 }
  0xed   :  { %15159 = vst [vmem:[#allocation22_spill] sm:$0xff] %v11908_v15  ;;  %v11910_v16 = vpop.f32.mrf.mxu1  ;;  %9169 = vmatmul.mubr.msk.f32.gmra.mxu1 %vm252_vm0, %v11299_v47 }
  0xee   :  { %15160 = vst [vmem:[#allocation23_spill] sm:$0xff] %v11910_v16  ;;  %v11914_v43 = vpop.f32.mrf.mxu0  ;;  %9120 = vmatmul.mubr.msk.f32.gmra.mxu0 %vm252_vm0, %v11323_v51  ;;  %9171 = vmatprep.mubr.msk.f32.mxu1 %vm252_vm0, %v11304_v48  ;;  %v2456_v16 = vld [vmem:[%s14905_s2 + $0x80] sm:$0xff] }
  0xef   :  { %15161 = vst [vmem:[#allocation24_spill] sm:$0xff] %v11914_v43  ;;  %9122 = vmatprep.mubr.msk.f32.mxu0 %vm252_vm0, %v11328_v52  ;;  %v11922_v44 = vpop.f32.mrf.mxu1 }
  0xf0   :  { %15162 = vst [vmem:[#allocation25_spill] sm:$0xff] %v11922_v44  ;;  %v11924_v17 = vpop.f32.mrf.mxu0 }
  0xf1   :  { %15163 = vst [vmem:[#allocation26_spill] sm:$0xff] %v11924_v17  ;;  %v11926_v20 = vpop.f32.mrf.mxu1  ;;  %9172 = vmatmul.mubr.msk.f32.gmra.mxu1 %vm252_vm0, %v11323_v51  ;;  %v2446_v17 = vld [vmem:[%s14905_s2 + $0x30] sm:$0xff] }
  0xf2   :  { %15164 = vst [vmem:[#allocation27_spill] sm:$0xff] %v11926_v20  ;;  %v11930_v47 = vpop.f32.mrf.mxu0  ;;  %9123 = vmatmul.mubr.msk.f32.gmra.mxu0 %vm252_vm0, %v11347_v55  ;;  %9174 = vmatprep.mubr.msk.f32.mxu1 %vm252_vm0, %v11328_v52 }
  0xf3   :  { %15165 = vst [vmem:[#allocation28_spill] sm:$0xff] %v11930_v47  ;;  %9125 = vmatprep.mubr.msk.f32.mxu0 %vm252_vm0, %v11352_v56  ;;  %v11938_v48 = vpop.f32.mrf.mxu1 }
  0xf4   :  { %15166 = vst [vmem:[#allocation29_spill] sm:$0xff] %v11938_v48  ;;  %v11940_v21 = vpop.f32.mrf.mxu0  ;;  %v2454_v48 = vld [vmem:[%s14905_s2 + $0x70] sm:$0xff] }
  0xf5   :  { %15167 = vst [vmem:[#allocation30_spill] sm:$0xff] %v11940_v21  ;;  %v11942_v22 = vpop.f32.mrf.mxu1  ;;  %9175 = vmatmul.mubr.msk.f32.gmra.mxu1 %vm252_vm0, %v11347_v55 }
  0xf6   :  { %15168 = vst [vmem:[#allocation31_spill] sm:$0xff] %v11942_v22  ;;  %v11946_v51 = vpop.f32.mrf.mxu0  ;;  %9126 = vmatmul.mubr.msk.f32.gmra.mxu0 %vm252_vm0, %v11371_v59  ;;  %9177 = vmatprep.mubr.msk.f32.mxu1 %vm252_vm0, %v11352_v56 }
  0xf7   :  { %15169 = vst [vmem:[#allocation32_spill] sm:$0xff] %v11946_v51  ;;  %9128 = vmatprep.mubr.msk.f32.mxu0 %vm252_vm0, %v11376_v60  ;;  %v11954_v52 = vpop.f32.mrf.mxu1 }
  0xf8   :  { %15170 = vst [vmem:[#allocation33_spill] sm:$0xff] %v11954_v52  ;;  %v11956_v25 = vpop.f32.mrf.mxu0 }
  0xf9   :  { %15171 = vst [vmem:[#allocation34_spill] sm:$0xff] %v11956_v25  ;;  %v11958_v26 = vpop.f32.mrf.mxu1  ;;  %9178 = vmatmul.mubr.msk.f32.gmra.mxu1 %vm252_vm0, %v11371_v59 }
  0xfa   :  { %15172 = vst [vmem:[#allocation35_spill] sm:$0xff] %v11958_v26  ;;  %v11962_v55 = vpop.f32.mrf.mxu0  ;;  %9129 = vmatmul.mubr.msk.f32.gmra.mxu0 %vm252_vm0, %v11395_v63  ;;  %9180 = vmatprep.mubr.msk.f32.mxu1 %vm252_vm0, %v11376_v60 }
  0xfb   :  { %15173 = vst [vmem:[#allocation36_spill] sm:$0xff] %v11962_v55  ;;  %9131 = vmatprep.mubr.msk.f32.mxu0 %vm252_vm0, %v11400_v0  ;;  %v11970_v56 = vpop.f32.mrf.mxu1 }
  0xfc   :  { %15174 = vst [vmem:[#allocation37_spill] sm:$0xff] %v11970_v56  ;;  %v11972_v27 = vpop.f32.mrf.mxu0 }
  0xfd   :  { %15175 = vst [vmem:[#allocation38_spill] sm:$0xff] %v11972_v27  ;;  %v11974_v30 = vpop.f32.mrf.mxu1  ;;  %9181 = vmatmul.mubr.msk.f32.gmra.mxu1 %vm252_vm0, %v11395_v63 }
  0xfe   :  { %15176 = vst [vmem:[#allocation39_spill] sm:$0xff] %v11974_v30  ;;  %v11978_v59 = vpop.f32.mrf.mxu0  ;;  %9132 = vmatmul.mubr.msk.f32.gmra.mxu0 %vm252_vm0, %v11419_v6  ;;  %9183 = vmatprep.mubr.msk.f32.mxu1 %vm252_vm0, %v11400_v0  ;;  %v2441_v0 = vld [vmem:[%s14905_s2 + $0x8] sm:$0xff]  ;;  %v2452_v30 = vld [vmem:[%s14905_s2 + $0x60] sm:$0xff] }
  0xff   :  { %15177 = vst [vmem:[#allocation40_spill] sm:$0xff] %v11978_v59  ;;  %9134 = vmatprep.mubr.msk.f32.mxu0 %vm252_vm0, %v11424_v7  ;;  %v11986_v60 = vpop.f32.mrf.mxu1 }
 0x100   :  { %15178 = vst [vmem:[#allocation41_spill] sm:$0xff] %v11986_v60  ;;  %v11988_v50 = vpop.f32.mrf.mxu0  ;;  %v2450_v60 = vld [vmem:[%s14905_s2 + $0x50] sm:$0xff] }
 0x101   :  { %15179 = vst [vmem:[#allocation42_spill] sm:$0xff] %v11988_v50  ;;  %v11995_v63 = vpop.f32.mrf.mxu1  ;;  %9184 = vmatmul.mubr.msk.f32.gmra.mxu1 %vm252_vm0, %v11419_v6  ;;  %v2442_v6 = vld [vmem:[%s14905_s2 + $0x10] sm:$0xff] }
 0x102   :  { %15180 = vst [vmem:[#allocation43_spill] sm:$0xff] %v11995_v63  ;;  %v11999_v27 = vpop.f32.mrf.mxu0  ;;  %9135 = vmatmul.mubr.msk.f32.gmra.mxu0 %vm252_vm0, %v11443_v12  ;;  %9186 = vmatprep.mubr.msk.f32.mxu1 %vm252_vm0, %v11424_v7 }
 0x103   :  { %15181 = vst [vmem:[#allocation44_spill] sm:$0xff] %v11999_v27  ;;  %9191 = vmatprep.mubr.msk.f32.mxu0 %vm2472_vm1, %v11993_v18  ;;  %v12010_v50 = vpop.f32.mrf.mxu1 }
 0x104   :  { %15182 = vst [vmem:[#allocation45_spill] sm:$0xff] %v12010_v50  ;;  %v12012_v55 = vpop.f32.mrf.mxu0 }
 0x105   :  { %15183 = vst [vmem:[#allocation46_spill] sm:$0xff] %v12012_v55  ;;  %v12017_v27 = vpop.f32.mrf.mxu1  ;;  %9187 = vmatmul.mubr.msk.f32.gmra.mxu1 %vm252_vm0, %v11443_v12  ;;  %v2443_v55 = vld [vmem:[%s14905_s2 + $0x18] sm:$0xff]  ;;  %v2444_v12 = vld [vmem:[%s14905_s2 + $0x20] sm:$0xff] }
 0x106   :  { %15184 = vst [vmem:[#allocation47_spill] sm:$0xff] %v12017_v27  ;;  %v12021_v7 = vpop.f32.mrf.mxu0  ;;  %9192 = vmatmul.mubr.msk.f32.vlgmr.msra.gmra.mxu0 %vm2472_vm1, %v2441_v0  ;;  %9255 = vmatprep.mubr.msk.f32.mxu1 %vm2472_vm1, %v11993_v18 }
 0x107   :  { %15185 = vst [vmem:[#allocation48_spill] sm:$0xff] %v12021_v7  ;;  %9194 = vmatprep.mubr.msk.f32.mxu0 %vm2472_vm1, %v2442_v6  ;;  %v12030_v25 = vpop.f32.mrf.mxu1  ;;  %v2445_v6 = vld [vmem:[%s14905_s2 + $0x28] sm:$0xff] }
 0x108   :  { %15186 = vst [vmem:[#allocation49_spill] sm:$0xff] %v12030_v25  ;;  %v12032_v59 = vpop.f32.mrf.mxu0 }
 0x109   :  { %15187 = vst [vmem:[#allocation50_spill] sm:$0xff] %v12032_v59  ;;  %v12037_v51 = vpop.f32.mrf.mxu1 }
 0x10a   :  { %15188 = vst [vmem:[#allocation51_spill] sm:$0xff] %v12037_v51  ;;  %v12039_v0 = vpop.f32.mrf.mxu0  ;;  %9195 = vmatmul.mubr.msk.f32.gmra.mxu0 %vm2472_vm1, %v2443_v55  ;;  %v2447_v55 = vld [vmem:[%s14905_s2 + $0x38] sm:$0xff] }
 0x10b   :  { %15189 = vst [vmem:[#allocation52_spill] sm:$0xff] %v12039_v0  ;;  %9197 = vmatprep.mubr.msk.f32.mxu0 %vm2472_vm1, %v2444_v12  ;;  %v12046_v21 = vpop.f32.mrf.mxu1 }
 0x10c   :  { %15190 = vst [vmem:[#allocation53_spill] sm:$0xff] %v12046_v21  ;;  %v12048_v47 = vpop.f32.mrf.mxu0  ;;  %v2460_v21 = vld [vmem:[%s14905_s2 + $0xa0] sm:$0xff] }
 0x10d   :  { %15191 = vst [vmem:[#allocation54_spill] sm:$0xff] %v12048_v47  ;;  %v12053_v43 = vpop.f32.mrf.mxu1 }
 0x10e   :  { %15192 = vst [vmem:[#allocation55_spill] sm:$0xff] %v12053_v43  ;;  %v12055_v15 = vpop.f32.mrf.mxu0  ;;  %9198 = vmatmul.mubr.msk.f32.gmra.mxu0 %vm2472_vm1, %v2445_v6 }
 0x10f   :  { %15193 = vst [vmem:[#allocation56_spill] sm:$0xff] %v12055_v15  ;;  %9200 = vmatprep.mubr.msk.f32.mxu0 %vm2472_vm1, %v2446_v17  ;;  %v12062_v12 = vpop.f32.mrf.mxu1  ;;  %v2449_v17 = vld [vmem:[%s14905_s2 + $0x48] sm:$0xff] }
 0x110   :  { %15194 = vst [vmem:[#allocation57_spill] sm:$0xff] %v12062_v12  ;;  %v12064_v38 = vpop.f32.mrf.mxu0 }
 0x111   :  { %15195 = vst [vmem:[#allocation58_spill] sm:$0xff] %v12064_v38  ;;  %v12069_v33 = vpop.f32.mrf.mxu1 }
 0x112   :  { %15196 = vst [vmem:[#allocation59_spill] sm:$0xff] %v12069_v33  ;;  %v12071_v50 = vpop.f32.mrf.mxu0  ;;  %9201 = vmatmul.mubr.msk.f32.gmra.mxu0 %vm2472_vm1, %v2447_v55 }
 0x113   :  { %15197 = vst [vmem:[#allocation60_spill] sm:$0xff] %v12071_v50  ;;  %9203 = vmatprep.mubr.msk.f32.mxu0 %vm2472_vm1, %v2448_v9  ;;  %v12078_v6 = vpop.f32.mrf.mxu1  ;;  %v2451_v9 = vld [vmem:[%s14905_s2 + $0x58] sm:$0xff] }
 0x114   :  { %15198 = vst [vmem:[#allocation61_spill] sm:$0xff] %v12078_v6  ;;  %v12080_v63 = vpop.f32.mrf.mxu0  ;;  %v2458_v6 = vld [vmem:[%s14905_s2 + $0x90] sm:$0xff] }
 0x115   :  { %15199 = vst [vmem:[#allocation62_spill] sm:$0xff] %v12080_v63  ;;  %v12085_v25 = vpop.f32.mrf.mxu1 }
 0x116   :  { %15200 = vst [vmem:[#allocation63_spill] sm:$0xff] %v12085_v25  ;;  %v12087_v56 = vpop.f32.mrf.mxu0  ;;  %9204 = vmatmul.mubr.msk.f32.gmra.mxu0 %vm2472_vm1, %v2449_v17 }
 0x117   :  { %15201 = vst [vmem:[#allocation64_spill] sm:$0xff] %v12087_v56  ;;  %9206 = vmatprep.mubr.msk.f32.mxu0 %vm2472_vm1, %v2450_v60  ;;  %v12094_v55 = vpop.f32.mrf.mxu1  ;;  %v2453_v60 = vld [vmem:[%s14905_s2 + $0x68] sm:$0xff] }
 0x118   :  { %15202 = vst [vmem:[#allocation65_spill] sm:$0xff] %v12094_v55  ;;  %v12096_v27 = vpop.f32.mrf.mxu0 }
 0x119   :  { %15203 = vst [vmem:[#allocation66_spill] sm:$0xff] %v12096_v27  ;;  %v12101_v26 = vpop.f32.mrf.mxu1 }
 0x11a   :  { %15204 = vst [vmem:[#allocation67_spill] sm:$0xff] %v12101_v26  ;;  %v12103_v52 = vpop.f32.mrf.mxu0  ;;  %9207 = vmatmul.mubr.msk.f32.gmra.mxu0 %vm2472_vm1, %v2451_v9 }
 0x11b   :  { %15205 = vst [vmem:[#allocation68_spill] sm:$0xff] %v12103_v52  ;;  %9209 = vmatprep.mubr.msk.f32.mxu0 %vm2472_vm1, %v2452_v30  ;;  %v12110_v17 = vpop.f32.mrf.mxu1  ;;  %v2455_v30 = vld [vmem:[%s14905_s2 + $0x78] sm:$0xff] }
 0x11c   :  { %15206 = vst [vmem:[#allocation69_spill] sm:$0xff] %v12110_v17  ;;  %v12112_v22 = vpop.f32.mrf.mxu0 }
 0x11d   :  { %15207 = vst [vmem:[#allocation70_spill] sm:$0xff] %v12112_v22  ;;  %v12117_v20 = vpop.f32.mrf.mxu1 }
 0x11e   :  { %15208 = vst [vmem:[#allocation71_spill] sm:$0xff] %v12117_v20  ;;  %v12119_v44 = vpop.f32.mrf.mxu0  ;;  %9210 = vmatmul.mubr.msk.f32.gmra.mxu0 %vm2472_vm1, %v2453_v60 }
 0x11f   :  { %15209 = vst [vmem:[#allocation72_spill] sm:$0xff] %v12119_v44  ;;  %9212 = vmatprep.mubr.msk.f32.mxu0 %vm2472_vm1, %v2454_v48  ;;  %v12126_v9 = vpop.f32.mrf.mxu1  ;;  %v2457_v48 = vld [vmem:[%s14905_s2 + $0x88] sm:$0xff] }
 0x120   :  { %15210 = vst [vmem:[#allocation73_spill] sm:$0xff] %v12126_v9  ;;  %v12128_v39 = vpop.f32.mrf.mxu0 }
 0x121   :  { %15211 = vst [vmem:[#allocation74_spill] sm:$0xff] %v12128_v39  ;;  %v12133_v11 = vpop.f32.mrf.mxu1 }
 0x122   :  { %15212 = vst [vmem:[#allocation75_spill] sm:$0xff] %v12133_v11  ;;  %v12135_v17 = vpop.f32.mrf.mxu0  ;;  %9213 = vmatmul.mubr.msk.f32.gmra.mxu0 %vm2472_vm1, %v2455_v30 }
 0x123   :  { %15213 = vst [vmem:[#allocation76_spill] sm:$0xff] %v12135_v17  ;;  %9215 = vmatprep.mubr.msk.f32.mxu0 %vm2472_vm1, %v2456_v16  ;;  %v12142_v60 = vpop.f32.mrf.mxu1  ;;  %v2459_v16 = vld [vmem:[%s14905_s2 + $0x98] sm:$0xff] }
 0x124   :  { %15214 = vst [vmem:[#allocation77_spill] sm:$0xff] %v12142_v60  ;;  %v12144_v9 = vpop.f32.mrf.mxu0 }
 0x125   :  { %15215 = vst [vmem:[#allocation78_spill] sm:$0xff] %v12144_v9  ;;  %v12149_v12 = vpop.f32.mrf.mxu1 }
 0x126   :  { %15216 = vst [vmem:[#allocation79_spill] sm:$0xff] %v12149_v12  ;;  %v12151_v11 = vpop.f32.mrf.mxu0  ;;  %9216 = vmatmul.mubr.msk.f32.gmra.mxu0 %vm2472_vm1, %v2457_v48 }
 0x127   :  { %15217 = vst [vmem:[#allocation80_spill] sm:$0xff] %v12151_v11  ;;  %9218 = vmatprep.mubr.msk.f32.mxu0 %vm2472_vm1, %v2458_v6  ;;  %v12158_v30 = vpop.f32.mrf.mxu1  ;;  %v2461_v6 = vld [vmem:[%s14905_s2 + $0xa8] sm:$0xff] }
 0x128   :  { %15218 = vst [vmem:[#allocation81_spill] sm:$0xff] %v12158_v30  ;;  %v12160_v60 = vpop.f32.mrf.mxu0 }
 0x129   :  { %15219 = vst [vmem:[#allocation82_spill] sm:$0xff] %v12160_v60  ;;  %v12165_v55 = vpop.f32.mrf.mxu1  ;;  %v2462_v60 = vld [vmem:[%s14905_s2 + $0xb0] sm:$0xff] }
 0x12a   :  { %15220 = vst [vmem:[#allocation83_spill] sm:$0xff] %v12165_v55  ;;  %v12167_v12 = vpop.f32.mrf.mxu0  ;;  %9219 = vmatmul.mubr.msk.f32.gmra.mxu0 %vm2472_vm1, %v2459_v16 }
 0x12b   :  { %15221 = vst [vmem:[#allocation84_spill] sm:$0xff] %v12167_v12  ;;  %9221 = vmatprep.mubr.msk.f32.mxu0 %vm2472_vm1, %v2460_v21  ;;  %v12174_v48 = vpop.f32.mrf.mxu1  ;;  %v2463_v21 = vld [vmem:[%s14905_s2 + $0xb8] sm:$0xff] }
 0x12c   :  { %15222 = vst [vmem:[#allocation85_spill] sm:$0xff] %v12174_v48  ;;  %v12176_v11 = vpop.f32.mrf.mxu0 }
 0x12d   :  { %15223 = vst [vmem:[#allocation86_spill] sm:$0xff] %v12176_v11  ;;  %v12181_v30 = vpop.f32.mrf.mxu1  ;;  %v2464_v11 = vld [vmem:[%s14905_s2 + $0xc0] sm:$0xff] }
 0x12e   :  { %15224 = vst [vmem:[#allocation87_spill] sm:$0xff] %v12181_v30  ;;  %v12183_v55 = vpop.f32.mrf.mxu0  ;;  %9222 = vmatmul.mubr.msk.f32.gmra.mxu0 %vm2472_vm1, %v2461_v6 }
 0x12f   :  { %15225 = vst [vmem:[#allocation88_spill] sm:$0xff] %v12183_v55  ;;  %9224 = vmatprep.mubr.msk.f32.mxu0 %vm2472_vm1, %v2462_v60  ;;  %v12190_v16 = vpop.f32.mrf.mxu1  ;;  %v2465_v60 = vld [vmem:[%s14905_s2 + $0xc8] sm:$0xff] }
 0x130   :  { %15226 = vst [vmem:[#allocation89_spill] sm:$0xff] %v12190_v16  ;;  %v12192_v12 = vpop.f32.mrf.mxu0 }
 0x131   :  { %15227 = vst [vmem:[#allocation90_spill] sm:$0xff] %v12192_v12  ;;  %v12197_v48 = vpop.f32.mrf.mxu1  ;;  %v2466_v12 = vld [vmem:[%s14905_s2 + $0xd0] sm:$0xff] }
 0x132   :  { %15228 = vst [vmem:[#allocation91_spill] sm:$0xff] %v12197_v48  ;;  %v12199_v30 = vpop.f32.mrf.mxu0  ;;  %9225 = vmatmul.mubr.msk.f32.gmra.mxu0 %vm2472_vm1, %v2463_v21 }
 0x133   :  { %15229 = vst [vmem:[#allocation92_spill] sm:$0xff] %v12199_v30  ;;  %9227 = vmatprep.mubr.msk.f32.mxu0 %vm2472_vm1, %v2464_v11  ;;  %v12206_v6 = vpop.f32.mrf.mxu1  ;;  %v2467_v11 = vld [vmem:[%s14905_s2 + $0xd8] sm:$0xff] }
 0x134   :  { %15230 = vst [vmem:[#allocation93_spill] sm:$0xff] %v12206_v6  ;;  %v12208_v55 = vpop.f32.mrf.mxu0 }
 0x135   :  { %15231 = vst [vmem:[#allocation94_spill] sm:$0xff] %v12208_v55  ;;  %v12213_v16 = vpop.f32.mrf.mxu1  ;;  %v2468_v55 = vld [vmem:[%s14905_s2 + $0xe0] sm:$0xff] }
 0x136   :  { %15232 = vst [vmem:[#allocation95_spill] sm:$0xff] %v12213_v16  ;;  %v12215_v48 = vpop.f32.mrf.mxu0  ;;  %9228 = vmatmul.mubr.msk.f32.gmra.mxu0 %vm2472_vm1, %v2465_v60 }
 0x137   :  { %15233 = vst [vmem:[#allocation96_spill] sm:$0xff] %v12215_v48  ;;  %9230 = vmatprep.mubr.msk.f32.mxu0 %vm2472_vm1, %v2466_v12  ;;  %v12222_v21 = vpop.f32.mrf.mxu1  ;;  %v2469_v12 = vld [vmem:[%s14905_s2 + $0xe8] sm:$0xff] }
 0x138   :  { %15234 = vst [vmem:[#allocation97_spill] sm:$0xff] %v12222_v21  ;;  %v12224_v30 = vpop.f32.mrf.mxu0 }
 0x139   :  { %15235 = vst [vmem:[#allocation98_spill] sm:$0xff] %v12224_v30  ;;  %v12229_v6 = vpop.f32.mrf.mxu1  ;;  %v2470_v30 = vld [vmem:[%s14905_s2 + $0xf0] sm:$0xff] }
 0x13a   :  { %15236 = vst [vmem:[#allocation99_spill] sm:$0xff] %v12229_v6  ;;  %v12231_v16 = vpop.f32.mrf.mxu0  ;;  %9231 = vmatmul.mubr.msk.f32.gmra.mxu0 %vm2472_vm1, %v2467_v11 }
 0x13b   :  { %15237 = vst [vmem:[#allocation100_spill] sm:$0xff] %v12231_v16  ;;  %9233 = vmatprep.mubr.msk.f32.mxu0 %vm2472_vm1, %v2468_v55  ;;  %v12238_v60 = vpop.f32.mrf.mxu1  ;;  %v2471_v55 = vld [vmem:[%s14905_s2 + $0xf8] sm:$0xff] }
 0x13c   :  { %15238 = vst [vmem:[#allocation101_spill] sm:$0xff] %v12238_v60  ;;  %v12240_v48 = vpop.f32.mrf.mxu0 }
 0x13d   :  { %15239 = vst [vmem:[#allocation102_spill] sm:$0xff] %v12240_v48  ;;  %v12245_v21 = vpop.f32.mrf.mxu1 }
 0x13e   :  { %15240 = vst [vmem:[#allocation103_spill] sm:$0xff] %v12245_v21  ;;  %v12247_v6 = vpop.f32.mrf.mxu0  ;;  %9234 = vmatmul.mubr.msk.f32.gmra.mxu0 %vm2472_vm1, %v2469_v12 }
 0x13f   :  { %15241 = vst [vmem:[#allocation104_spill] sm:$0xff] %v12247_v6  ;;  %9236 = vmatprep.mubr.msk.f32.mxu0 %vm2472_vm1, %v2470_v30  ;;  %v12254_v11 = vpop.f32.mrf.mxu1 }
 0x140   :  { %15242 = vst [vmem:[#allocation105_spill] sm:$0xff] %v12254_v11  ;;  %v12256_v16 = vpop.f32.mrf.mxu0 }
 0x141   :  { %15243 = vst [vmem:[#allocation106_spill] sm:$0xff] %v12256_v16  ;;  %v12258_v48 = vpop.f32.mrf.mxu1 }
 0x142   :  { %15244 = vst [vmem:[#allocation107_spill] sm:$0xff] %v12258_v48  ;;  %v12260_v60 = vpop.f32.mrf.mxu0  ;;  %9237 = vmatmul.mubr.msk.f32.gmra.mxu0 %vm2472_vm1, %v2471_v55 }
 0x143   :  { %15245 = vst [vmem:[#allocation108_spill] sm:$0xff] %v12260_v60  ;;  %v12263_v21 = vpop.f32.mrf.mxu1  ;;  %9319 = vmatprep.mubr.msk.f32.mxu0 %vm2472_vm1, %v11993_v18 }
 0x144   :  { %15246 = vst [vmem:[#allocation109_spill] sm:$0xff] %v12263_v21  ;;  %v12267_v30 = vpop.f32.mrf.mxu0 }
 0x145   :  { %15247 = vst [vmem:[#allocation110_spill] sm:$0xff] %v12267_v30  ;;  %v12269_v12 = vpop.f32.mrf.mxu1 }
 0x146   :  { %15248 = vst [vmem:[#allocation111_spill] sm:$0xff] %v12269_v12  ;;  %v12271_v6 = vpop.f32.mrf.mxu0 }
 0x147   :  { %15249 = vst [vmem:[#allocation112_spill] sm:$0xff] %v12271_v6  ;;  %v12273_v11 = vpop.f32.mrf.mxu1 }
 0x148   :  { %15250 = vst [vmem:[#allocation113_spill] sm:$0xff] %v12273_v11  ;;  %v12275_v16 = vpop.f32.mrf.mxu0 }
 0x149   :  { %15251 = vst [vmem:[#allocation114_spill] sm:$0xff] %v12275_v16  ;;  %v12277_v48 = vpop.f32.mrf.mxu1 }
 0x14a   :  { %15252 = vst [vmem:[#allocation115_spill] sm:$0xff] %v12277_v48  ;;  %v12279_v60 = vpop.f32.mrf.mxu0 }
 0x14b   :  { %15253 = vst [vmem:[#allocation116_spill] sm:$0xff] %v12279_v60  ;;  %v12281_v55 = vpop.f32.mrf.mxu1 }
 0x14c   :  { %15254 = vst [vmem:[#allocation117_spill] sm:$0xff] %v12281_v55  ;;  %v12283_v21 = vpop.f32.mrf.mxu0 }
 0x14d   :  { %15255 = vst [vmem:[#allocation118_spill] sm:$0xff] %v12283_v21  ;;  %v12285_v20 = vpop.f32.mrf.mxu1 }
 0x14e   :  { %15256 = vst [vmem:[#allocation119_spill] sm:$0xff] %v12285_v20  ;;  %v12287_v18 = vpop.f32.mrf.mxu0 }
 0x14f   :  { %15257 = vst [vmem:[#allocation120_spill] sm:$0xff] %v12287_v18  ;;  %v12289_v30 = vpop.f32.mrf.mxu1 }
 0x150   :  { %15258 = vst [vmem:[#allocation121_spill] sm:$0xff] %v12289_v30  ;;  %v12291_v12 = vpop.f32.mrf.mxu0 }
 0x151   :  { %15259 = vst [vmem:[#allocation122_spill] sm:$0xff] %v12291_v12  ;;  %v12293_v6 = vpop.f32.mrf.mxu1 }
 0x152   :  { %15260 = vst [vmem:[#allocation123_spill] sm:$0xff] %v12293_v6  ;;  %v12295_v11 = vpop.f32.mrf.mxu0 }
 0x153   :  { %15261 = vst [vmem:[#allocation124_spill] sm:$0xff] %v12295_v11  ;;  %v12297_v16 = vpop.f32.mrf.mxu1 }
 0x154   :  { %15262 = vst [vmem:[#allocation125_spill] sm:$0xff] %v12297_v16  ;;  %v12299_v48 = vpop.f32.mrf.mxu0 }
 0x155   :  { %15263 = vst [vmem:[#allocation126_spill] sm:$0xff] %v12299_v48  ;;  %v12301_v60 = vpop.f32.mrf.mxu1 }
 0x156   :  { %15264 = vst [vmem:[#allocation127_spill] sm:$0xff] %v12301_v60  ;;  %v12303_v55 = vpop.f32.mrf.mxu0 }
 0x157   :  { %15265 = vst [vmem:[#allocation128_spill] sm:$0xff] %v12303_v55  ;;  %v12305_v21 = vpop.f32.mrf.mxu1 }
 0x158   :  { %15266 = vst [vmem:[#allocation129_spill] sm:$0xff] %v12305_v21  ;;  %v12307_v20 = vpop.f32.mrf.mxu0 }
 0x159   :  { %15267 = vst [vmem:[#allocation130_spill] sm:$0xff] %v12307_v20  ;;  %v12309_v18 = vpop.f32.mrf.mxu1 }
 0x15a   :  { %15268 = vst [vmem:[#allocation131_spill] sm:$0xff] %v12309_v18  ;;  %v12311_v30 = vpop.f32.mrf.mxu0 }
 0x15b   :  { %15269 = vst [vmem:[#allocation132_spill] sm:$0xff] %v12311_v30  ;;  %v12313_v12 = vpop.f32.mrf.mxu1 }
 0x15c   :  { %15270 = vst [vmem:[#allocation133_spill] sm:$0xff] %v12313_v12  ;;  %v12315_v6 = vpop.f32.mrf.mxu0 }
 0x15d   :  { %15271 = vst [vmem:[#allocation134_spill] sm:$0xff] %v12315_v6  ;;  %v12317_v11 = vpop.f32.mrf.mxu1 }
 0x15e   :  { %15272 = vst [vmem:[#allocation135_spill] sm:$0xff] %v12317_v11  ;;  %v12319_v16 = vpop.f32.mrf.mxu0 }
 0x15f   :  { %15273 = vst [vmem:[#allocation136_spill] sm:$0xff] %v12319_v16  ;;  %v12321_v48 = vpop.f32.mrf.mxu1 }
 0x160   :  { %15274 = vst [vmem:[#allocation137_spill] sm:$0xff] %v12321_v48  ;;  %v12323_v60 = vpop.f32.mrf.mxu0 }
 0x161   :  { %15275 = vst [vmem:[#allocation138_spill] sm:$0xff] %v12323_v60  ;;  %v12325_v55 = vpop.f32.mrf.mxu1 }
 0x162   :  { %15276 = vst [vmem:[#allocation139_spill] sm:$0xff] %v12325_v55  ;;  %v12327_v21 = vpop.f32.mrf.mxu0 }
 0x163   :  { %15277 = vst [vmem:[#allocation140_spill] sm:$0xff] %v12327_v21  ;;  %v12329_v20 = vpop.f32.mrf.mxu1 }
 0x164   :  { %15278 = vst [vmem:[#allocation141_spill] sm:$0xff] %v12329_v20  ;;  %v12331_v18 = vpop.f32.mrf.mxu0 }
 0x165   :  { %15279 = vst [vmem:[#allocation142_spill] sm:$0xff] %v12331_v18  ;;  %v12333_v30 = vpop.f32.mrf.mxu1 }
 0x166   :  { %15280 = vst [vmem:[#allocation143_spill] sm:$0xff] %v12333_v30  ;;  %v12335_v12 = vpop.f32.mrf.mxu0 }
 0x167   :  { %15281 = vst [vmem:[#allocation144_spill] sm:$0xff] %v12335_v12  ;;  %v12337_v6 = vpop.f32.mrf.mxu1 }
 0x168   :  { %15282 = vst [vmem:[#allocation145_spill] sm:$0xff] %v12337_v6  ;;  %v12339_v11 = vpop.f32.mrf.mxu0 }
 0x169   :  { %15283 = vst [vmem:[#allocation146_spill] sm:$0xff] %v12339_v11  ;;  %v12341_v16 = vpop.f32.mrf.mxu1 }
 0x16a   :  { %15284 = vst [vmem:[#allocation147_spill] sm:$0xff] %v12341_v16  ;;  %v12343_v48 = vpop.f32.mrf.mxu0 }
 0x16b   :  { %15285 = vst [vmem:[#allocation148_spill] sm:$0xff] %v12343_v48  ;;  %v12345_v60 = vpop.f32.mrf.mxu1 }
 0x16c   :  { %15286 = vst [vmem:[#allocation149_spill] sm:$0xff] %v12345_v60  ;;  %v12347_v55 = vpop.f32.mrf.mxu0 }
 0x16d   :  { %15287 = vst [vmem:[#allocation150_spill] sm:$0xff] %v12347_v55  ;;  %v12349_v21 = vpop.f32.mrf.mxu1 }
 0x16e   :  { %15288 = vst [vmem:[#allocation151_spill] sm:$0xff] %v12349_v21  ;;  %v12351_v20 = vpop.f32.mrf.mxu0 }
 0x16f   :  { %15289 = vst [vmem:[#allocation152_spill] sm:$0xff] %v12351_v20  ;;  %v12353_v18 = vpop.f32.mrf.mxu1  ;;  %v12373_v20 = vpop.permute.xlu0 %187 }
 0x170   :  { %15290 = vst [vmem:[#allocation153_spill] sm:$0xff] %v12353_v18  ;;  %v12355_v30 = vpop.f32.mrf.mxu0  ;;  %15300 = vst [vmem:[#allocation163_spill] sm:$0xff] %v12373_v20  ;;  %v12461_v18 = vpop.permute.xlu1 %182 }
 0x171   :  { %15291 = vst [vmem:[#allocation154_spill] sm:$0xff] %v12355_v30  ;;  %v12357_v12 = vpop.f32.mrf.mxu1  ;;  %15344 = vst [vmem:[#allocation207_spill] sm:$0xff] %v12461_v18 }
 0x172   :  { %15292 = vst [vmem:[#allocation155_spill] sm:$0xff] %v12357_v12  ;;  %v12359_v6 = vpop.f32.mrf.mxu0 }
 0x173   :  { %15293 = vst [vmem:[#allocation156_spill] sm:$0xff] %v12359_v6  ;;  %v12361_v11 = vpop.f32.mrf.mxu1  ;;  %v12387_v44 = vpop.permute.xlu0 %207 }
 0x174   :  { %15294 = vst [vmem:[#allocation157_spill] sm:$0xff] %v12361_v11  ;;  %v12363_v26 = vpop.f32.mrf.mxu0  ;;  %15307 = vst [vmem:[#allocation170_spill] sm:$0xff] %v12387_v44 }
 0x175   :  { %15295 = vst [vmem:[#allocation158_spill] sm:$0xff] %v12363_v26  ;;  %v12365_v48 = vpop.f32.mrf.mxu1 }
 0x176   :  { %15296 = vst [vmem:[#allocation159_spill] sm:$0xff] %v12365_v48  ;;  %v12367_v25 = vpop.f32.mrf.mxu0 }
 0x177   :  { %15297 = vst [vmem:[#allocation160_spill] sm:$0xff] %v12367_v25  ;;  %v12369_v55 = vpop.f32.mrf.mxu1 }
 0x178   :  { %15298 = vst [vmem:[#allocation161_spill] sm:$0xff] %v12369_v55  ;;  %v12371_v33 = vpop.f32.mrf.mxu0 }
 0x179   :  { %15299 = vst [vmem:[#allocation162_spill] sm:$0xff] %v12371_v33  ;;  %v12375_v43 = vpop.f32.mrf.mxu1 }
 0x17a   :  { %15301 = vst [vmem:[#allocation164_spill] sm:$0xff] %v12375_v43  ;;  %v12377_v30 = vpop.f32.mrf.mxu0 }
 0x17b   :  { %15302 = vst [vmem:[#allocation165_spill] sm:$0xff] %v12377_v30  ;;  %v12379_v51 = vpop.f32.mrf.mxu1 }
 0x17c   :  { %15303 = vst [vmem:[#allocation166_spill] sm:$0xff] %v12379_v51  ;;  %v12381_v6 = vpop.f32.mrf.mxu0  ;;  %v12401_v51 = vpop.permute.xlu0 %177 }
 0x17d   :  { %15304 = vst [vmem:[#allocation167_spill] sm:$0xff] %v12381_v6  ;;  %v12383_v39 = vpop.f32.mrf.mxu1  ;;  %15314 = vst [vmem:[#allocation177_spill] sm:$0xff] %v12401_v51 }
 0x17e   :  { %15305 = vst [vmem:[#allocation168_spill] sm:$0xff] %v12383_v39  ;;  %v12385_v26 = vpop.f32.mrf.mxu0 }
 0x17f   :  { %15306 = vst [vmem:[#allocation169_spill] sm:$0xff] %v12385_v26  ;;  %v12389_v25 = vpop.f32.mrf.mxu1 }
 0x180   :  { %15308 = vst [vmem:[#allocation171_spill] sm:$0xff] %v12389_v25  ;;  %v12391_v9 = vpop.f32.mrf.mxu0 }
 0x181   :  { %15309 = vst [vmem:[#allocation172_spill] sm:$0xff] %v12391_v9  ;;  %v12393_v33 = vpop.f32.mrf.mxu1 }
 0x182   :  { %15310 = vst [vmem:[#allocation173_spill] sm:$0xff] %v12393_v33  ;;  %v12395_v17 = vpop.f32.mrf.mxu0  ;;  %v12415_v33 = vpop.permute.xlu0 %172 }
 0x183   :  { %15311 = vst [vmem:[#allocation174_spill] sm:$0xff] %v12395_v17  ;;  %v12397_v43 = vpop.f32.mrf.mxu1  ;;  %15321 = vst [vmem:[#allocation184_spill] sm:$0xff] %v12415_v33 }
 0x184   :  { %15312 = vst [vmem:[#allocation175_spill] sm:$0xff] %v12397_v43  ;;  %v12399_v30 = vpop.f32.mrf.mxu0 }
 0x185   :  { %15313 = vst [vmem:[#allocation176_spill] sm:$0xff] %v12399_v30  ;;  %v12403_v6 = vpop.f32.mrf.mxu1 }
 0x186   :  { %15315 = vst [vmem:[#allocation178_spill] sm:$0xff] %v12403_v6  ;;  %v12405_v39 = vpop.f32.mrf.mxu0 }
 0x187   :  { %15316 = vst [vmem:[#allocation179_spill] sm:$0xff] %v12405_v39  ;;  %v12407_v26 = vpop.f32.mrf.mxu1  ;;  %v12427_v39 = vpop.permute.xlu0 %107 }
 0x188   :  { %15317 = vst [vmem:[#allocation180_spill] sm:$0xff] %v12407_v26  ;;  %v12409_v55 = vpop.f32.mrf.mxu0  ;;  %15327 = vst [vmem:[#allocation190_spill] sm:$0xff] %v12427_v39 }
 0x189   :  { %15318 = vst [vmem:[#allocation181_spill] sm:$0xff] %v12409_v55  ;;  %v12411_v25 = vpop.f32.mrf.mxu1 }
 0x18a   :  { %15319 = vst [vmem:[#allocation182_spill] sm:$0xff] %v12411_v25  ;;  %v12413_v9 = vpop.f32.mrf.mxu0 }
 0x18b   :  { %15320 = vst [vmem:[#allocation183_spill] sm:$0xff] %v12413_v9  ;;  %v12417_v17 = vpop.f32.mrf.mxu1 }
 0x18c   :  { %15322 = vst [vmem:[#allocation185_spill] sm:$0xff] %v12417_v17  ;;  %v12419_v43 = vpop.f32.mrf.mxu0  ;;  %v12439_v17 = vpop.permute.xlu0 %102 }
 0x18d   :  { %15323 = vst [vmem:[#allocation186_spill] sm:$0xff] %v12419_v43  ;;  %v12423_v48 = vpop.f32.mrf.mxu1  ;;  %15333 = vst [vmem:[#allocation196_spill] sm:$0xff] %v12439_v17 }
 0x18e   :  { %v12421_v30 = vpop.f32.mrf.mxu0  ;;  %15325 = vst [vmem:[#allocation188_spill] sm:$0xff] %v12423_v48 }
 0x18f   :  { %15324 = vst [vmem:[#allocation187_spill] sm:$0xff] %v12421_v30  ;;  %v12431_v55 = vpop.f32.mrf.mxu1 }
 0x190   :  { %v12425_v6 = vpop.f32.mrf.mxu0  ;;  %15329 = vst [vmem:[#allocation192_spill] sm:$0xff] %v12431_v55  ;;  %v12449_v12 = vpop.permute.xlu0 %97 }
 0x191   :  { %15326 = vst [vmem:[#allocation189_spill] sm:$0xff] %v12425_v6  ;;  %v12437_v11 = vpop.f32.mrf.mxu1  ;;  %15338 = vst [vmem:[#allocation201_spill] sm:$0xff] %v12449_v12 }
 0x192   :  { %v12429_v26 = vpop.f32.mrf.mxu0  ;;  %15332 = vst [vmem:[#allocation195_spill] sm:$0xff] %v12437_v11 }
 0x193   :  { %15328 = vst [vmem:[#allocation191_spill] sm:$0xff] %v12429_v26  ;;  %v12445_v48 = vpop.f32.mrf.mxu1 }
 0x194   :  { %v12433_v25 = vpop.f32.mrf.mxu0  ;;  %15336 = vst [vmem:[#allocation199_spill] sm:$0xff] %v12445_v48 }
 0x195   :  { %15330 = vst [vmem:[#allocation193_spill] sm:$0xff] %v12433_v25  ;;  %v12453_v55 = vpop.f32.mrf.mxu1 }
 0x196   :  { %v12435_v9 = vpop.f32.mrf.mxu0  ;;  %15340 = vst [vmem:[#allocation203_spill] sm:$0xff] %v12453_v55 }
 0x197   :  { %15331 = vst [vmem:[#allocation194_spill] sm:$0xff] %v12435_v9  ;;  %v12459_v11 = vpop.f32.mrf.mxu1 }
 0x198   :  { %v12441_v43 = vpop.f32.mrf.mxu0  ;;  %15343 = vst [vmem:[#allocation206_spill] sm:$0xff] %v12459_v11 }
 0x199   :  { %15334 = vst [vmem:[#allocation197_spill] sm:$0xff] %v12441_v43  ;;  %v12463_v43 = vpop.permute.xlu0 %92 }
 0x19a   :  { %v12443_v30 = vpop.f32.mrf.mxu0  ;;  %15345 = vst [vmem:[#allocation208_spill] sm:$0xff] %v12463_v43 }
 0x19b   :  { %15335 = vst [vmem:[#allocation198_spill] sm:$0xff] %v12443_v30 }
 0x19c   :  { %v12447_v6 = vpop.f32.mrf.mxu0 }
 0x19d   :  { %15337 = vst [vmem:[#allocation200_spill] sm:$0xff] %v12447_v6  ;;  %v12469_v6 = vpop.f32.mrf.mxu1  ;;  %v12475_v55 = vpop.permute.xlu0 %227 }
 0x19e   :  { %v12451_v26 = vpop.f32.mrf.mxu0  ;;  %15348 = vst [vmem:[#allocation211_spill] sm:$0xff] %v12469_v6 }
 0x19f   :  { %15339 = vst [vmem:[#allocation202_spill] sm:$0xff] %v12451_v26  ;;  %v12473_v26 = vpop.permute.xlu1 %202 }
 0x1a0   :  { %v12455_v25 = vpop.f32.mrf.mxu0  ;;  %15350 = vst [vmem:[#allocation213_spill] sm:$0xff] %v12473_v26 }
 0x1a1   :  { %15341 = vst [vmem:[#allocation204_spill] sm:$0xff] %v12455_v25  ;;  %v12477_v25 = vpop.f32.mrf.mxu1  ;;  %v12489_v22 = vpop.permute.xlu0 %222 }
 0x1a2   :  { %v12457_v9 = vpop.f32.mrf.mxu0  ;;  %15351 = vst [vmem:[#allocation214_spill] sm:$0xff] %v12477_v25 }
 0x1a3   :  { %15342 = vst [vmem:[#allocation205_spill] sm:$0xff] %v12457_v9  ;;  %v12483_v21 = vpop.f32.mrf.mxu1 }
 0x1a4   :  { %v12465_v30 = vpop.f32.mrf.mxu0  ;;  %15354 = vst [vmem:[#allocation217_spill] sm:$0xff] %v12483_v21 }
 0x1a5   :  { %15346 = vst [vmem:[#allocation209_spill] sm:$0xff] %v12465_v30  ;;  %v12487_v30 = vpop.permute.xlu1 %197  ;;  %v12493_v52 = vpop.f32.mrf.mxu1 }
 0x1a6   :  { %v12467_v48 = vpop.f32.mrf.mxu0  ;;  %15356 = vst [vmem:[#allocation219_spill] sm:$0xff] %v12487_v30  ;;  %15358 = vst [vmem:[#allocation221_spill] sm:$0xff] %v12493_v52  ;;  %v12501_v63 = vpop.permute.xlu0 %217 }
 0x1a7   :  { %15347 = vst [vmem:[#allocation210_spill] sm:$0xff] %v12467_v48  ;;  %v12503_v50 = vpop.f32.mrf.mxu1 }
 0x1a8   :  { %v12471_v60 = vpop.f32.mrf.mxu0  ;;  %15362 = vst [vmem:[#allocation225_spill] sm:$0xff] %v12503_v50 }
 0x1a9   :  { %15349 = vst [vmem:[#allocation212_spill] sm:$0xff] %v12471_v60  ;;  %v12499_v25 = vpop.permute.xlu1 %192  ;;  %v12509_v15 = vpop.f32.mrf.mxu1 }
 0x1aa   :  { %v12479_v9 = vpop.f32.mrf.mxu0  ;;  %15361 = vst [vmem:[#allocation224_spill] sm:$0xff] %v12499_v25  ;;  %15365 = vst [vmem:[#allocation228_spill] sm:$0xff] %v12509_v15  ;;  %v12515_v52 = vpop.permute.xlu0 %212 }
 0x1ab   :  { %15352 = vst [vmem:[#allocation215_spill] sm:$0xff] %v12479_v9  ;;  %15368 = vst [vmem:[#allocation231_spill] sm:$0xff] %v12515_v52  ;;  %v12519_v7 = vpop.f32.mrf.mxu1 }
 0x1ac   :  { %v12481_v11 = vpop.f32.mrf.mxu0  ;;  %15370 = vst [vmem:[#allocation233_spill] sm:$0xff] %v12519_v7 }
 0x1ad   :  { %15353 = vst [vmem:[#allocation216_spill] sm:$0xff] %v12481_v11  ;;  %v12513_v0 = vpop.permute.xlu1 %127  ;;  %v12529_v3 = vpop.f32.mrf.mxu1 }
 0x1ae   :  { %v12485_v16 = vpop.f32.mrf.mxu0  ;;  %15367 = vst [vmem:[#allocation230_spill] sm:$0xff] %v12513_v0  ;;  %v12527_v34 = vpop.permute.xlu0 %147  ;;  %15375 = vst [vmem:[#allocation238_spill] sm:$0xff] %v12529_v3  ;;  %v431_v3 = vadd.f32 %v11764_v36, %v12427_v39 }
 0x1af   :  { %15355 = vst [vmem:[#allocation218_spill] sm:$0xff] %v12485_v16  ;;  %15374 = vst [vmem:[#allocation237_spill] sm:$0xff] %v12527_v34  ;;  %v426_v16 = vadd.f32 %v11774_v37, %v12439_v17 }
 0x1b0   :  { %v12491_v6 = vpop.f32.mrf.mxu0 }
 0x1b1   :  { %15357 = vst [vmem:[#allocation220_spill] sm:$0xff] %v12491_v6  ;;  %v12525_v50 = vpop.permute.xlu1 %122 }
 0x1b2   :  { %v12495_v27 = vpop.f32.mrf.mxu0  ;;  %15373 = vst [vmem:[#allocation236_spill] sm:$0xff] %v12525_v50 }
 0x1b3   :  { %15359 = vst [vmem:[#allocation222_spill] sm:$0xff] %v12495_v27 }
 0x1b4   :  { %v12497_v56 = vpop.f32.mrf.mxu0 }
 0x1b5   :  { %15360 = vst [vmem:[#allocation223_spill] sm:$0xff] %v12497_v56 }
 0x1b6   :  { %v12505_v21 = vpop.f32.mrf.mxu0 }
 0x1b7   :  { %15363 = vst [vmem:[#allocation226_spill] sm:$0xff] %v12505_v21  ;;  %v12539_v21 = vpop.permute.xlu1 %117 }
 0x1b8   :  { %v12507_v38 = vpop.f32.mrf.mxu0  ;;  %15378 = vst [vmem:[#allocation241_spill] sm:$0xff] %v12539_v21 }
 0x1b9   :  { %15364 = vst [vmem:[#allocation227_spill] sm:$0xff] %v12507_v38 }
 0x1ba   :  { %v12511_v47 = vpop.f32.mrf.mxu0 }
 0x1bb   :  { %15366 = vst [vmem:[#allocation229_spill] sm:$0xff] %v12511_v47  ;;  %v421_v47 = vadd.f32 %v11749_v31, %v12449_v12 }
 0x1bc   :  { %v12517_v59 = vpop.f32.mrf.mxu0 }
 0x1bd   :  { %15369 = vst [vmem:[#allocation232_spill] sm:$0xff] %v12517_v59  ;;  %v12537_v59 = vpop.f32.mrf.mxu1 }
 0x1be   :  { %v12521_v29 = vpop.f32.mrf.mxu0 }
 0x1bf   :  { %15371 = vst [vmem:[#allocation234_spill] sm:$0xff] %v12521_v29  ;;  %v12543_v29 = vpop.permute.xlu0 %142  ;;  %v12547_v6 = vpop.f32.mrf.mxu1 }
 0x1c0   :  { %v12523_v62 = vpop.f32.mrf.mxu0  ;;  %15379 = vst [vmem:[#allocation242_spill] sm:$0xff] %v12543_v29 }
 0x1c1   :  { %15372 = vst [vmem:[#allocation235_spill] sm:$0xff] %v12523_v62  ;;  %v416_v62 = vadd.f32 %v11758_v32, %v12463_v43  ;;  %v12551_v32 = vpop.permute.xlu1 %112 }
 0x1c2   :  { %v12531_v15 = vpop.f32.mrf.mxu0  ;;  %15380 = vst [vmem:[#allocation243_spill] sm:$0xff] %v12551_v32  ;;  %v436_v37 = vadd.f32 %v11790_v41, %v12551_v32 }
 0x1c3   :  { %15376 = vst [vmem:[#allocation239_spill] sm:$0xff] %v12531_v15 }
 0x1c4   :  { %v12533_v38 = vpop.f32.mrf.mxu0 }
 0x1c5   :  { %15377 = vst [vmem:[#allocation240_spill] sm:$0xff] %v12533_v38 }
 0x1c6   :  { %v9193_v7 = vpop.f32.mrf.mxu0 }
 0x1c7   :  { %v2811_v56 = vadd.f32 %v9193_v7, %v421_v47  ;;  %v441_v47 = vadd.f32 %v11780_v4, %v12539_v21  ;;  %v12555_v7 = vpop.permute.xlu0 %137 }
 0x1c8   :  { %v2635_v27 = vpop.f32.mrf.mxu0  ;;  %15381 = vst [vmem:[#allocation244_spill] sm:$0xff] %v12555_v7 }
 0x1c9   :  { %v7663_v15 = vmul.f32 -1.442695, %v2811_v56  ;;  %v2810_v38 = vadd.f32 %v2635_v27, %v416_v62  ;;  %v12557_v56 = vpop.f32.mrf.mxu1 }
 0x1ca   :  { %v9196_v31 = vpop.f32.mrf.mxu0 }
 0x1cb   :  { %9843 = vpow2.f32 %v7663_v15  ;;  %v7662_v11 = vmul.f32 -1.442695, %v2810_v38  ;;  %v2813_v60 = vadd.f32 %v9196_v31, %v431_v3  ;;  %v451_v31 = vadd.f32 %v11796_v8, %v12513_v0  ;;  %v12563_v24 = vpop.f32.mrf.mxu1  ;;  %v12567_v41 = vpop.permute.xlu0 %132 }
 0x1cc   :  { %v2645_v9 = vpop.f32.mrf.mxu0  ;;  %15382 = vst [vmem:[#allocation245_spill] sm:$0xff] %v12567_v41 }
 0x1cd   :  { %9845 = vpow2.f32 %v7662_v11  ;;  %v7665_v36 = vmul.f32 -1.442695, %v2813_v60  ;;  %v2812_v62 = vadd.f32 %v2645_v9, %v426_v16  ;;  %v446_v9 = vadd.f32 %v11806_v45, %v12525_v50 }
 0x1ce   :  { %v9199_v27 = vpop.f32.mrf.mxu0 }
 0x1cf   :  { %9847 = vpow2.f32 %v7665_v36  ;;  %v7664_v38 = vmul.f32 -1.442695, %v2812_v62  ;;  %v2815_v3 = vadd.f32 %v9199_v27, %v441_v47  ;;  %v461_v47 = vadd.f32 %v11812_v13, %v12555_v7  ;;  %v12571_v27 = vpop.f32.mrf.mxu1 }
 0x1d0   :  { %v2655_v15 = vpop.f32.mrf.mxu0 }
 0x1d1   :  { %9849 = vpow2.f32 %v7664_v38  ;;  %v7667_v4 = vmul.f32 -1.442695, %v2815_v3  ;;  %v2814_v48 = vadd.f32 %v2655_v15, %v436_v37  ;;  %v456_v38 = vadd.f32 %v11822_v49, %v12567_v41 }
 0x1d2   :  { %v9202_v60 = vpop.f32.mrf.mxu0 }
 0x1d3   :  { %9851 = vpow2.f32 %v7667_v4  ;;  %v7666_v16 = vmul.f32 -1.442695, %v2814_v48  ;;  %v2817_v11 = vadd.f32 %v9202_v60, %v451_v31  ;;  %v471_v31 = vadd.f32 %v11834_v19, %v12527_v34 }
 0x1d4   :  { %v2665_v36 = vpop.f32.mrf.mxu0 }
 0x1d5   :  { %9853 = vpow2.f32 %v7666_v16  ;;  %v7669_v8 = vmul.f32 -1.442695, %v2817_v11  ;;  %v2816_v62 = vadd.f32 %v2665_v36, %v446_v9  ;;  %v12577_v16 = vpop.f32.mrf.mxu1  ;;  %v466_v11 = vadd.f32 %v11844_v57, %v12543_v29 }
 0x1d6   :  { %v9205_v37 = vpop.f32.mrf.mxu0 }
 0x1d7   :  { %9855 = vpow2.f32 %v7669_v8  ;;  %v7668_v45 = vmul.f32 -1.442695, %v2816_v62  ;;  %v2819_v3 = vadd.f32 %v9205_v37, %v461_v47 }
 0x1d8   :  { %v9844_v48 = vpop.eup %9843  ;;  %v2675_v15 = vpop.f32.mrf.mxu0 }
 0x1d9   :  { %v2871_v4 = vadd.f32 1.0, %v9844_v48  ;;  %9857 = vpow2.f32 %v7668_v45  ;;  %v2818_v13 = vadd.f32 %v2675_v15, %v456_v38  ;;  %v12581_v45 = vpop.f32.mrf.mxu1 }
 0x1da   :  { %v9846_v60 = vpop.eup %9845  ;;  %9859 = vtanh.f32 %v2819_v3  ;;  %v9208_v9 = vpop.f32.mrf.mxu0 }
 0x1db   :  { %9861 = vrcp.f32 %v2871_v4  ;;  %v2870_v49 = vadd.f32 1.0, %v9846_v60  ;;  %v2821_v36 = vadd.f32 %v9208_v9, %v471_v31  ;;  %v12587_v4 = vpop.f32.mrf.mxu1 }
 0x1dc   :  { %v9848_v47 = vpop.eup %9847  ;;  %9863 = vtanh.f32 %v2818_v13  ;;  %v2685_v8 = vpop.f32.mrf.mxu0 }
 0x1dd   :  { %9865 = vrcp.f32 %v2870_v49  ;;  %v2873_v62 = vadd.f32 1.0, %v9848_v47  ;;  %v2820_v19 = vadd.f32 %v2685_v8, %v466_v11  ;;  %v12593_v49 = vpop.permute.xlu1 %247  ;;  %v2333_v8 = vadd.f32 %v12537_v59, %v12401_v51 }
 0x1de   :  { %v9850_v37 = vpop.eup %9849  ;;  %9867 = vtanh.f32 %v2821_v36  ;;  %v12583_v38 = vpop.f32.mrf.mxu0  ;;  %15383 = vst [vmem:[#allocation246_spill] sm:$0xff] %v12593_v49 }
 0x1df   :  { %9869 = vrcp.f32 %v2873_v62  ;;  %v2872_v3 = vadd.f32 1.0, %v9850_v37  ;;  %v12597_v62 = vpop.f32.mrf.mxu1 }
 0x1e0   :  { %v9852_v48 = vpop.eup %9851  ;;  %9871 = vtanh.f32 %v2820_v19  ;;  %v12585_v57 = vpop.f32.mrf.mxu0 }
 0x1e1   :  { %9873 = vrcp.f32 %v2872_v3  ;;  %v2895_v15 = vadd.f32 1.0, %v9852_v48  ;;  %v2328_v3 = vadd.f32 %v12547_v6, %v12415_v33  ;;  %v12603_v51 = vpop.f32.mrf.mxu1  ;;  %v12605_v53 = vpop.permute.xlu1 %242  ;;  %v2338_v6 = vadd.f32 %v12563_v24, %v12461_v18 }
 0x1e2   :  { %v9854_v31 = vpop.eup %9853  ;;  %v12589_v13 = vpop.f32.mrf.mxu0  ;;  %v2368_v18 = vadd.f32 %v12603_v51, %v12515_v52 }
 0x1e3   :  { %9875 = vrcp.f32 %v2895_v15  ;;  %v2894_v60 = vadd.f32 1.0, %v9854_v31 }
 0x1e4   :  { %v9856_v9 = vpop.eup %9855  ;;  %v12591_v11 = vpop.f32.mrf.mxu0 }
 0x1e5   :  { %9877 = vrcp.f32 %v2894_v60  ;;  %v2897_v36 = vadd.f32 1.0, %v9856_v9  ;;  %v2343_v60 = vadd.f32 %v12557_v56, %v12373_v20  ;;  %v2353_v56 = vadd.f32 %v12571_v27, %v12487_v30 }
 0x1e6   :  { %v9858_v47 = vpop.eup %9857  ;;  %v9217_v19 = vpop.f32.mrf.mxu0 }
 0x1e7   :  { %v9860_v37 = vpop.eup %9859  ;;  %9879 = vrcp.f32 %v2897_v36  ;;  %v2896_v48 = vadd.f32 1.0, %v9858_v47  ;;  %v2843_v31 = vadd.f32 %v9217_v19, %v2333_v8 }
 0x1e8   :  { %v9862_v15 = vpop.eup %9861  ;;  %v2715_v29 = vpop.f32.mrf.mxu0 }
 0x1e9   :  { %v9864_v58 = vpop.eup %9863  ;;  %9881 = vrcp.f32 %v2896_v48  ;;  %v2939_v9 = vmul.f32 %v9862_v15, %v9860_v37  ;;  %v2842_v34 = vadd.f32 %v2715_v29, %v2328_v3  ;;  %v7675_v19 = vmul.f32 -1.442695, %v2843_v31  ;;  %v12611_v15 = vpop.f32.mrf.mxu1 }
 0x1ea   :  { %v9866_v59 = vpop.eup %9865  ;;  %v9220_v54 = vpop.f32.mrf.mxu0 }
 0x1eb   :  { %v9868_v41 = vpop.eup %9867  ;;  %v2938_v36 = vmul.f32 %v9866_v59, %v9864_v58  ;;  %v2845_v47 = vadd.f32 %v9220_v54, %v2343_v60  ;;  %v7674_v37 = vmul.f32 -1.442695, %v2842_v34  ;;  %9883 = vpow2.f32 %v7675_v19  ;;  %v12613_v31 = vpop.permute.xlu1 %237 }
 0x1ec   :  { %v9870_v8 = vpop.eup %9869  ;;  %v2725_v33 = vpop.f32.mrf.mxu0 }
 0x1ed   :  { %v9872_v7 = vpop.eup %9871  ;;  %v2941_v29 = vmul.f32 %v9870_v8, %v9868_v41  ;;  %v2844_v3 = vadd.f32 %v2725_v33, %v2338_v6  ;;  %v7677_v20 = vmul.f32 -1.442695, %v2845_v47  ;;  %9885 = vpow2.f32 %v7674_v37  ;;  %v2377_v41 = vpop.f32.mrf.mxu1 }
 0x1ee   :  { %v9874_v48 = vpop.eup %9873  ;;  %v9223_v14 = vpop.f32.mrf.mxu0  ;;  %v2363_v37 = vadd.f32 %v12581_v45, %v12387_v44  ;;  %v2378_v10 = vadd.f32 %v2377_v41, %v12489_v22 }
 0x1ef   :  { %v2940_v50 = vmul.f32 %v9874_v48, %v9872_v7  ;;  %v7676_v46 = vmul.f32 -1.442695, %v2844_v3  ;;  %v2847_v24 = vadd.f32 %v9223_v14, %v2353_v56  ;;  %9887 = vpow2.f32 %v7677_v20  ;;  %v9185_v3 = vpop.f32.mrf.mxu1 }
 0x1f0   :  { %v9876_v58 = vpop.eup %9875  ;;  %v2735_v54 = vpop.f32.mrf.mxu0  ;;  %v2348_v14 = vadd.f32 %v12577_v16, %v12499_v25  ;;  %v2358_v16 = vadd.f32 %v12587_v4, %v12473_v26  ;;  %v2373_v26 = vadd.f32 %v12597_v62, %v12501_v63 }
 0x1f1   :  { %v2935_v60 = vmul.f32 0.0, %v9876_v58  ;;  %v7679_v59 = vmul.f32 -1.442695, %v2847_v24  ;;  %9889 = vpow2.f32 %v7676_v46  ;;  %v12623_v24 = vpop.permute.xlu1 %232 }
 0x1f2   :  { %v9878_v27 = vpop.eup %9877  ;;  %v9226_v33 = vpop.f32.mrf.mxu0  ;;  %v2846_v20 = vadd.f32 %v2735_v54, %v2348_v14 }
 0x1f3   :  { %v2934_v34 = vmul.f32 0.0, %v9878_v27  ;;  %v12615_v6 = vadd.f32 %v2939_v9, %v2935_v60  ;;  %9891 = vpow2.f32 %v7679_v59  ;;  %v2849_v58 = vadd.f32 %v9226_v33, %v2363_v37 }
 0x1f4   :  { %v9880_v47 = vpop.eup %9879  ;;  %v2745_v7 = vpop.f32.mrf.mxu0  ;;  %v7678_v27 = vmul.f32 -1.442695, %v2846_v20 }
 0x1f5   :  { %v2937_v8 = vmul.f32 0.0, %v9880_v47  ;;  %v12619_v19 = vadd.f32 %v2938_v36, %v2934_v34  ;;  %v2387_v36 = vpop.f32.mrf.mxu1  ;;  %v2848_v34 = vadd.f32 %v2745_v7, %v2358_v16  ;;  %v7681_v45 = vmul.f32 -1.442695, %v2849_v58  ;;  %v12631_v14 = vpop.permute.xlu1 %167 }
 0x1f6   :  { %v9882_v56 = vpop.eup %9881  ;;  %v9229_v48 = vpop.f32.mrf.mxu0  ;;  %9893 = vpow2.f32 %v7678_v27  ;;  %v491_v41 = vadd.f32 %v11866_v28, %v12631_v14 }
 0x1f7   :  { %v2936_v9 = vmul.f32 0.0, %v9882_v56  ;;  %v12625_v46 = vadd.f32 %v2941_v29, %v2937_v8  ;;  %v9188_v56 = vpop.f32.mrf.mxu1  ;;  %v7680_v29 = vmul.f32 -1.442695, %v2848_v34  ;;  %9895 = vpow2.f32 %v7681_v45 }
 0x1f8   :  { %v2755_v60 = vpop.f32.mrf.mxu0  ;;  %v9884_v54 = vpop.eup %9883  ;;  %v2403_v27 = vadd.f32 %v9188_v56, %v12593_v49  ;;  %v2383_v45 = vadd.f32 %v12611_v15, %v12475_v55  ;;  %v2393_v56 = vadd.f32 %v9185_v3, %v12613_v31 }
 0x1f9   :  { %v12629_v59 = vadd.f32 %v2940_v50, %v2936_v9  ;;  %v2967_v33 = vadd.f32 1.0, %v9884_v54  ;;  %v2397_v20 = vpop.f32.mrf.mxu1  ;;  %9897 = vpow2.f32 %v7680_v29  ;;  %v12633_v58 = vpop.permute.xlu1 %162  ;;  %v2851_v29 = vadd.f32 %v9229_v48, %v2373_v26 }
 0x1fa   :  { %v9232_v47 = vpop.f32.mrf.mxu0  ;;  %v9886_v25 = vpop.eup %9885  ;;  %v2850_v62 = vadd.f32 %v2755_v60, %v2368_v18 }
 0x1fb   :  { %v2966_v9 = vadd.f32 1.0, %v9886_v25  ;;  %9899 = vrcp.f32 %v2967_v33 }
 0x1fc   :  { %v2765_v44 = vpop.f32.mrf.mxu0  ;;  %v9888_v30 = vpop.eup %9887 }
 0x1fd   :  { %v2969_v7 = vadd.f32 1.0, %v9888_v30  ;;  %v2398_v30 = vadd.f32 %v2397_v20, %v12605_v53  ;;  %9901 = vrcp.f32 %v2966_v9  ;;  %v2852_v52 = vadd.f32 %v2765_v44, %v2378_v10  ;;  %v12645_v15 = vpop.permute.xlu1 %157 }
 0x1fe   :  { %v9235_v8 = vpop.f32.mrf.mxu0  ;;  %v9890_v4 = vpop.eup %9889  ;;  %v2388_v9 = vadd.f32 %v2387_v36, %v12623_v24  ;;  %v2825_v10 = vadd.f32 %v12589_v13, %v491_v41 }
 0x1ff   :  { %v2968_v34 = vadd.f32 1.0, %v9890_v4  ;;  %9903 = vrcp.f32 %v2969_v7  ;;  %v2853_v4 = vadd.f32 %v9232_v47, %v2383_v45  ;;  %v2855_v33 = vadd.f32 %v9235_v8, %v2393_v56 }
 0x200   :  { %v2775_v50 = vpop.f32.mrf.mxu0  ;;  %v9892_v37 = vpop.eup %9891  ;;  %v481_v8 = vadd.f32 %v11850_v23, %v12645_v15 }
 0x201   :  { %v2991_v25 = vadd.f32 1.0, %v9892_v37  ;;  %9905 = vrcp.f32 %v2968_v34  ;;  %v2854_v48 = vadd.f32 %v2775_v50, %v2388_v9  ;;  %v7683_v44 = vmul.f32 -1.442695, %v2855_v33  ;;  %v12655_v28 = vpop.permute.xlu1 %152 }
 0x202   :  { %v9238_v16 = vpop.f32.mrf.mxu0  ;;  %v2823_v7 = vadd.f32 %v12583_v38, %v481_v8 }
 0x203   :  { %v2857_v0 = vadd.f32 %v9238_v16, %v2403_v27  ;;  %9907 = vrcp.f32 %v2991_v25  ;;  %v9894_v26 = vpop.eup %9893  ;;  %v7682_v20 = vmul.f32 -1.442695, %v2854_v48  ;;  %v7673_v16 = vmul.f32 -1.442695, %v2825_v10 }
 0x204   :  { %v2785_v54 = vpop.f32.mrf.mxu0  ;;  %9909 = vtanh.f32 %v2851_v29  ;;  %v2990_v3 = vadd.f32 1.0, %v9894_v26  ;;  %v9896_v60 = vpop.eup %9895  ;;  %v476_v27 = vadd.f32 %v11860_v61, %v12655_v28 }
 0x205   :  { %v2856_v51 = vadd.f32 %v2785_v54, %v2398_v30  ;;  %v7685_v37 = vmul.f32 -1.442695, %v2857_v0  ;;  %9911 = vtanh.f32 %v2850_v62  ;;  %v486_v0 = vadd.f32 %v11876_v1, %v12633_v58 }
 0x206   :  { %9913 = vtanh.f32 %v2853_v4  ;;  %v2993_v36 = vadd.f32 1.0, %v9896_v60  ;;  %v9898_v47 = vpop.eup %9897  ;;  %v2822_v45 = vadd.f32 %v12585_v57, %v476_v27  ;;  %v7671_v54 = vmul.f32 -1.442695, %v2823_v7 }
 0x207   :  { %v7684_v18 = vmul.f32 -1.442695, %v2856_v51  ;;  %9915 = vtanh.f32 %v2852_v52  ;;  %v2824_v52 = vadd.f32 %v12591_v11, %v486_v0  ;;  %v2992_v50 = vadd.f32 1.0, %v9898_v47 }
 0x208   :  { %9917 = vpow2.f32 %v7685_v37  ;;  %v9900_v13 = vpop.eup %9899  ;;  %v7670_v38 = vmul.f32 -1.442695, %v2822_v45 }
 0x209   :  { %9919 = vrcp.f32 %v2990_v3  ;;  %v7672_v25 = vmul.f32 -1.442695, %v2824_v52 }
 0x20a   :  { %9921 = vpow2.f32 %v7684_v18  ;;  %v9902_v1 = vpop.eup %9901 }
 0x20b   :  { %9923 = vrcp.f32 %v2993_v36 }
 0x20c   :  { %9925 = vpow2.f32 %v7683_v44  ;;  %v9904_v34 = vpop.eup %9903 }
 0x20d   :  { %9927 = vrcp.f32 %v2992_v50 }
 0x20e   :  { %v9906_v23 = vpop.eup %9905  ;;  %9929 = vpow2.f32 %v7682_v20 }
 0x20f   :  { %9931 = vpow2.f32 %v7673_v16 }
 0x210   :  { %v9908_v11 = vpop.eup %9907  ;;  %9933 = vpow2.f32 %v7672_v25 }
 0x211   :  { %v9910_v30 = vpop.eup %9909  ;;  %v3031_v56 = vmul.f32 0.0, %v9908_v11  ;;  %9935 = vpow2.f32 %v7671_v54 }
 0x212   :  { %v9912_v29 = vpop.eup %9911  ;;  %v3035_v61 = vmul.f32 %v9910_v30, %v9900_v13  ;;  %9937 = vpow2.f32 %v7670_v38 }
 0x213   :  { %v9914_v62 = vpop.eup %9913  ;;  %v3034_v10 = vmul.f32 %v9912_v29, %v9902_v1 }
 0x214   :  { %v9916_v4 = vpop.eup %9915  ;;  %v12662_v9 = vadd.f32 %v3035_v61, %v3031_v56  ;;  %v3037_v48 = vmul.f32 %v9914_v62, %v9904_v34 }
 0x215   :  { %v9918_v51 = vpop.eup %9917  ;;  %v3036_v47 = vmul.f32 %v9916_v4, %v9906_v23 }
 0x216   :  { %v9920_v33 = vpop.eup %9919  ;;  %v3021_v26 = vadd.f32 1.0, %v9918_v51  ;;  %9939 = vtanh.f32 %v12662_v9 }
 0x217   :  { %v9922_v37 = vpop.eup %9921  ;;  %v3030_v18 = vmul.f32 0.0, %v9920_v33 }
 0x218   :  { %v9924_v57 = vpop.eup %9923  ;;  %v3020_v44 = vadd.f32 1.0, %v9922_v37  ;;  %9941 = vrcp.f32 %v3021_v26 }
 0x219   :  { %v9926_v41 = vpop.eup %9925  ;;  %v3033_v3 = vmul.f32 0.0, %v9924_v57  ;;  %v12667_v20 = vadd.f32 %v3034_v10, %v3030_v18 }
 0x21a   :  { %v9928_v60 = vpop.eup %9927  ;;  %v3019_v52 = vadd.f32 1.0, %v9926_v41 }
 0x21b   :  { %v3032_v0 = vmul.f32 0.0, %v9928_v60  ;;  %v12665_v36 = vadd.f32 %v3037_v48, %v3033_v3  ;;  %v9930_v8 = vpop.eup %9929 }
 0x21c   :  { %v9932_v50 = vpop.eup %9931  ;;  %v3018_v7 = vadd.f32 1.0, %v9930_v8 }
 0x21d   :  { %9943 = vtanh.f32 %v12665_v36  ;;  %v12670_v13 = vadd.f32 %v3036_v47, %v3032_v0  ;;  %v9934_v16 = vpop.eup %9933  ;;  %v2925_v1 = vadd.f32 1.0, %v9932_v50  ;;  %v12720_v50 = vld [vmem:[%s14905_s2 + $0x10] sm:$0xff] }
 0x21e   :  { %9945 = vrcp.f32 %v3020_v44  ;;  %v9936_v27 = vpop.eup %9935  ;;  %v2924_v34 = vadd.f32 1.0, %v9934_v16  ;;  %v12734_v16 = vld [vmem:[%s14905_s2 + $0x20] sm:$0xff] }
 0x21f   :  { %9947 = vtanh.f32 %v12670_v13  ;;  %v9938_v23 = vpop.eup %9937  ;;  %v2923_v45 = vadd.f32 1.0, %v9936_v27  ;;  %v12748_v27 = vld [vmem:[%s14905_s2 + $0x30] sm:$0xff] }
 0x220   :  { %9949 = vrcp.f32 %v3019_v52  ;;  %v2922_v25 = vadd.f32 1.0, %v9938_v23  ;;  %v12713_v52 = vld [vmem:[%s14905_s2 + $0x8] sm:$0xff]  ;;  %v12762_v23 = vld [vmem:[%s14905_s2 + $0x40] sm:$0xff] }
 0x221   :  { %9951 = vtanh.f32 %v12667_v20 }
 0x222   :  { %9953 = vtanh.f32 %v12625_v46 }
 0x223   :  { %9955 = vrcp.f32 %v3018_v7  ;;  %v9940_v11 = vpop.eup %9939  ;;  %v12727_v7 = vld [vmem:[%s14905_s2 + $0x18] sm:$0xff] }
 0x224   :  { %9957 = vrcp.f32 %v2925_v1  ;;  %v12741_v1 = vld [vmem:[%s14905_s2 + $0x28] sm:$0xff] }
 0x225   :  { %9959 = vtanh.f32 %v12629_v59  ;;  %v9942_v54 = vpop.eup %9941 }
 0x226   :  { %9961 = vtanh.f32 %v12615_v6 }
 0x227   :  { %9963 = vrcp.f32 %v2924_v34  ;;  %v12755_v34 = vld [vmem:[%s14905_s2 + $0x38] sm:$0xff] }
 0x228   :  { %9965 = vrcp.f32 %v2923_v45  ;;  %v12769_v45 = vld [vmem:[%s14905_s2 + $0x48] sm:$0xff] }
 0x229   :  { %9967 = vtanh.f32 %v12619_v19 }
 0x22a   :  { %v9944_v30 = vpop.eup %9943  ;;  %9969 = vrcp.f32 %v2922_v25  ;;  %v12776_v25 = vld [vmem:[%s14905_s2 + $0x50] sm:$0xff] }
 0x22b   :  { %v9946_v29 = vpop.eup %9945  ;;  %v12678_v62 = vmul.f32 %v9944_v30, %v9942_v54  ;;  %v12790_v54 = vld [vmem:[%s14905_s2 + $0x60] sm:$0xff]  ;;  %v12797_v30 = vld [vmem:[%s14905_s2 + $0x68] sm:$0xff] }
 0x22c   :  { %v9948_v38 = vpop.eup %9947  ;;  %15392 = vst [vmem:[#allocation255_spill] sm:$0xff] %v12790_v54  ;;  %15393 = vst [vmem:[#allocation256_spill] sm:$0xff] %v12797_v30 }
 0x22d   :  { %15384 = vst [vmem:[#allocation247_spill] sm:$0xff] %v12678_v62  ;;  %v9950_v56 = vpop.eup %9949  ;;  %9239 = vmatprep.subr.mxu1 %v12678_v62  ;;  %v12681_v4 = vmul.f32 %v9948_v38, %v9946_v29  ;;  %v12804_v29 = vld [vmem:[%s14905_s2 + $0x70] sm:$0xff]  ;;  %v12811_v38 = vld [vmem:[%s14905_s2 + $0x78] sm:$0xff] }
 0x22e   :  { %v9952_v51 = vpop.eup %9951  ;;  %9240 = vmatpush3.msra.mxu1 %v12678_v62  ;;  %v12685_v33 = vmul.f32 %v9950_v56, %v9940_v11  ;;  %v12783_v11 = vld [vmem:[%s14905_s2 + $0x58] sm:$0xff]  ;;  %15394 = vst [vmem:[#allocation257_spill] sm:$0xff] %v12804_v29  ;;  %15395 = vst [vmem:[#allocation258_spill] sm:$0xff] %v12811_v38  ;;  %v12818_v56 = vld [vmem:[%s14905_s2 + $0x80] sm:$0xff] }
 0x22f   :  { %15385 = vst [vmem:[#allocation248_spill] sm:$0xff] %v12681_v4  ;;  %v9954_v61 = vpop.eup %9953  ;;  %9241 = vmatprep.subr.mxu1 %v12681_v4  ;;  %15396 = vst [vmem:[#allocation259_spill] sm:$0xff] %v12818_v56 }
 0x230   :  { %15386 = vst [vmem:[#allocation249_spill] sm:$0xff] %v12685_v33  ;;  %v9956_v37 = vpop.eup %9955  ;;  %9242 = vmatpush3.msra.mxu1 %v12681_v4  ;;  %v681_v4 = vadd.f32 %v11760_v35, %v12449_v12  ;;  %v701_v35 = vadd.f32 %v11792_v42, %v12539_v21  ;;  %v15417_v42 = vld [vmem:[#allocation8_spill] sm:$0xff] }
 0x231   :  { %v9958_v57 = vpop.eup %9957  ;;  %9243 = vmatprep.subr.mxu1 %v12685_v33  ;;  %v12689_v26 = vmul.f32 %v9956_v37, %v9952_v51  ;;  %v12825_v51 = vld [vmem:[%s14905_s2 + $0x88] sm:$0xff]  ;;  %v12839_v37 = vld [vmem:[%s14905_s2 + $0x98] sm:$0xff]  ;;  %v15418_v21 = vld [vmem:[#allocation244_spill] sm:$0xff] }
 0x232   :  { %v9960_v41 = vpop.eup %9959  ;;  %9244 = vmatpush3.msra.mxu1 %v12685_v33  ;;  %v12693_v3 = vmul.f32 %v9958_v57, %v9954_v61  ;;  %15397 = vst [vmem:[#allocation260_spill] sm:$0xff] %v12825_v51  ;;  %v12832_v61 = vld [vmem:[%s14905_s2 + $0x90] sm:$0xff]  ;;  %15399 = vst [vmem:[#allocation262_spill] sm:$0xff] %v12839_v37  ;;  %v12846_v57 = vld [vmem:[%s14905_s2 + $0xa0] sm:$0xff] }
 0x233   :  { %15387 = vst [vmem:[#allocation250_spill] sm:$0xff] %v12689_v26  ;;  %v9962_v18 = vpop.eup %9961  ;;  %9245 = vmatprep.subr.mxu1 %v12689_v26  ;;  %15398 = vst [vmem:[#allocation261_spill] sm:$0xff] %v12832_v61  ;;  %v12930_v33 = vld [vmem:[%s14905_s2] sm:$0xff] }
 0x234   :  { %15388 = vst [vmem:[#allocation251_spill] sm:$0xff] %v12693_v3  ;;  %v9964_v48 = vpop.eup %9963  ;;  %9246 = vmatpush3.msra.mxu1 %v12689_v26  ;;  %15400 = vst [vmem:[#allocation263_spill] sm:$0xff] %v12846_v57  ;;  %v12923_v26 = vld [vmem:[%s14905_s2 + $0xf8] sm:$0xff] }
 0x235   :  { %v9966_v60 = vpop.eup %9965  ;;  %9247 = vmatprep.subr.mxu1 %v12693_v3  ;;  %v12697_v10 = vmul.f32 %v9964_v48, %v9960_v41  ;;  %v12853_v41 = vld [vmem:[%s14905_s2 + $0xa8] sm:$0xff]  ;;  %v12867_v48 = vld [vmem:[%s14905_s2 + $0xb8] sm:$0xff]  ;;  %15411 = vst [vmem:[#allocation274_spill] sm:$0xff] %v12923_v26  ;;  %15412 = vst [vmem:[#allocation275_spill] sm:$0xff] %v12930_v33 }
 0x236   :  { %v9968_v44 = vpop.eup %9967  ;;  %9248 = vmatpush3.msra.mxu1 %v12693_v3  ;;  %v12701_v0 = vmul.f32 %v9966_v60, %v9962_v18  ;;  %15401 = vst [vmem:[#allocation264_spill] sm:$0xff] %v12853_v41  ;;  %v12860_v18 = vld [vmem:[%s14905_s2 + $0xb0] sm:$0xff]  ;;  %15403 = vst [vmem:[#allocation266_spill] sm:$0xff] %v12867_v48  ;;  %v12874_v60 = vld [vmem:[%s14905_s2 + $0xc0] sm:$0xff] }
 0x237   :  { %15389 = vst [vmem:[#allocation252_spill] sm:$0xff] %v12697_v10  ;;  %9249 = vmatprep.subr.mxu1 %v12697_v10  ;;  %v9970_v47 = vpop.eup %9969  ;;  %15402 = vst [vmem:[#allocation265_spill] sm:$0xff] %v12860_v18  ;;  %v12916_v3 = vld [vmem:[%s14905_s2 + $0xf0] sm:$0xff] }
 0x238   :  { %15390 = vst [vmem:[#allocation253_spill] sm:$0xff] %v12701_v0  ;;  %9250 = vmatpush3.msra.mxu1 %v12697_v10  ;;  %v12705_v8 = vmul.f32 %v9970_v47, %v9968_v44  ;;  %15404 = vst [vmem:[#allocation267_spill] sm:$0xff] %v12874_v60  ;;  %v12881_v44 = vld [vmem:[%s14905_s2 + $0xc8] sm:$0xff]  ;;  %v12888_v47 = vld [vmem:[%s14905_s2 + $0xd0] sm:$0xff] }
 0x239   :  { %9251 = vmatprep.subr.mxu1 %v12701_v0  ;;  %15405 = vst [vmem:[#allocation268_spill] sm:$0xff] %v12881_v44  ;;  %15406 = vst [vmem:[#allocation269_spill] sm:$0xff] %v12888_v47  ;;  %v12909_v10 = vld [vmem:[%s14905_s2 + $0xe8] sm:$0xff] }
 0x23a   :  { %15391 = vst [vmem:[#allocation254_spill] sm:$0xff] %v12705_v8  ;;  %9252 = vmatpush3.msra.mxu1 %v12701_v0  ;;  %v12902_v0 = vld [vmem:[%s14905_s2 + $0xe0] sm:$0xff]  ;;  %15409 = vst [vmem:[#allocation272_spill] sm:$0xff] %v12909_v10 }
 0x23b   :  { %9253 = vmatprep.subr.mxu1 %v12705_v8  ;;  %15408 = vst [vmem:[#allocation271_spill] sm:$0xff] %v12902_v0  ;;  %15410 = vst [vmem:[#allocation273_spill] sm:$0xff] %v12916_v3 }
 0x23c   :  { %9254 = vmatpush3.msra.mxu1 %v12705_v8  ;;  %v12895_v8 = vld [vmem:[%s14905_s2 + $0xd8] sm:$0xff] }
 0x23d   :  { %9256 = vmatmul.mubr.msk.f32.vlgmr.msra.gmra.mxu1 %vm2472_vm1, %v12713_v52  ;;  %15407 = vst [vmem:[#allocation270_spill] sm:$0xff] %v12895_v8 }
 0x23e   :  { %9258 = vmatprep.mubr.msk.f32.mxu1 %vm2472_vm1, %v12720_v50 }
 0x241   :  { %9259 = vmatmul.mubr.msk.f32.gmra.mxu1 %vm2472_vm1, %v12727_v7 }
 0x242   :  { %9261 = vmatprep.mubr.msk.f32.mxu1 %vm2472_vm1, %v12734_v16 }
 0x245   :  { %9262 = vmatmul.mubr.msk.f32.gmra.mxu1 %vm2472_vm1, %v12741_v1 }
 0x246   :  { %9264 = vmatprep.mubr.msk.f32.mxu1 %vm2472_vm1, %v12748_v27 }
 0x249   :  { %9265 = vmatmul.mubr.msk.f32.gmra.mxu1 %vm2472_vm1, %v12755_v34 }
 0x24a   :  { %9267 = vmatprep.mubr.msk.f32.mxu1 %vm2472_vm1, %v12762_v23 }
 0x24d   :  { %9268 = vmatmul.mubr.msk.f32.gmra.mxu1 %vm2472_vm1, %v12769_v45 }
 0x24e   :  { %9270 = vmatprep.mubr.msk.f32.mxu1 %vm2472_vm1, %v12776_v25 }
 0x251   :  { %9271 = vmatmul.mubr.msk.f32.gmra.mxu1 %vm2472_vm1, %v12783_v11 }
 0x252   :  { %9273 = vmatprep.mubr.msk.f32.mxu1 %vm2472_vm1, %v12790_v54 }
 0x255   :  { %9274 = vmatmul.mubr.msk.f32.gmra.mxu1 %vm2472_vm1, %v12797_v30 }
 0x256   :  { %9276 = vmatprep.mubr.msk.f32.mxu1 %vm2472_vm1, %v12804_v29 }
 0x259   :  { %9277 = vmatmul.mubr.msk.f32.gmra.mxu1 %vm2472_vm1, %v12811_v38 }
 0x25a   :  { %9279 = vmatprep.mubr.msk.f32.mxu1 %vm2472_vm1, %v12818_v56  ;;  %v15434_v56 = vld [vmem:[#allocation219_spill] sm:$0xff] }
 0x25d   :  { %9280 = vmatmul.mubr.msk.f32.gmra.mxu1 %vm2472_vm1, %v12825_v51 }
 0x25e   :  { %9282 = vmatprep.mubr.msk.f32.mxu1 %vm2472_vm1, %v12832_v61 }
 0x261   :  { %9283 = vmatmul.mubr.msk.f32.gmra.mxu1 %vm2472_vm1, %v12839_v37 }
 0x262   :  { %9285 = vmatprep.mubr.msk.f32.mxu1 %vm2472_vm1, %v12846_v57 }
 0x265   :  { %9286 = vmatmul.mubr.msk.f32.gmra.mxu1 %vm2472_vm1, %v12853_v41 }
 0x266   :  { %9288 = vmatprep.mubr.msk.f32.mxu1 %vm2472_vm1, %v12860_v18 }
 0x269   :  { %9289 = vmatmul.mubr.msk.f32.gmra.mxu1 %vm2472_vm1, %v12867_v48 }
 0x26a   :  { %9291 = vmatprep.mubr.msk.f32.mxu1 %vm2472_vm1, %v12874_v60  ;;  %v686_v60 = vadd.f32 %v11788_v5, %v12439_v17  ;;  %v15415_v5 = vld [vmem:[#allocation7_spill] sm:$0xff]  ;;  %v15416_v17 = vld [vmem:[#allocation236_spill] sm:$0xff] }
 0x26d   :  { %9292 = vmatmul.mubr.msk.f32.gmra.mxu1 %vm2472_vm1, %v12881_v44 }
 0x26e   :  { %9294 = vmatprep.mubr.msk.f32.mxu1 %vm2472_vm1, %v12888_v47 }
 0x271   :  { %9295 = vmatmul.mubr.msk.f32.gmra.mxu1 %vm2472_vm1, %v12895_v8 }
 0x272   :  { %9297 = vmatprep.mubr.msk.f32.mxu1 %vm2472_vm1, %v12902_v0 }
 0x275   :  { %9298 = vmatmul.mubr.msk.f32.gmra.mxu1 %vm2472_vm1, %v12909_v10 }
 0x276   :  { %9300 = vmatprep.mubr.msk.f32.mxu1 %vm2472_vm1, %v12916_v3  ;;  %v676_v3 = vadd.f32 %v11772_v2, %v12463_v43  ;;  %v15413_v43 = vld [vmem:[#allocation6_spill] sm:$0xff] }
 0x279   :  { %9301 = vmatmul.mubr.msk.f32.gmra.mxu1 %vm2472_vm1, %v12923_v26  ;;  %v691_v26 = vadd.f32 %v11776_v40, %v12427_v39  ;;  %v696_v40 = vadd.f32 %v15413_v43, %v12551_v32  ;;  %v15414_v39 = vld [vmem:[#allocation230_spill] sm:$0xff]  ;;  %v15419_v43 = vld [vmem:[#allocation9_spill] sm:$0xff] }
 0x27a   :  { %9383 = vmatprep.mubr.msk.f32.mxu1 %vm2472_vm1, %v12930_v33  ;;  %v15420_v32 = vld [vmem:[#allocation245_spill] sm:$0xff] }
 0x2fd   :  { %v9257_v62 = vpop.f32.mrf.mxu1 }
 0x2fe   :  { %v3301_v10 = vadd.f32 %v9257_v62, %v681_v4 }
 0x2ff   :  { %v3125_v0 = vpop.f32.mrf.mxu1 }
 0x300   :  { %v7719_v8 = vmul.f32 -1.442695, %v3301_v10  ;;  %v3300_v47 = vadd.f32 %v3125_v0, %v676_v3 }
 0x301   :  { %v9260_v44 = vpop.f32.mrf.mxu1 }
 0x302   :  { %9971 = vpow2.f32 %v7719_v8  ;;  %v7718_v33 = vmul.f32 -1.442695, %v3300_v47  ;;  %v3303_v48 = vadd.f32 %v9260_v44, %v691_v26  ;;  %v711_v8 = vadd.f32 %v15415_v5, %v15414_v39  ;;  %v15421_v5 = vld [vmem:[#allocation10_spill] sm:$0xff] }
 0x303   :  { %v3135_v18 = vpop.f32.mrf.mxu1 }
 0x304   :  { %9973 = vpow2.f32 %v7718_v33  ;;  %v7721_v2 = vmul.f32 -1.442695, %v3303_v48  ;;  %v3302_v62 = vadd.f32 %v3135_v18, %v686_v60  ;;  %v706_v33 = vadd.f32 %v15417_v42, %v15416_v17  ;;  %v15422_v42 = vld [vmem:[#allocation237_spill] sm:$0xff] }
 0x305   :  { %v9263_v4 = vpop.f32.mrf.mxu1 }
 0x306   :  { %9975 = vpow2.f32 %v7721_v2  ;;  %v7720_v3 = vmul.f32 -1.442695, %v3302_v62  ;;  %v3305_v10 = vadd.f32 %v9263_v4, %v701_v35  ;;  %v721_v2 = vadd.f32 %v15419_v43, %v15418_v21 }
 0x307   :  { %v3145_v0 = vpop.f32.mrf.mxu1 }
 0x308   :  { %9977 = vpow2.f32 %v7720_v3  ;;  %v7723_v26 = vmul.f32 -1.442695, %v3305_v10  ;;  %v3304_v44 = vadd.f32 %v3145_v0, %v696_v40  ;;  %v716_v3 = vadd.f32 %v15421_v5, %v15420_v32 }
 0x309   :  { %v9266_v47 = vpop.f32.mrf.mxu1 }
 0x30a   :  { %9979 = vpow2.f32 %v7723_v26  ;;  %v7722_v18 = vmul.f32 -1.442695, %v3304_v44  ;;  %v3307_v48 = vadd.f32 %v9266_v47, %v711_v8  ;;  %v15423_v26 = vld [vmem:[#allocation11_spill] sm:$0xff] }
 0x30b   :  { %v3155_v60 = vpop.f32.mrf.mxu1  ;;  %v731_v44 = vadd.f32 %v15423_v26, %v15422_v42 }
 0x30c   :  { %9981 = vpow2.f32 %v7722_v18  ;;  %v7725_v35 = vmul.f32 -1.442695, %v3307_v48  ;;  %v3306_v62 = vadd.f32 %v3155_v60, %v706_v33  ;;  %v15424_v48 = vld [vmem:[#allocation242_spill] sm:$0xff]  ;;  %v15425_v33 = vld [vmem:[#allocation12_spill] sm:$0xff] }
 0x30d   :  { %v9269_v4 = vpop.f32.mrf.mxu1  ;;  %v726_v60 = vadd.f32 %v15425_v33, %v15424_v48  ;;  %v15427_v33 = vld [vmem:[#allocation210_spill] sm:$0xff]  ;;  %v15428_v48 = vld [vmem:[#allocation163_spill] sm:$0xff] }
 0x30e   :  { %9983 = vpow2.f32 %v7725_v35  ;;  %v7724_v40 = vmul.f32 -1.442695, %v3306_v62  ;;  %v3309_v10 = vadd.f32 %v9269_v4, %v721_v2 }
 0x30f   :  { %v9972_v0 = vpop.eup %9971  ;;  %v3165_v39 = vpop.f32.mrf.mxu1 }
 0x310   :  { %v3361_v8 = vadd.f32 1.0, %v9972_v0  ;;  %9985 = vpow2.f32 %v7724_v40  ;;  %v3308_v47 = vadd.f32 %v3165_v39, %v716_v3 }
 0x311   :  { %v9974_v17 = vpop.eup %9973  ;;  %9987 = vtanh.f32 %v3309_v10  ;;  %v9272_v18 = vpop.f32.mrf.mxu1 }
 0x312   :  { %9989 = vrcp.f32 %v3361_v8  ;;  %v3360_v43 = vadd.f32 1.0, %v9974_v17  ;;  %v3311_v5 = vadd.f32 %v9272_v18, %v731_v44  ;;  %v15426_v18 = vld [vmem:[#allocation177_spill] sm:$0xff] }
 0x313   :  { %v9976_v35 = vpop.eup %9975  ;;  %9991 = vtanh.f32 %v3308_v47  ;;  %v3175_v2 = vpop.f32.mrf.mxu1 }
 0x314   :  { %9993 = vrcp.f32 %v3360_v43  ;;  %v3363_v62 = vadd.f32 1.0, %v9976_v35  ;;  %v3310_v4 = vadd.f32 %v3175_v2, %v726_v60  ;;  %v2071_v60 = vadd.f32 %v15427_v33, %v15426_v18 }
 0x315   :  { %v9978_v32 = vpop.eup %9977  ;;  %9995 = vtanh.f32 %v3311_v5  ;;  %v12958_v0 = vpop.f32.mrf.mxu1 }
 0x316   :  { %9997 = vrcp.f32 %v3363_v62  ;;  %v3362_v39 = vadd.f32 1.0, %v9978_v32 }
 0x317   :  { %v9980_v3 = vpop.eup %9979  ;;  %9999 = vtanh.f32 %v3310_v4  ;;  %v12960_v40 = vpop.f32.mrf.mxu1 }
 0x318   :  { %10001 = vrcp.f32 %v3362_v39  ;;  %v3385_v10 = vadd.f32 1.0, %v9980_v3 }
 0x319   :  { %v9982_v17 = vpop.eup %9981  ;;  %v12962_v26 = vpop.f32.mrf.mxu1 }
 0x31a   :  { %10003 = vrcp.f32 %v3385_v10  ;;  %v3384_v44 = vadd.f32 1.0, %v9982_v17  ;;  %v15429_v10 = vld [vmem:[#allocation215_spill] sm:$0xff] }
 0x31b   :  { %v9984_v8 = vpop.eup %9983  ;;  %v12964_v47 = vpop.f32.mrf.mxu1  ;;  %v2081_v17 = vadd.f32 %v15429_v10, %v15428_v48  ;;  %v15435_v10 = vld [vmem:[#allocation218_spill] sm:$0xff] }
 0x31c   :  { %10005 = vrcp.f32 %v3384_v44  ;;  %v3387_v43 = vadd.f32 1.0, %v9984_v8  ;;  %v15430_v44 = vld [vmem:[#allocation184_spill] sm:$0xff] }
 0x31d   :  { %v9986_v32 = vpop.eup %9985  ;;  %v9281_v5 = vpop.f32.mrf.mxu1  ;;  %v15431_v8 = vld [vmem:[#allocation212_spill] sm:$0xff] }
 0x31e   :  { %v9988_v35 = vpop.eup %9987  ;;  %10007 = vrcp.f32 %v3387_v43  ;;  %v3386_v2 = vadd.f32 1.0, %v9986_v32  ;;  %v3333_v62 = vadd.f32 %v9281_v5, %v2071_v60  ;;  %v2066_v18 = vadd.f32 %v15431_v8, %v15430_v44  ;;  %v15432_v60 = vld [vmem:[#allocation207_spill] sm:$0xff]  ;;  %v15433_v5 = vld [vmem:[#allocation216_spill] sm:$0xff] }
 0x31f   :  { %v9990_v4 = vpop.eup %9989  ;;  %v3205_v39 = vpop.f32.mrf.mxu1  ;;  %v2076_v37 = vadd.f32 %v15433_v5, %v15432_v60 }
 0x320   :  { %v9992_v3 = vpop.eup %9991  ;;  %10009 = vrcp.f32 %v3386_v2  ;;  %v3429_v42 = vmul.f32 %v9990_v4, %v9988_v35  ;;  %v7731_v21 = vmul.f32 -1.442695, %v3333_v62  ;;  %v2091_v2 = vadd.f32 %v15435_v10, %v15434_v56 }
 0x321   :  { %v9994_v12 = vpop.eup %9993  ;;  %v9284_v41 = vpop.f32.mrf.mxu1  ;;  %v3332_v62 = vadd.f32 %v3205_v39, %v2066_v18 }
 0x322   :  { %v9996_v33 = vpop.eup %9995  ;;  %v3428_v57 = vmul.f32 %v9994_v12, %v9992_v3  ;;  %10011 = vpow2.f32 %v7731_v21  ;;  %v3335_v43 = vadd.f32 %v9284_v41, %v2081_v17 }
 0x323   :  { %v9998_v32 = vpop.eup %9997  ;;  %v3215_v61 = vpop.f32.mrf.mxu1  ;;  %v7730_v17 = vmul.f32 -1.442695, %v3332_v62 }
 0x324   :  { %v10000_v51 = vpop.eup %9999  ;;  %v3431_v35 = vmul.f32 %v9998_v32, %v9996_v33  ;;  %v7733_v4 = vmul.f32 -1.442695, %v3335_v43  ;;  %v3334_v38 = vadd.f32 %v3215_v61, %v2076_v37  ;;  %v15436_v61 = vld [vmem:[#allocation224_spill] sm:$0xff]  ;;  %v15438_v43 = vld [vmem:[#allocation170_spill] sm:$0xff] }
 0x325   :  { %v10002_v48 = vpop.eup %10001  ;;  %v9287_v29 = vpop.f32.mrf.mxu1  ;;  %v15437_v37 = vld [vmem:[#allocation220_spill] sm:$0xff]  ;;  %v15439_v32 = vld [vmem:[#allocation222_spill] sm:$0xff] }
 0x326   :  { %v3430_v30 = vmul.f32 %v10002_v48, %v10000_v51  ;;  %10013 = vpow2.f32 %v7733_v4  ;;  %v3337_v12 = vadd.f32 %v9287_v29, %v2091_v2  ;;  %v7732_v60 = vmul.f32 -1.442695, %v3334_v38  ;;  %v15440_v4 = vld [vmem:[#allocation213_spill] sm:$0xff] }
 0x327   :  { %v10004_v21 = vpop.eup %10003  ;;  %v3225_v41 = vpop.f32.mrf.mxu1  ;;  %v2086_v51 = vadd.f32 %v15437_v37, %v15436_v61  ;;  %v2101_v38 = vadd.f32 %v15439_v32, %v15438_v43 }
 0x328   :  { %v3425_v3 = vmul.f32 %v10004_v21, %v12615_v6  ;;  %v7735_v8 = vmul.f32 -1.442695, %v3337_v12  ;;  %v15441_v12 = vld [vmem:[#allocation223_spill] sm:$0xff] }
 0x329   :  { %v10006_v5 = vpop.eup %10005  ;;  %v9290_v44 = vpop.f32.mrf.mxu1  ;;  %v2096_v21 = vadd.f32 %v15441_v12, %v15440_v4 }
 0x32a   :  { %v12977_v54 = vadd.f32 %v3429_v42, %v3425_v3  ;;  %v3424_v18 = vmul.f32 %v10006_v5, %v12619_v19  ;;  %10015 = vpow2.f32 %v7735_v8  ;;  %v3336_v42 = vadd.f32 %v3225_v41, %v2086_v51 }
 0x32b   :  { %v10008_v39 = vpop.eup %10007  ;;  %v3235_v48 = vpop.f32.mrf.mxu1  ;;  %10017 = vpow2.f32 %v7730_v17 }
 0x32c   :  { %v12982_v29 = vadd.f32 %v3428_v57, %v3424_v18  ;;  %v3427_v33 = vmul.f32 %v10008_v39, %v12625_v46  ;;  %10019 = vpow2.f32 %v7732_v60  ;;  %v3339_v57 = vadd.f32 %v9290_v44, %v2101_v38  ;;  %v15443_v44 = vld [vmem:[#allocation229_spill] sm:$0xff] }
 0x32d   :  { %v10010_v6 = vpop.eup %10009  ;;  %v9293_v10 = vpop.f32.mrf.mxu1  ;;  %v7734_v46 = vmul.f32 -1.442695, %v3336_v42  ;;  %v3338_v17 = vadd.f32 %v3235_v48, %v2096_v21  ;;  %v15444_v21 = vld [vmem:[#allocation239_spill] sm:$0xff] }
 0x32e   :  { %v12987_v2 = vadd.f32 %v3431_v35, %v3427_v33  ;;  %v3426_v19 = vmul.f32 %v10010_v6, %v12629_v59  ;;  %v7737_v60 = vmul.f32 -1.442695, %v3339_v57  ;;  %v15442_v35 = vld [vmem:[#allocation226_spill] sm:$0xff]  ;;  %v2141_v57 = vadd.f32 %v15444_v21, %v12593_v49 }
 0x32f   :  { %v10012_v62 = vpop.eup %10011  ;;  %v3245_v3 = vpop.f32.mrf.mxu1  ;;  %v2111_v51 = vadd.f32 %v15442_v35, %v12501_v63  ;;  %10021 = vpow2.f32 %v7734_v46  ;;  %v7736_v59 = vmul.f32 -1.442695, %v3338_v17  ;;  %v15445_v17 = vld [vmem:[#allocation231_spill] sm:$0xff] }
 0x330   :  { %v12992_v8 = vadd.f32 %v3430_v30, %v3426_v19  ;;  %v3457_v18 = vadd.f32 1.0, %v10012_v62  ;;  %v2121_v30 = vadd.f32 %v15443_v44, %v12475_v55 }
 0x331   :  { %v9296_v5 = vpop.f32.mrf.mxu1  ;;  %v3341_v32 = vadd.f32 %v9293_v10, %v2111_v51  ;;  %v15448_v51 = vld [vmem:[#allocation232_spill] sm:$0xff] }
 0x332   :  { %10023 = vrcp.f32 %v3457_v18  ;;  %v3343_v19 = vadd.f32 %v9296_v5, %v2121_v30  ;;  %v15446_v18 = vld [vmem:[#allocation227_spill] sm:$0xff] }
 0x333   :  { %v10014_v39 = vpop.eup %10013  ;;  %v3255_v41 = vpop.f32.mrf.mxu1  ;;  %10025 = vpow2.f32 %v7737_v60  ;;  %v15447_v60 = vld [vmem:[#allocation240_spill] sm:$0xff] }
 0x334   :  { %v3459_v37 = vadd.f32 1.0, %v10014_v39  ;;  %v2106_v39 = vadd.f32 %v15446_v18, %v15445_v17  ;;  %v2136_v10 = vadd.f32 %v15447_v60, %v12605_v53  ;;  %v15450_v18 = vld [vmem:[#allocation235_spill] sm:$0xff] }
 0x335   :  { %v9299_v33 = vpop.f32.mrf.mxu1  ;;  %v2126_v17 = vadd.f32 %v15450_v18, %v12623_v24 }
 0x336   :  { %10027 = vrcp.f32 %v3459_v37  ;;  %v3340_v30 = vadd.f32 %v3245_v3, %v2106_v39  ;;  %v15452_v39 = vld [vmem:[#allocation17_spill] sm:$0xff] }
 0x337   :  { %v10016_v6 = vpop.eup %10015  ;;  %v3265_v48 = vpop.f32.mrf.mxu1  ;;  %10029 = vpow2.f32 %v7736_v59  ;;  %v2116_v59 = vadd.f32 %v15448_v51, %v12489_v22 }
 0x338   :  { %v3481_v38 = vadd.f32 1.0, %v10016_v6  ;;  %v10018_v42 = vpop.eup %10017  ;;  %v15449_v6 = vld [vmem:[#allocation234_spill] sm:$0xff]  ;;  %v3344_v51 = vadd.f32 %v3265_v48, %v2126_v17 }
 0x339   :  { %v9302_v62 = vpop.f32.mrf.mxu1  ;;  %v10020_v12 = vpop.eup %10019  ;;  %v3456_v35 = vadd.f32 1.0, %v10018_v42  ;;  %v2131_v44 = vadd.f32 %v15449_v6, %v12613_v31  ;;  %v15454_v6 = vld [vmem:[#allocation14_spill] sm:$0xff] }
 0x33a   :  { %10031 = vrcp.f32 %v3481_v38  ;;  %v3347_v37 = vadd.f32 %v9302_v62, %v2141_v57  ;;  %v3458_v5 = vadd.f32 1.0, %v10020_v12  ;;  %v15451_v62 = vld [vmem:[#allocation15_spill] sm:$0xff] }
 0x33b   :  { %10033 = vtanh.f32 %v3341_v32  ;;  %v3275_v46 = vpop.f32.mrf.mxu1  ;;  %v3342_v32 = vadd.f32 %v3255_v41, %v2116_v59  ;;  %v3345_v21 = vadd.f32 %v9299_v33, %v2131_v44  ;;  %v751_v57 = vadd.f32 %v15451_v62, %v12631_v14  ;;  %v15453_v59 = vld [vmem:[#allocation13_spill] sm:$0xff] }
 0x33c   :  { %10035 = vtanh.f32 %v3343_v19  ;;  %v3346_v38 = vadd.f32 %v3275_v46, %v2136_v10  ;;  %v7741_v49 = vmul.f32 -1.442695, %v3347_v37  ;;  %v10022_v42 = vpop.eup %10021  ;;  %v746_v10 = vadd.f32 %v15452_v39, %v12633_v58 }
 0x33d   :  { %10037 = vrcp.f32 %v3456_v35  ;;  %v3480_v60 = vadd.f32 1.0, %v10022_v42  ;;  %v3315_v41 = vadd.f32 %v12962_v26, %v751_v57  ;;  %v7739_v46 = vmul.f32 -1.442695, %v3345_v21 }
 0x33e   :  { %10039 = vrcp.f32 %v3458_v5  ;;  %v7740_v12 = vmul.f32 -1.442695, %v3346_v38  ;;  %v741_v5 = vadd.f32 %v15453_v59, %v12645_v15  ;;  %v736_v44 = vadd.f32 %v15454_v6, %v12655_v28 }
 0x33f   :  { %10041 = vtanh.f32 %v3340_v30  ;;  %v10024_v19 = vpop.eup %10023  ;;  %v3314_v17 = vadd.f32 %v12964_v47, %v746_v10 }
 0x340   :  { %10043 = vtanh.f32 %v3342_v32  ;;  %v10026_v3 = vpop.eup %10025  ;;  %v3313_v38 = vadd.f32 %v12958_v0, %v741_v5  ;;  %v7729_v32 = vmul.f32 -1.442695, %v3315_v41  ;;  %v3312_v62 = vadd.f32 %v12960_v40, %v736_v44 }
 0x341   :  { %10045 = vpow2.f32 %v7741_v49  ;;  %v3483_v35 = vadd.f32 1.0, %v10026_v3  ;;  %v7738_v49 = vmul.f32 -1.442695, %v3344_v51  ;;  %v7728_v57 = vmul.f32 -1.442695, %v3314_v17 }
 0x342   :  { %10047 = vrcp.f32 %v3480_v60  ;;  %v7727_v47 = vmul.f32 -1.442695, %v3313_v38  ;;  %v7726_v0 = vmul.f32 -1.442695, %v3312_v62 }
 0x343   :  { %v10028_v33 = vpop.eup %10027  ;;  %10049 = vpow2.f32 %v7740_v12 }
 0x344   :  { %v10030_v37 = vpop.eup %10029  ;;  %10051 = vrcp.f32 %v3483_v35 }
 0x345   :  { %v3482_v26 = vadd.f32 1.0, %v10030_v37  ;;  %10053 = vpow2.f32 %v7739_v46 }
 0x347   :  { %v10032_v48 = vpop.eup %10031  ;;  %10055 = vrcp.f32 %v3482_v26 }
 0x348   :  { %v10034_v30 = vpop.eup %10033  ;;  %v3521_v21 = vmul.f32 %v10032_v48, %v12662_v9  ;;  %10057 = vpow2.f32 %v7738_v49 }
 0x349   :  { %v3525_v18 = vmul.f32 %v10034_v30, %v10024_v19  ;;  %v10036_v42 = vpop.eup %10035  ;;  %10059 = vpow2.f32 %v7729_v32 }
 0x34a   :  { %v3527_v60 = vmul.f32 %v10036_v42, %v10028_v33  ;;  %v10038_v51 = vpop.eup %10037  ;;  %10061 = vpow2.f32 %v7728_v57 }
 0x34b   :  { %v13023_v12 = vadd.f32 %v3525_v18, %v3521_v21  ;;  %v10040_v3 = vpop.eup %10039  ;;  %10063 = vpow2.f32 %v7727_v47 }
 0x34c   :  { %v10042_v39 = vpop.eup %10041  ;;  %10065 = vpow2.f32 %v7726_v0 }
 0x34d   :  { %v10044_v41 = vpop.eup %10043  ;;  %v3524_v5 = vmul.f32 %v10042_v39, %v10038_v51  ;;  %10067 = vtanh.f32 %v13023_v12 }
 0x34e   :  { %v10046_v9 = vpop.eup %10045  ;;  %v3526_v17 = vmul.f32 %v10044_v41, %v10040_v3 }
 0x34f   :  { %v10048_v46 = vpop.eup %10047  ;;  %v3511_v40 = vadd.f32 1.0, %v10046_v9 }
 0x350   :  { %v10050_v19 = vpop.eup %10049  ;;  %v3520_v37 = vmul.f32 %v10048_v46, %v12667_v20 }
 0x351   :  { %v10052_v10 = vpop.eup %10051  ;;  %v3510_v6 = vadd.f32 1.0, %v10050_v19  ;;  %10069 = vrcp.f32 %v3511_v40 }
 0x352   :  { %v10054_v35 = vpop.eup %10053  ;;  %v3523_v33 = vmul.f32 %v10052_v10, %v12665_v36  ;;  %v13031_v38 = vadd.f32 %v3524_v5, %v3520_v37 }
 0x353   :  { %v3509_v49 = vadd.f32 1.0, %v10054_v35 }
 0x354   :  { %v10056_v59 = vpop.eup %10055  ;;  %v13028_v44 = vadd.f32 %v3527_v60, %v3523_v33 }
 0x355   :  { %v3522_v48 = vmul.f32 %v10056_v59, %v12670_v13  ;;  %v10058_v26 = vpop.eup %10057 }
 0x356   :  { %v10060_v30 = vpop.eup %10059  ;;  %10071 = vtanh.f32 %v13028_v44  ;;  %v3508_v36 = vadd.f32 1.0, %v10058_v26 }
 0x357   :  { %v13034_v20 = vadd.f32 %v3526_v17, %v3522_v48  ;;  %10073 = vrcp.f32 %v3510_v6  ;;  %v10062_v32 = vpop.eup %10061  ;;  %v3415_v21 = vadd.f32 1.0, %v10060_v30 }
 0x358   :  { %v10064_v18 = vpop.eup %10063  ;;  %v3414_v13 = vadd.f32 1.0, %v10062_v32  ;;  %v15474_v32 = vld [vmem:[#allocation266_spill] sm:$0xff] }
 0x359   :  { %10075 = vtanh.f32 %v13034_v20  ;;  %v10066_v42 = vpop.eup %10065  ;;  %v3413_v62 = vadd.f32 1.0, %v10064_v18  ;;  %v15476_v18 = vld [vmem:[#allocation268_spill] sm:$0xff] }
 0x35a   :  { %10077 = vrcp.f32 %v3509_v49  ;;  %v3412_v57 = vadd.f32 1.0, %v10066_v42  ;;  %v10068_v60 = vpop.eup %10067  ;;  %v15478_v42 = vld [vmem:[#allocation270_spill] sm:$0xff] }
 0x35b   :  { %10079 = vtanh.f32 %v13031_v38 }
 0x35c   :  { %10081 = vtanh.f32 %v12987_v2 }
 0x35d   :  { %10083 = vrcp.f32 %v3508_v36 }
 0x35e   :  { %10085 = vrcp.f32 %v3415_v21  ;;  %v10070_v47 = vpop.eup %10069  ;;  %v15475_v21 = vld [vmem:[#allocation267_spill] sm:$0xff] }
 0x35f   :  { %10087 = vtanh.f32 %v12992_v8 }
 0x360   :  { %10089 = vtanh.f32 %v12977_v54 }
 0x361   :  { %10091 = vrcp.f32 %v3414_v13  ;;  %v15477_v13 = vld [vmem:[#allocation269_spill] sm:$0xff] }
 0x362   :  { %10093 = vrcp.f32 %v3413_v62  ;;  %v15479_v62 = vld [vmem:[#allocation271_spill] sm:$0xff] }
 0x363   :  { %10095 = vtanh.f32 %v12982_v29  ;;  %v10072_v51 = vpop.eup %10071 }
 0x364   :  { %v10074_v3 = vpop.eup %10073  ;;  %10097 = vrcp.f32 %v3412_v57  ;;  %v13042_v39 = vmul.f32 %v10072_v51, %v10070_v47  ;;  %v15480_v57 = vld [vmem:[#allocation272_spill] sm:$0xff]  ;;  %v15482_v47 = vld [vmem:[#allocation274_spill] sm:$0xff]  ;;  %v15483_v51 = vld [vmem:[#allocation275_spill] sm:$0xff] }
 0x366   :  { %15455 = vst [vmem:[#allocation6_spill] sm:$0xff] %v13042_v39  ;;  %v10076_v0 = vpop.eup %10075  ;;  %9303 = vmatprep.subr.mxu0 %v13042_v39 }
 0x367   :  { %v10078_v41 = vpop.eup %10077  ;;  %v13045_v9 = vmul.f32 %v10076_v0, %v10074_v3  ;;  %9304 = vmatpush3.msra.mxu0 %v13042_v39  ;;  %v15484_v3 = vld [vmem:[#allocation201_spill] sm:$0xff]  ;;  %v15485_v0 = vld [vmem:[#allocation48_spill] sm:$0xff] }
 0x368   :  { %v10080_v46 = vpop.eup %10079  ;;  %v13049_v10 = vmul.f32 %v10078_v41, %v10068_v60  ;;  %v15481_v60 = vld [vmem:[#allocation273_spill] sm:$0xff]  ;;  %v943_v41 = vadd.f32 %v15485_v0, %v15484_v3  ;;  %v15497_v0 = vld [vmem:[#allocation60_spill] sm:$0xff] }
 0x369   :  { %15456 = vst [vmem:[#allocation7_spill] sm:$0xff] %v13045_v9  ;;  %v10082_v19 = vpop.eup %10081  ;;  %9305 = vmatprep.subr.mxu0 %v13045_v9 }
 0x36a   :  { %15457 = vst [vmem:[#allocation8_spill] sm:$0xff] %v13049_v10  ;;  %v10084_v40 = vpop.eup %10083  ;;  %9306 = vmatpush3.msra.mxu0 %v13045_v9 }
 0x36b   :  { %v10086_v35 = vpop.eup %10085  ;;  %9307 = vmatprep.subr.mxu0 %v13049_v10  ;;  %v13053_v37 = vmul.f32 %v10084_v40, %v10080_v46  ;;  %v15487_v40 = vld [vmem:[#allocation50_spill] sm:$0xff] }
 0x36c   :  { %v10088_v33 = vpop.eup %10087  ;;  %9308 = vmatpush3.msra.mxu0 %v13049_v10  ;;  %v13057_v5 = vmul.f32 %v10086_v35, %v10082_v19  ;;  %v15486_v19 = vld [vmem:[#allocation208_spill] sm:$0xff] }
 0x36d   :  { %15458 = vst [vmem:[#allocation9_spill] sm:$0xff] %v13053_v37  ;;  %v10090_v59 = vpop.eup %10089  ;;  %9309 = vmatprep.subr.mxu0 %v13053_v37  ;;  %v938_v35 = vadd.f32 %v15487_v40, %v15486_v19 }
 0x36e   :  { %15459 = vst [vmem:[#allocation10_spill] sm:$0xff] %v13057_v5  ;;  %v10092_v6 = vpop.eup %10091  ;;  %9310 = vmatpush3.msra.mxu0 %v13053_v37 }
 0x36f   :  { %v10094_v48 = vpop.eup %10093  ;;  %9311 = vmatprep.subr.mxu0 %v13057_v5  ;;  %v13061_v17 = vmul.f32 %v10092_v6, %v10088_v33  ;;  %v15488_v6 = vld [vmem:[#allocation190_spill] sm:$0xff] }
 0x370   :  { %v10096_v26 = vpop.eup %10095  ;;  %9312 = vmatpush3.msra.mxu0 %v13057_v5  ;;  %v13065_v49 = vmul.f32 %v10094_v48, %v10090_v59  ;;  %v15489_v48 = vld [vmem:[#allocation52_spill] sm:$0xff] }
 0x371   :  { %15460 = vst [vmem:[#allocation11_spill] sm:$0xff] %v13061_v17  ;;  %9313 = vmatprep.subr.mxu0 %v13061_v17  ;;  %v10098_v30 = vpop.eup %10097 }
 0x372   :  { %15461 = vst [vmem:[#allocation12_spill] sm:$0xff] %v13065_v49  ;;  %9314 = vmatpush3.msra.mxu0 %v13061_v17  ;;  %v13069_v36 = vmul.f32 %v10098_v30, %v10096_v26  ;;  %v953_v26 = vadd.f32 %v15489_v48, %v15488_v6 }
 0x373   :  { %9315 = vmatprep.subr.mxu0 %v13065_v49 }
 0x374   :  { %15462 = vst [vmem:[#allocation210_spill] sm:$0xff] %v13069_v36  ;;  %9316 = vmatpush3.msra.mxu0 %v13065_v49 }
 0x375   :  { %9317 = vmatprep.subr.mxu0 %v13069_v36 }
 0x376   :  { %9318 = vmatpush3.msra.mxu0 %v13069_v36 }
 0x377   :  { %9320 = vmatmul.mubr.msk.f32.vlgmr.msra.gmra.mxu0 %vm2472_vm1, %v12713_v52  ;;  %v15463_v52 = vld [vmem:[#allocation255_spill] sm:$0xff] }
 0x378   :  { %9322 = vmatprep.mubr.msk.f32.mxu0 %vm2472_vm1, %v12720_v50  ;;  %v15464_v50 = vld [vmem:[#allocation256_spill] sm:$0xff] }
 0x37b   :  { %9323 = vmatmul.mubr.msk.f32.gmra.mxu0 %vm2472_vm1, %v12727_v7  ;;  %v15465_v7 = vld [vmem:[#allocation257_spill] sm:$0xff] }
 0x37c   :  { %9325 = vmatprep.mubr.msk.f32.mxu0 %vm2472_vm1, %v12734_v16  ;;  %v15466_v16 = vld [vmem:[#allocation258_spill] sm:$0xff] }
 0x37f   :  { %9326 = vmatmul.mubr.msk.f32.gmra.mxu0 %vm2472_vm1, %v12741_v1  ;;  %v15467_v1 = vld [vmem:[#allocation259_spill] sm:$0xff] }
 0x380   :  { %9328 = vmatprep.mubr.msk.f32.mxu0 %vm2472_vm1, %v12748_v27  ;;  %v15468_v27 = vld [vmem:[#allocation260_spill] sm:$0xff] }
 0x383   :  { %9329 = vmatmul.mubr.msk.f32.gmra.mxu0 %vm2472_vm1, %v12755_v34  ;;  %v15469_v34 = vld [vmem:[#allocation261_spill] sm:$0xff] }
 0x384   :  { %9331 = vmatprep.mubr.msk.f32.mxu0 %vm2472_vm1, %v12762_v23  ;;  %v15470_v23 = vld [vmem:[#allocation262_spill] sm:$0xff] }
 0x387   :  { %9332 = vmatmul.mubr.msk.f32.gmra.mxu0 %vm2472_vm1, %v12769_v45  ;;  %v15471_v45 = vld [vmem:[#allocation263_spill] sm:$0xff] }
 0x388   :  { %9334 = vmatprep.mubr.msk.f32.mxu0 %vm2472_vm1, %v12776_v25  ;;  %v15472_v25 = vld [vmem:[#allocation264_spill] sm:$0xff] }
 0x38b   :  { %9335 = vmatmul.mubr.msk.f32.gmra.mxu0 %vm2472_vm1, %v12783_v11  ;;  %v15473_v11 = vld [vmem:[#allocation265_spill] sm:$0xff] }
 0x38c   :  { %9337 = vmatprep.mubr.msk.f32.mxu0 %vm2472_vm1, %v15463_v52 }
 0x38f   :  { %9338 = vmatmul.mubr.msk.f32.gmra.mxu0 %vm2472_vm1, %v15464_v50 }
 0x390   :  { %9340 = vmatprep.mubr.msk.f32.mxu0 %vm2472_vm1, %v15465_v7  ;;  %v15490_v7 = vld [vmem:[#allocation196_spill] sm:$0xff] }
 0x393   :  { %9341 = vmatmul.mubr.msk.f32.gmra.mxu0 %vm2472_vm1, %v15466_v16  ;;  %v15491_v16 = vld [vmem:[#allocation54_spill] sm:$0xff] }
 0x394   :  { %9343 = vmatprep.mubr.msk.f32.mxu0 %vm2472_vm1, %v15467_v1  ;;  %v948_v1 = vadd.f32 %v15491_v16, %v15490_v7  ;;  %v15501_v16 = vld [vmem:[#allocation64_spill] sm:$0xff] }
 0x397   :  { %9344 = vmatmul.mubr.msk.f32.gmra.mxu0 %vm2472_vm1, %v15468_v27 }
 0x398   :  { %9346 = vmatprep.mubr.msk.f32.mxu0 %vm2472_vm1, %v15469_v34 }
 0x39b   :  { %9347 = vmatmul.mubr.msk.f32.gmra.mxu0 %vm2472_vm1, %v15470_v23 }
 0x39c   :  { %9349 = vmatprep.mubr.msk.f32.mxu0 %vm2472_vm1, %v15471_v45  ;;  %v15492_v45 = vld [vmem:[#allocation241_spill] sm:$0xff] }
 0x39f   :  { %9350 = vmatmul.mubr.msk.f32.gmra.mxu0 %vm2472_vm1, %v15472_v25  ;;  %v15493_v25 = vld [vmem:[#allocation56_spill] sm:$0xff] }
 0x3a0   :  { %9352 = vmatprep.mubr.msk.f32.mxu0 %vm2472_vm1, %v15473_v11  ;;  %v963_v11 = vadd.f32 %v15493_v25, %v15492_v45  ;;  %v15502_v25 = vld [vmem:[#allocation245_spill] sm:$0xff] }
 0x3a3   :  { %9353 = vmatmul.mubr.msk.f32.gmra.mxu0 %vm2472_vm1, %v15474_v32 }
 0x3a4   :  { %9355 = vmatprep.mubr.msk.f32.mxu0 %vm2472_vm1, %v15475_v21 }
 0x3a7   :  { %9356 = vmatmul.mubr.msk.f32.gmra.mxu0 %vm2472_vm1, %v15476_v18 }
 0x3a8   :  { %9358 = vmatprep.mubr.msk.f32.mxu0 %vm2472_vm1, %v15477_v13  ;;  %v15494_v13 = vld [vmem:[#allocation243_spill] sm:$0xff] }
 0x3ab   :  { %9359 = vmatmul.mubr.msk.f32.gmra.mxu0 %vm2472_vm1, %v15478_v42  ;;  %v15495_v42 = vld [vmem:[#allocation58_spill] sm:$0xff] }
 0x3ac   :  { %9361 = vmatprep.mubr.msk.f32.mxu0 %vm2472_vm1, %v15479_v62  ;;  %v958_v62 = vadd.f32 %v15495_v42, %v15494_v13 }
 0x3af   :  { %9362 = vmatmul.mubr.msk.f32.gmra.mxu0 %vm2472_vm1, %v15480_v57 }
 0x3b0   :  { %9364 = vmatprep.mubr.msk.f32.mxu0 %vm2472_vm1, %v15481_v60 }
 0x3b3   :  { %9365 = vmatmul.mubr.msk.f32.gmra.mxu0 %vm2472_vm1, %v15482_v47 }
 0x3b4   :  { %9447 = vmatprep.mubr.msk.f32.mxu0 %vm2472_vm1, %v15483_v51  ;;  %v15496_v51 = vld [vmem:[#allocation230_spill] sm:$0xff] }
 0x437   :  { %v9321_v46 = vpop.f32.mrf.mxu0 }
 0x438   :  { %v3792_v33 = vadd.f32 %v9321_v46, %v943_v41  ;;  %v973_v41 = vadd.f32 %v15497_v0, %v15496_v51 }
 0x439   :  { %v3616_v59 = vpop.f32.mrf.mxu0 }
 0x43a   :  { %v7775_v30 = vmul.f32 -1.442695, %v3792_v33  ;;  %v3791_v52 = vadd.f32 %v3616_v59, %v938_v35  ;;  %v15498_v33 = vld [vmem:[#allocation236_spill] sm:$0xff]  ;;  %v15499_v59 = vld [vmem:[#allocation62_spill] sm:$0xff] }
 0x43b   :  { %v9324_v50 = vpop.f32.mrf.mxu0  ;;  %v968_v48 = vadd.f32 %v15499_v59, %v15498_v33  ;;  %v15507_v59 = vld [vmem:[#allocation70_spill] sm:$0xff] }
 0x43c   :  { %10099 = vpow2.f32 %v7775_v30  ;;  %v7774_v27 = vmul.f32 -1.442695, %v3791_v52  ;;  %v3794_v34 = vadd.f32 %v9324_v50, %v953_v26  ;;  %v15500_v50 = vld [vmem:[#allocation244_spill] sm:$0xff] }
 0x43d   :  { %v3626_v23 = vpop.f32.mrf.mxu0 }
 0x43e   :  { %10101 = vpow2.f32 %v7774_v27  ;;  %v7777_v32 = vmul.f32 -1.442695, %v3794_v34  ;;  %v3793_v21 = vadd.f32 %v3626_v23, %v948_v1  ;;  %v983_v1 = vadd.f32 %v15501_v16, %v15500_v50 }
 0x43f   :  { %v9327_v18 = vpop.f32.mrf.mxu0 }
 0x440   :  { %10103 = vpow2.f32 %v7777_v32  ;;  %v7776_v57 = vmul.f32 -1.442695, %v3793_v21  ;;  %v3796_v60 = vadd.f32 %v9327_v18, %v963_v11  ;;  %v15503_v11 = vld [vmem:[#allocation66_spill] sm:$0xff] }
 0x441   :  { %v3636_v47 = vpop.f32.mrf.mxu0  ;;  %v978_v32 = vadd.f32 %v15503_v11, %v15502_v25 }
 0x442   :  { %10105 = vpow2.f32 %v7776_v57  ;;  %v7779_v46 = vmul.f32 -1.442695, %v3796_v60  ;;  %v3795_v40 = vadd.f32 %v3636_v47, %v958_v62  ;;  %v15504_v57 = vld [vmem:[#allocation237_spill] sm:$0xff]  ;;  %v15505_v60 = vld [vmem:[#allocation68_spill] sm:$0xff] }
 0x443   :  { %v9330_v35 = vpop.f32.mrf.mxu0  ;;  %v993_v47 = vadd.f32 %v15505_v60, %v15504_v57 }
 0x444   :  { %10107 = vpow2.f32 %v7779_v46  ;;  %v7778_v26 = vmul.f32 -1.442695, %v3795_v40  ;;  %v3798_v30 = vadd.f32 %v9330_v35, %v973_v41  ;;  %v15506_v35 = vld [vmem:[#allocation242_spill] sm:$0xff] }
 0x445   :  { %v3646_v52 = vpop.f32.mrf.mxu0 }
 0x446   :  { %10109 = vpow2.f32 %v7778_v26  ;;  %v7781_v27 = vmul.f32 -1.442695, %v3798_v30  ;;  %v3797_v34 = vadd.f32 %v3646_v52, %v968_v48  ;;  %v988_v48 = vadd.f32 %v15507_v59, %v15506_v35 }
 0x447   :  { %v9333_v23 = vpop.f32.mrf.mxu0 }
 0x448   :  { %10111 = vpow2.f32 %v7781_v27  ;;  %v7780_v21 = vmul.f32 -1.442695, %v3797_v34  ;;  %v3800_v18 = vadd.f32 %v9333_v23, %v983_v1 }
 0x449   :  { %v10100_v42 = vpop.eup %10099  ;;  %v3656_v62 = vpop.f32.mrf.mxu0 }
 0x44a   :  { %v3852_v0 = vadd.f32 1.0, %v10100_v42  ;;  %10113 = vpow2.f32 %v7780_v21  ;;  %v3799_v41 = vadd.f32 %v3656_v62, %v978_v32 }
 0x44b   :  { %v10102_v46 = vpop.eup %10101  ;;  %10115 = vtanh.f32 %v3800_v18  ;;  %v9336_v40 = vpop.f32.mrf.mxu0 }
 0x44c   :  { %10117 = vrcp.f32 %v3852_v0  ;;  %v3851_v26 = vadd.f32 1.0, %v10102_v46  ;;  %v3802_v30 = vadd.f32 %v9336_v40, %v993_v47  ;;  %v15509_v46 = vld [vmem:[#allocation147_spill] sm:$0xff] }
 0x44d   :  { %v10104_v52 = vpop.eup %10103  ;;  %10119 = vtanh.f32 %v3799_v41  ;;  %v3666_v16 = vpop.f32.mrf.mxu0  ;;  %v15508_v41 = vld [vmem:[#allocation177_spill] sm:$0xff] }
 0x44e   :  { %10121 = vrcp.f32 %v3851_v26  ;;  %v3854_v1 = vadd.f32 1.0, %v10104_v52  ;;  %v3801_v27 = vadd.f32 %v3666_v16, %v988_v48  ;;  %v1809_v40 = vadd.f32 %v15509_v46, %v15508_v41 }
 0x44f   :  { %v10106_v34 = vpop.eup %10105  ;;  %10123 = vtanh.f32 %v3802_v30  ;;  %v13162_v23 = vpop.f32.mrf.mxu0 }
 0x450   :  { %10125 = vrcp.f32 %v3854_v1  ;;  %v3853_v11 = vadd.f32 1.0, %v10106_v34 }
 0x451   :  { %v10108_v32 = vpop.eup %10107  ;;  %10127 = vtanh.f32 %v3801_v27  ;;  %v13164_v21 = vpop.f32.mrf.mxu0 }
 0x452   :  { %10129 = vrcp.f32 %v3853_v11  ;;  %v3876_v18 = vadd.f32 1.0, %v10108_v32  ;;  %v15510_v11 = vld [vmem:[#allocation163_spill] sm:$0xff] }
 0x453   :  { %v10110_v42 = vpop.eup %10109  ;;  %v13166_v62 = vpop.f32.mrf.mxu0  ;;  %v15511_v32 = vld [vmem:[#allocation151_spill] sm:$0xff] }
 0x454   :  { %10131 = vrcp.f32 %v3876_v18  ;;  %v3875_v60 = vadd.f32 1.0, %v10110_v42  ;;  %v1819_v18 = vadd.f32 %v15511_v32, %v15510_v11  ;;  %v15516_v32 = vld [vmem:[#allocation155_spill] sm:$0xff] }
 0x455   :  { %v10112_v47 = vpop.eup %10111  ;;  %v13168_v0 = vpop.f32.mrf.mxu0 }
 0x456   :  { %10133 = vrcp.f32 %v3875_v60  ;;  %v3878_v59 = vadd.f32 1.0, %v10112_v47  ;;  %v15512_v60 = vld [vmem:[#allocation184_spill] sm:$0xff]  ;;  %v15513_v47 = vld [vmem:[#allocation149_spill] sm:$0xff] }
 0x457   :  { %v10114_v48 = vpop.eup %10113  ;;  %v9345_v26 = vpop.f32.mrf.mxu0  ;;  %v1804_v39 = vadd.f32 %v15513_v47, %v15512_v60 }
 0x458   :  { %v10116_v30 = vpop.eup %10115  ;;  %10135 = vrcp.f32 %v3878_v59  ;;  %v3877_v52 = vadd.f32 1.0, %v10114_v48  ;;  %v3824_v16 = vadd.f32 %v9345_v26, %v1809_v40  ;;  %v15514_v40 = vld [vmem:[#allocation207_spill] sm:$0xff]  ;;  %v15515_v26 = vld [vmem:[#allocation153_spill] sm:$0xff] }
 0x459   :  { %v10118_v1 = vpop.eup %10117  ;;  %v3696_v27 = vpop.f32.mrf.mxu0  ;;  %v1814_v49 = vadd.f32 %v15515_v26, %v15514_v40 }
 0x45a   :  { %v10120_v34 = vpop.eup %10119  ;;  %10137 = vrcp.f32 %v3877_v52  ;;  %v3920_v42 = vmul.f32 %v10118_v1, %v10116_v30  ;;  %v7787_v37 = vmul.f32 -1.442695, %v3824_v16  ;;  %v1829_v52 = vadd.f32 %v15516_v32, %v15434_v56 }
 0x45b   :  { %v10122_v10 = vpop.eup %10121  ;;  %v9348_v9 = vpop.f32.mrf.mxu0  ;;  %v3823_v16 = vadd.f32 %v3696_v27, %v1804_v39 }
 0x45c   :  { %v10124_v46 = vpop.eup %10123  ;;  %v3919_v36 = vmul.f32 %v10122_v10, %v10120_v34  ;;  %10139 = vpow2.f32 %v7787_v37  ;;  %v3826_v59 = vadd.f32 %v9348_v9, %v1819_v18 }
 0x45d   :  { %v10126_v48 = vpop.eup %10125  ;;  %v3706_v17 = vpop.f32.mrf.mxu0  ;;  %v7786_v18 = vmul.f32 -1.442695, %v3823_v16 }
 0x45e   :  { %v10128_v5 = vpop.eup %10127  ;;  %v3922_v30 = vmul.f32 %v10126_v48, %v10124_v46  ;;  %v7789_v1 = vmul.f32 -1.442695, %v3826_v59  ;;  %v3825_v35 = vadd.f32 %v3706_v17, %v1814_v49  ;;  %v15517_v17 = vld [vmem:[#allocation157_spill] sm:$0xff]  ;;  %v15518_v46 = vld [vmem:[#allocation159_spill] sm:$0xff] }
 0x45f   :  { %v10130_v25 = vpop.eup %10129  ;;  %v9351_v13 = vpop.f32.mrf.mxu0 }
 0x460   :  { %v3921_v7 = vmul.f32 %v10130_v25, %v10128_v5  ;;  %10141 = vpow2.f32 %v7789_v1  ;;  %v3828_v10 = vadd.f32 %v9351_v13, %v1829_v52  ;;  %v7788_v19 = vmul.f32 -1.442695, %v3825_v35  ;;  %v15519_v52 = vld [vmem:[#allocation161_spill] sm:$0xff] }
 0x461   :  { %v10132_v37 = vpop.eup %10131  ;;  %v3716_v9 = vpop.f32.mrf.mxu0  ;;  %v1824_v5 = vadd.f32 %v15517_v17, %v15436_v61  ;;  %v1839_v35 = vadd.f32 %v15518_v46, %v15438_v43  ;;  %v1834_v16 = vadd.f32 %v15519_v52, %v15440_v4 }
 0x462   :  { %v3916_v34 = vmul.f32 %v10132_v37, %v12977_v54  ;;  %v7791_v47 = vmul.f32 -1.442695, %v3828_v10 }
 0x463   :  { %v10134_v26 = vpop.eup %10133  ;;  %v9354_v40 = vpop.f32.mrf.mxu0 }
 0x464   :  { %v13181_v60 = vadd.f32 %v3920_v42, %v3916_v34  ;;  %v3915_v39 = vmul.f32 %v10134_v26, %v12982_v29  ;;  %10143 = vpow2.f32 %v7791_v47  ;;  %v3827_v42 = vadd.f32 %v3716_v9, %v1824_v5 }
 0x465   :  { %v10136_v27 = vpop.eup %10135  ;;  %v3726_v49 = vpop.f32.mrf.mxu0  ;;  %10145 = vpow2.f32 %v7786_v18 }
 0x466   :  { %v13186_v13 = vadd.f32 %v3919_v36, %v3915_v39  ;;  %v3918_v25 = vmul.f32 %v10136_v27, %v12987_v2  ;;  %10147 = vpow2.f32 %v7788_v19  ;;  %v3830_v36 = vadd.f32 %v9354_v40, %v1839_v35  ;;  %v15521_v40 = vld [vmem:[#allocation168_spill] sm:$0xff] }
 0x467   :  { %v10138_v54 = vpop.eup %10137  ;;  %v9357_v59 = vpop.f32.mrf.mxu0  ;;  %v7790_v2 = vmul.f32 -1.442695, %v3827_v42  ;;  %v3829_v37 = vadd.f32 %v3726_v49, %v1834_v16 }
 0x468   :  { %v13191_v48 = vadd.f32 %v3922_v30, %v3918_v25  ;;  %v3917_v29 = vmul.f32 %v10138_v54, %v12992_v8  ;;  %v7793_v19 = vmul.f32 -1.442695, %v3830_v36  ;;  %v15520_v30 = vld [vmem:[#allocation164_spill] sm:$0xff]  ;;  %v15524_v36 = vld [vmem:[#allocation231_spill] sm:$0xff] }
 0x469   :  { %v10140_v32 = vpop.eup %10139  ;;  %v3736_v1 = vpop.f32.mrf.mxu0  ;;  %v1849_v39 = vadd.f32 %v15520_v30, %v12501_v63  ;;  %10149 = vpow2.f32 %v7790_v2  ;;  %v7792_v8 = vmul.f32 -1.442695, %v3829_v37  ;;  %v15525_v2 = vld [vmem:[#allocation166_spill] sm:$0xff] }
 0x46a   :  { %v13196_v10 = vadd.f32 %v3921_v7, %v3917_v29  ;;  %v3948_v18 = vadd.f32 1.0, %v10140_v32  ;;  %v1859_v7 = vadd.f32 %v15521_v40, %v12475_v55  ;;  %v15522_v29 = vld [vmem:[#allocation246_spill] sm:$0xff]  ;;  %v1844_v37 = vadd.f32 %v15525_v2, %v15524_v36 }
 0x46b   :  { %v9360_v34 = vpop.f32.mrf.mxu0  ;;  %v3832_v5 = vadd.f32 %v9357_v59, %v1849_v39  ;;  %v15523_v32 = vld [vmem:[#allocation178_spill] sm:$0xff]  ;;  %v15528_v39 = vld [vmem:[#allocation173_spill] sm:$0xff] }
 0x46c   :  { %10151 = vrcp.f32 %v3948_v18  ;;  %v3834_v46 = vadd.f32 %v9360_v34, %v1859_v7  ;;  %v1879_v52 = vadd.f32 %v15523_v32, %v15522_v29  ;;  %v15526_v18 = vld [vmem:[#allocation180_spill] sm:$0xff]  ;;  %v15529_v32 = vld [vmem:[#allocation175_spill] sm:$0xff] }
 0x46d   :  { %v10142_v47 = vpop.eup %10141  ;;  %v3746_v9 = vpop.f32.mrf.mxu0  ;;  %10153 = vpow2.f32 %v7793_v19  ;;  %v1874_v59 = vadd.f32 %v15526_v18, %v12605_v53  ;;  %v1864_v2 = vadd.f32 %v15529_v32, %v12623_v24 }
 0x46e   :  { %v3950_v26 = vadd.f32 1.0, %v10142_v47 }
 0x46f   :  { %v9363_v27 = vpop.f32.mrf.mxu0 }
 0x470   :  { %10155 = vrcp.f32 %v3950_v26  ;;  %v15527_v26 = vld [vmem:[#allocation171_spill] sm:$0xff] }
 0x471   :  { %v10144_v17 = vpop.eup %10143  ;;  %v3756_v49 = vpop.f32.mrf.mxu0  ;;  %10157 = vpow2.f32 %v7792_v8  ;;  %v1854_v30 = vadd.f32 %v15527_v26, %v12489_v22  ;;  %v1869_v8 = vadd.f32 %v15528_v39, %v12613_v31  ;;  %v15533_v39 = vld [vmem:[#allocation74_spill] sm:$0xff] }
 0x472   :  { %v3972_v25 = vadd.f32 1.0, %v10144_v17  ;;  %v10146_v54 = vpop.eup %10145  ;;  %v3831_v17 = vadd.f32 %v3736_v1, %v1844_v37  ;;  %v3835_v26 = vadd.f32 %v3756_v49, %v1864_v2  ;;  %v15531_v37 = vld [vmem:[#allocation78_spill] sm:$0xff] }
 0x473   :  { %v9366_v35 = vpop.f32.mrf.mxu0  ;;  %v10148_v42 = vpop.eup %10147  ;;  %v3947_v47 = vadd.f32 1.0, %v10146_v54  ;;  %v3833_v7 = vadd.f32 %v3746_v9, %v1854_v30  ;;  %v15532_v30 = vld [vmem:[#allocation72_spill] sm:$0xff] }
 0x474   :  { %10159 = vrcp.f32 %v3972_v25  ;;  %v3838_v19 = vadd.f32 %v9366_v35, %v1879_v52  ;;  %v3949_v34 = vadd.f32 1.0, %v10148_v42  ;;  %v15530_v35 = vld [vmem:[#allocation76_spill] sm:$0xff] }
 0x475   :  { %10161 = vtanh.f32 %v3832_v5  ;;  %v3766_v16 = vpop.f32.mrf.mxu0  ;;  %v3836_v5 = vadd.f32 %v9363_v27, %v1869_v8  ;;  %v1013_v52 = vadd.f32 %v15530_v35, %v12631_v14  ;;  %v998_v8 = vadd.f32 %v15533_v39, %v12655_v28 }
 0x476   :  { %10163 = vtanh.f32 %v3834_v46  ;;  %v3837_v40 = vadd.f32 %v3766_v16, %v1874_v59  ;;  %v7797_v25 = vmul.f32 -1.442695, %v3838_v19  ;;  %v10150_v54 = vpop.eup %10149  ;;  %v1008_v59 = vadd.f32 %v15531_v37, %v12633_v58 }
 0x477   :  { %10165 = vrcp.f32 %v3947_v47  ;;  %v3971_v18 = vadd.f32 1.0, %v10150_v54  ;;  %v3806_v9 = vadd.f32 %v13166_v62, %v1013_v52  ;;  %v7795_v16 = vmul.f32 -1.442695, %v3836_v5 }
 0x478   :  { %10167 = vrcp.f32 %v3949_v34  ;;  %v7796_v42 = vmul.f32 -1.442695, %v3837_v40  ;;  %v1003_v34 = vadd.f32 %v15532_v30, %v12645_v15  ;;  %v7794_v40 = vmul.f32 -1.442695, %v3835_v26 }
 0x479   :  { %10169 = vtanh.f32 %v3831_v17  ;;  %v10152_v46 = vpop.eup %10151  ;;  %v3805_v17 = vadd.f32 %v13168_v0, %v1008_v59  ;;  %v3803_v35 = vadd.f32 %v13164_v21, %v998_v8 }
 0x47a   :  { %10171 = vtanh.f32 %v3833_v7  ;;  %v10154_v1 = vpop.eup %10153  ;;  %v3804_v5 = vadd.f32 %v13162_v23, %v1003_v34 }
 0x47b   :  { %10173 = vpow2.f32 %v7797_v25  ;;  %v3974_v47 = vadd.f32 1.0, %v10154_v1  ;;  %v7785_v25 = vmul.f32 -1.442695, %v3806_v9  ;;  %v7784_v52 = vmul.f32 -1.442695, %v3805_v17 }
 0x47c   :  { %10175 = vrcp.f32 %v3971_v18  ;;  %v7783_v0 = vmul.f32 -1.442695, %v3804_v5  ;;  %v7782_v23 = vmul.f32 -1.442695, %v3803_v35 }
 0x47d   :  { %v10156_v27 = vpop.eup %10155  ;;  %10177 = vpow2.f32 %v7796_v42 }
 0x47e   :  { %v10158_v19 = vpop.eup %10157  ;;  %10179 = vrcp.f32 %v3974_v47 }
 0x47f   :  { %v3973_v62 = vadd.f32 1.0, %v10158_v19  ;;  %10181 = vpow2.f32 %v7795_v16 }
 0x481   :  { %v10160_v49 = vpop.eup %10159  ;;  %10183 = vrcp.f32 %v3973_v62 }
 0x482   :  { %v10162_v7 = vpop.eup %10161  ;;  %v4012_v32 = vmul.f32 %v10160_v49, %v13023_v12  ;;  %10185 = vpow2.f32 %v7794_v40 }
 0x483   :  { %v4016_v2 = vmul.f32 %v10162_v7, %v10152_v46  ;;  %v10164_v54 = vpop.eup %10163  ;;  %10187 = vpow2.f32 %v7785_v25 }
 0x484   :  { %v4018_v18 = vmul.f32 %v10164_v54, %v10156_v27  ;;  %v10166_v26 = vpop.eup %10165  ;;  %10189 = vpow2.f32 %v7784_v52 }
 0x485   :  { %v13227_v42 = vadd.f32 %v4016_v2, %v4012_v32  ;;  %v10168_v1 = vpop.eup %10167  ;;  %10191 = vpow2.f32 %v7783_v0 }
 0x486   :  { %v10170_v37 = vpop.eup %10169  ;;  %10193 = vpow2.f32 %v7782_v23 }
 0x487   :  { %v10172_v9 = vpop.eup %10171  ;;  %v4015_v34 = vmul.f32 %v10170_v37, %v10166_v26  ;;  %10195 = vtanh.f32 %v13227_v42 }
 0x488   :  { %v10174_v12 = vpop.eup %10173  ;;  %v4017_v17 = vmul.f32 %v10172_v9, %v10168_v1 }
 0x489   :  { %v10176_v16 = vpop.eup %10175  ;;  %v4002_v21 = vadd.f32 1.0, %v10174_v12 }
 0x48a   :  { %v10178_v46 = vpop.eup %10177  ;;  %v4011_v19 = vmul.f32 %v10176_v16, %v13031_v38 }
 0x48b   :  { %v10180_v59 = vpop.eup %10179  ;;  %v4001_v39 = vadd.f32 1.0, %v10178_v46  ;;  %10197 = vrcp.f32 %v4002_v21 }
 0x48c   :  { %v10182_v47 = vpop.eup %10181  ;;  %v4014_v27 = vmul.f32 %v10180_v59, %v13028_v44  ;;  %v13235_v5 = vadd.f32 %v4015_v34, %v4011_v19 }
 0x48d   :  { %v4000_v40 = vadd.f32 1.0, %v10182_v47 }
 0x48e   :  { %v10184_v30 = vpop.eup %10183  ;;  %v13232_v8 = vadd.f32 %v4018_v18, %v4014_v27 }
 0x48f   :  { %v4013_v49 = vmul.f32 %v10184_v30, %v13034_v20  ;;  %v10186_v62 = vpop.eup %10185 }
 0x490   :  { %v10188_v7 = vpop.eup %10187  ;;  %10199 = vtanh.f32 %v13232_v8  ;;  %v3999_v44 = vadd.f32 1.0, %v10186_v62 }
 0x491   :  { %v13238_v38 = vadd.f32 %v4017_v17, %v4013_v49  ;;  %10201 = vrcp.f32 %v4001_v39  ;;  %v10190_v25 = vpop.eup %10189  ;;  %v3906_v32 = vadd.f32 1.0, %v10188_v7 }
 0x492   :  { %v10192_v2 = vpop.eup %10191  ;;  %v3905_v20 = vadd.f32 1.0, %v10190_v25  ;;  %v13281_v25 = vld [vmem:[%s14905_s2 + $0x8] sm:$0xff] }
 0x493   :  { %10203 = vtanh.f32 %v13238_v38  ;;  %v10194_v54 = vpop.eup %10193  ;;  %v3904_v35 = vadd.f32 1.0, %v10192_v2  ;;  %v13295_v2 = vld [vmem:[%s14905_s2 + $0x18] sm:$0xff] }
 0x494   :  { %10205 = vrcp.f32 %v4000_v40  ;;  %v3903_v52 = vadd.f32 1.0, %v10194_v54  ;;  %v10196_v18 = vpop.eup %10195  ;;  %v13309_v54 = vld [vmem:[%s14905_s2 + $0x28] sm:$0xff] }
 0x495   :  { %10207 = vtanh.f32 %v13235_v5  ;;  %15543 = vst [vmem:[#allocation213_spill] sm:$0xff] %v13309_v54 }
 0x496   :  { %10209 = vtanh.f32 %v13191_v48 }
 0x497   :  { %10211 = vrcp.f32 %v3999_v44 }
 0x498   :  { %10213 = vrcp.f32 %v3906_v32  ;;  %v10198_v0 = vpop.eup %10197  ;;  %v13288_v32 = vld [vmem:[%s14905_s2 + $0x10] sm:$0xff] }
 0x499   :  { %10215 = vtanh.f32 %v13196_v10 }
 0x49a   :  { %10217 = vtanh.f32 %v13181_v60 }
 0x49b   :  { %10219 = vrcp.f32 %v3905_v20  ;;  %v13302_v20 = vld [vmem:[%s14905_s2 + $0x20] sm:$0xff] }
 0x49c   :  { %10221 = vrcp.f32 %v3904_v35  ;;  %15542 = vst [vmem:[#allocation222_spill] sm:$0xff] %v13302_v20  ;;  %v13316_v35 = vld [vmem:[%s14905_s2 + $0x30] sm:$0xff] }
 0x49d   :  { %10223 = vtanh.f32 %v13186_v13  ;;  %v10200_v26 = vpop.eup %10199  ;;  %15544 = vst [vmem:[#allocation223_spill] sm:$0xff] %v13316_v35 }
 0x49e   :  { %v10202_v1 = vpop.eup %10201  ;;  %10225 = vrcp.f32 %v3903_v52  ;;  %v13246_v37 = vmul.f32 %v10200_v26, %v10198_v0  ;;  %v13323_v52 = vld [vmem:[%s14905_s2 + $0x38] sm:$0xff]  ;;  %v13337_v0 = vld [vmem:[%s14905_s2 + $0x48] sm:$0xff]  ;;  %v13344_v26 = vld [vmem:[%s14905_s2 + $0x50] sm:$0xff] }
 0x49f   :  { %15545 = vst [vmem:[#allocation226_spill] sm:$0xff] %v13323_v52  ;;  %15547 = vst [vmem:[#allocation239_spill] sm:$0xff] %v13337_v0 }
 0x4a0   :  { %15534 = vst [vmem:[#allocation215_spill] sm:$0xff] %v13246_v37  ;;  %v10204_v23 = vpop.eup %10203  ;;  %9367 = vmatprep.subr.mxu1 %v13246_v37  ;;  %15548 = vst [vmem:[#allocation227_spill] sm:$0xff] %v13344_v26 }
 0x4a1   :  { %v10206_v9 = vpop.eup %10205  ;;  %v13249_v12 = vmul.f32 %v10204_v23, %v10202_v1  ;;  %9368 = vmatpush3.msra.mxu1 %v13246_v37  ;;  %v13351_v1 = vld [vmem:[%s14905_s2 + $0x58] sm:$0xff]  ;;  %v13358_v23 = vld [vmem:[%s14905_s2 + $0x60] sm:$0xff] }
 0x4a2   :  { %v10208_v16 = vpop.eup %10207  ;;  %v13253_v59 = vmul.f32 %v10206_v9, %v10196_v18  ;;  %v13330_v18 = vld [vmem:[%s14905_s2 + $0x40] sm:$0xff]  ;;  %15549 = vst [vmem:[#allocation240_spill] sm:$0xff] %v13351_v1  ;;  %15550 = vst [vmem:[#allocation232_spill] sm:$0xff] %v13358_v23  ;;  %v13365_v9 = vld [vmem:[%s14905_s2 + $0x68] sm:$0xff] }
 0x4a3   :  { %15535 = vst [vmem:[#allocation212_spill] sm:$0xff] %v13249_v12  ;;  %v10210_v46 = vpop.eup %10209  ;;  %9369 = vmatprep.subr.mxu1 %v13249_v12  ;;  %15546 = vst [vmem:[#allocation229_spill] sm:$0xff] %v13330_v18  ;;  %v13491_v37 = vld [vmem:[%s14905_s2 + $0xf8] sm:$0xff] }
 0x4a4   :  { %15536 = vst [vmem:[#allocation216_spill] sm:$0xff] %v13253_v59  ;;  %v10212_v21 = vpop.eup %10211  ;;  %9370 = vmatpush3.msra.mxu1 %v13249_v12  ;;  %15551 = vst [vmem:[#allocation234_spill] sm:$0xff] %v13365_v9  ;;  %v13484_v12 = vld [vmem:[%s14905_s2 + $0xf0] sm:$0xff] }
 0x4a5   :  { %v10214_v47 = vpop.eup %10213  ;;  %9371 = vmatprep.subr.mxu1 %v13253_v59  ;;  %v13257_v19 = vmul.f32 %v10212_v21, %v10208_v16  ;;  %v13372_v16 = vld [vmem:[%s14905_s2 + $0x70] sm:$0xff]  ;;  %v13386_v21 = vld [vmem:[%s14905_s2 + $0x80] sm:$0xff]  ;;  %15568 = vst [vmem:[#allocation266_spill] sm:$0xff] %v13484_v12  ;;  %15569 = vst [vmem:[#allocation267_spill] sm:$0xff] %v13491_v37 }
 0x4a6   :  { %v10216_v27 = vpop.eup %10215  ;;  %9372 = vmatpush3.msra.mxu1 %v13253_v59  ;;  %v13261_v34 = vmul.f32 %v10214_v47, %v10210_v46  ;;  %15552 = vst [vmem:[#allocation235_spill] sm:$0xff] %v13372_v16  ;;  %v13379_v46 = vld [vmem:[%s14905_s2 + $0x78] sm:$0xff]  ;;  %15554 = vst [vmem:[#allocation17_spill] sm:$0xff] %v13386_v21  ;;  %v13393_v47 = vld [vmem:[%s14905_s2 + $0x88] sm:$0xff] }
 0x4a7   :  { %15537 = vst [vmem:[#allocation219_spill] sm:$0xff] %v13257_v19  ;;  %v10218_v30 = vpop.eup %10217  ;;  %9373 = vmatprep.subr.mxu1 %v13257_v19  ;;  %15553 = vst [vmem:[#allocation15_spill] sm:$0xff] %v13379_v46  ;;  %v13477_v59 = vld [vmem:[%s14905_s2 + $0xe8] sm:$0xff] }
 0x4a8   :  { %15538 = vst [vmem:[#allocation218_spill] sm:$0xff] %v13261_v34  ;;  %v10220_v39 = vpop.eup %10219  ;;  %9374 = vmatpush3.msra.mxu1 %v13257_v19  ;;  %15555 = vst [vmem:[#allocation13_spill] sm:$0xff] %v13393_v47  ;;  %v13470_v19 = vld [vmem:[%s14905_s2 + $0xe0] sm:$0xff] }
 0x4a9   :  { %v10222_v49 = vpop.eup %10221  ;;  %9375 = vmatprep.subr.mxu1 %v13261_v34  ;;  %v13265_v17 = vmul.f32 %v10220_v39, %v10216_v27  ;;  %v13400_v27 = vld [vmem:[%s14905_s2 + $0x90] sm:$0xff]  ;;  %v13414_v39 = vld [vmem:[%s14905_s2 + $0xa0] sm:$0xff]  ;;  %15566 = vst [vmem:[#allocation264_spill] sm:$0xff] %v13470_v19  ;;  %15567 = vst [vmem:[#allocation265_spill] sm:$0xff] %v13477_v59 }
 0x4aa   :  { %v10224_v62 = vpop.eup %10223  ;;  %9376 = vmatpush3.msra.mxu1 %v13261_v34  ;;  %v13269_v40 = vmul.f32 %v10222_v49, %v10218_v30  ;;  %15556 = vst [vmem:[#allocation14_spill] sm:$0xff] %v13400_v27  ;;  %v13407_v30 = vld [vmem:[%s14905_s2 + $0x98] sm:$0xff]  ;;  %15558 = vst [vmem:[#allocation256_spill] sm:$0xff] %v13414_v39  ;;  %v13421_v49 = vld [vmem:[%s14905_s2 + $0xa8] sm:$0xff] }
 0x4ab   :  { %15539 = vst [vmem:[#allocation224_spill] sm:$0xff] %v13265_v17  ;;  %9377 = vmatprep.subr.mxu1 %v13265_v17  ;;  %v10226_v7 = vpop.eup %10225  ;;  %15557 = vst [vmem:[#allocation255_spill] sm:$0xff] %v13407_v30  ;;  %v13463_v34 = vld [vmem:[%s14905_s2 + $0xd8] sm:$0xff] }
 0x4ac   :  { %15540 = vst [vmem:[#allocation220_spill] sm:$0xff] %v13269_v40  ;;  %9378 = vmatpush3.msra.mxu1 %v13265_v17  ;;  %v13273_v44 = vmul.f32 %v10226_v7, %v10224_v62  ;;  %15559 = vst [vmem:[#allocation257_spill] sm:$0xff] %v13421_v49  ;;  %v13428_v62 = vld [vmem:[%s14905_s2 + $0xb0] sm:$0xff]  ;;  %v13435_v7 = vld [vmem:[%s14905_s2 + $0xb8] sm:$0xff] }
 0x4ad   :  { %9379 = vmatprep.subr.mxu1 %v13269_v40  ;;  %15560 = vst [vmem:[#allocation258_spill] sm:$0xff] %v13428_v62  ;;  %15561 = vst [vmem:[#allocation259_spill] sm:$0xff] %v13435_v7  ;;  %v13456_v17 = vld [vmem:[%s14905_s2 + $0xd0] sm:$0xff] }
 0x4ae   :  { %15541 = vst [vmem:[#allocation170_spill] sm:$0xff] %v13273_v44  ;;  %9380 = vmatpush3.msra.mxu1 %v13269_v40  ;;  %v13449_v40 = vld [vmem:[%s14905_s2 + $0xc8] sm:$0xff]  ;;  %15564 = vst [vmem:[#allocation262_spill] sm:$0xff] %v13456_v17 }
 0x4af   :  { %9381 = vmatprep.subr.mxu1 %v13273_v44  ;;  %15563 = vst [vmem:[#allocation261_spill] sm:$0xff] %v13449_v40  ;;  %15565 = vst [vmem:[#allocation263_spill] sm:$0xff] %v13463_v34 }
 0x4b0   :  { %9382 = vmatpush3.msra.mxu1 %v13273_v44  ;;  %v13442_v44 = vld [vmem:[%s14905_s2 + $0xc0] sm:$0xff] }
 0x4b1   :  { %9384 = vmatmul.mubr.msk.f32.vlgmr.msra.gmra.mxu1 %vm2472_vm1, %v13281_v25  ;;  %15562 = vst [vmem:[#allocation260_spill] sm:$0xff] %v13442_v44 }
 0x4b2   :  { %9386 = vmatprep.mubr.msk.f32.mxu1 %vm2472_vm1, %v13288_v32 }
 0x4b5   :  { %9387 = vmatmul.mubr.msk.f32.gmra.mxu1 %vm2472_vm1, %v13295_v2 }
 0x4b6   :  { %9389 = vmatprep.mubr.msk.f32.mxu1 %vm2472_vm1, %v13302_v20  ;;  %v15588_v20 = vld [vmem:[#allocation57_spill] sm:$0xff] }
 0x4b9   :  { %9390 = vmatmul.mubr.msk.f32.gmra.mxu1 %vm2472_vm1, %v13309_v54 }
 0x4ba   :  { %9392 = vmatprep.mubr.msk.f32.mxu1 %vm2472_vm1, %v13316_v35 }
 0x4bd   :  { %9393 = vmatmul.mubr.msk.f32.gmra.mxu1 %vm2472_vm1, %v13323_v52 }
 0x4be   :  { %9395 = vmatprep.mubr.msk.f32.mxu1 %vm2472_vm1, %v13330_v18 }
 0x4c1   :  { %9396 = vmatmul.mubr.msk.f32.gmra.mxu1 %vm2472_vm1, %v13337_v0  ;;  %v15581_v0 = vld [vmem:[#allocation146_spill] sm:$0xff] }
 0x4c2   :  { %9398 = vmatprep.mubr.msk.f32.mxu1 %vm2472_vm1, %v13344_v26  ;;  %v15580_v26 = vld [vmem:[#allocation184_spill] sm:$0xff] }
 0x4c5   :  { %9399 = vmatmul.mubr.msk.f32.gmra.mxu1 %vm2472_vm1, %v13351_v1 }
 0x4c6   :  { %9401 = vmatprep.mubr.msk.f32.mxu1 %vm2472_vm1, %v13358_v23 }
 0x4c9   :  { %9402 = vmatmul.mubr.msk.f32.gmra.mxu1 %vm2472_vm1, %v13365_v9 }
 0x4ca   :  { %9404 = vmatprep.mubr.msk.f32.mxu1 %vm2472_vm1, %v13372_v16 }
 0x4cd   :  { %9405 = vmatmul.mubr.msk.f32.gmra.mxu1 %vm2472_vm1, %v13379_v46 }
 0x4ce   :  { %9407 = vmatprep.mubr.msk.f32.mxu1 %vm2472_vm1, %v13386_v21 }
 0x4d1   :  { %9408 = vmatmul.mubr.msk.f32.gmra.mxu1 %vm2472_vm1, %v13393_v47 }
 0x4d2   :  { %9410 = vmatprep.mubr.msk.f32.mxu1 %vm2472_vm1, %v13400_v27 }
 0x4d5   :  { %9411 = vmatmul.mubr.msk.f32.gmra.mxu1 %vm2472_vm1, %v13407_v30  ;;  %v15573_v30 = vld [vmem:[#allocation59_spill] sm:$0xff] }
 0x4d6   :  { %9413 = vmatprep.mubr.msk.f32.mxu1 %vm2472_vm1, %v13414_v39  ;;  %v1225_v27 = vadd.f32 %v15573_v30, %v15492_v45 }
 0x4d9   :  { %9414 = vmatmul.mubr.msk.f32.gmra.mxu1 %vm2472_vm1, %v13421_v49 }
 0x4da   :  { %9416 = vmatprep.mubr.msk.f32.mxu1 %vm2472_vm1, %v13428_v62 }
 0x4dd   :  { %9417 = vmatmul.mubr.msk.f32.gmra.mxu1 %vm2472_vm1, %v13435_v7 }
 0x4de   :  { %9419 = vmatprep.mubr.msk.f32.mxu1 %vm2472_vm1, %v13442_v44  ;;  %v15572_v44 = vld [vmem:[#allocation55_spill] sm:$0xff] }
 0x4df   :  { %v1215_v7 = vadd.f32 %v15572_v44, %v15488_v6 }
 0x4e1   :  { %9420 = vmatmul.mubr.msk.f32.gmra.mxu1 %vm2472_vm1, %v13449_v40 }
 0x4e2   :  { %9422 = vmatprep.mubr.msk.f32.mxu1 %vm2472_vm1, %v13456_v17 }
 0x4e5   :  { %9423 = vmatmul.mubr.msk.f32.gmra.mxu1 %vm2472_vm1, %v13463_v34 }
 0x4e6   :  { %9425 = vmatprep.mubr.msk.f32.mxu1 %vm2472_vm1, %v13470_v19  ;;  %v15571_v19 = vld [vmem:[#allocation51_spill] sm:$0xff] }
 0x4e7   :  { %v1205_v34 = vadd.f32 %v15571_v19, %v15484_v3 }
 0x4e9   :  { %9426 = vmatmul.mubr.msk.f32.gmra.mxu1 %vm2472_vm1, %v13477_v59  ;;  %v13498_v59 = vld [vmem:[%s14905_s2] sm:$0xff] }
 0x4ea   :  { %9428 = vmatprep.mubr.msk.f32.mxu1 %vm2472_vm1, %v13484_v12  ;;  %15570 = vst [vmem:[#allocation268_spill] sm:$0xff] %v13498_v59 }
 0x4ed   :  { %9429 = vmatmul.mubr.msk.f32.gmra.mxu1 %vm2472_vm1, %v13491_v37 }
 0x4ee   :  { %9511 = vmatprep.mubr.msk.f32.mxu1 %vm2472_vm1, %v13498_v59 }
 0x571   :  { %v9385_v12 = vpop.f32.mrf.mxu1 }
 0x572   :  { %v4283_v17 = vadd.f32 %v9385_v12, %v1205_v34  ;;  %v15574_v12 = vld [vmem:[#allocation63_spill] sm:$0xff] }
 0x573   :  { %v13504_v40 = vpop.f32.mrf.mxu1  ;;  %v1235_v34 = vadd.f32 %v15574_v12, %v15496_v51 }
 0x574   :  { %v7831_v62 = vmul.f32 -1.442695, %v4283_v17 }
 0x575   :  { %v9388_v37 = vpop.f32.mrf.mxu1 }
 0x576   :  { %10227 = vpow2.f32 %v7831_v62  ;;  %v4285_v49 = vadd.f32 %v9388_v37, %v1215_v7  ;;  %v15575_v37 = vld [vmem:[#allocation67_spill] sm:$0xff] }
 0x577   :  { %v13508_v39 = vpop.f32.mrf.mxu1  ;;  %v1245_v7 = vadd.f32 %v15575_v37, %v15500_v50  ;;  %v15578_v50 = vld [vmem:[#allocation148_spill] sm:$0xff] }
 0x578   :  { %v7833_v59 = vmul.f32 -1.442695, %v4285_v49  ;;  %v1557_v51 = vadd.f32 %v15578_v50, %v15510_v11  ;;  %v15584_v50 = vld [vmem:[#allocation152_spill] sm:$0xff] }
 0x579   :  { %v9391_v47 = vpop.f32.mrf.mxu1 }
 0x57a   :  { %10229 = vpow2.f32 %v7833_v59  ;;  %v4287_v19 = vadd.f32 %v9391_v47, %v1225_v27  ;;  %v15576_v47 = vld [vmem:[#allocation71_spill] sm:$0xff] }
 0x57b   :  { %v13512_v3 = vpop.f32.mrf.mxu1  ;;  %v1255_v27 = vadd.f32 %v15576_v47, %v15504_v57 }
 0x57c   :  { %v7835_v21 = vmul.f32 -1.442695, %v4287_v19 }
 0x57d   :  { %v9394_v44 = vpop.f32.mrf.mxu1 }
 0x57e   :  { %10231 = vpow2.f32 %v7835_v21  ;;  %v4289_v17 = vadd.f32 %v9394_v44, %v1235_v34 }
 0x57f   :  { %v4137_v62 = vpop.f32.mrf.mxu1 }
 0x580   :  { %v7837_v6 = vmul.f32 -1.442695, %v4289_v17 }
 0x581   :  { %v9397_v46 = vpop.f32.mrf.mxu1 }
 0x582   :  { %10233 = vpow2.f32 %v7837_v6  ;;  %v4291_v30 = vadd.f32 %v9397_v46, %v1245_v7 }
 0x583   :  { %v10228_v49 = vpop.eup %10227  ;;  %v13518_v59 = vpop.f32.mrf.mxu1 }
 0x584   :  { %v4343_v45 = vadd.f32 1.0, %v10228_v49  ;;  %10235 = vtanh.f32 %v4291_v30 }
 0x585   :  { %v9400_v19 = vpop.f32.mrf.mxu1 }
 0x586   :  { %10237 = vrcp.f32 %v4343_v45  ;;  %v4293_v21 = vadd.f32 %v9400_v19, %v1255_v27  ;;  %v15577_v45 = vld [vmem:[#allocation144_spill] sm:$0xff] }
 0x587   :  { %v10230_v12 = vpop.eup %10229  ;;  %v13522_v34 = vpop.f32.mrf.mxu1  ;;  %v1547_v47 = vadd.f32 %v15577_v45, %v15508_v41  ;;  %v1542_v45 = vadd.f32 %v15581_v0, %v15580_v26 }
 0x588   :  { %v4345_v44 = vadd.f32 1.0, %v10230_v12  ;;  %10239 = vtanh.f32 %v4293_v21 }
 0x589   :  { %v13524_v17 = vpop.f32.mrf.mxu1 }
 0x58a   :  { %10241 = vrcp.f32 %v4345_v44 }
 0x58b   :  { %v10232_v6 = vpop.eup %10231  ;;  %v13526_v46 = vpop.f32.mrf.mxu1 }
 0x58c   :  { %v4367_v37 = vadd.f32 1.0, %v10232_v6 }
 0x58d   :  { %v13528_v7 = vpop.f32.mrf.mxu1 }
 0x58e   :  { %10243 = vrcp.f32 %v4367_v37  ;;  %v15579_v37 = vld [vmem:[#allocation65_spill] sm:$0xff] }
 0x58f   :  { %v10234_v49 = vpop.eup %10233  ;;  %v13530_v30 = vpop.f32.mrf.mxu1  ;;  %v1230_v9 = vadd.f32 %v15579_v37, %v15498_v33 }
 0x590   :  { %v4369_v27 = vadd.f32 1.0, %v10234_v49 }
 0x591   :  { %v9409_v19 = vpop.f32.mrf.mxu1  ;;  %v10236_v12 = vpop.eup %10235  ;;  %v4288_v18 = vadd.f32 %v4137_v62, %v1230_v9 }
 0x592   :  { %10245 = vrcp.f32 %v4369_v27  ;;  %v4315_v21 = vadd.f32 %v9409_v19, %v1547_v47  ;;  %v15582_v27 = vld [vmem:[#allocation207_spill] sm:$0xff]  ;;  %v15583_v47 = vld [vmem:[#allocation150_spill] sm:$0xff] }
 0x593   :  { %v10238_v57 = vpop.eup %10237  ;;  %v4187_v44 = vpop.f32.mrf.mxu1  ;;  %v1552_v19 = vadd.f32 %v15583_v47, %v15582_v27  ;;  %v7836_v0 = vmul.f32 -1.442695, %v4288_v18  ;;  %v15587_v27 = vld [vmem:[#allocation196_spill] sm:$0xff] }
 0x594   :  { %v4411_v6 = vmul.f32 %v10238_v57, %v10236_v12  ;;  %v7843_v16 = vmul.f32 -1.442695, %v4315_v21  ;;  %v1567_v57 = vadd.f32 %v15584_v50, %v15434_v56  ;;  %v4314_v21 = vadd.f32 %v4187_v44, %v1542_v45  ;;  %v15589_v44 = vld [vmem:[#allocation243_spill] sm:$0xff] }
 0x595   :  { %v9412_v23 = vpop.f32.mrf.mxu1  ;;  %v10240_v1 = vpop.eup %10239  ;;  %v1210_v50 = vadd.f32 %v15588_v20, %v15587_v27 }
 0x596   :  { %10247 = vpow2.f32 %v7843_v16  ;;  %v4317_v49 = vadd.f32 %v9412_v23, %v1557_v51  ;;  %v15585_v51 = vld [vmem:[#allocation208_spill] sm:$0xff]  ;;  %v15586_v23 = vld [vmem:[#allocation53_spill] sm:$0xff]  ;;  %v7842_v9 = vmul.f32 -1.442695, %v4314_v21 }
 0x597   :  { %v10242_v41 = vpop.eup %10241  ;;  %v4197_v52 = vpop.f32.mrf.mxu1  ;;  %v1200_v26 = vadd.f32 %v15586_v23, %v15585_v51 }
 0x598   :  { %v4413_v12 = vmul.f32 %v10242_v41, %v10240_v1  ;;  %v7845_v11 = vmul.f32 -1.442695, %v4317_v49  ;;  %v4316_v37 = vadd.f32 %v4197_v52, %v1552_v19  ;;  %v15590_v52 = vld [vmem:[#allocation61_spill] sm:$0xff]  ;;  %v15591_v49 = vld [vmem:[#allocation154_spill] sm:$0xff] }
 0x599   :  { %v9415_v33 = vpop.f32.mrf.mxu1  ;;  %v1220_v45 = vadd.f32 %v15590_v52, %v15589_v44  ;;  %v1562_v19 = vadd.f32 %v15591_v49, %v15436_v61 }
 0x59a   :  { %10249 = vpow2.f32 %v7845_v11  ;;  %v4319_v35 = vadd.f32 %v9415_v33, %v1567_v57  ;;  %v7844_v41 = vmul.f32 -1.442695, %v4316_v37  ;;  %v4282_v33 = vadd.f32 %v13504_v40, %v1200_v26  ;;  %v15592_v57 = vld [vmem:[#allocation156_spill] sm:$0xff] }
 0x59b   :  { %v10244_v54 = vpop.eup %10243  ;;  %v4207_v16 = vpop.f32.mrf.mxu1  ;;  %v4286_v20 = vadd.f32 %v13512_v3, %v1220_v45  ;;  %v1577_v21 = vadd.f32 %v15592_v57, %v15438_v43 }
 0x59c   :  { %v4407_v47 = vmul.f32 %v10244_v54, %v13181_v60  ;;  %v7847_v62 = vmul.f32 -1.442695, %v4319_v35  ;;  %v4284_v60 = vadd.f32 %v13508_v39, %v1210_v50  ;;  %v4318_v40 = vadd.f32 %v4207_v16, %v1562_v19 }
 0x59d   :  { %v9418_v1 = vpop.f32.mrf.mxu1  ;;  %v7834_v3 = vmul.f32 -1.442695, %v4286_v20  ;;  %v15595_v20 = vld [vmem:[#allocation165_spill] sm:$0xff] }
 0x59e   :  { %v13552_v11 = vadd.f32 %v4411_v6, %v4407_v47  ;;  %10251 = vpow2.f32 %v7847_v62  ;;  %v7830_v6 = vmul.f32 -1.442695, %v4282_v33  ;;  %v15593_v47 = vld [vmem:[#allocation158_spill] sm:$0xff]  ;;  %v4321_v62 = vadd.f32 %v9418_v1, %v1577_v21  ;;  %v15594_v33 = vld [vmem:[#allocation160_spill] sm:$0xff] }
 0x59f   :  { %v10246_v18 = vpop.eup %10245  ;;  %10253 = vpow2.f32 %v7836_v0  ;;  %v4217_v54 = vpop.f32.mrf.mxu1  ;;  %v1572_v39 = vadd.f32 %v15593_v47, %v15440_v4  ;;  %v7832_v0 = vmul.f32 -1.442695, %v4284_v60  ;;  %v7846_v52 = vmul.f32 -1.442695, %v4318_v40  ;;  %v15596_v40 = vld [vmem:[#allocation242_spill] sm:$0xff] }
 0x5a0   :  { %v4409_v35 = vmul.f32 %v10246_v18, %v13191_v48  ;;  %10255 = vpow2.f32 %v7842_v9  ;;  %v7849_v16 = vmul.f32 -1.442695, %v4321_v62  ;;  %v1587_v49 = vadd.f32 %v15594_v33, %v12501_v63 }
 0x5a1   :  { %10257 = vpow2.f32 %v7844_v41  ;;  %v9421_v26 = vpop.f32.mrf.mxu1  ;;  %v4320_v48 = vadd.f32 %v4217_v54, %v1572_v39  ;;  %v1597_v54 = vadd.f32 %v15595_v20, %v12475_v55 }
 0x5a2   :  { %v13561_v37 = vadd.f32 %v4413_v12, %v4409_v35  ;;  %10259 = vpow2.f32 %v7830_v6  ;;  %v4323_v35 = vadd.f32 %v9421_v26, %v1587_v49  ;;  %v15597_v6 = vld [vmem:[#allocation73_spill] sm:$0xff] }
 0x5a3   :  { %v10248_v23 = vpop.eup %10247  ;;  %v4227_v50 = vpop.f32.mrf.mxu1  ;;  %10261 = vpow2.f32 %v7832_v0  ;;  %v7848_v19 = vmul.f32 -1.442695, %v4320_v48 }
 0x5a4   :  { %v4439_v45 = vadd.f32 1.0, %v10248_v23  ;;  %10263 = vpow2.f32 %v7834_v3  ;;  %v1250_v23 = vadd.f32 %v15597_v6, %v15596_v40  ;;  %v15602_v6 = vld [vmem:[#allocation169_spill] sm:$0xff] }
 0x5a5   :  { %v9424_v9 = vpop.f32.mrf.mxu1  ;;  %10265 = vpow2.f32 %v7846_v52  ;;  %v15598_v52 = vld [vmem:[#allocation174_spill] sm:$0xff] }
 0x5a6   :  { %10267 = vrcp.f32 %v4439_v45  ;;  %v4325_v0 = vadd.f32 %v9424_v9, %v1597_v54  ;;  %v1617_v48 = vadd.f32 %v15598_v52, %v15522_v29  ;;  %v4292_v45 = vadd.f32 %v13522_v34, %v1250_v23  ;;  %v15601_v9 = vld [vmem:[#allocation167_spill] sm:$0xff] }
 0x5a7   :  { %v10250_v18 = vpop.eup %10249  ;;  %v4237_v41 = vpop.f32.mrf.mxu1  ;;  %10269 = vpow2.f32 %v7849_v16  ;;  %v15599_v16 = vld [vmem:[#allocation162_spill] sm:$0xff]  ;;  %v1592_v20 = vadd.f32 %v15601_v9, %v12489_v22  ;;  %v1607_v34 = vadd.f32 %v15602_v6, %v12613_v31  ;;  %v15606_v6 = vld [vmem:[#allocation75_spill] sm:$0xff] }
 0x5a8   :  { %v4441_v12 = vadd.f32 1.0, %v10250_v18  ;;  %v1582_v33 = vadd.f32 %v15599_v16, %v15524_v36 }
 0x5a9   :  { %v9427_v60 = vpop.f32.mrf.mxu1 }
 0x5aa   :  { %10271 = vrcp.f32 %v4441_v12  ;;  %v15600_v12 = vld [vmem:[#allocation176_spill] sm:$0xff]  ;;  %v4327_v16 = vadd.f32 %v9427_v60, %v1607_v34  ;;  %v1265_v34 = vadd.f32 %v15606_v6, %v12645_v15 }
 0x5ab   :  { %v10252_v1 = vpop.eup %10251  ;;  %v4247_v57 = vpop.f32.mrf.mxu1  ;;  %10273 = vpow2.f32 %v7848_v19  ;;  %v1612_v49 = vadd.f32 %v15600_v12, %v12605_v53 }
 0x5ac   :  { %v10254_v21 = vpop.eup %10253  ;;  %v4463_v47 = vadd.f32 1.0, %v10252_v1  ;;  %v7851_v60 = vmul.f32 -1.442695, %v4327_v16 }
 0x5ad   :  { %v10256_v39 = vpop.eup %10255  ;;  %v9430_v62 = vpop.f32.mrf.mxu1  ;;  %v4368_v18 = vadd.f32 1.0, %v10254_v21  ;;  %v4322_v21 = vadd.f32 %v4227_v50, %v1582_v33 }
 0x5ae   :  { %v10258_v3 = vpop.eup %10257  ;;  %10275 = vrcp.f32 %v4463_v47  ;;  %v4438_v1 = vadd.f32 1.0, %v10256_v39  ;;  %v4329_v19 = vadd.f32 %v9430_v62, %v1617_v48  ;;  %v4324_v47 = vadd.f32 %v4237_v41, %v1592_v20  ;;  %v15603_v62 = vld [vmem:[#allocation172_spill] sm:$0xff] }
 0x5af   :  { %10277 = vtanh.f32 %v4323_v35  ;;  %v4257_v26 = vpop.f32.mrf.mxu1  ;;  %v4440_v54 = vadd.f32 1.0, %v10258_v3  ;;  %v10260_v23 = vpop.eup %10259  ;;  %v1602_v48 = vadd.f32 %v15603_v62, %v12623_v24 }
 0x5b0   :  { %10279 = vtanh.f32 %v4325_v0  ;;  %v4328_v35 = vadd.f32 %v4257_v26, %v1612_v49  ;;  %v10262_v52 = vpop.eup %10261  ;;  %v7853_v12 = vmul.f32 -1.442695, %v4329_v19  ;;  %v15604_v0 = vld [vmem:[#allocation79_spill] sm:$0xff]  ;;  %v4342_v6 = vadd.f32 1.0, %v10260_v23 }
 0x5b1   :  { %10281 = vtanh.f32 %v4292_v45  ;;  %v10264_v39 = vpop.eup %10263  ;;  %v1275_v9 = vadd.f32 %v15604_v0, %v12631_v14 }
 0x5b2   :  { %10283 = vrcp.f32 %v4368_v18  ;;  %v10266_v3 = vpop.eup %10265  ;;  %v7852_v45 = vmul.f32 -1.442695, %v4328_v35  ;;  %v4326_v18 = vadd.f32 %v4247_v57, %v1602_v48  ;;  %v4295_v48 = vadd.f32 %v13524_v17, %v1265_v34 }
 0x5b3   :  { %10285 = vrcp.f32 %v4438_v1  ;;  %v10268_v50 = vpop.eup %10267  ;;  %v4462_v26 = vadd.f32 1.0, %v10266_v3  ;;  %v4297_v33 = vadd.f32 %v13528_v7, %v1275_v9  ;;  %v15605_v1 = vld [vmem:[#allocation81_spill] sm:$0xff]  ;;  %v4366_v9 = vadd.f32 1.0, %v10264_v39 }
 0x5b4   :  { %10287 = vrcp.f32 %v4440_v54  ;;  %v10270_v41 = vpop.eup %10269  ;;  %v1270_v19 = vadd.f32 %v15605_v1, %v12633_v58  ;;  %v15608_v1 = vld [vmem:[#allocation245_spill] sm:$0xff] }
 0x5b5   :  { %10289 = vtanh.f32 %v4322_v21  ;;  %v4465_v20 = vadd.f32 1.0, %v10270_v41  ;;  %v15607_v21 = vld [vmem:[#allocation77_spill] sm:$0xff]  ;;  %v7841_v3 = vmul.f32 -1.442695, %v4297_v33 }
 0x5b6   :  { %10291 = vtanh.f32 %v4324_v47  ;;  %v1260_v35 = vadd.f32 %v15607_v21, %v12655_v28  ;;  %v4344_v47 = vadd.f32 1.0, %v10262_v52  ;;  %v4296_v7 = vadd.f32 %v13530_v30, %v1270_v19  ;;  %v15609_v52 = vld [vmem:[#allocation69_spill] sm:$0xff] }
 0x5b7   :  { %10293 = vpow2.f32 %v7853_v12  ;;  %v10272_v49 = vpop.eup %10271  ;;  %v7850_v12 = vmul.f32 -1.442695, %v4326_v18 }
 0x5b8   :  { %10295 = vrcp.f32 %v4462_v26  ;;  %v10274_v54 = vpop.eup %10273  ;;  %v4294_v30 = vadd.f32 %v13526_v46, %v1260_v35  ;;  %v7840_v18 = vmul.f32 -1.442695, %v4296_v7 }
 0x5b9   :  { %10297 = vpow2.f32 %v7852_v45  ;;  %v4464_v16 = vadd.f32 1.0, %v10274_v54  ;;  %v1240_v45 = vadd.f32 %v15609_v52, %v15608_v1 }
 0x5ba   :  { %10299 = vrcp.f32 %v4465_v20  ;;  %v7838_v23 = vmul.f32 -1.442695, %v4294_v30 }
 0x5bb   :  { %v10276_v57 = vpop.eup %10275  ;;  %10301 = vpow2.f32 %v7851_v60 }
 0x5bc   :  { %v10278_v62 = vpop.eup %10277  ;;  %v4503_v0 = vmul.f32 %v10276_v57, %v13227_v42  ;;  %10303 = vrcp.f32 %v4464_v16  ;;  %v7839_v42 = vmul.f32 -1.442695, %v4295_v48 }
 0x5bd   :  { %v4507_v26 = vmul.f32 %v10278_v62, %v10268_v50  ;;  %v10280_v41 = vpop.eup %10279  ;;  %10305 = vrcp.f32 %v4344_v47  ;;  %v4290_v50 = vadd.f32 %v13518_v59, %v1240_v45 }
 0x5be   :  { %v10282_v19 = vpop.eup %10281  ;;  %v4509_v17 = vmul.f32 %v10280_v41, %v10272_v49  ;;  %10307 = vpow2.f32 %v7850_v12 }
 0x5bf   :  { %v13599_v20 = vadd.f32 %v4507_v26, %v4503_v0  ;;  %v10284_v33 = vpop.eup %10283  ;;  %10309 = vpow2.f32 %v7841_v3 }
 0x5c0   :  { %v10286_v39 = vpop.eup %10285  ;;  %10311 = vrcp.f32 %v4366_v9  ;;  %v4408_v45 = vmul.f32 %v10284_v33, %v13196_v10 }
 0x5c1   :  { %v10288_v60 = vpop.eup %10287  ;;  %10313 = vrcp.f32 %v4342_v6 }
 0x5c2   :  { %v10290_v54 = vpop.eup %10289  ;;  %10315 = vpow2.f32 %v7840_v18 }
 0x5c3   :  { %v10292_v34 = vpop.eup %10291  ;;  %10317 = vpow2.f32 %v7839_v42  ;;  %v4506_v12 = vmul.f32 %v10290_v54, %v10286_v39 }
 0x5c4   :  { %v10294_v46 = vpop.eup %10293  ;;  %10319 = vtanh.f32 %v4290_v50  ;;  %v4508_v9 = vmul.f32 %v10292_v34, %v10288_v60 }
 0x5c5   :  { %v10296_v21 = vpop.eup %10295  ;;  %10321 = vpow2.f32 %v7838_v23  ;;  %v4493_v47 = vadd.f32 1.0, %v10294_v46 }
 0x5c6   :  { %v10298_v35 = vpop.eup %10297  ;;  %v4502_v7 = vmul.f32 %v10296_v21, %v13235_v5  ;;  %10323 = vtanh.f32 %v13599_v20 }
 0x5c7   :  { %v10300_v49 = vpop.eup %10299  ;;  %v4492_v62 = vadd.f32 1.0, %v10298_v35  ;;  %10325 = vrcp.f32 %v4493_v47 }
 0x5c8   :  { %v10302_v57 = vpop.eup %10301  ;;  %v4505_v16 = vmul.f32 %v10300_v49, %v13232_v8  ;;  %v13609_v5 = vadd.f32 %v4506_v12, %v4502_v7 }
 0x5c9   :  { %v10304_v59 = vpop.eup %10303  ;;  %v4491_v41 = vadd.f32 1.0, %v10302_v57 }
 0x5ca   :  { %v10306_v48 = vpop.eup %10305  ;;  %v13605_v3 = vadd.f32 %v4509_v17, %v4505_v16  ;;  %v4504_v0 = vmul.f32 %v10304_v59, %v13238_v38 }
 0x5cb   :  { %v10308_v26 = vpop.eup %10307  ;;  %v4412_v18 = vmul.f32 %v10306_v48, %v10282_v19 }
 0x5cc   :  { %v10310_v52 = vpop.eup %10309  ;;  %10327 = vtanh.f32 %v13605_v3  ;;  %v13612_v8 = vadd.f32 %v4508_v9, %v4504_v0  ;;  %v4490_v38 = vadd.f32 1.0, %v10308_v26 }
 0x5cd   :  { %v10312_v6 = vpop.eup %10311  ;;  %10329 = vrcp.f32 %v4492_v62  ;;  %v4397_v42 = vadd.f32 1.0, %v10310_v52  ;;  %v13616_v10 = vadd.f32 %v4412_v18, %v4408_v45 }
 0x5ce   :  { %v10314_v30 = vpop.eup %10313  ;;  %10331 = vtanh.f32 %v13612_v8  ;;  %v4406_v50 = vmul.f32 %v10312_v6, %v13186_v13 }
 0x5cf   :  { %v10316_v17 = vpop.eup %10315  ;;  %10333 = vrcp.f32 %v4491_v41 }
 0x5d0   :  { %v10318_v39 = vpop.eup %10317  ;;  %10335 = vtanh.f32 %v13609_v5  ;;  %v4396_v54 = vadd.f32 1.0, %v10316_v17 }
 0x5d1   :  { %v10320_v33 = vpop.eup %10319  ;;  %10337 = vtanh.f32 %v13561_v37  ;;  %v4395_v23 = vadd.f32 1.0, %v10318_v39  ;;  %v15619_v39 = vld [vmem:[#allocation222_spill] sm:$0xff] }
 0x5d2   :  { %v4410_v60 = vmul.f32 %v10320_v33, %v10314_v30  ;;  %10339 = vrcp.f32 %v4490_v38  ;;  %v10322_v19 = vpop.eup %10321  ;;  %v15621_v33 = vld [vmem:[#allocation223_spill] sm:$0xff] }
 0x5d3   :  { %10341 = vrcp.f32 %v4397_v42  ;;  %v4394_v13 = vadd.f32 1.0, %v10322_v19  ;;  %v10324_v46 = vpop.eup %10323  ;;  %v15627_v19 = vld [vmem:[#allocation232_spill] sm:$0xff] }
 0x5d4   :  { %v13620_v34 = vadd.f32 %v4410_v60, %v4406_v50  ;;  %10343 = vtanh.f32 %v13616_v10  ;;  %v10326_v21 = vpop.eup %10325  ;;  %v15620_v50 = vld [vmem:[#allocation213_spill] sm:$0xff]  ;;  %v15622_v60 = vld [vmem:[#allocation226_spill] sm:$0xff] }
 0x5d5   :  { %10345 = vtanh.f32 %v13552_v11 }
 0x5d6   :  { %15610 = vst [vmem:[#allocation269_spill] sm:$0xff] %v13620_v34  ;;  %10347 = vrcp.f32 %v4396_v54  ;;  %v15623_v54 = vld [vmem:[#allocation229_spill] sm:$0xff] }
 0x5d7   :  { %10349 = vrcp.f32 %v4395_v23  ;;  %v15628_v23 = vld [vmem:[#allocation234_spill] sm:$0xff] }
 0x5d8   :  { %10351 = vtanh.f32 %v13620_v34 }
 0x5d9   :  { %v10328_v35 = vpop.eup %10327  ;;  %10353 = vrcp.f32 %v4394_v13  ;;  %v15629_v13 = vld [vmem:[#allocation235_spill] sm:$0xff] }
 0x5da   :  { %v10330_v49 = vpop.eup %10329  ;;  %v13625_v47 = vmul.f32 %v10328_v35, %v10326_v21  ;;  %v15631_v21 = vld [vmem:[#allocation17_spill] sm:$0xff] }
 0x5db   :  { %v10332_v57 = vpop.eup %10331  ;;  %v15632_v35 = vld [vmem:[#allocation13_spill] sm:$0xff] }
 0x5dc   :  { %15611 = vst [vmem:[#allocation270_spill] sm:$0xff] %v13625_v47  ;;  %v10334_v7 = vpop.eup %10333  ;;  %9431 = vmatprep.subr.mxu0 %v13625_v47  ;;  %v13628_v16 = vmul.f32 %v10332_v57, %v10330_v49  ;;  %v15633_v49 = vld [vmem:[#allocation14_spill] sm:$0xff]  ;;  %v15634_v57 = vld [vmem:[#allocation255_spill] sm:$0xff] }
 0x5dd   :  { %v10336_v59 = vpop.eup %10335  ;;  %9432 = vmatpush3.msra.mxu0 %v13625_v47  ;;  %v13632_v62 = vmul.f32 %v10334_v7, %v10324_v46  ;;  %v15630_v46 = vld [vmem:[#allocation15_spill] sm:$0xff]  ;;  %v15635_v7 = vld [vmem:[#allocation256_spill] sm:$0xff] }
 0x5de   :  { %15612 = vst [vmem:[#allocation271_spill] sm:$0xff] %v13628_v16  ;;  %v10338_v12 = vpop.eup %10337  ;;  %9433 = vmatprep.subr.mxu0 %v13628_v16 }
 0x5df   :  { %15613 = vst [vmem:[#allocation272_spill] sm:$0xff] %v13632_v62  ;;  %v10340_v48 = vpop.eup %10339  ;;  %9434 = vmatpush3.msra.mxu0 %v13628_v16  ;;  %v15663_v16 = vld [vmem:[#allocation87_spill] sm:$0xff] }
 0x5e0   :  { %v10342_v0 = vpop.eup %10341  ;;  %9435 = vmatprep.subr.mxu0 %v13632_v62  ;;  %v13636_v9 = vmul.f32 %v10340_v48, %v10336_v59  ;;  %v15636_v59 = vld [vmem:[#allocation257_spill] sm:$0xff]  ;;  %v15638_v48 = vld [vmem:[#allocation259_spill] sm:$0xff] }
 0x5e1   :  { %v10344_v26 = vpop.eup %10343  ;;  %9436 = vmatpush3.msra.mxu0 %v13632_v62  ;;  %v13640_v52 = vmul.f32 %v10342_v0, %v10338_v12  ;;  %v15637_v12 = vld [vmem:[#allocation258_spill] sm:$0xff]  ;;  %v15639_v0 = vld [vmem:[#allocation260_spill] sm:$0xff]  ;;  %v15662_v62 = vld [vmem:[#allocation163_spill] sm:$0xff] }
 0x5e2   :  { %15614 = vst [vmem:[#allocation273_spill] sm:$0xff] %v13636_v9  ;;  %v10346_v41 = vpop.eup %10345  ;;  %9437 = vmatprep.subr.mxu0 %v13636_v9  ;;  %v1295_v47 = vadd.f32 %v15663_v16, %v15662_v62  ;;  %v15670_v16 = vld [vmem:[#allocation91_spill] sm:$0xff] }
 0x5e3   :  { %15615 = vst [vmem:[#allocation274_spill] sm:$0xff] %v13640_v52  ;;  %v10348_v45 = vpop.eup %10347  ;;  %9438 = vmatpush3.msra.mxu0 %v13636_v9 }
 0x5e4   :  { %v10350_v6 = vpop.eup %10349  ;;  %9439 = vmatprep.subr.mxu0 %v13640_v52  ;;  %v13644_v30 = vmul.f32 %v10348_v45, %v10344_v26  ;;  %v15640_v26 = vld [vmem:[#allocation261_spill] sm:$0xff]  ;;  %v15642_v45 = vld [vmem:[#allocation263_spill] sm:$0xff] }
 0x5e5   :  { %v10352_v18 = vpop.eup %10351  ;;  %9440 = vmatpush3.msra.mxu0 %v13640_v52  ;;  %v13648_v38 = vmul.f32 %v10350_v6, %v10346_v41  ;;  %v15641_v41 = vld [vmem:[#allocation262_spill] sm:$0xff]  ;;  %v15643_v6 = vld [vmem:[#allocation264_spill] sm:$0xff] }
 0x5e6   :  { %15616 = vst [vmem:[#allocation275_spill] sm:$0xff] %v13644_v30  ;;  %9441 = vmatprep.subr.mxu0 %v13644_v30  ;;  %v10354_v17 = vpop.eup %10353 }
 0x5e7   :  { %15617 = vst [vmem:[#allocation48_spill] sm:$0xff] %v13648_v38  ;;  %9442 = vmatpush3.msra.mxu0 %v13644_v30  ;;  %v13652_v42 = vmul.f32 %v10354_v17, %v10352_v18  ;;  %v15644_v18 = vld [vmem:[#allocation265_spill] sm:$0xff]  ;;  %v15645_v17 = vld [vmem:[#allocation266_spill] sm:$0xff] }
 0x5e8   :  { %9443 = vmatprep.subr.mxu0 %v13648_v38 }
 0x5e9   :  { %15618 = vst [vmem:[#allocation50_spill] sm:$0xff] %v13652_v42  ;;  %9444 = vmatpush3.msra.mxu0 %v13648_v38  ;;  %v15664_v38 = vld [vmem:[#allocation236_spill] sm:$0xff] }
 0x5ea   :  { %9445 = vmatprep.subr.mxu0 %v13652_v42 }
 0x5eb   :  { %9446 = vmatpush3.msra.mxu0 %v13652_v42 }
 0x5ec   :  { %9448 = vmatmul.mubr.msk.f32.vlgmr.msra.gmra.mxu0 %vm2472_vm1, %v13281_v25  ;;  %v15624_v25 = vld [vmem:[#allocation239_spill] sm:$0xff] }
 0x5ed   :  { %9450 = vmatprep.mubr.msk.f32.mxu0 %vm2472_vm1, %v13288_v32  ;;  %v15625_v32 = vld [vmem:[#allocation227_spill] sm:$0xff] }
 0x5f0   :  { %9451 = vmatmul.mubr.msk.f32.gmra.mxu0 %vm2472_vm1, %v13295_v2  ;;  %v15626_v2 = vld [vmem:[#allocation240_spill] sm:$0xff] }
 0x5f1   :  { %9453 = vmatprep.mubr.msk.f32.mxu0 %vm2472_vm1, %v15619_v39  ;;  %v15646_v39 = vld [vmem:[#allocation267_spill] sm:$0xff] }
 0x5f4   :  { %9454 = vmatmul.mubr.msk.f32.gmra.mxu0 %vm2472_vm1, %v15620_v50  ;;  %v15647_v50 = vld [vmem:[#allocation268_spill] sm:$0xff] }
 0x5f5   :  { %9456 = vmatprep.mubr.msk.f32.mxu0 %vm2472_vm1, %v15621_v33  ;;  %v15648_v33 = vld [vmem:[#allocation201_spill] sm:$0xff] }
 0x5f8   :  { %9457 = vmatmul.mubr.msk.f32.gmra.mxu0 %vm2472_vm1, %v15622_v60  ;;  %v15649_v60 = vld [vmem:[#allocation112_spill] sm:$0xff] }
 0x5f9   :  { %9459 = vmatprep.mubr.msk.f32.mxu0 %vm2472_vm1, %v15623_v54  ;;  %v1467_v54 = vadd.f32 %v15649_v60, %v15648_v33  ;;  %v15656_v60 = vld [vmem:[#allocation244_spill] sm:$0xff] }
 0x5fc   :  { %9460 = vmatmul.mubr.msk.f32.gmra.mxu0 %vm2472_vm1, %v15624_v25 }
 0x5fd   :  { %9462 = vmatprep.mubr.msk.f32.mxu0 %vm2472_vm1, %v15625_v32 }
 0x600   :  { %9463 = vmatmul.mubr.msk.f32.gmra.mxu0 %vm2472_vm1, %v15626_v2 }
 0x601   :  { %9465 = vmatprep.mubr.msk.f32.mxu0 %vm2472_vm1, %v15627_v19  ;;  %v15650_v19 = vld [vmem:[#allocation190_spill] sm:$0xff] }
 0x604   :  { %9466 = vmatmul.mubr.msk.f32.gmra.mxu0 %vm2472_vm1, %v15628_v23  ;;  %v15651_v23 = vld [vmem:[#allocation116_spill] sm:$0xff] }
 0x605   :  { %9468 = vmatprep.mubr.msk.f32.mxu0 %vm2472_vm1, %v15629_v13  ;;  %v1477_v13 = vadd.f32 %v15651_v23, %v15650_v19 }
 0x608   :  { %9469 = vmatmul.mubr.msk.f32.gmra.mxu0 %vm2472_vm1, %v15630_v46 }
 0x609   :  { %9471 = vmatprep.mubr.msk.f32.mxu0 %vm2472_vm1, %v15631_v21 }
 0x60c   :  { %9472 = vmatmul.mubr.msk.f32.gmra.mxu0 %vm2472_vm1, %v15632_v35 }
 0x60d   :  { %9474 = vmatprep.mubr.msk.f32.mxu0 %vm2472_vm1, %v15633_v49 }
 0x610   :  { %9475 = vmatmul.mubr.msk.f32.gmra.mxu0 %vm2472_vm1, %v15634_v57  ;;  %v15652_v57 = vld [vmem:[#allocation241_spill] sm:$0xff] }
 0x611   :  { %9477 = vmatprep.mubr.msk.f32.mxu0 %vm2472_vm1, %v15635_v7  ;;  %v15653_v7 = vld [vmem:[#allocation120_spill] sm:$0xff] }
 0x614   :  { %9478 = vmatmul.mubr.msk.f32.gmra.mxu0 %vm2472_vm1, %v15636_v59  ;;  %v1487_v59 = vadd.f32 %v15653_v7, %v15652_v57  ;;  %v15659_v7 = vld [vmem:[#allocation132_spill] sm:$0xff] }
 0x615   :  { %9480 = vmatprep.mubr.msk.f32.mxu0 %vm2472_vm1, %v15637_v12 }
 0x618   :  { %9481 = vmatmul.mubr.msk.f32.gmra.mxu0 %vm2472_vm1, %v15638_v48 }
 0x619   :  { %9483 = vmatprep.mubr.msk.f32.mxu0 %vm2472_vm1, %v15639_v0 }
 0x61c   :  { %9484 = vmatmul.mubr.msk.f32.gmra.mxu0 %vm2472_vm1, %v15640_v26 }
 0x61d   :  { %9486 = vmatprep.mubr.msk.f32.mxu0 %vm2472_vm1, %v15641_v41  ;;  %v15654_v41 = vld [vmem:[#allocation230_spill] sm:$0xff] }
 0x620   :  { %9487 = vmatmul.mubr.msk.f32.gmra.mxu0 %vm2472_vm1, %v15642_v45  ;;  %v15655_v45 = vld [vmem:[#allocation124_spill] sm:$0xff] }
 0x621   :  { %9489 = vmatprep.mubr.msk.f32.mxu0 %vm2472_vm1, %v15643_v6  ;;  %v1497_v6 = vadd.f32 %v15655_v45, %v15654_v41  ;;  %v15667_v41 = vld [vmem:[#allocation85_spill] sm:$0xff] }
 0x624   :  { %9490 = vmatmul.mubr.msk.f32.gmra.mxu0 %vm2472_vm1, %v15644_v18 }
 0x625   :  { %9492 = vmatprep.mubr.msk.f32.mxu0 %vm2472_vm1, %v15645_v17 }
 0x628   :  { %9493 = vmatmul.mubr.msk.f32.gmra.mxu0 %vm2472_vm1, %v15646_v39 }
 0x629   :  { %9575 = vmatprep.mubr.msk.f32.mxu0 %vm2472_vm1, %v15647_v50 }
 0x6ac   :  { %v9449_v25 = vpop.f32.mrf.mxu0 }
 0x6ad   :  { %v4774_v32 = vadd.f32 %v9449_v25, %v1467_v54  ;;  %v15657_v54 = vld [vmem:[#allocation128_spill] sm:$0xff] }
 0x6ae   :  { %v13723_v2 = vpop.f32.mrf.mxu0  ;;  %v1507_v25 = vadd.f32 %v15657_v54, %v15656_v60  ;;  %v15666_v60 = vld [vmem:[#allocation184_spill] sm:$0xff] }
 0x6af   :  { %v7887_v46 = vmul.f32 -1.442695, %v4774_v32 }
 0x6b0   :  { %v9452_v21 = vpop.f32.mrf.mxu0 }
 0x6b1   :  { %10355 = vpow2.f32 %v7887_v46  ;;  %v4776_v35 = vadd.f32 %v9452_v21, %v1477_v13 }
 0x6b2   :  { %v13727_v49 = vpop.f32.mrf.mxu0 }
 0x6b3   :  { %v7889_v12 = vmul.f32 -1.442695, %v4776_v35  ;;  %v15658_v35 = vld [vmem:[#allocation237_spill] sm:$0xff] }
 0x6b4   :  { %v9455_v48 = vpop.f32.mrf.mxu0 }
 0x6b5   :  { %10357 = vpow2.f32 %v7889_v12  ;;  %v4778_v0 = vadd.f32 %v9455_v48, %v1487_v59  ;;  %v1517_v59 = vadd.f32 %v15659_v7, %v15658_v35  ;;  %v15661_v7 = vld [vmem:[#allocation83_spill] sm:$0xff] }
 0x6b6   :  { %v13731_v26 = vpop.f32.mrf.mxu0 }
 0x6b7   :  { %v7891_v18 = vmul.f32 -1.442695, %v4778_v0 }
 0x6b8   :  { %v9458_v17 = vpop.f32.mrf.mxu0 }
 0x6b9   :  { %10359 = vpow2.f32 %v7891_v18  ;;  %v4780_v39 = vadd.f32 %v9458_v17, %v1497_v6 }
 0x6ba   :  { %v4628_v50 = vpop.f32.mrf.mxu0 }
 0x6bb   :  { %v7893_v32 = vmul.f32 -1.442695, %v4780_v39 }
 0x6bc   :  { %v9461_v23 = vpop.f32.mrf.mxu0 }
 0x6bd   :  { %10361 = vpow2.f32 %v7893_v32  ;;  %v4782_v13 = vadd.f32 %v9461_v23, %v1507_v25 }
 0x6be   :  { %v10356_v46 = vpop.eup %10355  ;;  %v13737_v21 = vpop.f32.mrf.mxu0 }
 0x6bf   :  { %v4834_v12 = vadd.f32 1.0, %v10356_v46  ;;  %10363 = vtanh.f32 %v4782_v13  ;;  %v15660_v46 = vld [vmem:[#allocation177_spill] sm:$0xff] }
 0x6c0   :  { %v9464_v48 = vpop.f32.mrf.mxu0 }
 0x6c1   :  { %10365 = vrcp.f32 %v4834_v12  ;;  %v4784_v0 = vadd.f32 %v9464_v48, %v1517_v59  ;;  %v1285_v59 = vadd.f32 %v15661_v7, %v15660_v46  ;;  %v1280_v7 = vadd.f32 %v15667_v41, %v15666_v60 }
 0x6c2   :  { %v10358_v45 = vpop.eup %10357  ;;  %v13741_v6 = vpop.f32.mrf.mxu0 }
 0x6c3   :  { %v4836_v18 = vadd.f32 1.0, %v10358_v45  ;;  %10367 = vtanh.f32 %v4784_v0 }
 0x6c4   :  { %v13743_v17 = vpop.f32.mrf.mxu0 }
 0x6c5   :  { %10369 = vrcp.f32 %v4836_v18 }
 0x6c6   :  { %v10360_v39 = vpop.eup %10359  ;;  %v13745_v54 = vpop.f32.mrf.mxu0 }
 0x6c7   :  { %v4858_v25 = vadd.f32 1.0, %v10360_v39 }
 0x6c8   :  { %v13747_v32 = vpop.f32.mrf.mxu0 }
 0x6c9   :  { %10371 = vrcp.f32 %v4858_v25  ;;  %v15665_v25 = vld [vmem:[#allocation126_spill] sm:$0xff] }
 0x6ca   :  { %v10362_v23 = vpop.eup %10361  ;;  %v13749_v13 = vpop.f32.mrf.mxu0  ;;  %v1492_v30 = vadd.f32 %v15665_v25, %v15664_v38 }
 0x6cb   :  { %v4860_v12 = vadd.f32 1.0, %v10362_v23 }
 0x6cc   :  { %v9473_v48 = vpop.f32.mrf.mxu0  ;;  %v10364_v45 = vpop.eup %10363  ;;  %v4779_v57 = vadd.f32 %v4628_v50, %v1492_v30 }
 0x6cd   :  { %10373 = vrcp.f32 %v4860_v12  ;;  %v4806_v0 = vadd.f32 %v9473_v48, %v1285_v59  ;;  %v15668_v12 = vld [vmem:[#allocation207_spill] sm:$0xff]  ;;  %v15669_v59 = vld [vmem:[#allocation89_spill] sm:$0xff] }
 0x6ce   :  { %v10366_v9 = vpop.eup %10365  ;;  %v4678_v18 = vpop.f32.mrf.mxu0  ;;  %v1290_v48 = vadd.f32 %v15669_v59, %v15668_v12  ;;  %v7892_v41 = vmul.f32 -1.442695, %v4779_v57  ;;  %v15672_v12 = vld [vmem:[#allocation118_spill] sm:$0xff] }
 0x6cf   :  { %v4902_v39 = vmul.f32 %v10366_v9, %v10364_v45  ;;  %v7899_v42 = vmul.f32 -1.442695, %v4806_v0  ;;  %v1305_v9 = vadd.f32 %v15670_v16, %v15434_v56  ;;  %v4805_v0 = vadd.f32 %v4678_v18, %v1280_v7  ;;  %v15674_v7 = vld [vmem:[#allocation93_spill] sm:$0xff] }
 0x6d0   :  { %v9476_v52 = vpop.f32.mrf.mxu0  ;;  %v10368_v35 = vpop.eup %10367  ;;  %v1472_v16 = vadd.f32 %v15672_v12, %v15587_v27 }
 0x6d1   :  { %10375 = vpow2.f32 %v7899_v42  ;;  %v4808_v23 = vadd.f32 %v9476_v52, %v1295_v47  ;;  %v15671_v47 = vld [vmem:[#allocation114_spill] sm:$0xff]  ;;  %v7898_v30 = vmul.f32 -1.442695, %v4805_v0 }
 0x6d2   :  { %v10370_v46 = vpop.eup %10369  ;;  %v4688_v19 = vpop.f32.mrf.mxu0  ;;  %v1462_v52 = vadd.f32 %v15671_v47, %v15585_v51 }
 0x6d3   :  { %v4904_v45 = vmul.f32 %v10370_v46, %v10368_v35  ;;  %v7901_v62 = vmul.f32 -1.442695, %v4808_v23  ;;  %v4807_v25 = vadd.f32 %v4688_v19, %v1290_v48  ;;  %v15673_v19 = vld [vmem:[#allocation122_spill] sm:$0xff]  ;;  %v1300_v23 = vadd.f32 %v15674_v7, %v15436_v61  ;;  %v15675_v48 = vld [vmem:[#allocation95_spill] sm:$0xff] }
 0x6d4   :  { %v9479_v38 = vpop.f32.mrf.mxu0  ;;  %v1482_v18 = vadd.f32 %v15673_v19, %v15589_v44 }
 0x6d5   :  { %10377 = vpow2.f32 %v7901_v62  ;;  %v4810_v33 = vadd.f32 %v9479_v38, %v1305_v9  ;;  %v7900_v35 = vmul.f32 -1.442695, %v4807_v25  ;;  %v4773_v62 = vadd.f32 %v13723_v2, %v1462_v52  ;;  %v15676_v52 = vld [vmem:[#allocation97_spill] sm:$0xff] }
 0x6d6   :  { %v10372_v34 = vpop.eup %10371  ;;  %v4698_v42 = vpop.f32.mrf.mxu0  ;;  %v1315_v9 = vadd.f32 %v15675_v48, %v15438_v43 }
 0x6d7   :  { %v4898_v59 = vmul.f32 %v10372_v34, %v13552_v11  ;;  %v7903_v50 = vmul.f32 -1.442695, %v4810_v33  ;;  %v4775_v11 = vadd.f32 %v13727_v49, %v1472_v16  ;;  %v4777_v33 = vadd.f32 %v13731_v26, %v1482_v18 }
 0x6d8   :  { %v9482_v46 = vpop.f32.mrf.mxu0  ;;  %v4809_v2 = vadd.f32 %v4698_v42, %v1300_v23  ;;  %v7886_v0 = vmul.f32 -1.442695, %v4773_v62  ;;  %v1310_v49 = vadd.f32 %v15676_v52, %v15440_v4  ;;  %v15677_v62 = vld [vmem:[#allocation99_spill] sm:$0xff] }
 0x6d9   :  { %v13771_v38 = vadd.f32 %v4902_v39, %v4898_v59  ;;  %10379 = vpow2.f32 %v7903_v50  ;;  %v4812_v59 = vadd.f32 %v9482_v46, %v1315_v9  ;;  %v7890_v26 = vmul.f32 -1.442695, %v4777_v33  ;;  %v15679_v9 = vld [vmem:[#allocation134_spill] sm:$0xff] }
 0x6da   :  { %v10374_v57 = vpop.eup %10373  ;;  %10381 = vpow2.f32 %v7892_v41  ;;  %v4708_v34 = vpop.f32.mrf.mxu0  ;;  %v7888_v41 = vmul.f32 -1.442695, %v4775_v11  ;;  %v7902_v16 = vmul.f32 -1.442695, %v4809_v2  ;;  %v15678_v11 = vld [vmem:[#allocation103_spill] sm:$0xff]  ;;  %v1512_v2 = vadd.f32 %v15679_v9, %v15596_v40 }
 0x6db   :  { %v4900_v12 = vmul.f32 %v10374_v57, %v13561_v37  ;;  %10383 = vpow2.f32 %v7898_v30  ;;  %v4811_v37 = vadd.f32 %v4708_v34, %v1310_v49  ;;  %v7905_v42 = vmul.f32 -1.442695, %v4812_v59  ;;  %v15680_v59 = vld [vmem:[#allocation111_spill] sm:$0xff] }
 0x6dc   :  { %10385 = vpow2.f32 %v7900_v35  ;;  %v9485_v39 = vpop.f32.mrf.mxu0  ;;  %v1325_v57 = vadd.f32 %v15677_v62, %v12501_v63  ;;  %v1335_v34 = vadd.f32 %v15678_v11, %v12475_v55  ;;  %v15684_v11 = vld [vmem:[#allocation107_spill] sm:$0xff] }
 0x6dd   :  { %v13780_v25 = vadd.f32 %v4904_v45, %v4900_v12  ;;  %10387 = vpow2.f32 %v7886_v0  ;;  %v7904_v7 = vmul.f32 -1.442695, %v4811_v37 }
 0x6de   :  { %v10376_v47 = vpop.eup %10375  ;;  %v4718_v50 = vpop.f32.mrf.mxu0  ;;  %10389 = vpow2.f32 %v7888_v41  ;;  %v4814_v33 = vadd.f32 %v9485_v39, %v1325_v57 }
 0x6df   :  { %v4930_v19 = vadd.f32 1.0, %v10376_v47  ;;  %10391 = vpow2.f32 %v7890_v26  ;;  %v1355_v26 = vadd.f32 %v15680_v59, %v15522_v29 }
 0x6e0   :  { %v9488_v30 = vpop.f32.mrf.mxu0  ;;  %10393 = vpow2.f32 %v7902_v16  ;;  %v4783_v16 = vadd.f32 %v13741_v6, %v1512_v2  ;;  %v1345_v6 = vadd.f32 %v15684_v11, %v12613_v31  ;;  %v15689_v11 = vld [vmem:[#allocation138_spill] sm:$0xff] }
 0x6e1   :  { %10395 = vrcp.f32 %v4930_v19  ;;  %v4816_v52 = vadd.f32 %v9488_v30, %v1335_v34  ;;  %v15681_v19 = vld [vmem:[#allocation101_spill] sm:$0xff] }
 0x6e2   :  { %v10378_v18 = vpop.eup %10377  ;;  %v4728_v35 = vpop.f32.mrf.mxu0  ;;  %10397 = vpow2.f32 %v7905_v42  ;;  %v15682_v42 = vld [vmem:[#allocation113_spill] sm:$0xff] }
 0x6e3   :  { %v4932_v45 = vadd.f32 1.0, %v10378_v18  ;;  %v1320_v18 = vadd.f32 %v15681_v19, %v15524_v36  ;;  %v15683_v30 = vld [vmem:[#allocation105_spill] sm:$0xff] }
 0x6e4   :  { %v9491_v23 = vpop.f32.mrf.mxu0 }
 0x6e5   :  { %10399 = vrcp.f32 %v4932_v45  ;;  %v1350_v45 = vadd.f32 %v15682_v42, %v12605_v53  ;;  %v4813_v34 = vadd.f32 %v4718_v50, %v1320_v18 }
 0x6e6   :  { %v10380_v46 = vpop.eup %10379  ;;  %v4738_v12 = vpop.f32.mrf.mxu0  ;;  %10401 = vpow2.f32 %v7904_v7  ;;  %v1330_v7 = vadd.f32 %v15683_v30, %v12489_v22 }
 0x6e7   :  { %v10382_v48 = vpop.eup %10381  ;;  %v4954_v0 = vadd.f32 1.0, %v10380_v46 }
 0x6e8   :  { %v10384_v47 = vpop.eup %10383  ;;  %v9494_v49 = vpop.f32.mrf.mxu0  ;;  %v4859_v37 = vadd.f32 1.0, %v10382_v48  ;;  %v4815_v9 = vadd.f32 %v4728_v35, %v1330_v7  ;;  %v15688_v7 = vld [vmem:[#allocation136_spill] sm:$0xff] }
 0x6e9   :  { %v10386_v41 = vpop.eup %10385  ;;  %10403 = vrcp.f32 %v4954_v0  ;;  %v4929_v62 = vadd.f32 1.0, %v10384_v47  ;;  %v4820_v57 = vadd.f32 %v9494_v49, %v1355_v26  ;;  %v4818_v0 = vadd.f32 %v9491_v23, %v1345_v6  ;;  %v15685_v49 = vld [vmem:[#allocation109_spill] sm:$0xff] }
 0x6ea   :  { %10405 = vtanh.f32 %v4814_v33  ;;  %v4748_v39 = vpop.f32.mrf.mxu0  ;;  %v4931_v46 = vadd.f32 1.0, %v10386_v41  ;;  %v10388_v48 = vpop.eup %10387  ;;  %v1340_v26 = vadd.f32 %v15685_v49, %v12623_v24  ;;  %v1522_v6 = vadd.f32 %v15689_v11, %v12655_v28 }
 0x6eb   :  { %10407 = vtanh.f32 %v4816_v52  ;;  %v4819_v33 = vadd.f32 %v4748_v39, %v1350_v45  ;;  %v10390_v2 = vpop.eup %10389  ;;  %v7909_v59 = vmul.f32 -1.442695, %v4820_v57  ;;  %v15686_v52 = vld [vmem:[#allocation140_spill] sm:$0xff]  ;;  %v7907_v23 = vmul.f32 -1.442695, %v4818_v0  ;;  %v15687_v45 = vld [vmem:[#allocation142_spill] sm:$0xff] }
 0x6ec   :  { %10409 = vtanh.f32 %v4783_v16  ;;  %v10392_v47 = vpop.eup %10391  ;;  %v1537_v19 = vadd.f32 %v15686_v52, %v12631_v14 }
 0x6ed   :  { %10411 = vrcp.f32 %v4859_v37  ;;  %v10394_v41 = vpop.eup %10393  ;;  %v7908_v16 = vmul.f32 -1.442695, %v4819_v33  ;;  %v4817_v37 = vadd.f32 %v4738_v12, %v1340_v26 }
 0x6ee   :  { %10413 = vrcp.f32 %v4929_v62  ;;  %v10396_v50 = vpop.eup %10395  ;;  %v4953_v39 = vadd.f32 1.0, %v10394_v41  ;;  %v4788_v18 = vadd.f32 %v13747_v32, %v1537_v19  ;;  %v1532_v62 = vadd.f32 %v15687_v45, %v12633_v58 }
 0x6ef   :  { %10415 = vrcp.f32 %v4931_v46  ;;  %v10398_v35 = vpop.eup %10397  ;;  %v1527_v46 = vadd.f32 %v15688_v7, %v12645_v15  ;;  %v4857_v41 = vadd.f32 1.0, %v10392_v47 }
 0x6f0   :  { %10417 = vtanh.f32 %v4813_v34  ;;  %v4956_v57 = vadd.f32 1.0, %v10398_v35  ;;  %v4835_v34 = vadd.f32 1.0, %v10390_v2  ;;  %v4787_v32 = vadd.f32 %v13749_v13, %v1532_v62  ;;  %v15690_v2 = vld [vmem:[#allocation130_spill] sm:$0xff] }
 0x6f1   :  { %10419 = vtanh.f32 %v4815_v9  ;;  %v7906_v9 = vmul.f32 -1.442695, %v4817_v37  ;;  %v7897_v49 = vmul.f32 -1.442695, %v4788_v18  ;;  %v4785_v13 = vadd.f32 %v13745_v54, %v1522_v6 }
 0x6f2   :  { %10421 = vpow2.f32 %v7909_v59  ;;  %v10400_v42 = vpop.eup %10399  ;;  %v4786_v59 = vadd.f32 %v13743_v17, %v1527_v46  ;;  %v7896_v37 = vmul.f32 -1.442695, %v4787_v32 }
 0x6f3   :  { %10423 = vrcp.f32 %v4953_v39  ;;  %v10402_v30 = vpop.eup %10401  ;;  %v4833_v39 = vadd.f32 1.0, %v10388_v48  ;;  %v7894_v48 = vmul.f32 -1.442695, %v4785_v13 }
 0x6f4   :  { %10425 = vpow2.f32 %v7908_v16  ;;  %v4955_v33 = vadd.f32 1.0, %v10402_v30  ;;  %v1502_v16 = vadd.f32 %v15690_v2, %v15608_v1 }
 0x6f5   :  { %10427 = vrcp.f32 %v4956_v57 }
 0x6f6   :  { %v10404_v12 = vpop.eup %10403  ;;  %10429 = vpow2.f32 %v7907_v23 }
 0x6f7   :  { %v10406_v0 = vpop.eup %10405  ;;  %v4994_v26 = vmul.f32 %v10404_v12, %v13599_v20  ;;  %10431 = vrcp.f32 %v4955_v33  ;;  %v7895_v20 = vmul.f32 -1.442695, %v4786_v59 }
 0x6f8   :  { %v4998_v52 = vmul.f32 %v10406_v0, %v10396_v50  ;;  %v10408_v19 = vpop.eup %10407  ;;  %10433 = vrcp.f32 %v4835_v34  ;;  %v4781_v50 = vadd.f32 %v13737_v21, %v1502_v16 }
 0x6f9   :  { %v10410_v35 = vpop.eup %10409  ;;  %v5000_v17 = vmul.f32 %v10408_v19, %v10400_v42  ;;  %10435 = vpow2.f32 %v7906_v9 }
 0x6fa   :  { %v13818_v45 = vadd.f32 %v4998_v52, %v4994_v26  ;;  %v10412_v18 = vpop.eup %10411  ;;  %10437 = vpow2.f32 %v7897_v49 }
 0x6fb   :  { %v10414_v47 = vpop.eup %10413  ;;  %10439 = vrcp.f32 %v4857_v41  ;;  %v4899_v52 = vmul.f32 %v10412_v18, %v13616_v10 }
 0x6fc   :  { %v10416_v23 = vpop.eup %10415  ;;  %10441 = vrcp.f32 %v4833_v39 }
 0x6fd   :  { %v10418_v62 = vpop.eup %10417  ;;  %10443 = vpow2.f32 %v7896_v37 }
 0x6fe   :  { %v10420_v57 = vpop.eup %10419  ;;  %10445 = vpow2.f32 %v7895_v20  ;;  %v4997_v12 = vmul.f32 %v10418_v62, %v10414_v47 }
 0x6ff   :  { %v10422_v54 = vpop.eup %10421  ;;  %10447 = vtanh.f32 %v4781_v50  ;;  %v4999_v59 = vmul.f32 %v10420_v57, %v10416_v23 }
 0x700   :  { %v10424_v30 = vpop.eup %10423  ;;  %10449 = vpow2.f32 %v7894_v48  ;;  %v4984_v46 = vadd.f32 1.0, %v10422_v54 }
 0x701   :  { %v10426_v7 = vpop.eup %10425  ;;  %v4993_v6 = vmul.f32 %v10424_v30, %v13609_v5  ;;  %10451 = vtanh.f32 %v13818_v45 }
 0x702   :  { %v10428_v42 = vpop.eup %10427  ;;  %v4983_v32 = vadd.f32 1.0, %v10426_v7  ;;  %10453 = vrcp.f32 %v4984_v46 }
 0x703   :  { %v10430_v11 = vpop.eup %10429  ;;  %v4996_v34 = vmul.f32 %v10428_v42, %v13605_v3  ;;  %v13828_v5 = vadd.f32 %v4997_v12, %v4993_v6 }
 0x704   :  { %v10432_v21 = vpop.eup %10431  ;;  %v4982_v26 = vadd.f32 1.0, %v10430_v11 }
 0x705   :  { %v10434_v33 = vpop.eup %10433  ;;  %v13824_v9 = vadd.f32 %v5000_v17, %v4996_v34  ;;  %v4995_v0 = vmul.f32 %v10432_v21, %v13612_v8  ;;  %v15691_v17 = vld [vmem:[#allocation269_spill] sm:$0xff] }
 0x706   :  { %v10436_v49 = vpop.eup %10435  ;;  %v4903_v16 = vmul.f32 %v10434_v33, %v10410_v35 }
 0x707   :  { %v10438_v41 = vpop.eup %10437  ;;  %10455 = vtanh.f32 %v13824_v9  ;;  %v13831_v3 = vadd.f32 %v4999_v59, %v4995_v0  ;;  %v4981_v8 = vadd.f32 1.0, %v10436_v49 }
 0x708   :  { %v10440_v19 = vpop.eup %10439  ;;  %10457 = vrcp.f32 %v4983_v32  ;;  %v4888_v13 = vadd.f32 1.0, %v10438_v41  ;;  %v13835_v10 = vadd.f32 %v4903_v16, %v4899_v52 }
 0x709   :  { %v10442_v2 = vpop.eup %10441  ;;  %10459 = vtanh.f32 %v13831_v3  ;;  %v4897_v20 = vmul.f32 %v10440_v19, %v15691_v17  ;;  %v13893_v17 = vld [vmem:[%s14905_s2 + $0x18] sm:$0xff] }
 0x70a   :  { %v10444_v39 = vpop.eup %10443  ;;  %10461 = vrcp.f32 %v4982_v26  ;;  %15703 = vst [vmem:[#allocation151_spill] sm:$0xff] %v13893_v17 }
 0x70b   :  { %v10446_v37 = vpop.eup %10445  ;;  %10463 = vtanh.f32 %v13828_v5  ;;  %v4887_v50 = vadd.f32 1.0, %v10444_v39 }
 0x70c   :  { %v10448_v18 = vpop.eup %10447  ;;  %10465 = vtanh.f32 %v13780_v25  ;;  %v4886_v23 = vadd.f32 1.0, %v10446_v37  ;;  %v13886_v37 = vld [vmem:[%s14905_s2 + $0x10] sm:$0xff] }
 0x70d   :  { %v4901_v47 = vmul.f32 %v10448_v18, %v10442_v2  ;;  %10467 = vrcp.f32 %v4981_v8  ;;  %v10450_v35 = vpop.eup %10449  ;;  %15702 = vst [vmem:[#allocation147_spill] sm:$0xff] %v13886_v37  ;;  %v13907_v18 = vld [vmem:[%s14905_s2 + $0x28] sm:$0xff] }
 0x70e   :  { %10469 = vrcp.f32 %v4888_v13  ;;  %v4885_v48 = vadd.f32 1.0, %v10450_v35  ;;  %v10452_v57 = vpop.eup %10451  ;;  %v13879_v13 = vld [vmem:[%s14905_s2 + $0x8] sm:$0xff]  ;;  %15705 = vst [vmem:[#allocation153_spill] sm:$0xff] %v13907_v18  ;;  %v13928_v35 = vld [vmem:[%s14905_s2 + $0x40] sm:$0xff] }
 0x70f   :  { %v13839_v62 = vadd.f32 %v4901_v47, %v4897_v20  ;;  %10471 = vtanh.f32 %v13835_v10  ;;  %v10454_v54 = vpop.eup %10453  ;;  %15701 = vst [vmem:[#allocation70_spill] sm:$0xff] %v13879_v13  ;;  %v13900_v20 = vld [vmem:[%s14905_s2 + $0x20] sm:$0xff]  ;;  %v13914_v47 = vld [vmem:[%s14905_s2 + $0x30] sm:$0xff]  ;;  %15708 = vst [vmem:[#allocation159_spill] sm:$0xff] %v13928_v35 }
 0x710   :  { %10473 = vtanh.f32 %v13771_v38  ;;  %15704 = vst [vmem:[#allocation149_spill] sm:$0xff] %v13900_v20  ;;  %15706 = vst [vmem:[#allocation155_spill] sm:$0xff] %v13914_v47 }
 0x711   :  { %15692 = vst [vmem:[#allocation52_spill] sm:$0xff] %v13839_v62  ;;  %10475 = vrcp.f32 %v4887_v50  ;;  %v13921_v50 = vld [vmem:[%s14905_s2 + $0x38] sm:$0xff] }
 0x712   :  { %10477 = vrcp.f32 %v4886_v23  ;;  %15707 = vst [vmem:[#allocation157_spill] sm:$0xff] %v13921_v50  ;;  %v13935_v23 = vld [vmem:[%s14905_s2 + $0x48] sm:$0xff] }
 0x713   :  { %10479 = vtanh.f32 %v13839_v62  ;;  %15709 = vst [vmem:[#allocation161_spill] sm:$0xff] %v13935_v23 }
 0x714   :  { %v10456_v30 = vpop.eup %10455  ;;  %10481 = vrcp.f32 %v4885_v48  ;;  %v13942_v48 = vld [vmem:[%s14905_s2 + $0x50] sm:$0xff] }
 0x715   :  { %v10458_v7 = vpop.eup %10457  ;;  %v13844_v42 = vmul.f32 %v10456_v30, %v10454_v54  ;;  %15710 = vst [vmem:[#allocation164_spill] sm:$0xff] %v13942_v48  ;;  %v13956_v54 = vld [vmem:[%s14905_s2 + $0x60] sm:$0xff]  ;;  %v13963_v30 = vld [vmem:[%s14905_s2 + $0x68] sm:$0xff] }
 0x716   :  { %v10460_v46 = vpop.eup %10459  ;;  %15712 = vst [vmem:[#allocation246_spill] sm:$0xff] %v13956_v54  ;;  %15713 = vst [vmem:[#allocation178_spill] sm:$0xff] %v13963_v30 }
 0x717   :  { %15693 = vst [vmem:[#allocation54_spill] sm:$0xff] %v13844_v42  ;;  %v10462_v11 = vpop.eup %10461  ;;  %9495 = vmatprep.subr.mxu1 %v13844_v42  ;;  %v13847_v6 = vmul.f32 %v10460_v46, %v10458_v7  ;;  %v13970_v7 = vld [vmem:[%s14905_s2 + $0x70] sm:$0xff]  ;;  %v13977_v46 = vld [vmem:[%s14905_s2 + $0x78] sm:$0xff] }
 0x718   :  { %v10464_v34 = vpop.eup %10463  ;;  %9496 = vmatpush3.msra.mxu1 %v13844_v42  ;;  %v13851_v12 = vmul.f32 %v10462_v11, %v10452_v57  ;;  %v13949_v57 = vld [vmem:[%s14905_s2 + $0x58] sm:$0xff]  ;;  %15714 = vst [vmem:[#allocation231_spill] sm:$0xff] %v13970_v7  ;;  %15715 = vst [vmem:[#allocation166_spill] sm:$0xff] %v13977_v46  ;;  %v13984_v11 = vld [vmem:[%s14905_s2 + $0x80] sm:$0xff] }
 0x719   :  { %15694 = vst [vmem:[#allocation56_spill] sm:$0xff] %v13847_v6  ;;  %v10466_v21 = vpop.eup %10465  ;;  %9497 = vmatprep.subr.mxu1 %v13847_v6  ;;  %15711 = vst [vmem:[#allocation168_spill] sm:$0xff] %v13949_v57  ;;  %v15733_v42 = vld [vmem:[#allocation115_spill] sm:$0xff] }
 0x71a   :  { %15695 = vst [vmem:[#allocation58_spill] sm:$0xff] %v13851_v12  ;;  %v10468_v32 = vpop.eup %10467  ;;  %9498 = vmatpush3.msra.mxu1 %v13847_v6  ;;  %15716 = vst [vmem:[#allocation180_spill] sm:$0xff] %v13984_v11  ;;  %v15732_v6 = vld [vmem:[#allocation201_spill] sm:$0xff] }
 0x71b   :  { %v10470_v33 = vpop.eup %10469  ;;  %9499 = vmatprep.subr.mxu1 %v13851_v12  ;;  %v13855_v0 = vmul.f32 %v10468_v32, %v10464_v34  ;;  %v13991_v34 = vld [vmem:[%s14905_s2 + $0x88] sm:$0xff]  ;;  %v14005_v32 = vld [vmem:[%s14905_s2 + $0x98] sm:$0xff] }
 0x71c   :  { %v10472_v59 = vpop.eup %10471  ;;  %9500 = vmatpush3.msra.mxu1 %v13851_v12  ;;  %v13859_v26 = vmul.f32 %v10470_v33, %v10466_v21  ;;  %15717 = vst [vmem:[#allocation171_spill] sm:$0xff] %v13991_v34  ;;  %v13998_v21 = vld [vmem:[%s14905_s2 + $0x90] sm:$0xff]  ;;  %15719 = vst [vmem:[#allocation175_spill] sm:$0xff] %v14005_v32  ;;  %v14012_v33 = vld [vmem:[%s14905_s2 + $0xa0] sm:$0xff] }
 0x71d   :  { %15696 = vst [vmem:[#allocation60_spill] sm:$0xff] %v13855_v0  ;;  %v10474_v49 = vpop.eup %10473  ;;  %9501 = vmatprep.subr.mxu1 %v13855_v0  ;;  %15718 = vst [vmem:[#allocation173_spill] sm:$0xff] %v13998_v21  ;;  %v10962_v12 = vld [vmem:[%s14905_s2] sm:$0xff] }
 0x71e   :  { %15697 = vst [vmem:[#allocation62_spill] sm:$0xff] %v13859_v26  ;;  %v10476_v41 = vpop.eup %10475  ;;  %9502 = vmatpush3.msra.mxu1 %v13855_v0  ;;  %15720 = vst [vmem:[#allocation76_spill] sm:$0xff] %v14012_v33  ;;  %v14089_v0 = vld [vmem:[%s14905_s2 + $0xf8] sm:$0xff] }
 0x71f   :  { %v10478_v52 = vpop.eup %10477  ;;  %9503 = vmatprep.subr.mxu1 %v13859_v26  ;;  %v13863_v19 = vmul.f32 %v10476_v41, %v10472_v59  ;;  %v14019_v59 = vld [vmem:[%s14905_s2 + $0xa8] sm:$0xff]  ;;  %v14033_v41 = vld [vmem:[%s14905_s2 + $0xb8] sm:$0xff]  ;;  %15731 = vst [vmem:[#allocation148_spill] sm:$0xff] %v14089_v0 }
 0x720   :  { %v10480_v2 = vpop.eup %10479  ;;  %9504 = vmatpush3.msra.mxu1 %v13859_v26  ;;  %v13867_v16 = vmul.f32 %v10478_v52, %v10474_v49  ;;  %15721 = vst [vmem:[#allocation78_spill] sm:$0xff] %v14019_v59  ;;  %v14026_v49 = vld [vmem:[%s14905_s2 + $0xb0] sm:$0xff]  ;;  %15723 = vst [vmem:[#allocation74_spill] sm:$0xff] %v14033_v41  ;;  %v14040_v52 = vld [vmem:[%s14905_s2 + $0xc0] sm:$0xff] }
 0x721   :  { %15698 = vst [vmem:[#allocation64_spill] sm:$0xff] %v13863_v19  ;;  %9505 = vmatprep.subr.mxu1 %v13863_v19  ;;  %v10482_v8 = vpop.eup %10481  ;;  %15722 = vst [vmem:[#allocation72_spill] sm:$0xff] %v14026_v49  ;;  %v14082_v26 = vld [vmem:[%s14905_s2 + $0xf0] sm:$0xff] }
 0x722   :  { %15699 = vst [vmem:[#allocation66_spill] sm:$0xff] %v13867_v16  ;;  %9506 = vmatpush3.msra.mxu1 %v13863_v19  ;;  %v13871_v39 = vmul.f32 %v10482_v8, %v10480_v2  ;;  %15724 = vst [vmem:[#allocation51_spill] sm:$0xff] %v14040_v52  ;;  %v14047_v2 = vld [vmem:[%s14905_s2 + $0xc8] sm:$0xff]  ;;  %v14054_v8 = vld [vmem:[%s14905_s2 + $0xd0] sm:$0xff] }
 0x723   :  { %9507 = vmatprep.subr.mxu1 %v13867_v16  ;;  %15725 = vst [vmem:[#allocation55_spill] sm:$0xff] %v14047_v2  ;;  %15726 = vst [vmem:[#allocation59_spill] sm:$0xff] %v14054_v8  ;;  %v14075_v19 = vld [vmem:[%s14905_s2 + $0xe8] sm:$0xff] }
 0x724   :  { %15700 = vst [vmem:[#allocation68_spill] sm:$0xff] %v13871_v39  ;;  %9508 = vmatpush3.msra.mxu1 %v13867_v16  ;;  %v14068_v16 = vld [vmem:[%s14905_s2 + $0xe0] sm:$0xff]  ;;  %15729 = vst [vmem:[#allocation71_spill] sm:$0xff] %v14075_v19 }
 0x725   :  { %9509 = vmatprep.subr.mxu1 %v13871_v39  ;;  %15728 = vst [vmem:[#allocation67_spill] sm:$0xff] %v14068_v16  ;;  %15730 = vst [vmem:[#allocation144_spill] sm:$0xff] %v14082_v26 }
 0x726   :  { %9510 = vmatpush3.msra.mxu1 %v13871_v39  ;;  %v14061_v39 = vld [vmem:[%s14905_s2 + $0xd8] sm:$0xff] }
 0x727   :  { %9512 = vmatmul.mubr.msk.f32.vlgmr.msra.gmra.mxu1 %vm2472_vm1, %v13879_v13  ;;  %15727 = vst [vmem:[#allocation63_spill] sm:$0xff] %v14061_v39 }
 0x728   :  { %9514 = vmatprep.mubr.msk.f32.mxu1 %vm2472_vm1, %v13886_v37 }
 0x72b   :  { %9515 = vmatmul.mubr.msk.f32.gmra.mxu1 %vm2472_vm1, %v13893_v17 }
 0x72c   :  { %9517 = vmatprep.mubr.msk.f32.mxu1 %vm2472_vm1, %v13900_v20  ;;  %v15750_v20 = vld [vmem:[#allocation82_spill] sm:$0xff] }
 0x72f   :  { %9518 = vmatmul.mubr.msk.f32.gmra.mxu1 %vm2472_vm1, %v13907_v18 }
 0x730   :  { %9520 = vmatprep.mubr.msk.f32.mxu1 %vm2472_vm1, %v13914_v47 }
 0x733   :  { %9521 = vmatmul.mubr.msk.f32.gmra.mxu1 %vm2472_vm1, %v13921_v50 }
 0x734   :  { %9523 = vmatprep.mubr.msk.f32.mxu1 %vm2472_vm1, %v13928_v35  ;;  %v15748_v35 = vld [vmem:[#allocation236_spill] sm:$0xff] }
 0x737   :  { %9524 = vmatmul.mubr.msk.f32.gmra.mxu1 %vm2472_vm1, %v13935_v23 }
 0x738   :  { %9526 = vmatprep.mubr.msk.f32.mxu1 %vm2472_vm1, %v13942_v48 }
 0x73b   :  { %9527 = vmatmul.mubr.msk.f32.gmra.mxu1 %vm2472_vm1, %v13949_v57  ;;  %v15747_v57 = vld [vmem:[#allocation84_spill] sm:$0xff] }
 0x73c   :  { %9529 = vmatprep.mubr.msk.f32.mxu1 %vm2472_vm1, %v13956_v54 }
 0x73f   :  { %9530 = vmatmul.mubr.msk.f32.gmra.mxu1 %vm2472_vm1, %v13963_v30 }
 0x740   :  { %9532 = vmatprep.mubr.msk.f32.mxu1 %vm2472_vm1, %v13970_v7 }
 0x743   :  { %9533 = vmatmul.mubr.msk.f32.gmra.mxu1 %vm2472_vm1, %v13977_v46 }
 0x744   :  { %9535 = vmatprep.mubr.msk.f32.mxu1 %vm2472_vm1, %v13984_v11 }
 0x747   :  { %9536 = vmatmul.mubr.msk.f32.gmra.mxu1 %vm2472_vm1, %v13991_v34 }
 0x748   :  { %9538 = vmatprep.mubr.msk.f32.mxu1 %vm2472_vm1, %v13998_v21 }
 0x74b   :  { %9539 = vmatmul.mubr.msk.f32.gmra.mxu1 %vm2472_vm1, %v14005_v32  ;;  %v15737_v32 = vld [vmem:[#allocation123_spill] sm:$0xff] }
 0x74c   :  { %9541 = vmatprep.mubr.msk.f32.mxu1 %vm2472_vm1, %v14012_v33  ;;  %v15736_v33 = vld [vmem:[#allocation241_spill] sm:$0xff] }
 0x74d   :  { %v1749_v21 = vadd.f32 %v15737_v32, %v15736_v33 }
 0x74f   :  { %9542 = vmatmul.mubr.msk.f32.gmra.mxu1 %vm2472_vm1, %v14019_v59 }
 0x750   :  { %9544 = vmatprep.mubr.msk.f32.mxu1 %vm2472_vm1, %v14026_v49 }
 0x753   :  { %9545 = vmatmul.mubr.msk.f32.gmra.mxu1 %vm2472_vm1, %v14033_v41 }
 0x754   :  { %9547 = vmatprep.mubr.msk.f32.mxu1 %vm2472_vm1, %v14040_v52 }
 0x757   :  { %9548 = vmatmul.mubr.msk.f32.gmra.mxu1 %vm2472_vm1, %v14047_v2  ;;  %v15735_v2 = vld [vmem:[#allocation119_spill] sm:$0xff] }
 0x758   :  { %9550 = vmatprep.mubr.msk.f32.mxu1 %vm2472_vm1, %v14054_v8  ;;  %v15734_v8 = vld [vmem:[#allocation190_spill] sm:$0xff] }
 0x759   :  { %v1739_v52 = vadd.f32 %v15735_v2, %v15734_v8 }
 0x75b   :  { %9551 = vmatmul.mubr.msk.f32.gmra.mxu1 %vm2472_vm1, %v14061_v39 }
 0x75c   :  { %9553 = vmatprep.mubr.msk.f32.mxu1 %vm2472_vm1, %v14068_v16 }
 0x75f   :  { %9554 = vmatmul.mubr.msk.f32.gmra.mxu1 %vm2472_vm1, %v14075_v19  ;;  %v1729_v19 = vadd.f32 %v15733_v42, %v15732_v6 }
 0x760   :  { %9556 = vmatprep.mubr.msk.f32.mxu1 %vm2472_vm1, %v14082_v26 }
 0x763   :  { %9557 = vmatmul.mubr.msk.f32.gmra.mxu1 %vm2472_vm1, %v14089_v0 }
 0x764   :  { %9639 = vmatprep.mubr.msk.f32.mxu1 %vm2472_vm1, %v10962_v12 }
 0x7e7   :  { %v9513_v16 = vpop.f32.mrf.mxu1 }
 0x7e8   :  { %v5265_v39 = vadd.f32 %v9513_v16, %v1729_v19  ;;  %v15738_v19 = vld [vmem:[#allocation230_spill] sm:$0xff]  ;;  %v15739_v16 = vld [vmem:[#allocation127_spill] sm:$0xff] }
 0x7e9   :  { %v14099_v26 = vpop.f32.mrf.mxu1  ;;  %v1759_v11 = vadd.f32 %v15739_v16, %v15738_v19  ;;  %v15746_v19 = vld [vmem:[#allocation163_spill] sm:$0xff] }
 0x7ea   :  { %v7943_v41 = vmul.f32 -1.442695, %v5265_v39  ;;  %v1033_v48 = vadd.f32 %v15747_v57, %v15746_v19  ;;  %v15753_v57 = vld [vmem:[#allocation88_spill] sm:$0xff] }
 0x7eb   :  { %v9516_v49 = vpop.f32.mrf.mxu1 }
 0x7ec   :  { %10483 = vpow2.f32 %v7943_v41  ;;  %v5267_v0 = vadd.f32 %v9516_v49, %v1739_v52  ;;  %v15740_v49 = vld [vmem:[#allocation244_spill] sm:$0xff]  ;;  %v15741_v52 = vld [vmem:[#allocation131_spill] sm:$0xff] }
 0x7ed   :  { %v14103_v59 = vpop.f32.mrf.mxu1  ;;  %v1769_v8 = vadd.f32 %v15741_v52, %v15740_v49 }
 0x7ee   :  { %v7945_v12 = vmul.f32 -1.442695, %v5267_v0 }
 0x7ef   :  { %v9519_v34 = vpop.f32.mrf.mxu1 }
 0x7f0   :  { %10485 = vpow2.f32 %v7945_v12  ;;  %v5269_v42 = vadd.f32 %v9519_v34, %v1749_v21  ;;  %v15742_v34 = vld [vmem:[#allocation237_spill] sm:$0xff]  ;;  %v15743_v21 = vld [vmem:[#allocation135_spill] sm:$0xff] }
 0x7f1   :  { %v14107_v6 = vpop.f32.mrf.mxu1  ;;  %v1779_v33 = vadd.f32 %v15743_v21, %v15742_v34 }
 0x7f2   :  { %v7947_v46 = vmul.f32 -1.442695, %v5269_v42 }
 0x7f3   :  { %v9522_v2 = vpop.f32.mrf.mxu1 }
 0x7f4   :  { %10487 = vpow2.f32 %v7947_v46  ;;  %v5271_v39 = vadd.f32 %v9522_v2, %v1759_v11 }
 0x7f5   :  { %v5119_v41 = vpop.f32.mrf.mxu1 }
 0x7f6   :  { %v7949_v7 = vmul.f32 -1.442695, %v5271_v39 }
 0x7f7   :  { %v9525_v30 = vpop.f32.mrf.mxu1 }
 0x7f8   :  { %10489 = vpow2.f32 %v7949_v7  ;;  %v5273_v0 = vadd.f32 %v9525_v30, %v1769_v8 }
 0x7f9   :  { %v10484_v32 = vpop.eup %10483  ;;  %v14113_v12 = vpop.f32.mrf.mxu1 }
 0x7fa   :  { %v5325_v54 = vadd.f32 1.0, %v10484_v32  ;;  %10491 = vtanh.f32 %v5273_v0 }
 0x7fb   :  { %v9528_v42 = vpop.f32.mrf.mxu1 }
 0x7fc   :  { %10493 = vrcp.f32 %v5325_v54  ;;  %v5275_v46 = vadd.f32 %v9528_v42, %v1779_v33  ;;  %v15744_v54 = vld [vmem:[#allocation177_spill] sm:$0xff]  ;;  %v15745_v33 = vld [vmem:[#allocation80_spill] sm:$0xff] }
 0x7fd   :  { %v10486_v11 = vpop.eup %10485  ;;  %v14117_v16 = vpop.f32.mrf.mxu1  ;;  %v1023_v21 = vadd.f32 %v15745_v33, %v15744_v54  ;;  %v1018_v33 = vadd.f32 %v15750_v20, %v15666_v60 }
 0x7fe   :  { %v5327_v2 = vadd.f32 1.0, %v10486_v11  ;;  %10495 = vtanh.f32 %v5275_v46 }
 0x7ff   :  { %v14119_v39 = vpop.f32.mrf.mxu1 }
 0x800   :  { %10497 = vrcp.f32 %v5327_v2 }
 0x801   :  { %v10488_v30 = vpop.eup %10487  ;;  %v14121_v7 = vpop.f32.mrf.mxu1 }
 0x802   :  { %v5349_v8 = vadd.f32 1.0, %v10488_v30 }
 0x803   :  { %v14123_v52 = vpop.f32.mrf.mxu1 }
 0x804   :  { %10499 = vrcp.f32 %v5349_v8  ;;  %v15749_v8 = vld [vmem:[#allocation129_spill] sm:$0xff] }
 0x805   :  { %v10490_v32 = vpop.eup %10489  ;;  %v14125_v0 = vpop.f32.mrf.mxu1  ;;  %v1754_v50 = vadd.f32 %v15749_v8, %v15748_v35 }
 0x806   :  { %v5351_v42 = vadd.f32 1.0, %v10490_v32 }
 0x807   :  { %v9537_v34 = vpop.f32.mrf.mxu1  ;;  %v10492_v11 = vpop.eup %10491  ;;  %v5270_v17 = vadd.f32 %v5119_v41, %v1754_v50 }
 0x808   :  { %10501 = vrcp.f32 %v5351_v42  ;;  %v5297_v46 = vadd.f32 %v9537_v34, %v1023_v21  ;;  %v15751_v42 = vld [vmem:[#allocation207_spill] sm:$0xff]  ;;  %v15752_v34 = vld [vmem:[#allocation86_spill] sm:$0xff] }
 0x809   :  { %v10494_v49 = vpop.eup %10493  ;;  %v5169_v2 = vpop.f32.mrf.mxu1  ;;  %v1028_v21 = vadd.f32 %v15752_v34, %v15751_v42  ;;  %v7948_v20 = vmul.f32 -1.442695, %v5270_v17  ;;  %v15755_v42 = vld [vmem:[#allocation121_spill] sm:$0xff] }
 0x80a   :  { %v5393_v30 = vmul.f32 %v10494_v49, %v10492_v11  ;;  %v7955_v23 = vmul.f32 -1.442695, %v5297_v46  ;;  %v1043_v49 = vadd.f32 %v15753_v57, %v15434_v56  ;;  %v5296_v46 = vadd.f32 %v5169_v2, %v1018_v33  ;;  %v15757_v33 = vld [vmem:[#allocation90_spill] sm:$0xff] }
 0x80b   :  { %v9540_v47 = vpop.f32.mrf.mxu1  ;;  %v10496_v18 = vpop.eup %10495  ;;  %v1734_v57 = vadd.f32 %v15755_v42, %v15587_v27 }
 0x80c   :  { %10503 = vpow2.f32 %v7955_v23  ;;  %v5299_v32 = vadd.f32 %v9540_v47, %v1033_v48  ;;  %v15754_v47 = vld [vmem:[#allocation117_spill] sm:$0xff]  ;;  %v7954_v50 = vmul.f32 -1.442695, %v5296_v46 }
 0x80d   :  { %v10498_v54 = vpop.eup %10497  ;;  %v5179_v37 = vpop.f32.mrf.mxu1  ;;  %v1724_v48 = vadd.f32 %v15754_v47, %v15585_v51 }
 0x80e   :  { %v5395_v11 = vmul.f32 %v10498_v54, %v10496_v18  ;;  %v7957_v19 = vmul.f32 -1.442695, %v5299_v32  ;;  %v5298_v8 = vadd.f32 %v5179_v37, %v1028_v21  ;;  %v15756_v37 = vld [vmem:[#allocation125_spill] sm:$0xff]  ;;  %v1038_v32 = vadd.f32 %v15757_v33, %v15436_v61  ;;  %v15758_v21 = vld [vmem:[#allocation92_spill] sm:$0xff] }
 0x80f   :  { %v9543_v35 = vpop.f32.mrf.mxu1  ;;  %v1744_v2 = vadd.f32 %v15756_v37, %v15589_v44 }
 0x810   :  { %10505 = vpow2.f32 %v7957_v19  ;;  %v5301_v13 = vadd.f32 %v9543_v35, %v1043_v49  ;;  %v7956_v18 = vmul.f32 -1.442695, %v5298_v8  ;;  %v5264_v35 = vadd.f32 %v14099_v26, %v1724_v48  ;;  %v15759_v48 = vld [vmem:[#allocation94_spill] sm:$0xff] }
 0x811   :  { %v10500_v62 = vpop.eup %10499  ;;  %v5189_v23 = vpop.f32.mrf.mxu1  ;;  %v1053_v49 = vadd.f32 %v15758_v21, %v15438_v43 }
 0x812   :  { %v5389_v34 = vmul.f32 %v10500_v62, %v13771_v38  ;;  %v7959_v41 = vmul.f32 -1.442695, %v5301_v13  ;;  %v5266_v38 = vadd.f32 %v14103_v59, %v1734_v57  ;;  %v5268_v13 = vadd.f32 %v14107_v6, %v1744_v2 }
 0x813   :  { %v9546_v54 = vpop.f32.mrf.mxu1  ;;  %v5300_v26 = vadd.f32 %v5189_v23, %v1038_v32  ;;  %v7942_v46 = vmul.f32 -1.442695, %v5264_v35  ;;  %v1048_v59 = vadd.f32 %v15759_v48, %v15440_v4  ;;  %v15760_v35 = vld [vmem:[#allocation96_spill] sm:$0xff] }
 0x814   :  { %v14147_v19 = vadd.f32 %v5393_v30, %v5389_v34  ;;  %10507 = vpow2.f32 %v7959_v41  ;;  %v5303_v34 = vadd.f32 %v9546_v54, %v1053_v49  ;;  %v7946_v6 = vmul.f32 -1.442695, %v5268_v13  ;;  %v15762_v49 = vld [vmem:[#allocation137_spill] sm:$0xff] }
 0x815   :  { %v10502_v17 = vpop.eup %10501  ;;  %10509 = vpow2.f32 %v7948_v20  ;;  %v5199_v62 = vpop.f32.mrf.mxu1  ;;  %v7944_v20 = vmul.f32 -1.442695, %v5266_v38  ;;  %v7958_v57 = vmul.f32 -1.442695, %v5300_v26  ;;  %v15761_v38 = vld [vmem:[#allocation100_spill] sm:$0xff]  ;;  %v1774_v26 = vadd.f32 %v15762_v49, %v15596_v40 }
 0x816   :  { %v5391_v42 = vmul.f32 %v10502_v17, %v13780_v25  ;;  %10511 = vpow2.f32 %v7954_v50  ;;  %v5302_v25 = vadd.f32 %v5199_v62, %v1048_v59  ;;  %v7961_v23 = vmul.f32 -1.442695, %v5303_v34  ;;  %v15763_v34 = vld [vmem:[#allocation108_spill] sm:$0xff] }
 0x817   :  { %10513 = vpow2.f32 %v7956_v18  ;;  %v9549_v30 = vpop.f32.mrf.mxu1  ;;  %v1063_v17 = vadd.f32 %v15760_v35, %v12501_v63  ;;  %v1073_v62 = vadd.f32 %v15761_v38, %v12475_v55  ;;  %v15767_v38 = vld [vmem:[#allocation104_spill] sm:$0xff] }
 0x818   :  { %v14156_v8 = vadd.f32 %v5395_v11, %v5391_v42  ;;  %10515 = vpow2.f32 %v7942_v46  ;;  %v7960_v33 = vmul.f32 -1.442695, %v5302_v25 }
 0x819   :  { %v10504_v47 = vpop.eup %10503  ;;  %v5209_v41 = vpop.f32.mrf.mxu1  ;;  %10517 = vpow2.f32 %v7944_v20  ;;  %v5305_v13 = vadd.f32 %v9549_v30, %v1063_v17 }
 0x81a   :  { %v5421_v37 = vadd.f32 1.0, %v10504_v47  ;;  %10519 = vpow2.f32 %v7946_v6  ;;  %v1093_v6 = vadd.f32 %v15763_v34, %v15522_v29 }
 0x81b   :  { %v9552_v50 = vpop.f32.mrf.mxu1  ;;  %10521 = vpow2.f32 %v7958_v57  ;;  %v5274_v57 = vadd.f32 %v14117_v16, %v1774_v26  ;;  %v1083_v16 = vadd.f32 %v15767_v38, %v12613_v31  ;;  %v15772_v38 = vld [vmem:[#allocation141_spill] sm:$0xff] }
 0x81c   :  { %10523 = vrcp.f32 %v5421_v37  ;;  %v5307_v48 = vadd.f32 %v9552_v50, %v1073_v62  ;;  %v15764_v37 = vld [vmem:[#allocation98_spill] sm:$0xff] }
 0x81d   :  { %v10506_v2 = vpop.eup %10505  ;;  %v5219_v18 = vpop.f32.mrf.mxu1  ;;  %10525 = vpow2.f32 %v7961_v23  ;;  %v15765_v23 = vld [vmem:[#allocation110_spill] sm:$0xff] }
 0x81e   :  { %v5423_v11 = vadd.f32 1.0, %v10506_v2  ;;  %v1058_v2 = vadd.f32 %v15764_v37, %v15524_v36  ;;  %v15766_v50 = vld [vmem:[#allocation102_spill] sm:$0xff] }
 0x81f   :  { %v9555_v32 = vpop.f32.mrf.mxu1 }
 0x820   :  { %10527 = vrcp.f32 %v5423_v11  ;;  %v1088_v11 = vadd.f32 %v15765_v23, %v12605_v53  ;;  %v5304_v62 = vadd.f32 %v5209_v41, %v1058_v2 }
 0x821   :  { %v10508_v54 = vpop.eup %10507  ;;  %v5229_v42 = vpop.f32.mrf.mxu1  ;;  %10529 = vpow2.f32 %v7960_v33  ;;  %v1068_v33 = vadd.f32 %v15766_v50, %v12489_v22 }
 0x822   :  { %v10510_v21 = vpop.eup %10509  ;;  %v5445_v46 = vadd.f32 1.0, %v10508_v54 }
 0x823   :  { %v10512_v47 = vpop.eup %10511  ;;  %v9558_v59 = vpop.f32.mrf.mxu1  ;;  %v5350_v25 = vadd.f32 1.0, %v10510_v21  ;;  %v5306_v49 = vadd.f32 %v5219_v18, %v1068_v33  ;;  %v15771_v33 = vld [vmem:[#allocation139_spill] sm:$0xff] }
 0x824   :  { %v10514_v20 = vpop.eup %10513  ;;  %10531 = vrcp.f32 %v5445_v46  ;;  %v5420_v35 = vadd.f32 1.0, %v10512_v47  ;;  %v5311_v17 = vadd.f32 %v9558_v59, %v1093_v6  ;;  %v5309_v46 = vadd.f32 %v9555_v32, %v1083_v16  ;;  %v15768_v59 = vld [vmem:[#allocation106_spill] sm:$0xff] }
 0x825   :  { %10533 = vtanh.f32 %v5305_v13  ;;  %v5239_v30 = vpop.f32.mrf.mxu1  ;;  %v5422_v54 = vadd.f32 1.0, %v10514_v20  ;;  %v10516_v21 = vpop.eup %10515  ;;  %v1078_v6 = vadd.f32 %v15768_v59, %v12623_v24  ;;  %v1784_v16 = vadd.f32 %v15772_v38, %v12655_v28 }
 0x826   :  { %10535 = vtanh.f32 %v5307_v48  ;;  %v5310_v13 = vadd.f32 %v5239_v30, %v1088_v11  ;;  %v10518_v26 = vpop.eup %10517  ;;  %v7965_v34 = vmul.f32 -1.442695, %v5311_v17  ;;  %v15769_v48 = vld [vmem:[#allocation143_spill] sm:$0xff]  ;;  %v7963_v32 = vmul.f32 -1.442695, %v5309_v46  ;;  %v15770_v11 = vld [vmem:[#allocation145_spill] sm:$0xff] }
 0x827   :  { %10537 = vtanh.f32 %v5274_v57  ;;  %v10520_v47 = vpop.eup %10519  ;;  %v1799_v37 = vadd.f32 %v15769_v48, %v12631_v14 }
 0x828   :  { %10539 = vrcp.f32 %v5350_v25  ;;  %v10522_v20 = vpop.eup %10521  ;;  %v7964_v57 = vmul.f32 -1.442695, %v5310_v13  ;;  %v5308_v25 = vadd.f32 %v5229_v42, %v1078_v6 }
 0x829   :  { %10541 = vrcp.f32 %v5420_v35  ;;  %v10524_v41 = vpop.eup %10523  ;;  %v5444_v30 = vadd.f32 1.0, %v10522_v20  ;;  %v5279_v2 = vadd.f32 %v14123_v52, %v1799_v37  ;;  %v1794_v35 = vadd.f32 %v15770_v11, %v12633_v58 }
 0x82a   :  { %10543 = vrcp.f32 %v5422_v54  ;;  %v10526_v18 = vpop.eup %10525  ;;  %v1789_v54 = vadd.f32 %v15771_v33, %v12645_v15  ;;  %v5348_v20 = vadd.f32 1.0, %v10520_v47 }
 0x82b   :  { %10545 = vtanh.f32 %v5304_v62  ;;  %v5447_v17 = vadd.f32 1.0, %v10526_v18  ;;  %v5326_v62 = vadd.f32 1.0, %v10518_v26  ;;  %v5278_v52 = vadd.f32 %v14125_v0, %v1794_v35  ;;  %v15773_v26 = vld [vmem:[#allocation133_spill] sm:$0xff] }
 0x82c   :  { %10547 = vtanh.f32 %v5306_v49  ;;  %v7962_v49 = vmul.f32 -1.442695, %v5308_v25  ;;  %v7953_v59 = vmul.f32 -1.442695, %v5279_v2  ;;  %v5276_v0 = vadd.f32 %v14121_v7, %v1784_v16 }
 0x82d   :  { %10549 = vpow2.f32 %v7965_v34  ;;  %v10528_v23 = vpop.eup %10527  ;;  %v5277_v34 = vadd.f32 %v14119_v39, %v1789_v54  ;;  %v7952_v25 = vmul.f32 -1.442695, %v5278_v52 }
 0x82e   :  { %10551 = vrcp.f32 %v5444_v30  ;;  %v10530_v50 = vpop.eup %10529  ;;  %v5324_v30 = vadd.f32 1.0, %v10516_v21  ;;  %v7950_v21 = vmul.f32 -1.442695, %v5276_v0 }
 0x82f   :  { %10553 = vpow2.f32 %v7964_v57  ;;  %v5446_v13 = vadd.f32 1.0, %v10530_v50  ;;  %v1764_v57 = vadd.f32 %v15773_v26, %v15608_v1 }
 0x830   :  { %10555 = vrcp.f32 %v5447_v17 }
 0x831   :  { %v10532_v42 = vpop.eup %10531  ;;  %10557 = vpow2.f32 %v7963_v32 }
 0x832   :  { %v10534_v46 = vpop.eup %10533  ;;  %v5485_v6 = vmul.f32 %v10532_v42, %v13818_v45  ;;  %10559 = vrcp.f32 %v5446_v13  ;;  %v7951_v45 = vmul.f32 -1.442695, %v5277_v34 }
 0x833   :  { %v5489_v48 = vmul.f32 %v10534_v46, %v10524_v41  ;;  %v10536_v37 = vpop.eup %10535  ;;  %10561 = vrcp.f32 %v5326_v62  ;;  %v5272_v41 = vadd.f32 %v14113_v12, %v1764_v57 }
 0x834   :  { %v10538_v18 = vpop.eup %10537  ;;  %v5491_v39 = vmul.f32 %v10536_v37, %v10528_v23  ;;  %10563 = vpow2.f32 %v7962_v49 }
 0x835   :  { %v14194_v11 = vadd.f32 %v5489_v48, %v5485_v6  ;;  %v10540_v2 = vpop.eup %10539  ;;  %10565 = vpow2.f32 %v7953_v59 }
 0x836   :  { %v10542_v47 = vpop.eup %10541  ;;  %10567 = vrcp.f32 %v5348_v20  ;;  %v5390_v48 = vmul.f32 %v10540_v2, %v13835_v10 }
 0x837   :  { %v10544_v32 = vpop.eup %10543  ;;  %10569 = vrcp.f32 %v5324_v30 }
 0x838   :  { %v10546_v35 = vpop.eup %10545  ;;  %10571 = vpow2.f32 %v7952_v25 }
 0x839   :  { %v10548_v17 = vpop.eup %10547  ;;  %10573 = vpow2.f32 %v7951_v45  ;;  %v5488_v42 = vmul.f32 %v10546_v35, %v10542_v47 }
 0x83a   :  { %v10550_v7 = vpop.eup %10549  ;;  %10575 = vtanh.f32 %v5272_v41  ;;  %v5490_v34 = vmul.f32 %v10548_v17, %v10544_v32 }
 0x83b   :  { %v10552_v50 = vpop.eup %10551  ;;  %10577 = vpow2.f32 %v7950_v21  ;;  %v5475_v54 = vadd.f32 1.0, %v10550_v7 }
 0x83c   :  { %v10554_v33 = vpop.eup %10553  ;;  %v5484_v16 = vmul.f32 %v10552_v50, %v13828_v5  ;;  %10579 = vtanh.f32 %v14194_v11 }
 0x83d   :  { %v10556_v23 = vpop.eup %10555  ;;  %v5474_v52 = vadd.f32 1.0, %v10554_v33  ;;  %10581 = vrcp.f32 %v5475_v54 }
 0x83e   :  { %v10558_v38 = vpop.eup %10557  ;;  %v5487_v62 = vmul.f32 %v10556_v23, %v13824_v9  ;;  %v14204_v5 = vadd.f32 %v5488_v42, %v5484_v16 }
 0x83f   :  { %v10560_v12 = vpop.eup %10559  ;;  %v5473_v6 = vadd.f32 1.0, %v10558_v38 }
 0x840   :  { %v10562_v13 = vpop.eup %10561  ;;  %v14200_v49 = vadd.f32 %v5491_v39, %v5487_v62  ;;  %v5486_v46 = vmul.f32 %v10560_v12, %v13831_v3  ;;  %v15774_v39 = vld [vmem:[#allocation52_spill] sm:$0xff] }
 0x841   :  { %v10564_v59 = vpop.eup %10563  ;;  %v5394_v57 = vmul.f32 %v10562_v13, %v10538_v18 }
 0x842   :  { %v10566_v20 = vpop.eup %10565  ;;  %10583 = vtanh.f32 %v14200_v49  ;;  %v14207_v9 = vadd.f32 %v5490_v34, %v5486_v46  ;;  %v5472_v3 = vadd.f32 1.0, %v10564_v59 }
 0x843   :  { %v10568_v37 = vpop.eup %10567  ;;  %10585 = vrcp.f32 %v5474_v52  ;;  %v5379_v0 = vadd.f32 1.0, %v10566_v20  ;;  %v14211_v10 = vadd.f32 %v5394_v57, %v5390_v48 }
 0x844   :  { %v10570_v26 = vpop.eup %10569  ;;  %10587 = vtanh.f32 %v14207_v9  ;;  %v5388_v45 = vmul.f32 %v10568_v37, %v15774_v39  ;;  %v15786_v39 = vld [vmem:[#allocation151_spill] sm:$0xff] }
 0x845   :  { %v10572_v30 = vpop.eup %10571  ;;  %10589 = vrcp.f32 %v5473_v6 }
 0x846   :  { %v10574_v25 = vpop.eup %10573  ;;  %10591 = vtanh.f32 %v14204_v5  ;;  %v5378_v41 = vadd.f32 1.0, %v10572_v30 }
 0x847   :  { %v10576_v2 = vpop.eup %10575  ;;  %10593 = vtanh.f32 %v14156_v8  ;;  %v5377_v32 = vadd.f32 1.0, %v10574_v25  ;;  %v15785_v25 = vld [vmem:[#allocation147_spill] sm:$0xff] }
 0x848   :  { %v5392_v47 = vmul.f32 %v10576_v2, %v10570_v26  ;;  %10595 = vrcp.f32 %v5472_v3  ;;  %v10578_v18 = vpop.eup %10577  ;;  %v15788_v2 = vld [vmem:[#allocation153_spill] sm:$0xff] }
 0x849   :  { %10597 = vrcp.f32 %v5379_v0  ;;  %v5376_v21 = vadd.f32 1.0, %v10578_v18  ;;  %v10580_v17 = vpop.eup %10579  ;;  %v15784_v0 = vld [vmem:[#allocation70_spill] sm:$0xff]  ;;  %v15791_v18 = vld [vmem:[#allocation159_spill] sm:$0xff] }
 0x84a   :  { %v14215_v35 = vadd.f32 %v5392_v47, %v5388_v45  ;;  %10599 = vtanh.f32 %v14211_v10  ;;  %v10582_v7 = vpop.eup %10581  ;;  %v15787_v45 = vld [vmem:[#allocation149_spill] sm:$0xff]  ;;  %v15789_v47 = vld [vmem:[#allocation155_spill] sm:$0xff] }
 0x84b   :  { %10601 = vtanh.f32 %v14147_v19 }
 0x84c   :  { %15775 = vst [vmem:[#allocation65_spill] sm:$0xff] %v14215_v35  ;;  %10603 = vrcp.f32 %v5378_v41  ;;  %v15790_v41 = vld [vmem:[#allocation157_spill] sm:$0xff] }
 0x84d   :  { %10605 = vrcp.f32 %v5377_v32  ;;  %v15792_v32 = vld [vmem:[#allocation161_spill] sm:$0xff] }
 0x84e   :  { %10607 = vtanh.f32 %v14215_v35 }
 0x84f   :  { %v10584_v50 = vpop.eup %10583  ;;  %10609 = vrcp.f32 %v5376_v21  ;;  %v15793_v21 = vld [vmem:[#allocation164_spill] sm:$0xff] }
 0x850   :  { %v10586_v33 = vpop.eup %10585  ;;  %v14220_v23 = vmul.f32 %v10584_v50, %v10582_v7  ;;  %v15795_v7 = vld [vmem:[#allocation246_spill] sm:$0xff] }
 0x851   :  { %v10588_v54 = vpop.eup %10587  ;;  %v15796_v50 = vld [vmem:[#allocation178_spill] sm:$0xff] }
 0x852   :  { %15776 = vst [vmem:[#allocation146_spill] sm:$0xff] %v14220_v23  ;;  %v10590_v38 = vpop.eup %10589  ;;  %9559 = vmatprep.subr.mxu0 %v14220_v23  ;;  %v14223_v16 = vmul.f32 %v10588_v54, %v10586_v33  ;;  %v15797_v33 = vld [vmem:[#allocation231_spill] sm:$0xff]  ;;  %v15798_v54 = vld [vmem:[#allocation166_spill] sm:$0xff] }
 0x853   :  { %v10592_v62 = vpop.eup %10591  ;;  %9560 = vmatpush3.msra.mxu0 %v14220_v23  ;;  %v14227_v42 = vmul.f32 %v10590_v38, %v10580_v17  ;;  %v15794_v17 = vld [vmem:[#allocation168_spill] sm:$0xff]  ;;  %v15830_v23 = vld [vmem:[#allocation23_spill] sm:$0xff] }
 0x854   :  { %15777 = vst [vmem:[#allocation150_spill] sm:$0xff] %v14223_v16  ;;  %v10594_v12 = vpop.eup %10593  ;;  %9561 = vmatprep.subr.mxu0 %v14223_v16  ;;  %v15799_v38 = vld [vmem:[#allocation180_spill] sm:$0xff] }
 0x855   :  { %15778 = vst [vmem:[#allocation152_spill] sm:$0xff] %v14227_v42  ;;  %v10596_v52 = vpop.eup %10595  ;;  %9562 = vmatpush3.msra.mxu0 %v14223_v16  ;;  %v15829_v16 = vld [vmem:[#allocation163_spill] sm:$0xff] }
 0x856   :  { %v10598_v13 = vpop.eup %10597  ;;  %9563 = vmatprep.subr.mxu0 %v14227_v42  ;;  %v14231_v46 = vmul.f32 %v10596_v52, %v10592_v62  ;;  %v15800_v62 = vld [vmem:[#allocation171_spill] sm:$0xff] }
 0x857   :  { %v10600_v34 = vpop.eup %10599  ;;  %9564 = vmatpush3.msra.mxu0 %v14227_v42  ;;  %v14235_v6 = vmul.f32 %v10598_v13, %v10594_v12  ;;  %v15801_v12 = vld [vmem:[#allocation173_spill] sm:$0xff]  ;;  %v15802_v52 = vld [vmem:[#allocation175_spill] sm:$0xff]  ;;  %v15803_v13 = vld [vmem:[#allocation76_spill] sm:$0xff] }
 0x858   :  { %15779 = vst [vmem:[#allocation208_spill] sm:$0xff] %v14231_v46  ;;  %v10602_v59 = vpop.eup %10601  ;;  %9565 = vmatprep.subr.mxu0 %v14231_v46 }
 0x859   :  { %15780 = vst [vmem:[#allocation53_spill] sm:$0xff] %v14235_v6  ;;  %v10604_v20 = vpop.eup %10603  ;;  %9566 = vmatpush3.msra.mxu0 %v14231_v46 }
 0x85a   :  { %v10606_v48 = vpop.eup %10605  ;;  %9567 = vmatprep.subr.mxu0 %v14235_v6  ;;  %v14239_v37 = vmul.f32 %v10604_v20, %v10600_v34  ;;  %v15804_v34 = vld [vmem:[#allocation78_spill] sm:$0xff] }
 0x85b   :  { %v10608_v26 = vpop.eup %10607  ;;  %9568 = vmatpush3.msra.mxu0 %v14235_v6  ;;  %v14243_v57 = vmul.f32 %v10606_v48, %v10602_v59  ;;  %v15805_v59 = vld [vmem:[#allocation72_spill] sm:$0xff]  ;;  %v15806_v20 = vld [vmem:[#allocation74_spill] sm:$0xff]  ;;  %v15807_v48 = vld [vmem:[#allocation51_spill] sm:$0xff] }
 0x85c   :  { %15781 = vst [vmem:[#allocation196_spill] sm:$0xff] %v14239_v37  ;;  %9569 = vmatprep.subr.mxu0 %v14239_v37  ;;  %v10610_v3 = vpop.eup %10609 }
 0x85d   :  { %15782 = vst [vmem:[#allocation57_spill] sm:$0xff] %v14243_v57  ;;  %9570 = vmatpush3.msra.mxu0 %v14239_v37  ;;  %v14247_v30 = vmul.f32 %v10610_v3, %v10608_v26  ;;  %v15808_v26 = vld [vmem:[#allocation55_spill] sm:$0xff] }
 0x85e   :  { %9571 = vmatprep.subr.mxu0 %v14243_v57  ;;  %v15809_v3 = vld [vmem:[#allocation59_spill] sm:$0xff] }
 0x85f   :  { %15783 = vst [vmem:[#allocation243_spill] sm:$0xff] %v14247_v30  ;;  %9572 = vmatpush3.msra.mxu0 %v14243_v57 }
 0x860   :  { %9573 = vmatprep.subr.mxu0 %v14247_v30 }
 0x861   :  { %9574 = vmatpush3.msra.mxu0 %v14247_v30  ;;  %v15833_v30 = vld [vmem:[#allocation21_spill] sm:$0xff] }
 0x862   :  { %9576 = vmatmul.mubr.msk.f32.vlgmr.msra.gmra.mxu0 %vm2472_vm1, %v15784_v0  ;;  %v15810_v0 = vld [vmem:[#allocation63_spill] sm:$0xff] }
 0x863   :  { %9578 = vmatprep.mubr.msk.f32.mxu0 %vm2472_vm1, %v15785_v25  ;;  %v15811_v25 = vld [vmem:[#allocation67_spill] sm:$0xff] }
 0x866   :  { %9579 = vmatmul.mubr.msk.f32.gmra.mxu0 %vm2472_vm1, %v15786_v39  ;;  %v15812_v39 = vld [vmem:[#allocation71_spill] sm:$0xff] }
 0x867   :  { %9581 = vmatprep.mubr.msk.f32.mxu0 %vm2472_vm1, %v15787_v45  ;;  %v15813_v45 = vld [vmem:[#allocation144_spill] sm:$0xff] }
 0x86a   :  { %9582 = vmatmul.mubr.msk.f32.gmra.mxu0 %vm2472_vm1, %v15788_v2  ;;  %v15814_v2 = vld [vmem:[#allocation148_spill] sm:$0xff] }
 0x86b   :  { %9584 = vmatprep.mubr.msk.f32.mxu0 %vm2472_vm1, %v15789_v47  ;;  %v15815_v47 = vld [vmem:[#allocation201_spill] sm:$0xff] }
 0x86e   :  { %9585 = vmatmul.mubr.msk.f32.gmra.mxu0 %vm2472_vm1, %v15790_v41  ;;  %v15816_v41 = vld [vmem:[#allocation179_spill] sm:$0xff] }
 0x86f   :  { %9587 = vmatprep.mubr.msk.f32.mxu0 %vm2472_vm1, %v15791_v18  ;;  %v1991_v18 = vadd.f32 %v15816_v41, %v15815_v47 }
 0x872   :  { %9588 = vmatmul.mubr.msk.f32.gmra.mxu0 %vm2472_vm1, %v15792_v32 }
 0x873   :  { %9590 = vmatprep.mubr.msk.f32.mxu0 %vm2472_vm1, %v15793_v21 }
 0x876   :  { %9591 = vmatmul.mubr.msk.f32.gmra.mxu0 %vm2472_vm1, %v15794_v17 }
 0x877   :  { %9593 = vmatprep.mubr.msk.f32.mxu0 %vm2472_vm1, %v15795_v7  ;;  %v15817_v7 = vld [vmem:[#allocation190_spill] sm:$0xff] }
 0x87a   :  { %9594 = vmatmul.mubr.msk.f32.gmra.mxu0 %vm2472_vm1, %v15796_v50  ;;  %v15818_v50 = vld [vmem:[#allocation183_spill] sm:$0xff] }
 0x87b   :  { %9596 = vmatprep.mubr.msk.f32.mxu0 %vm2472_vm1, %v15797_v33  ;;  %v2001_v33 = vadd.f32 %v15818_v50, %v15817_v7 }
 0x87e   :  { %9597 = vmatmul.mubr.msk.f32.gmra.mxu0 %vm2472_vm1, %v15798_v54 }
 0x87f   :  { %9599 = vmatprep.mubr.msk.f32.mxu0 %vm2472_vm1, %v15799_v38 }
 0x882   :  { %9600 = vmatmul.mubr.msk.f32.gmra.mxu0 %vm2472_vm1, %v15800_v62 }
 0x883   :  { %9602 = vmatprep.mubr.msk.f32.mxu0 %vm2472_vm1, %v15801_v12 }
 0x886   :  { %9603 = vmatmul.mubr.msk.f32.gmra.mxu0 %vm2472_vm1, %v15802_v52  ;;  %v15819_v52 = vld [vmem:[#allocation241_spill] sm:$0xff] }
 0x887   :  { %9605 = vmatprep.mubr.msk.f32.mxu0 %vm2472_vm1, %v15803_v13  ;;  %v15820_v13 = vld [vmem:[#allocation187_spill] sm:$0xff] }
 0x88a   :  { %9606 = vmatmul.mubr.msk.f32.gmra.mxu0 %vm2472_vm1, %v15804_v34  ;;  %v2011_v34 = vadd.f32 %v15820_v13, %v15819_v52  ;;  %v15825_v13 = vld [vmem:[#allocation237_spill] sm:$0xff] }
 0x88b   :  { %9608 = vmatprep.mubr.msk.f32.mxu0 %vm2472_vm1, %v15805_v59 }
 0x88e   :  { %9609 = vmatmul.mubr.msk.f32.gmra.mxu0 %vm2472_vm1, %v15806_v20 }
 0x88f   :  { %9611 = vmatprep.mubr.msk.f32.mxu0 %vm2472_vm1, %v15807_v48 }
 0x892   :  { %9612 = vmatmul.mubr.msk.f32.gmra.mxu0 %vm2472_vm1, %v15808_v26 }
 0x893   :  { %9614 = vmatprep.mubr.msk.f32.mxu0 %vm2472_vm1, %v15809_v3  ;;  %v15821_v3 = vld [vmem:[#allocation230_spill] sm:$0xff] }
 0x896   :  { %9615 = vmatmul.mubr.msk.f32.gmra.mxu0 %vm2472_vm1, %v15810_v0  ;;  %v15822_v0 = vld [vmem:[#allocation191_spill] sm:$0xff] }
 0x897   :  { %9617 = vmatprep.mubr.msk.f32.mxu0 %vm2472_vm1, %v15811_v25  ;;  %v2021_v25 = vadd.f32 %v15822_v0, %v15821_v3  ;;  %v15831_v3 = vld [vmem:[#allocation236_spill] sm:$0xff] }
 0x89a   :  { %9618 = vmatmul.mubr.msk.f32.gmra.mxu0 %vm2472_vm1, %v15812_v39 }
 0x89b   :  { %9620 = vmatprep.mubr.msk.f32.mxu0 %vm2472_vm1, %v15813_v45 }
 0x89e   :  { %9621 = vmatmul.mubr.msk.f32.gmra.mxu0 %vm2472_vm1, %v15814_v2 }
 0x922   :  { %v9577_v32 = vpop.f32.mrf.mxu0 }
 0x923   :  { %v5756_v21 = vadd.f32 %v9577_v32, %v1991_v18  ;;  %v15823_v18 = vld [vmem:[#allocation244_spill] sm:$0xff]  ;;  %v15824_v32 = vld [vmem:[#allocation194_spill] sm:$0xff] }
 0x924   :  { %v14316_v17 = vpop.f32.mrf.mxu0 }
 0x925   :  { %v7999_v54 = vmul.f32 -1.442695, %v5756_v21  ;;  %v2031_v21 = vadd.f32 %v15824_v32, %v15823_v18 }
 0x926   :  { %v9580_v38 = vpop.f32.mrf.mxu0 }
 0x927   :  { %10611 = vpow2.f32 %v7999_v54  ;;  %v5758_v62 = vadd.f32 %v9580_v38, %v2001_v33 }
 0x928   :  { %v14320_v12 = vpop.f32.mrf.mxu0 }
 0x929   :  { %v8001_v59 = vmul.f32 -1.442695, %v5758_v62 }
 0x92a   :  { %v9583_v20 = vpop.f32.mrf.mxu0 }
 0x92b   :  { %10613 = vpow2.f32 %v8001_v59  ;;  %v5760_v48 = vadd.f32 %v9583_v20, %v2011_v34  ;;  %v15826_v34 = vld [vmem:[#allocation198_spill] sm:$0xff] }
 0x92c   :  { %v14324_v26 = vpop.f32.mrf.mxu0  ;;  %v2041_v59 = vadd.f32 %v15826_v34, %v15825_v13  ;;  %v15827_v34 = vld [vmem:[#allocation177_spill] sm:$0xff]  ;;  %v771_v13 = vadd.f32 %v15830_v23, %v15829_v16  ;;  %v15836_v23 = vld [vmem:[#allocation27_spill] sm:$0xff] }
 0x92d   :  { %v8003_v39 = vmul.f32 -1.442695, %v5760_v48 }
 0x92e   :  { %v9586_v45 = vpop.f32.mrf.mxu0 }
 0x92f   :  { %10615 = vpow2.f32 %v8003_v39  ;;  %v5762_v2 = vadd.f32 %v9586_v45, %v2021_v25 }
 0x930   :  { %v5610_v41 = vpop.f32.mrf.mxu0 }
 0x931   :  { %v8005_v50 = vmul.f32 -1.442695, %v5762_v2 }
 0x932   :  { %v9589_v33 = vpop.f32.mrf.mxu0 }
 0x933   :  { %10617 = vpow2.f32 %v8005_v50  ;;  %v5764_v54 = vadd.f32 %v9589_v33, %v2031_v21 }
 0x934   :  { %v10612_v38 = vpop.eup %10611  ;;  %v14330_v62 = vpop.f32.mrf.mxu0 }
 0x935   :  { %v5816_v20 = vadd.f32 1.0, %v10612_v38  ;;  %10619 = vtanh.f32 %v5764_v54 }
 0x936   :  { %v9592_v48 = vpop.f32.mrf.mxu0 }
 0x937   :  { %10621 = vrcp.f32 %v5816_v20  ;;  %v5766_v0 = vadd.f32 %v9592_v48, %v2041_v59  ;;  %v15828_v59 = vld [vmem:[#allocation19_spill] sm:$0xff] }
 0x938   :  { %v10614_v25 = vpop.eup %10613  ;;  %v14334_v39 = vpop.f32.mrf.mxu0  ;;  %v761_v20 = vadd.f32 %v15828_v59, %v15827_v34  ;;  %v756_v59 = vadd.f32 %v15833_v30, %v15666_v60 }
 0x939   :  { %v5818_v45 = vadd.f32 1.0, %v10614_v25  ;;  %10623 = vtanh.f32 %v5766_v0 }
 0x93a   :  { %v14336_v2 = vpop.f32.mrf.mxu0 }
 0x93b   :  { %10625 = vrcp.f32 %v5818_v45 }
 0x93c   :  { %v10616_v32 = vpop.eup %10615  ;;  %v14338_v21 = vpop.f32.mrf.mxu0 }
 0x93d   :  { %v5840_v50 = vadd.f32 1.0, %v10616_v32 }
 0x93e   :  { %v14340_v33 = vpop.f32.mrf.mxu0 }
 0x93f   :  { %10627 = vrcp.f32 %v5840_v50  ;;  %v15832_v50 = vld [vmem:[#allocation193_spill] sm:$0xff] }
 0x940   :  { %v10618_v38 = vpop.eup %10617  ;;  %v14342_v54 = vpop.f32.mrf.mxu0  ;;  %v2016_v52 = vadd.f32 %v15832_v50, %v15831_v3 }
 0x941   :  { %v5842_v48 = vadd.f32 1.0, %v10618_v38 }
 0x942   :  { %v9601_v46 = vpop.f32.mrf.mxu0  ;;  %v10620_v25 = vpop.eup %10619  ;;  %v5761_v57 = vadd.f32 %v5610_v41, %v2016_v52 }
 0x943   :  { %10629 = vrcp.f32 %v5842_v48  ;;  %v5788_v0 = vadd.f32 %v9601_v46, %v761_v20  ;;  %v15834_v48 = vld [vmem:[#allocation207_spill] sm:$0xff]  ;;  %v15835_v46 = vld [vmem:[#allocation25_spill] sm:$0xff] }
 0x944   :  { %v10622_v42 = vpop.eup %10621  ;;  %v5660_v45 = vpop.f32.mrf.mxu0  ;;  %v766_v20 = vadd.f32 %v15835_v46, %v15834_v48  ;;  %v8004_v30 = vmul.f32 -1.442695, %v5761_v57  ;;  %v15838_v48 = vld [vmem:[#allocation186_spill] sm:$0xff] }
 0x945   :  { %v5884_v32 = vmul.f32 %v10622_v42, %v10620_v25  ;;  %v8011_v18 = vmul.f32 -1.442695, %v5788_v0  ;;  %v781_v42 = vadd.f32 %v15836_v23, %v15434_v56  ;;  %v5787_v0 = vadd.f32 %v5660_v45, %v756_v59  ;;  %v15840_v59 = vld [vmem:[#allocation29_spill] sm:$0xff] }
 0x946   :  { %v9604_v7 = vpop.f32.mrf.mxu0  ;;  %v10624_v47 = vpop.eup %10623  ;;  %v1996_v23 = vadd.f32 %v15838_v48, %v15587_v27 }
 0x947   :  { %10631 = vpow2.f32 %v8011_v18  ;;  %v5790_v38 = vadd.f32 %v9604_v7, %v771_v13  ;;  %v15837_v7 = vld [vmem:[#allocation181_spill] sm:$0xff]  ;;  %v8010_v52 = vmul.f32 -1.442695, %v5787_v0 }
 0x948   :  { %v10626_v34 = vpop.eup %10625  ;;  %v5670_v37 = vpop.f32.mrf.mxu0  ;;  %v1986_v13 = vadd.f32 %v15837_v7, %v15585_v51 }
 0x949   :  { %v5886_v25 = vmul.f32 %v10626_v34, %v10624_v47  ;;  %v8013_v16 = vmul.f32 -1.442695, %v5790_v38  ;;  %v5789_v50 = vadd.f32 %v5670_v37, %v766_v20  ;;  %v15839_v37 = vld [vmem:[#allocation189_spill] sm:$0xff]  ;;  %v776_v38 = vadd.f32 %v15840_v59, %v15436_v61  ;;  %v15841_v20 = vld [vmem:[#allocation31_spill] sm:$0xff] }
 0x94a   :  { %v9607_v3 = vpop.f32.mrf.mxu0  ;;  %v2006_v45 = vadd.f32 %v15839_v37, %v15589_v44 }
 0x94b   :  { %10633 = vpow2.f32 %v8013_v16  ;;  %v5792_v6 = vadd.f32 %v9607_v3, %v781_v42  ;;  %v8012_v47 = vmul.f32 -1.442695, %v5789_v50  ;;  %v5755_v16 = vadd.f32 %v14316_v17, %v1986_v13  ;;  %v15842_v13 = vld [vmem:[#allocation33_spill] sm:$0xff] }
 0x94c   :  { %v10628_v35 = vpop.eup %10627  ;;  %v5680_v18 = vpop.f32.mrf.mxu0  ;;  %v791_v42 = vadd.f32 %v15841_v20, %v15438_v43 }
 0x94d   :  { %v5880_v46 = vmul.f32 %v10628_v35, %v14147_v19  ;;  %v8015_v41 = vmul.f32 -1.442695, %v5792_v6  ;;  %v5757_v19 = vadd.f32 %v14320_v12, %v1996_v23  ;;  %v5759_v6 = vadd.f32 %v14324_v26, %v2006_v45 }
 0x94e   :  { %v9610_v34 = vpop.f32.mrf.mxu0  ;;  %v5791_v17 = vadd.f32 %v5680_v18, %v776_v38  ;;  %v7998_v0 = vmul.f32 -1.442695, %v5755_v16  ;;  %v786_v12 = vadd.f32 %v15842_v13, %v15440_v4  ;;  %v15843_v16 = vld [vmem:[#allocation35_spill] sm:$0xff] }
 0x94f   :  { %v14364_v3 = vadd.f32 %v5884_v32, %v5880_v46  ;;  %10635 = vpow2.f32 %v8015_v41  ;;  %v5794_v46 = vadd.f32 %v9610_v34, %v791_v42  ;;  %v8002_v26 = vmul.f32 -1.442695, %v5759_v6  ;;  %v14382_v34 = vld [vmem:[%s14906_s4] sm:$0xff] }
 0x950   :  { %v10630_v57 = vpop.eup %10629  ;;  %10637 = vpow2.f32 %v8004_v30  ;;  %v5690_v35 = vpop.f32.mrf.mxu0  ;;  %v8000_v30 = vmul.f32 -1.442695, %v5757_v19  ;;  %v8014_v23 = vmul.f32 -1.442695, %v5791_v17  ;;  %9703 = vmatprep.mubr.msk.f32.mxu0 %vm2472_vm1, %v14382_v34  ;;  %v15845_v17 = vld [vmem:[#allocation200_spill] sm:$0xff] }
 0x951   :  { %v5882_v48 = vmul.f32 %v10630_v57, %v14156_v8  ;;  %10639 = vpow2.f32 %v8010_v52  ;;  %v5793_v8 = vadd.f32 %v5690_v35, %v786_v12  ;;  %v8017_v18 = vmul.f32 -1.442695, %v5794_v46  ;;  %v15844_v35 = vld [vmem:[#allocation39_spill] sm:$0xff] }
 0x952   :  { %10641 = vpow2.f32 %v8012_v47  ;;  %v9613_v32 = vpop.f32.mrf.mxu0  ;;  %v801_v57 = vadd.f32 %v15843_v16, %v12501_v63  ;;  %v811_v6 = vadd.f32 %v15844_v35, %v12475_v55 }
 0x953   :  { %v14373_v50 = vadd.f32 %v5886_v25, %v5882_v48  ;;  %10643 = vpow2.f32 %v7998_v0  ;;  %v8016_v59 = vmul.f32 -1.442695, %v5793_v8  ;;  %v2036_v0 = vadd.f32 %v15845_v17, %v15596_v40 }
 0x954   :  { %v10632_v7 = vpop.eup %10631  ;;  %v5700_v41 = vpop.f32.mrf.mxu0  ;;  %10645 = vpow2.f32 %v8000_v30  ;;  %v5796_v48 = vadd.f32 %v9613_v32, %v801_v57 }
 0x955   :  { %v5912_v37 = vadd.f32 1.0, %v10632_v7  ;;  %10647 = vpow2.f32 %v8002_v26  ;;  %v15846_v26 = vld [vmem:[#allocation47_spill] sm:$0xff]  ;;  %v5765_v32 = vadd.f32 %v14334_v39, %v2036_v0 }
 0x956   :  { %v9616_v52 = vpop.f32.mrf.mxu0  ;;  %10649 = vpow2.f32 %v8014_v23  ;;  %v831_v23 = vadd.f32 %v15846_v26, %v15522_v29 }
 0x957   :  { %10651 = vrcp.f32 %v5912_v37  ;;  %v5798_v12 = vadd.f32 %v9616_v52, %v811_v6  ;;  %v15849_v52 = vld [vmem:[#allocation41_spill] sm:$0xff]  ;;  %v15850_v6 = vld [vmem:[#allocation43_spill] sm:$0xff] }
 0x958   :  { %v10634_v45 = vpop.eup %10633  ;;  %v5710_v47 = vpop.f32.mrf.mxu0  ;;  %10653 = vpow2.f32 %v8017_v18  ;;  %v821_v39 = vadd.f32 %v15850_v6, %v12613_v31 }
 0x959   :  { %v5914_v25 = vadd.f32 1.0, %v10634_v45  ;;  %v15847_v45 = vld [vmem:[#allocation37_spill] sm:$0xff] }
 0x95a   :  { %v9619_v38 = vpop.f32.mrf.mxu0  ;;  %v796_v18 = vadd.f32 %v15847_v45, %v15524_v36 }
 0x95b   :  { %10655 = vrcp.f32 %v5914_v25  ;;  %v15848_v25 = vld [vmem:[#allocation49_spill] sm:$0xff]  ;;  %v5800_v26 = vadd.f32 %v9619_v38, %v821_v39  ;;  %v15855_v39 = vld [vmem:[#allocation204_spill] sm:$0xff] }
 0x95c   :  { %v10636_v19 = vpop.eup %10635  ;;  %v5720_v20 = vpop.f32.mrf.mxu0  ;;  %10657 = vpow2.f32 %v8016_v59  ;;  %v826_v16 = vadd.f32 %v15848_v25, %v12605_v53 }
 0x95d   :  { %v10638_v42 = vpop.eup %10637  ;;  %v5936_v7 = vadd.f32 1.0, %v10636_v19  ;;  %v806_v19 = vadd.f32 %v15849_v52, %v12489_v22  ;;  %v8019_v38 = vmul.f32 -1.442695, %v5800_v26 }
 0x95e   :  { %v10640_v13 = vpop.eup %10639  ;;  %v9622_v30 = vpop.f32.mrf.mxu0  ;;  %v5841_v8 = vadd.f32 1.0, %v10638_v42  ;;  %v5795_v42 = vadd.f32 %v5700_v41, %v796_v18 }
 0x95f   :  { %v10642_v46 = vpop.eup %10641  ;;  %10659 = vrcp.f32 %v5936_v7  ;;  %v5911_v57 = vadd.f32 1.0, %v10640_v13  ;;  %v5802_v59 = vadd.f32 %v9622_v30, %v831_v23  ;;  %v5797_v0 = vadd.f32 %v5710_v47, %v806_v19  ;;  %v15851_v30 = vld [vmem:[#allocation45_spill] sm:$0xff] }
 0x960   :  { %10661 = vtanh.f32 %v5796_v48  ;;  %v5730_v37 = vpop.f32.mrf.mxu0  ;;  %v5913_v35 = vadd.f32 1.0, %v10642_v46  ;;  %v10644_v17 = vpop.eup %10643  ;;  %v816_v23 = vadd.f32 %v15851_v30, %v12623_v24 }
 0x961   :  { %10663 = vtanh.f32 %v5798_v12  ;;  %v5801_v48 = vadd.f32 %v5730_v37, %v826_v16  ;;  %v10646_v7 = vpop.eup %10645  ;;  %v8021_v45 = vmul.f32 -1.442695, %v5802_v59  ;;  %v15852_v12 = vld [vmem:[#allocation205_spill] sm:$0xff] }
 0x962   :  { %10665 = vtanh.f32 %v5765_v32  ;;  %v10648_v13 = vpop.eup %10647  ;;  %v2061_v25 = vadd.f32 %v15852_v12, %v12631_v14 }
 0x963   :  { %10667 = vrcp.f32 %v5841_v8  ;;  %v10650_v46 = vpop.eup %10649  ;;  %v8020_v32 = vmul.f32 -1.442695, %v5801_v48  ;;  %v5799_v8 = vadd.f32 %v5720_v20, %v816_v23  ;;  %v5817_v48 = vadd.f32 1.0, %v10646_v7  ;;  %v15856_v7 = vld [vmem:[#allocation197_spill] sm:$0xff] }
 0x964   :  { %10669 = vrcp.f32 %v5911_v57  ;;  %v10652_v41 = vpop.eup %10651  ;;  %v5935_v37 = vadd.f32 1.0, %v10650_v46  ;;  %v5770_v18 = vadd.f32 %v14340_v33, %v2061_v25  ;;  %v15853_v57 = vld [vmem:[#allocation209_spill] sm:$0xff]  ;;  %v5839_v12 = vadd.f32 1.0, %v10648_v13 }
 0x965   :  { %10671 = vrcp.f32 %v5913_v35  ;;  %v10654_v47 = vpop.eup %10653  ;;  %v2056_v59 = vadd.f32 %v15853_v57, %v12633_v58  ;;  %v15854_v35 = vld [vmem:[#allocation202_spill] sm:$0xff]  ;;  %v8018_v26 = vmul.f32 -1.442695, %v5799_v8 }
 0x966   :  { %10673 = vtanh.f32 %v5795_v42  ;;  %v5938_v52 = vadd.f32 1.0, %v10654_v47  ;;  %v2051_v6 = vadd.f32 %v15854_v35, %v12645_v15  ;;  %v2046_v42 = vadd.f32 %v15855_v39, %v12655_v28 }
 0x967   :  { %10675 = vtanh.f32 %v5797_v0  ;;  %v5769_v33 = vadd.f32 %v14342_v54, %v2056_v59  ;;  %v8009_v23 = vmul.f32 -1.442695, %v5770_v18  ;;  %v5815_v47 = vadd.f32 1.0, %v10644_v17 }
 0x968   :  { %10677 = vpow2.f32 %v8021_v45  ;;  %v10656_v16 = vpop.eup %10655  ;;  %v5768_v30 = vadd.f32 %v14336_v2, %v2051_v6  ;;  %v5767_v54 = vadd.f32 %v14338_v21, %v2046_v42 }
 0x969   :  { %10679 = vrcp.f32 %v5935_v37  ;;  %v10658_v19 = vpop.eup %10657  ;;  %v8008_v8 = vmul.f32 -1.442695, %v5769_v33 }
 0x96a   :  { %10681 = vpow2.f32 %v8020_v32  ;;  %v5937_v0 = vadd.f32 1.0, %v10658_v19  ;;  %v2026_v32 = vadd.f32 %v15856_v7, %v15608_v1  ;;  %v8006_v17 = vmul.f32 -1.442695, %v5767_v54 }
 0x96b   :  { %10683 = vrcp.f32 %v5938_v52 }
 0x96c   :  { %v10660_v20 = vpop.eup %10659  ;;  %10685 = vpow2.f32 %v8019_v38 }
 0x96d   :  { %v10662_v45 = vpop.eup %10661  ;;  %v5976_v46 = vmul.f32 %v10660_v20, %v14194_v11  ;;  %10687 = vrcp.f32 %v5937_v0  ;;  %v8007_v11 = vmul.f32 -1.442695, %v5768_v30 }
 0x96e   :  { %v5980_v25 = vmul.f32 %v10662_v45, %v10652_v41  ;;  %v10664_v37 = vpop.eup %10663  ;;  %10689 = vrcp.f32 %v5817_v48  ;;  %v5763_v41 = vadd.f32 %v14330_v62, %v2026_v32 }
 0x96f   :  { %v10666_v57 = vpop.eup %10665  ;;  %v5982_v2 = vmul.f32 %v10664_v37, %v10656_v16  ;;  %10691 = vpow2.f32 %v8018_v26 }
 0x970   :  { %v14418_v59 = vadd.f32 %v5980_v25, %v5976_v46  ;;  %v10668_v18 = vpop.eup %10667  ;;  %10693 = vpow2.f32 %v8009_v23 }
 0x971   :  { %v10670_v13 = vpop.eup %10669  ;;  %10695 = vrcp.f32 %v5839_v12  ;;  %v5881_v37 = vmul.f32 %v10668_v18, %v14211_v10 }
 0x972   :  { %v10672_v38 = vpop.eup %10671  ;;  %10697 = vrcp.f32 %v5815_v47 }
 0x973   :  { %v10674_v52 = vpop.eup %10673  ;;  %10699 = vpow2.f32 %v8008_v8 }
 0x974   :  { %v10676_v19 = vpop.eup %10675  ;;  %10701 = vpow2.f32 %v8007_v11  ;;  %v5979_v33 = vmul.f32 %v10674_v52, %v10670_v13  ;;  %v15857_v11 = vld [vmem:[#allocation65_spill] sm:$0xff] }
 0x975   :  { %v10678_v21 = vpop.eup %10677  ;;  %10703 = vtanh.f32 %v5763_v41  ;;  %v5981_v23 = vmul.f32 %v10676_v19, %v10672_v38 }
 0x976   :  { %v10680_v35 = vpop.eup %10679  ;;  %10705 = vpow2.f32 %v8006_v17  ;;  %v5966_v39 = vadd.f32 1.0, %v10678_v21 }
 0x977   :  { %v10682_v6 = vpop.eup %10681  ;;  %v5975_v48 = vmul.f32 %v10680_v35, %v14204_v5  ;;  %10707 = vtanh.f32 %v14418_v59 }
 0x978   :  { %v10684_v16 = vpop.eup %10683  ;;  %v5965_v0 = vadd.f32 1.0, %v10682_v6  ;;  %10709 = vrcp.f32 %v5966_v39 }
 0x979   :  { %v10686_v42 = vpop.eup %10685  ;;  %v5978_v20 = vmul.f32 %v10684_v16, %v14200_v49  ;;  %v14428_v5 = vadd.f32 %v5979_v33, %v5975_v48 }
 0x97a   :  { %v10688_v62 = vpop.eup %10687  ;;  %v5964_v12 = vadd.f32 1.0, %v10686_v42 }
 0x97b   :  { %v10690_v26 = vpop.eup %10689  ;;  %v14424_v45 = vadd.f32 %v5982_v2, %v5978_v20  ;;  %v5977_v30 = vmul.f32 %v10688_v62, %v14207_v9 }
 0x97c   :  { %v10692_v46 = vpop.eup %10691  ;;  %v5885_v47 = vmul.f32 %v10690_v26, %v10666_v57 }
 0x97d   :  { %v10694_v25 = vpop.eup %10693  ;;  %10711 = vtanh.f32 %v14424_v45  ;;  %v14431_v49 = vadd.f32 %v5981_v23, %v5977_v30  ;;  %v5963_v9 = vadd.f32 1.0, %v10692_v46 }
 0x97e   :  { %v10696_v7 = vpop.eup %10695  ;;  %10713 = vrcp.f32 %v5965_v0  ;;  %v5870_v8 = vadd.f32 1.0, %v10694_v25  ;;  %v14435_v10 = vadd.f32 %v5885_v47, %v5881_v37 }
 0x97f   :  { %v10698_v32 = vpop.eup %10697  ;;  %10715 = vtanh.f32 %v14431_v49  ;;  %v5879_v13 = vmul.f32 %v10696_v7, %v15857_v11  ;;  %v10964_v11 = vld [vmem:[%s14905_s2 + $0x10] sm:$0xff] }
 0x980   :  { %v10700_v54 = vpop.eup %10699  ;;  %10717 = vrcp.f32 %v5964_v12 }
 0x981   :  { %v10702_v2 = vpop.eup %10701  ;;  %10719 = vtanh.f32 %v14428_v5  ;;  %v5869_v38 = vadd.f32 1.0, %v10700_v54 }
 0x982   :  { %v10704_v18 = vpop.eup %10703  ;;  %10721 = vtanh.f32 %v14373_v50  ;;  %v5868_v52 = vadd.f32 1.0, %v10702_v2  ;;  %v10963_v2 = vld [vmem:[%s14905_s2 + $0x8] sm:$0xff] }
 0x983   :  { %v5883_v41 = vmul.f32 %v10704_v18, %v10698_v32  ;;  %10723 = vrcp.f32 %v5963_v9  ;;  %v10706_v57 = vpop.eup %10705  ;;  %v10966_v18 = vld [vmem:[%s14905_s2 + $0x20] sm:$0xff] }
 0x984   :  { %10725 = vrcp.f32 %v5870_v8  ;;  %v5867_v19 = vadd.f32 1.0, %v10706_v57  ;;  %v10708_v21 = vpop.eup %10707  ;;  %v10968_v57 = vld [vmem:[%s14905_s2 + $0x30] sm:$0xff] }
 0x985   :  { %v14439_v17 = vadd.f32 %v5883_v41, %v5879_v13  ;;  %10727 = vtanh.f32 %v14435_v10  ;;  %v10710_v35 = vpop.eup %10709  ;;  %v10965_v13 = vld [vmem:[%s14905_s2 + $0x18] sm:$0xff]  ;;  %v10967_v41 = vld [vmem:[%s14905_s2 + $0x28] sm:$0xff] }
 0x986   :  { %10729 = vtanh.f32 %v14364_v3 }
 0x987   :  { %10731 = vrcp.f32 %v5869_v38  ;;  %v15858_v38 = vld [vmem:[#allocation10_spill] sm:$0xff] }
 0x988   :  { %10733 = vrcp.f32 %v5868_v52  ;;  %v15859_v52 = vld [vmem:[#allocation11_spill] sm:$0xff] }
 0x989   :  { %10735 = vtanh.f32 %v14439_v17 }
 0x98a   :  { %v10712_v6 = vpop.eup %10711  ;;  %10737 = vrcp.f32 %v5867_v19  ;;  %v10969_v19 = vld [vmem:[%s14905_s2 + $0x38] sm:$0xff] }
 0x98b   :  { %v10714_v16 = vpop.eup %10713  ;;  %v5994_v39 = vmul.f32 %v10712_v6, %v10710_v35  ;;  %v10970_v35 = vld [vmem:[%s14905_s2 + $0x40] sm:$0xff] }
 0x98c   :  { %v10716_v42 = vpop.eup %10715  ;;  %v15861_v6 = vld [vmem:[#allocation210_spill] sm:$0xff] }
 0x98d   :  { %v10718_v48 = vpop.eup %10717  ;;  %9623 = vmatprep.subr.mxu1 %v5994_v39  ;;  %v5993_v20 = vmul.f32 %v10716_v42, %v10714_v16  ;;  %v10971_v16 = vld [vmem:[%s14905_s2 + $0x48] sm:$0xff]  ;;  %v10972_v42 = vld [vmem:[%s14905_s2 + $0x50] sm:$0xff] }
 0x98e   :  { %v10720_v62 = vpop.eup %10719  ;;  %9624 = vmatpush3.msra.mxu1 %v5994_v39  ;;  %v5992_v0 = vmul.f32 %v10718_v48, %v10708_v21  ;;  %v15860_v21 = vld [vmem:[#allocation12_spill] sm:$0xff]  ;;  %v10973_v48 = vld [vmem:[%s14905_s2 + $0x58] sm:$0xff] }
 0x98f   :  { %v10722_v33 = vpop.eup %10721  ;;  %9625 = vmatprep.subr.mxu1 %v5993_v20 }
 0x990   :  { %v10724_v26 = vpop.eup %10723  ;;  %9626 = vmatpush3.msra.mxu1 %v5993_v20 }
 0x991   :  { %v10726_v30 = vpop.eup %10725  ;;  %9627 = vmatprep.subr.mxu1 %v5992_v0  ;;  %v5991_v23 = vmul.f32 %v10724_v26, %v10720_v62  ;;  %v10975_v62 = vld [vmem:[%s14905_s2 + $0x68] sm:$0xff]  ;;  %v10978_v26 = vld [vmem:[%s14905_s2 + $0x80] sm:$0xff] }
 0x992   :  { %v10728_v46 = vpop.eup %10727  ;;  %9628 = vmatpush3.msra.mxu1 %v5992_v0  ;;  %v14444_v25 = vmul.f32 %v10726_v30, %v10722_v33  ;;  %v10976_v33 = vld [vmem:[%s14905_s2 + $0x70] sm:$0xff]  ;;  %v10979_v30 = vld [vmem:[%s14905_s2 + $0x88] sm:$0xff] }
 0x993   :  { %v10730_v12 = vpop.eup %10729  ;;  %9629 = vmatprep.subr.mxu1 %v5991_v23 }
 0x994   :  { %v10732_v37 = vpop.eup %10731  ;;  %9630 = vmatpush3.msra.mxu1 %v5991_v23 }
 0x995   :  { %v10734_v7 = vpop.eup %10733  ;;  %9631 = vmatprep.subr.mxu1 %v14444_v25  ;;  %v14447_v32 = vmul.f32 %v10732_v37, %v10728_v46  ;;  %v10981_v46 = vld [vmem:[%s14905_s2 + $0x98] sm:$0xff]  ;;  %v10983_v37 = vld [vmem:[%s14905_s2 + $0xa8] sm:$0xff] }
 0x996   :  { %v10736_v47 = vpop.eup %10735  ;;  %9632 = vmatpush3.msra.mxu1 %v14444_v25  ;;  %v14451_v9 = vmul.f32 %v10734_v7, %v10730_v12  ;;  %v10982_v12 = vld [vmem:[%s14905_s2 + $0xa0] sm:$0xff]  ;;  %v10984_v7 = vld [vmem:[%s14905_s2 + $0xb0] sm:$0xff] }
 0x997   :  { %9633 = vmatprep.subr.mxu1 %v14447_v32  ;;  %v10738_v54 = vpop.eup %10737 }
 0x998   :  { %9634 = vmatpush3.msra.mxu1 %v14447_v32  ;;  %v14455_v8 = vmul.f32 %v10738_v54, %v10736_v47  ;;  %v10985_v47 = vld [vmem:[%s14905_s2 + $0xb8] sm:$0xff]  ;;  %v10986_v54 = vld [vmem:[%s14905_s2 + $0xc0] sm:$0xff] }
 0x999   :  { %9635 = vmatprep.subr.mxu1 %v14451_v9 }
 0x99a   :  { %9636 = vmatpush3.msra.mxu1 %v14451_v9 }
 0x99b   :  { %9637 = vmatprep.subr.mxu1 %v14455_v8 }
 0x99c   :  { %9638 = vmatpush3.msra.mxu1 %v14455_v8 }
 0x99d   :  { %9640 = vmatmul.mubr.msk.f32.vlgmr.msra.gmra.mxu1 %vm2472_vm1, %v10963_v2  ;;  %9706 = vmatprep.subr.mxu1 %v5994_v39  ;;  %v10987_v2 = vld [vmem:[%s14905_s2 + $0xc8] sm:$0xff] }
 0x99e   :  { %9707 = vmatpush3.msra.mxu1 %v5994_v39  ;;  %9642 = vmatprep.mubr.msk.f32.mxu1 %vm2472_vm1, %v10964_v11  ;;  %v15862_v39 = vld [vmem:[#allocation54_spill] sm:$0xff]  ;;  %v10988_v11 = vld [vmem:[%s14905_s2 + $0xd0] sm:$0xff] }
 0x99f   :  { %9708 = vmatprep.subr.mxu1 %v5993_v20 }
 0x9a0   :  { %9709 = vmatpush3.msra.mxu1 %v5993_v20  ;;  %v10974_v20 = vld [vmem:[%s14905_s2 + $0x60] sm:$0xff] }
 0x9a1   :  { %9643 = vmatmul.mubr.msk.f32.gmra.mxu1 %vm2472_vm1, %v10965_v13  ;;  %9710 = vmatprep.subr.mxu1 %v5992_v0  ;;  %v10989_v13 = vld [vmem:[%s14905_s2 + $0xd8] sm:$0xff] }
 0x9a2   :  { %9711 = vmatpush3.msra.mxu1 %v5992_v0  ;;  %9645 = vmatprep.mubr.msk.f32.mxu1 %vm2472_vm1, %v10966_v18  ;;  %v10977_v0 = vld [vmem:[%s14905_s2 + $0x78] sm:$0xff]  ;;  %v10990_v18 = vld [vmem:[%s14905_s2 + $0xe0] sm:$0xff] }
 0x9a3   :  { %9712 = vmatprep.subr.mxu1 %v5991_v23 }
 0x9a4   :  { %9713 = vmatpush3.msra.mxu1 %v5991_v23  ;;  %v10980_v23 = vld [vmem:[%s14905_s2 + $0x90] sm:$0xff] }
 0x9a5   :  { %9646 = vmatmul.mubr.msk.f32.gmra.mxu1 %vm2472_vm1, %v10967_v41  ;;  %9714 = vmatprep.subr.mxu1 %v15858_v38  ;;  %v10991_v41 = vld [vmem:[%s14905_s2 + $0xe8] sm:$0xff] }
 0x9a6   :  { %9715 = vmatpush3.msra.mxu1 %v15858_v38  ;;  %9648 = vmatprep.mubr.msk.f32.mxu1 %vm2472_vm1, %v10968_v57  ;;  %v10992_v38 = vld [vmem:[%s14905_s2 + $0xf0] sm:$0xff]  ;;  %v10993_v57 = vld [vmem:[%s14905_s2 + $0xf8] sm:$0xff] }
 0x9a7   :  { %9716 = vmatprep.subr.mxu1 %v15859_v52 }
 0x9a8   :  { %9717 = vmatpush3.msra.mxu1 %v15859_v52  ;;  %v14598_v52 = vld [vmem:[%s14906_s4 + $0x8] sm:$0xff] }
 0x9a9   :  { %9649 = vmatmul.mubr.msk.f32.gmra.mxu1 %vm2472_vm1, %v10969_v19  ;;  %9718 = vmatprep.subr.mxu1 %v15860_v21  ;;  %v15863_v19 = vld [vmem:[#allocation56_spill] sm:$0xff] }
 0x9aa   :  { %9719 = vmatpush3.msra.mxu1 %v15860_v21  ;;  %9651 = vmatprep.mubr.msk.f32.mxu1 %vm2472_vm1, %v10970_v35  ;;  %v15864_v21 = vld [vmem:[#allocation58_spill] sm:$0xff]  ;;  %v15865_v35 = vld [vmem:[#allocation60_spill] sm:$0xff] }
 0x9ab   :  { %9720 = vmatprep.subr.mxu1 %v15861_v6 }
 0x9ac   :  { %9721 = vmatpush3.msra.mxu1 %v15861_v6  ;;  %v15866_v6 = vld [vmem:[#allocation274_spill] sm:$0xff] }
 0x9ad   :  { %9652 = vmatmul.mubr.msk.f32.gmra.mxu1 %vm2472_vm1, %v10971_v16  ;;  %9744 = vmatprep.subr.mxu1 %v15862_v39  ;;  %v15867_v16 = vld [vmem:[#allocation275_spill] sm:$0xff] }
 0x9ae   :  { %9654 = vmatprep.mubr.msk.f32.mxu1 %vm2472_vm1, %v10972_v42  ;;  %v15869_v42 = vld [vmem:[#allocation50_spill] sm:$0xff] }
 0x9b1   :  { %9655 = vmatmul.mubr.msk.f32.gmra.mxu1 %vm2472_vm1, %v10973_v48  ;;  %v15870_v48 = vld [vmem:[#allocation215_spill] sm:$0xff] }
 0x9b2   :  { %9657 = vmatprep.mubr.msk.f32.mxu1 %vm2472_vm1, %v10974_v20  ;;  %v15871_v20 = vld [vmem:[#allocation212_spill] sm:$0xff] }
 0x9b5   :  { %9658 = vmatmul.mubr.msk.f32.gmra.mxu1 %vm2472_vm1, %v10975_v62  ;;  %v15872_v62 = vld [vmem:[#allocation216_spill] sm:$0xff] }
 0x9b6   :  { %9660 = vmatprep.mubr.msk.f32.mxu1 %vm2472_vm1, %v10976_v33  ;;  %v15873_v33 = vld [vmem:[#allocation219_spill] sm:$0xff] }
 0x9b9   :  { %9661 = vmatmul.mubr.msk.f32.gmra.mxu1 %vm2472_vm1, %v10977_v0  ;;  %v15874_v0 = vld [vmem:[#allocation53_spill] sm:$0xff] }
 0x9ba   :  { %9663 = vmatprep.mubr.msk.f32.mxu1 %vm2472_vm1, %v10978_v26  ;;  %v15875_v26 = vld [vmem:[#allocation196_spill] sm:$0xff] }
 0x9bd   :  { %9664 = vmatmul.mubr.msk.f32.gmra.mxu1 %vm2472_vm1, %v10979_v30  ;;  %v15876_v30 = vld [vmem:[#allocation57_spill] sm:$0xff] }
 0x9be   :  { %9666 = vmatprep.mubr.msk.f32.mxu1 %vm2472_vm1, %v10980_v23  ;;  %v15877_v23 = vld [vmem:[#allocation243_spill] sm:$0xff] }
 0x9c1   :  { %9667 = vmatmul.mubr.msk.f32.gmra.mxu1 %vm2472_vm1, %v10981_v46  ;;  %v15878_v46 = vld [vmem:[#allocation247_spill] sm:$0xff] }
 0x9c2   :  { %9669 = vmatprep.mubr.msk.f32.mxu1 %vm2472_vm1, %v10982_v12  ;;  %v15879_v12 = vld [vmem:[#allocation248_spill] sm:$0xff] }
 0x9c5   :  { %9670 = vmatmul.mubr.msk.f32.gmra.mxu1 %vm2472_vm1, %v10983_v37  ;;  %v15880_v37 = vld [vmem:[#allocation249_spill] sm:$0xff] }
 0x9c6   :  { %9672 = vmatprep.mubr.msk.f32.mxu1 %vm2472_vm1, %v10984_v7  ;;  %v15881_v7 = vld [vmem:[#allocation250_spill] sm:$0xff] }
 0x9c9   :  { %9673 = vmatmul.mubr.msk.f32.gmra.mxu1 %vm2472_vm1, %v10985_v47  ;;  %v15882_v47 = vld [vmem:[#allocation201_spill] sm:$0xff] }
 0x9ca   :  { %9675 = vmatprep.mubr.msk.f32.mxu1 %vm2472_vm1, %v10986_v54  ;;  %v15883_v54 = vld [vmem:[#allocation182_spill] sm:$0xff] }
 0x9cd   :  { %9676 = vmatmul.mubr.msk.f32.gmra.mxu1 %vm2472_vm1, %v10987_v2  ;;  %v2253_v2 = vadd.f32 %v15883_v54, %v15882_v47  ;;  %v15891_v47 = vld [vmem:[#allocation230_spill] sm:$0xff] }
 0x9ce   :  { %9678 = vmatprep.mubr.msk.f32.mxu1 %vm2472_vm1, %v10988_v11 }
 0x9d1   :  { %9679 = vmatmul.mubr.msk.f32.gmra.mxu1 %vm2472_vm1, %v10989_v13  ;;  %v15884_v13 = vld [vmem:[#allocation185_spill] sm:$0xff] }
 0x9d2   :  { %9681 = vmatprep.mubr.msk.f32.mxu1 %vm2472_vm1, %v10990_v18  ;;  %v2248_v18 = vadd.f32 %v15884_v13, %v15585_v51 }
 0x9d5   :  { %9682 = vmatmul.mubr.msk.f32.gmra.mxu1 %vm2472_vm1, %v10991_v41 }
 0x9d6   :  { %9684 = vmatprep.mubr.msk.f32.mxu1 %vm2472_vm1, %v10992_v38  ;;  %v15885_v38 = vld [vmem:[#allocation190_spill] sm:$0xff] }
 0x9d9   :  { %9685 = vmatmul.mubr.msk.f32.gmra.mxu1 %vm2472_vm1, %v10993_v57  ;;  %v15886_v57 = vld [vmem:[#allocation188_spill] sm:$0xff] }
 0x9da   :  { %9722 = vmatprep.mubr.msk.f32.mxu1 %vm2472_vm1, %v14382_v34 }
 0x9dd   :  { %9723 = vmatmul.mubr.msk.f32.vlgmr.msra.gmra.mxu1 %vm2472_vm1, %v14598_v52 }
 0x9de   :  { %9745 = vmatpush3.msra.mxu1 %v15862_v39  ;;  %9760 = vmatprep.mubr.msk.f32.mxu1 %vm2472_vm1, %v14382_v34  ;;  %v15868_v39 = vld [vmem:[#allocation48_spill] sm:$0xff] }
 0x9df   :  { %9746 = vmatprep.subr.mxu1 %v15863_v19 }
 0x9e0   :  { %9747 = vmatpush3.msra.mxu1 %v15863_v19  ;;  %v2263_v19 = vadd.f32 %v15886_v57, %v15885_v38 }
 0x9e1   :  { %9748 = vmatprep.subr.mxu1 %v15864_v21 }
 0x9e2   :  { %9749 = vmatpush3.msra.mxu1 %v15864_v21 }
 0x9e3   :  { %9750 = vmatprep.subr.mxu1 %v15865_v35 }
 0x9e4   :  { %9751 = vmatpush3.msra.mxu1 %v15865_v35 }
 0x9e5   :  { %9752 = vmatprep.subr.mxu1 %v15866_v6 }
 0x9e6   :  { %9753 = vmatpush3.msra.mxu1 %v15866_v6 }
 0x9e7   :  { %9754 = vmatprep.subr.mxu1 %v15867_v16 }
 0x9e8   :  { %9755 = vmatpush3.msra.mxu1 %v15867_v16  ;;  %v15887_v16 = vld [vmem:[#allocation192_spill] sm:$0xff] }
 0x9e9   :  { %9756 = vmatprep.subr.mxu1 %v15868_v39 }
 0x9ea   :  { %9757 = vmatpush3.msra.mxu1 %v15868_v39  ;;  %v2258_v39 = vadd.f32 %v15887_v16, %v15587_v27  ;;  %v15892_v27 = vld [vmem:[#allocation203_spill] sm:$0xff] }
 0x9eb   :  { %9758 = vmatprep.subr.mxu1 %v15869_v42  ;;  %v2283_v54 = vadd.f32 %v15892_v27, %v15891_v47 }
 0x9ec   :  { %9759 = vmatpush3.msra.mxu1 %v15869_v42 }
 0x9ed   :  { %9761 = vmatmul.mubr.msk.f32.vlgmr.msra.gmra.mxu1 %vm2472_vm1, %v14598_v52  ;;  %9782 = vmatprep.subr.mxu1 %v15870_v48 }
 0x9ee   :  { %9783 = vmatpush3.msra.mxu1 %v15870_v48  ;;  %9798 = vmatprep.mubr.msk.f32.mxu1 %vm2472_vm1, %v14382_v34 }
 0x9ef   :  { %9784 = vmatprep.subr.mxu1 %v15871_v20 }
 0x9f0   :  { %9785 = vmatpush3.msra.mxu1 %v15871_v20 }
 0x9f1   :  { %9786 = vmatprep.subr.mxu1 %v15872_v62 }
 0x9f2   :  { %9787 = vmatpush3.msra.mxu1 %v15872_v62  ;;  %v15888_v62 = vld [vmem:[#allocation241_spill] sm:$0xff] }
 0x9f3   :  { %9788 = vmatprep.subr.mxu1 %v15873_v33 }
 0x9f4   :  { %9789 = vmatpush3.msra.mxu1 %v15873_v33  ;;  %v15889_v33 = vld [vmem:[#allocation195_spill] sm:$0xff] }
 0x9f5   :  { %9790 = vmatprep.subr.mxu1 %v15874_v0 }
 0x9f6   :  { %9791 = vmatpush3.msra.mxu1 %v15874_v0  ;;  %v2273_v0 = vadd.f32 %v15889_v33, %v15888_v62 }
 0x9f7   :  { %9792 = vmatprep.subr.mxu1 %v15875_v26 }
 0x9f8   :  { %9793 = vmatpush3.msra.mxu1 %v15875_v26 }
 0x9f9   :  { %9794 = vmatprep.subr.mxu1 %v15876_v30 }
 0x9fa   :  { %9795 = vmatpush3.msra.mxu1 %v15876_v30 }
 0x9fb   :  { %9796 = vmatprep.subr.mxu1 %v15877_v23 }
 0x9fc   :  { %9797 = vmatpush3.msra.mxu1 %v15877_v23  ;;  %v15890_v23 = vld [vmem:[#allocation199_spill] sm:$0xff] }
 0x9fd   :  { %9799 = vmatmul.mubr.msk.f32.vlgmr.msra.gmra.mxu1 %vm2472_vm1, %v14598_v52  ;;  %9820 = vmatprep.subr.mxu1 %v15878_v46 }
 0x9fe   :  { %9821 = vmatpush3.msra.mxu1 %v15878_v46  ;;  %9836 = vmatprep.mubr.msk.f32.mxu1 %vm2472_vm1, %v14382_v34  ;;  %v2268_v46 = vadd.f32 %v15890_v23, %v15589_v44  ;;  %v15896_v44 = vld [vmem:[#allocation211_spill] sm:$0xff] }
 0x9ff   :  { %9822 = vmatprep.subr.mxu1 %v15879_v12 }
 0xa00   :  { %9823 = vmatpush3.msra.mxu1 %v15879_v12 }
 0xa01   :  { %9824 = vmatprep.subr.mxu1 %v15880_v37 }
 0xa02   :  { %9825 = vmatpush3.msra.mxu1 %v15880_v37 }
 0xa03   :  { %9826 = vmatprep.subr.mxu1 %v15881_v7 }
 0xa04   :  { %9827 = vmatpush3.msra.mxu1 %v15881_v7 }
 0xa5d   :  { %v9641_v11 = vpop.f32.mrf.mxu1 }
 0xa5e   :  { %v6247_v34 = vadd.f32 %v9641_v11, %v2253_v2 }
 0xa5f   :  { %v6071_v41 = vpop.f32.mrf.mxu1 }
 0xa60   :  { %v8055_v21 = vmul.f32 -1.442695, %v6247_v34  ;;  %v6246_v35 = vadd.f32 %v6071_v41, %v2248_v18  ;;  %v15893_v18 = vld [vmem:[#allocation236_spill] sm:$0xff]  ;;  %v15894_v34 = vld [vmem:[#allocation206_spill] sm:$0xff] }
 0xa61   :  { %v9644_v6 = vpop.f32.mrf.mxu1  ;;  %v2278_v41 = vadd.f32 %v15894_v34, %v15893_v18 }
 0xa62   :  { %10739 = vpow2.f32 %v8055_v21  ;;  %v8054_v42 = vmul.f32 -1.442695, %v6246_v35  ;;  %v6249_v48 = vadd.f32 %v9644_v6, %v2263_v19  ;;  %v15895_v21 = vld [vmem:[#allocation244_spill] sm:$0xff] }
 0xa63   :  { %v6081_v20 = vpop.f32.mrf.mxu1  ;;  %v2293_v35 = vadd.f32 %v15896_v44, %v15895_v21 }
 0xa64   :  { %10741 = vpow2.f32 %v8054_v42  ;;  %v8057_v51 = vmul.f32 -1.442695, %v6249_v48  ;;  %v6248_v26 = vadd.f32 %v6081_v20, %v2258_v39  ;;  %v15897_v42 = vld [vmem:[#allocation214_spill] sm:$0xff] }
 0xa65   :  { %v9647_v30 = vpop.f32.mrf.mxu1  ;;  %v2288_v48 = vadd.f32 %v15897_v42, %v15608_v1 }
 0xa66   :  { %10743 = vpow2.f32 %v8057_v51  ;;  %v8056_v12 = vmul.f32 -1.442695, %v6248_v26  ;;  %v6251_v37 = vadd.f32 %v9647_v30, %v2273_v0  ;;  %v15898_v51 = vld [vmem:[#allocation237_spill] sm:$0xff] }
 0xa67   :  { %v6091_v7 = vpop.f32.mrf.mxu1  ;;  %v15899_v26 = vld [vmem:[#allocation217_spill] sm:$0xff] }
 0xa68   :  { %10745 = vpow2.f32 %v8056_v12  ;;  %v8059_v2 = vmul.f32 -1.442695, %v6251_v37  ;;  %v6250_v11 = vadd.f32 %v6091_v7, %v2268_v46  ;;  %v2303_v30 = vadd.f32 %v15899_v26, %v15898_v51  ;;  %v15900_v7 = vld [vmem:[#allocation221_spill] sm:$0xff] }
 0xa69   :  { %v9650_v13 = vpop.f32.mrf.mxu1  ;;  %v2298_v47 = vadd.f32 %v15900_v7, %v15596_v40 }
 0xa6a   :  { %10747 = vpow2.f32 %v8059_v2  ;;  %v8058_v38 = vmul.f32 -1.442695, %v6250_v11  ;;  %v6253_v57 = vadd.f32 %v9650_v13, %v2283_v54  ;;  %v15901_v11 = vld [vmem:[#allocation225_spill] sm:$0xff] }
 0xa6b   :  { %v6101_v19 = vpop.f32.mrf.mxu1  ;;  %v2313_v13 = vadd.f32 %v15901_v11, %v12645_v15 }
 0xa6c   :  { %10749 = vpow2.f32 %v8058_v38  ;;  %v8061_v6 = vmul.f32 -1.442695, %v6253_v57  ;;  %v6252_v16 = vadd.f32 %v6101_v19, %v2278_v41  ;;  %v15902_v57 = vld [vmem:[#allocation228_spill] sm:$0xff] }
 0xa6d   :  { %v9653_v39 = vpop.f32.mrf.mxu1  ;;  %v2308_v19 = vadd.f32 %v15902_v57, %v12655_v28 }
 0xa6e   :  { %10751 = vpow2.f32 %v8061_v6  ;;  %v8060_v20 = vmul.f32 -1.442695, %v6252_v16  ;;  %v6255_v62 = vadd.f32 %v9653_v39, %v2293_v35  ;;  %v15903_v35 = vld [vmem:[#allocation233_spill] sm:$0xff] }
 0xa6f   :  { %v10740_v33 = vpop.eup %10739  ;;  %v6111_v0 = vpop.f32.mrf.mxu1  ;;  %v2323_v6 = vadd.f32 %v15903_v35, %v12631_v14 }
 0xa70   :  { %v6307_v23 = vadd.f32 1.0, %v10740_v33  ;;  %10753 = vpow2.f32 %v8060_v20  ;;  %v6254_v46 = vadd.f32 %v6111_v0, %v2288_v48  ;;  %v15904_v20 = vld [vmem:[#allocation238_spill] sm:$0xff] }
 0xa71   :  { %v10742_v12 = vpop.eup %10741  ;;  %10755 = vtanh.f32 %v6255_v62  ;;  %v9656_v37 = vpop.f32.mrf.mxu1  ;;  %v2318_v62 = vadd.f32 %v15904_v20, %v12633_v58  ;;  %v15912_v20 = vld [vmem:[#allocation24_spill] sm:$0xff] }
 0xa72   :  { %10757 = vrcp.f32 %v6307_v23  ;;  %v6257_v27 = vadd.f32 %v9656_v37, %v2303_v30  ;;  %v6306_v54 = vadd.f32 1.0, %v10742_v12  ;;  %v15905_v30 = vld [vmem:[#allocation177_spill] sm:$0xff]  ;;  %v15906_v23 = vld [vmem:[#allocation16_spill] sm:$0xff] }
 0xa73   :  { %v10744_v1 = vpop.eup %10743  ;;  %v6121_v2 = vpop.f32.mrf.mxu1  ;;  %10759 = vtanh.f32 %v6254_v46  ;;  %v501_v14 = vadd.f32 %v15906_v23, %v15905_v30 }
 0xa74   :  { %v6309_v18 = vadd.f32 1.0, %v10744_v1  ;;  %v6256_v34 = vadd.f32 %v6121_v2, %v2298_v47  ;;  %10761 = vtanh.f32 %v6257_v27  ;;  %v15907_v27 = vld [vmem:[#allocation18_spill] sm:$0xff] }
 0xa75   :  { %v10746_v41 = vpop.eup %10745  ;;  %v9659_v38 = vpop.f32.mrf.mxu1  ;;  %v496_v58 = vadd.f32 %v15907_v27, %v15666_v60 }
 0xa76   :  { %10763 = vrcp.f32 %v6309_v18  ;;  %v6308_v21 = vadd.f32 1.0, %v10746_v41  ;;  %v6259_v40 = vadd.f32 %v9659_v38, %v2313_v13  ;;  %v15909_v41 = vld [vmem:[#allocation20_spill] sm:$0xff] }
 0xa77   :  { %v10748_v44 = vpop.eup %10747  ;;  %10765 = vrcp.f32 %v6306_v54  ;;  %v6131_v16 = vpop.f32.mrf.mxu1 }
 0xa78   :  { %v6331_v39 = vadd.f32 1.0, %v10748_v44  ;;  %10767 = vtanh.f32 %v6256_v34  ;;  %v8063_v15 = vmul.f32 -1.442695, %v6259_v40  ;;  %v6258_v42 = vadd.f32 %v6131_v16, %v2308_v19  ;;  %v15908_v34 = vld [vmem:[#allocation163_spill] sm:$0xff]  ;;  %v15911_v16 = vld [vmem:[#allocation22_spill] sm:$0xff] }
 0xa79   :  { %v10750_v48 = vpop.eup %10749  ;;  %10769 = vrcp.f32 %v6308_v21  ;;  %v9662_v33 = vpop.f32.mrf.mxu1  ;;  %v511_v38 = vadd.f32 %v15909_v41, %v15908_v34  ;;  %v15913_v41 = vld [vmem:[#allocation26_spill] sm:$0xff] }
 0xa7a   :  { %10771 = vrcp.f32 %v6331_v39  ;;  %v6330_v28 = vadd.f32 1.0, %v10750_v48  ;;  %v8062_v0 = vmul.f32 -1.442695, %v6258_v42  ;;  %v6261_v51 = vadd.f32 %v9662_v33, %v2323_v6  ;;  %v15910_v6 = vld [vmem:[#allocation207_spill] sm:$0xff] }
 0xa7b   :  { %v10752_v26 = vpop.eup %10751  ;;  %10773 = vpow2.f32 %v8063_v15  ;;  %v6141_v46 = vpop.f32.mrf.mxu1  ;;  %v506_v39 = vadd.f32 %v15911_v16, %v15910_v6  ;;  %v15914_v6 = vld [vmem:[#allocation28_spill] sm:$0xff] }
 0xa7c   :  { %10775 = vrcp.f32 %v6330_v28  ;;  %v6333_v12 = vadd.f32 1.0, %v10752_v26  ;;  %v8065_v37 = vmul.f32 -1.442695, %v6261_v51  ;;  %v6260_v7 = vadd.f32 %v6141_v46, %v2318_v62 }
 0xa7d   :  { %v10754_v47 = vpop.eup %10753  ;;  %10777 = vpow2.f32 %v8062_v0  ;;  %v9665_v1 = vpop.f32.mrf.mxu1  ;;  %v521_v62 = vadd.f32 %v15912_v20, %v15434_v56  ;;  %v15915_v20 = vld [vmem:[#allocation30_spill] sm:$0xff] }
 0xa7e   :  { %v10756_v54 = vpop.eup %10755  ;;  %10779 = vrcp.f32 %v6333_v12  ;;  %v6332_v2 = vadd.f32 1.0, %v10754_v47  ;;  %v8064_v11 = vmul.f32 -1.442695, %v6260_v7  ;;  %v6279_v13 = vadd.f32 %v9665_v1, %v501_v14 }
 0xa7f   :  { %v10758_v18 = vpop.eup %10757  ;;  %10781 = vpow2.f32 %v8065_v37  ;;  %v6151_v57 = vpop.f32.mrf.mxu1 }
 0xa80   :  { %10783 = vrcp.f32 %v6332_v2  ;;  %v6375_v19 = vmul.f32 %v10758_v18, %v10756_v54  ;;  %v8067_v21 = vmul.f32 -1.442695, %v6279_v13  ;;  %v6278_v40 = vadd.f32 %v6151_v57, %v496_v58  ;;  %v10760_v44 = vpop.eup %10759 }
 0xa81   :  { %10785 = vpow2.f32 %v8064_v11  ;;  %v9668_v60 = vpop.f32.mrf.mxu1  ;;  %v10762_v35 = vpop.eup %10761 }
 0xa82   :  { %10787 = vpow2.f32 %v8067_v21  ;;  %v8066_v15 = vmul.f32 -1.442695, %v6278_v40  ;;  %v6281_v42 = vadd.f32 %v9668_v60, %v511_v38  ;;  %v516_v38 = vadd.f32 %v15913_v41, %v15436_v61  ;;  %v15920_v41 = vld [vmem:[#allocation38_spill] sm:$0xff] }
 0xa83   :  { %v10764_v48 = vpop.eup %10763  ;;  %v6161_v33 = vpop.f32.mrf.mxu1 }
 0xa84   :  { %v10766_v28 = vpop.eup %10765  ;;  %v6377_v0 = vmul.f32 %v10764_v48, %v10762_v35  ;;  %10789 = vpow2.f32 %v8066_v15  ;;  %v8069_v51 = vmul.f32 -1.442695, %v6281_v42  ;;  %v6280_v26 = vadd.f32 %v6161_v33, %v506_v39 }
 0xa85   :  { %v10768_v30 = vpop.eup %10767  ;;  %v9671_v23 = vpop.f32.mrf.mxu1  ;;  %v6374_v18 = vmul.f32 %v10766_v28, %v10760_v44 }
 0xa86   :  { %v10770_v14 = vpop.eup %10769  ;;  %10791 = vpow2.f32 %v8069_v51  ;;  %v8068_v46 = vmul.f32 -1.442695, %v6280_v26  ;;  %v6283_v12 = vadd.f32 %v9671_v23, %v521_v62  ;;  %v526_v62 = vadd.f32 %v15915_v20, %v15440_v4 }
 0xa87   :  { %v10772_v37 = vpop.eup %10771  ;;  %v6171_v7 = vpop.f32.mrf.mxu1  ;;  %v6376_v42 = vmul.f32 %v10770_v14, %v10768_v30 }
 0xa88   :  { %v10774_v47 = vpop.eup %10773  ;;  %v6371_v27 = vmul.f32 %v10772_v37, %v14364_v3  ;;  %10793 = vpow2.f32 %v8068_v46  ;;  %v8071_v58 = vmul.f32 -1.442695, %v6283_v12  ;;  %v6282_v44 = vadd.f32 %v6171_v7, %v516_v38  ;;  %v15916_v7 = vld [vmem:[#allocation32_spill] sm:$0xff] }
 0xa89   :  { %v10776_v56 = vpop.eup %10775  ;;  %v6359_v1 = vadd.f32 1.0, %v10774_v47  ;;  %v9674_v54 = vpop.f32.mrf.mxu1  ;;  %v541_v47 = vadd.f32 %v15916_v7, %v12501_v63  ;;  %v546_v38 = vadd.f32 %v15920_v41, %v12489_v22 }
 0xa8a   :  { %v10778_v2 = vpop.eup %10777  ;;  %v6379_v11 = vadd.f32 %v6375_v19, %v6371_v27  ;;  %v6370_v13 = vmul.f32 %v10776_v56, %v14439_v17  ;;  %10795 = vpow2.f32 %v8071_v58  ;;  %v531_v19 = vadd.f32 %v15914_v6, %v15438_v43  ;;  %v15917_v27 = vld [vmem:[#allocation40_spill] sm:$0xff] }
 0xa8b   :  { %v10780_v34 = vpop.eup %10779  ;;  %10797 = vrcp.f32 %v6359_v1  ;;  %v6358_v57 = vadd.f32 1.0, %v10778_v2  ;;  %v6181_v21 = vpop.f32.mrf.mxu1  ;;  %v8070_v23 = vmul.f32 -1.442695, %v6282_v44  ;;  %v561_v58 = vadd.f32 %v15917_v27, %v12613_v31 }
 0xa8c   :  { %v10782_v40 = vpop.eup %10781  ;;  %10799 = vtanh.f32 %v6379_v11  ;;  %v6378_v3 = vadd.f32 %v6374_v18, %v6370_v13  ;;  %v6373_v60 = vmul.f32 %v10780_v34, %v14373_v50  ;;  %v6285_v33 = vadd.f32 %v9674_v54, %v531_v19  ;;  %v15918_v54 = vld [vmem:[#allocation34_spill] sm:$0xff]  ;;  %v15919_v11 = vld [vmem:[#allocation36_spill] sm:$0xff] }
 0xa8d   :  { %v10784_v35 = vpop.eup %10783  ;;  %10801 = vrcp.f32 %v6358_v57  ;;  %v6361_v17 = vadd.f32 1.0, %v10782_v40  ;;  %v9677_v16 = vpop.f32.mrf.mxu1  ;;  %v6284_v46 = vadd.f32 %v6181_v21, %v526_v62  ;;  %v536_v2 = vadd.f32 %v15918_v54, %v15524_v36  ;;  %v15921_v40 = vld [vmem:[#allocation42_spill] sm:$0xff] }
 0xa8e   :  { %v10786_v39 = vpop.eup %10785  ;;  %10803 = vtanh.f32 %v6378_v3  ;;  %v6381_v15 = vadd.f32 %v6377_v0, %v6373_v60  ;;  %v6372_v61 = vmul.f32 %v10784_v35, %v14435_v10  ;;  %v8073_v30 = vmul.f32 -1.442695, %v6285_v33 }
 0xa8f   :  { %v10788_v48 = vpop.eup %10787  ;;  %10805 = vrcp.f32 %v6361_v17  ;;  %v6360_v50 = vadd.f32 1.0, %v10786_v39  ;;  %v6191_v28 = vpop.f32.mrf.mxu1  ;;  %v8072_v56 = vmul.f32 -1.442695, %v6284_v46  ;;  %v551_v13 = vadd.f32 %v15919_v11, %v12475_v55  ;;  %v15922_v55 = vld [vmem:[#allocation44_spill] sm:$0xff] }
 0xa90   :  { %10807 = vtanh.f32 %v6381_v15  ;;  %v6380_v43 = vadd.f32 %v6376_v42, %v6372_v61  ;;  %v6403_v51 = vadd.f32 1.0, %v10788_v48  ;;  %v6287_v63 = vadd.f32 %v9677_v16, %v541_v47  ;;  %v15923_v61 = vld [vmem:[#allocation46_spill] sm:$0xff] }
 0xa91   :  { %v10790_v26 = vpop.eup %10789  ;;  %10809 = vrcp.f32 %v6360_v50  ;;  %v9680_v12 = vpop.f32.mrf.mxu1  ;;  %v556_v3 = vadd.f32 %v15921_v40, %v12623_v24  ;;  %v6286_v36 = vadd.f32 %v6191_v28, %v536_v2  ;;  %v571_v6 = vadd.f32 %v15922_v55, %v15522_v29 }
 0xa92   :  { %10811 = vtanh.f32 %v6380_v43  ;;  %v6402_v0 = vadd.f32 1.0, %v10790_v26  ;;  %v6289_v19 = vadd.f32 %v9680_v12, %v551_v13  ;;  %v566_v42 = vadd.f32 %v15923_v61, %v12605_v53  ;;  %v14719_v29 = vpop.permute.xlu1 %6506  ;;  %v14722_v53 = vpop.permute.xlu0 %6501 }
 0xa93   :  { %v10792_v10 = vpop.eup %10791  ;;  %10813 = vrcp.f32 %v6403_v51  ;;  %v6201_v14 = vpop.f32.mrf.mxu1 }
 0xa94   :  { %10815 = vrcp.f32 %v6402_v0  ;;  %v6405_v4 = vadd.f32 1.0, %v10792_v10  ;;  %v6288_v22 = vadd.f32 %v6201_v14, %v546_v38 }
 0xa95   :  { %v10794_v37 = vpop.eup %10793  ;;  %10817 = vpow2.f32 %v8070_v23  ;;  %v9683_v1 = vpop.f32.mrf.mxu1 }
 0xa96   :  { %10819 = vrcp.f32 %v6405_v4  ;;  %v6404_v18 = vadd.f32 1.0, %v10794_v37  ;;  %v6291_v57 = vadd.f32 %v9683_v1, %v561_v58 }
 0xa97   :  { %v10796_v34 = vpop.eup %10795  ;;  %10821 = vpow2.f32 %v8073_v30  ;;  %v6211_v21 = vpop.f32.mrf.mxu1 }
 0xa98   :  { %v10798_v31 = vpop.eup %10797  ;;  %10823 = vrcp.f32 %v6404_v18  ;;  %v6427_v60 = vadd.f32 1.0, %v10796_v34  ;;  %v6290_v16 = vadd.f32 %v6211_v21, %v556_v3  ;;  %v8075_v24 = vmul.f32 -1.442695, %v6291_v57 }
 0xa99   :  { %v10800_v35 = vpop.eup %10799  ;;  %10825 = vpow2.f32 %v8072_v56  ;;  %v9686_v17 = vpop.f32.mrf.mxu1 }
 0xa9a   :  { %v10802_v44 = vpop.eup %10801  ;;  %10827 = vrcp.f32 %v6427_v60  ;;  %v6387_v39 = vmul.f32 %v10800_v35, %v10798_v31  ;;  %v6293_v62 = vadd.f32 %v9686_v17, %v571_v6  ;;  %v8074_v51 = vmul.f32 -1.442695, %v6290_v16 }
 0xa9b   :  { %v10804_v15 = vpop.eup %10803  ;;  %10829 = vtanh.f32 %v6287_v63  ;;  %v6221_v48 = vpop.f32.mrf.mxu1 }
 0xa9c   :  { %v10806_v20 = vpop.eup %10805  ;;  %10831 = vtanh.f32 %v6286_v36  ;;  %v6292_v33 = vadd.f32 %v6221_v48, %v566_v42  ;;  %v8077_v10 = vmul.f32 -1.442695, %v6293_v62  ;;  %v6386_v11 = vmul.f32 %v10804_v15, %v10802_v44 }
 0xa9d   :  { %v10808_v50 = vpop.eup %10807  ;;  %10833 = vtanh.f32 %v6289_v19  ;;  %v9724_v28 = vpop.f32.mrf.mxu1 }
 0xa9e   :  { %v10810_v43 = vpop.eup %10809  ;;  %10835 = vtanh.f32 %v6288_v22  ;;  %v6698_v26 = vadd.f32 %v9724_v28, %v14719_v29  ;;  %v6389_v23 = vmul.f32 %v10808_v50, %v10806_v20  ;;  %v8076_v37 = vmul.f32 -1.442695, %v6292_v33 }
 0xa9f   :  { %v10812_v46 = vpop.eup %10811  ;;  %10837 = vpow2.f32 %v8075_v24  ;;  %v6692_v12 = vpop.f32.mrf.mxu1 }
 0xaa0   :  { %v10814_v0 = vpop.eup %10813  ;;  %8083 = vst [vmem:[%s14907_s6 + $0x18] sm:$0xff] %v6698_v26  ;;  %v6693_v30 = vadd.f32 %v6692_v12, %v14722_v53  ;;  %9828 = vmatprep.subr.mxu1 %v6389_v23  ;;  %v6388_v14 = vmul.f32 %v10812_v46, %v10810_v43  ;;  %10839 = vpow2.f32 %v8074_v51  ;;  %v6713_v47 = vmul.f32 %v6698_v26, %v6698_v26 }
 0xaa1   :  { %v10816_v4 = vpop.eup %10815  ;;  %9829 = vmatpush3.msra.mxu1 %v6389_v23  ;;  %10841 = vpow2.f32 %v8077_v10 }
 0xaa2   :  { %v10818_v7 = vpop.eup %10817  ;;  %8082 = vst [vmem:[%s14907_s6 + $0x10] sm:$0xff] %v6693_v30  ;;  %v14731_v27 = vadd.f32 %v6698_v26, %v6693_v30  ;;  %v6712_v58 = vmul.f32 %v6693_v30, %v6693_v30  ;;  %9830 = vmatprep.subr.mxu1 %v6388_v14 }
 0xaa3   :  { %v10820_v56 = vpop.eup %10819  ;;  %v6426_v1 = vadd.f32 1.0, %v10818_v7  ;;  %9831 = vmatpush3.msra.mxu1 %v6388_v14 }
 0xaa4   :  { %v10822_v54 = vpop.eup %10821  ;;  %v14733_v2 = vadd.f32 %v6713_v47, %v6712_v58  ;;  %9832 = vmatprep.subr.mxu1 %v6387_v39 }
 0xaa5   :  { %v10824_v13 = vpop.eup %10823  ;;  %10843 = vrcp.f32 %v6426_v1  ;;  %v6429_v18 = vadd.f32 1.0, %v10822_v54  ;;  %9833 = vmatpush3.msra.mxu1 %v6387_v39 }
 0xaa6   :  { %v10826_v34 = vpop.eup %10825  ;;  %10845 = vpow2.f32 %v8076_v37  ;;  %9834 = vmatprep.subr.mxu1 %v6386_v11 }
 0xaa7   :  { %v10828_v41 = vpop.eup %10827  ;;  %10847 = vrcp.f32 %v6429_v18  ;;  %v6428_v38 = vadd.f32 1.0, %v10826_v34  ;;  %9835 = vmatpush3.msra.mxu1 %v6386_v11 }
 0xaa8   :  { %v10830_v63 = vpop.eup %10829  ;;  %v6467_v57 = vmul.f32 %v10828_v41, %v14418_v59  ;;  %9837 = vmatmul.mubr.msk.f32.vlgmr.msra.gmra.mxu1 %vm2472_vm1, %v14598_v52 }
 0xaa9   :  { %v10832_v21 = vpop.eup %10831  ;;  %10849 = vrcp.f32 %v6428_v38  ;;  %v6471_v31 = vmul.f32 %v10830_v63, %v10814_v0  ;;  %v15924_v63 = vld [vmem:[#allocation251_spill] sm:$0xff] }
 0xaaa   :  { %v10834_v40 = vpop.eup %10833  ;;  %v6470_v3 = vmul.f32 %v10832_v21, %v10816_v4  ;;  %v15926_v21 = vld [vmem:[#allocation253_spill] sm:$0xff] }
 0xaab   :  { %v10836_v60 = vpop.eup %10835  ;;  %v6475_v36 = vadd.f32 %v6471_v31, %v6467_v57  ;;  %v6473_v35 = vmul.f32 %v10834_v40, %v10820_v56  ;;  %v15925_v57 = vld [vmem:[#allocation252_spill] sm:$0xff]  ;;  %v15927_v31 = vld [vmem:[#allocation254_spill] sm:$0xff] }
 0xaac   :  { %v10838_v55 = vpop.eup %10837  ;;  %v6472_v6 = vmul.f32 %v10836_v60, %v10824_v13  ;;  %v15928_v40 = vld [vmem:[#allocation146_spill] sm:$0xff] }
 0xaad   :  { %10851 = vtanh.f32 %v6475_v36  ;;  %v6455_v19 = vadd.f32 1.0, %v10838_v55  ;;  %v9762_v17 = vpop.f32.mrf.mxu1  ;;  %v10840_v22 = vpop.eup %10839  ;;  %v15929_v60 = vld [vmem:[#allocation150_spill] sm:$0xff]  ;;  %v15930_v36 = vld [vmem:[#allocation152_spill] sm:$0xff] }
 0xaae   :  { %v6906_v44 = vadd.f32 %v9762_v17, %v14719_v29  ;;  %v10842_v16 = vpop.eup %10841  ;;  %v6454_v61 = vadd.f32 1.0, %v10840_v22  ;;  %v15932_v55 = vld [vmem:[#allocation218_spill] sm:$0xff]  ;;  %v15937_v22 = vld [vmem:[#allocation271_spill] sm:$0xff] }
 0xaaf   :  { %10853 = vrcp.f32 %v6455_v19  ;;  %v6900_v59 = vpop.f32.mrf.mxu1  ;;  %v6457_v33 = vadd.f32 1.0, %v10842_v16  ;;  %v15934_v19 = vld [vmem:[#allocation220_spill] sm:$0xff]  ;;  %v15935_v17 = vld [vmem:[#allocation170_spill] sm:$0xff]  ;;  %v15939_v16 = vld [vmem:[#allocation273_spill] sm:$0xff] }
 0xab0   :  { %8091 = vst [vmem:[%s14907_s6 + $0x38] sm:$0xff] %v6906_v44  ;;  %v6901_v39 = vadd.f32 %v6900_v59, %v14722_v53  ;;  %v6921_v48 = vmul.f32 %v6906_v44, %v6906_v44  ;;  %10855 = vrcp.f32 %v6454_v61  ;;  %v15938_v59 = vld [vmem:[#allocation272_spill] sm:$0xff]  ;;  %v15942_v61 = vld [vmem:[#allocation66_spill] sm:$0xff] }
 0xab2   :  { %v10844_v15 = vpop.eup %10843  ;;  %8090 = vst [vmem:[%s14907_s6 + $0x30] sm:$0xff] %v6901_v39  ;;  %v14747_v20 = vadd.f32 %v6906_v44, %v6901_v39  ;;  %v6920_v62 = vmul.f32 %v6901_v39, %v6901_v39  ;;  %v15936_v44 = vld [vmem:[#allocation270_spill] sm:$0xff] }
 0xab3   :  { %v10846_v42 = vpop.eup %10845  ;;  %v6466_v24 = vmul.f32 %v10844_v15, %v14428_v5  ;;  %v15940_v39 = vld [vmem:[#allocation62_spill] sm:$0xff]  ;;  %v15941_v15 = vld [vmem:[#allocation64_spill] sm:$0xff] }
 0xab4   :  { %v10848_v50 = vpop.eup %10847  ;;  %v14750_v51 = vadd.f32 %v6921_v48, %v6920_v62  ;;  %v6456_v23 = vadd.f32 1.0, %v10846_v42  ;;  %v15943_v42 = vld [vmem:[#allocation68_spill] sm:$0xff]  ;;  %v15945_v48 = vld [vmem:[#allocation7_spill] sm:$0xff] }
 0xab5   :  { %v6474_v28 = vadd.f32 %v6470_v3, %v6466_v24  ;;  %v6469_v43 = vmul.f32 %v10848_v50, %v14424_v45  ;;  %v10994_v3 = vld [vmem:[%s14906_s4] sm:$0xff]  ;;  %v15946_v62 = vld [vmem:[#allocation8_spill] sm:$0xff]  ;;  %v15947_v50 = vld [vmem:[#allocation9_spill] sm:$0xff] }
 0xab6   :  { %v10850_v26 = vpop.eup %10849  ;;  %v15944_v24 = vld [vmem:[#allocation6_spill] sm:$0xff] }
 0xab7   :  { %10857 = vtanh.f32 %v6474_v28  ;;  %v6477_v5 = vadd.f32 %v6473_v35, %v6469_v43  ;;  %v6468_v46 = vmul.f32 %v10850_v26, %v14431_v49  ;;  %v15931_v35 = vld [vmem:[#allocation208_spill] sm:$0xff] }
 0xab8   :  { %10859 = vrcp.f32 %v6457_v33 }
 0xab9   :  { %10861 = vtanh.f32 %v6477_v5  ;;  %v6476_v12 = vadd.f32 %v6472_v6, %v6468_v46  ;;  %v15933_v6 = vld [vmem:[#allocation224_spill] sm:$0xff] }
 0xaba   :  { %v10852_v0 = vpop.eup %10851  ;;  %10863 = vrcp.f32 %v6456_v23 }
 0xabb   :  { %10865 = vtanh.f32 %v6476_v12 }
 0xabc   :  { %v10854_v10 = vpop.eup %10853 }
 0xabd   :  { %v9800_v30 = vpop.f32.mrf.mxu1  ;;  %v6483_v14 = vmul.f32 %v10854_v10, %v10852_v0  ;;  %v10856_v58 = vpop.eup %10855 }
 0xabe   :  { %v7114_v45 = vadd.f32 %v9800_v30, %v14719_v29 }
 0xabf   :  { %v7108_v4 = vpop.f32.mrf.mxu1 }
 0xac0   :  { %8099 = vst [vmem:[%s14907_s6 + $0x58] sm:$0xff] %v7114_v45  ;;  %v7109_v37 = vadd.f32 %v7108_v4, %v14722_v53  ;;  %v7129_v7 = vmul.f32 %v7114_v45, %v7114_v45 }
 0xac2   :  { %8098 = vst [vmem:[%s14907_s6 + $0x50] sm:$0xff] %v7109_v37  ;;  %v14761_v49 = vadd.f32 %v7114_v45, %v7109_v37  ;;  %v7128_v47 = vmul.f32 %v7109_v37, %v7109_v37  ;;  %v6705_v45 = vrot.slane %v14731_v27, 4  ;;  %v6715_v37 = vrot.slane %v14733_v2, 4 }
 0xac4   :  { %v10858_v56 = vpop.eup %10857  ;;  %v14763_v1 = vadd.f32 %v7129_v7, %v7128_v47  ;;  %v6913_v47 = vrot.slane %v14747_v20, 4 }
 0xac5   :  { %v10860_v54 = vpop.eup %10859  ;;  %v6482_v11 = vmul.f32 %v10858_v56, %v10856_v58  ;;  %v6706_v58 = vadd.f32 %v6705_v45, %v14731_v27 }
 0xac6   :  { %v10862_v13 = vpop.eup %10861 }
 0xac7   :  { %v10864_v18 = vpop.eup %10863  ;;  %v6485_v34 = vmul.f32 %v10862_v13, %v10860_v54  ;;  %v6716_v54 = vadd.f32 %v6715_v37, %v14733_v2 }
 0xac8   :  { %v10866_v41 = vpop.eup %10865 }
 0xac9   :  { %9687 = vmatprep.subr.mxu0 %v6485_v34  ;;  %v6484_v38 = vmul.f32 %v10866_v41, %v10864_v18  ;;  %v6914_v41 = vadd.f32 %v6913_v47, %v14747_v20 }
 0xaca   :  { %9688 = vmatpush3.msra.mxu0 %v6485_v34 }
 0xacb   :  { %9689 = vmatprep.subr.mxu0 %v6484_v38 }
 0xacc   :  { %9690 = vmatpush3.msra.mxu0 %v6484_v38 }
 0xacd   :  { %9691 = vmatprep.subr.mxu0 %v6483_v14 }
 0xace   :  { %9692 = vmatpush3.msra.mxu0 %v6483_v14 }
 0xacf   :  { %9693 = vmatprep.subr.mxu0 %v6482_v11 }
 0xad0   :  { %9694 = vmatpush3.msra.mxu0 %v6482_v11  ;;  %v6923_v11 = vrot.slane %v14750_v51, 4 }
 0xad1   :  { %9695 = vmatprep.subr.mxu0 %v15924_v63 }
 0xad2   :  { %9696 = vmatpush3.msra.mxu0 %v15924_v63  ;;  %v6707_v63 = vrot.slane %v6706_v58, 2  ;;  %v6924_v2 = vadd.f32 %v6923_v11, %v14750_v51 }
 0xad3   :  { %9697 = vmatprep.subr.mxu0 %v15925_v57 }
 0xad4   :  { %9698 = vmatpush3.msra.mxu0 %v15925_v57 }
 0xad5   :  { %9699 = vmatprep.subr.mxu0 %v15926_v21 }
 0xad6   :  { %9700 = vmatpush3.msra.mxu0 %v15926_v21  ;;  %v6717_v21 = vrot.slane %v6716_v54, 2 }
 0xad7   :  { %9701 = vmatprep.subr.mxu0 %v15927_v31 }
 0xad8   :  { %9702 = vmatpush3.msra.mxu0 %v15927_v31 }
 0xad9   :  { %9704 = vmatmul.mubr.msk.f32.vlgmr.msra.gmra.mxu0 %vm2472_vm1, %v14598_v52  ;;  %9725 = vmatprep.subr.mxu0 %v15928_v40 }
 0xada   :  { %9726 = vmatpush3.msra.mxu0 %v15928_v40  ;;  %9741 = vmatprep.mubr.msk.f32.mxu0 %vm2472_vm1, %v10994_v3 }
 0xadb   :  { %9727 = vmatprep.subr.mxu0 %v15929_v60 }
 0xadc   :  { %9728 = vmatpush3.msra.mxu0 %v15929_v60  ;;  %v6915_v60 = vrot.slane %v6914_v41, 2 }
 0xadd   :  { %9729 = vmatprep.subr.mxu0 %v15930_v36 }
 0xade   :  { %9730 = vmatpush3.msra.mxu0 %v15930_v36  ;;  %v6708_v36 = vadd.f32 %v6707_v63, %v6706_v58 }
 0xadf   :  { %9731 = vmatprep.subr.mxu0 %v15931_v35 }
 0xae0   :  { %9732 = vmatpush3.msra.mxu0 %v15931_v35  ;;  %v6709_v51 = vrot.slane %v6708_v36, 1 }
 0xae1   :  { %9733 = vmatprep.subr.mxu0 %v15932_v55 }
 0xae2   :  { %9734 = vmatpush3.msra.mxu0 %v15932_v55 }
 0xae3   :  { %9735 = vmatprep.subr.mxu0 %v15933_v6 }
 0xae4   :  { %9736 = vmatpush3.msra.mxu0 %v15933_v6 }
 0xae5   :  { %9737 = vmatprep.subr.mxu0 %v15934_v19 }
 0xae6   :  { %9738 = vmatpush3.msra.mxu0 %v15934_v19  ;;  %v6718_v19 = vadd.f32 %v6717_v21, %v6716_v54 }
 0xae7   :  { %9739 = vmatprep.subr.mxu0 %v15935_v17 }
 0xae8   :  { %9740 = vmatpush3.msra.mxu0 %v15935_v17  ;;  %v6925_v17 = vrot.slane %v6924_v2, 2 }
 0xae9   :  { %9742 = vmatmul.mubr.msk.f32.vlgmr.msra.gmra.mxu0 %vm2472_vm1, %v14598_v52  ;;  %9763 = vmatprep.subr.mxu0 %v15936_v44 }
 0xaea   :  { %9764 = vmatpush3.msra.mxu0 %v15936_v44  ;;  %9779 = vmatprep.mubr.msk.f32.mxu0 %vm2472_vm1, %v10994_v3 }
 0xaeb   :  { %9765 = vmatprep.subr.mxu0 %v15937_v22 }
 0xaec   :  { %9766 = vmatpush3.msra.mxu0 %v15937_v22 }
 0xaed   :  { %9767 = vmatprep.subr.mxu0 %v15938_v59 }
 0xaee   :  { %9768 = vmatpush3.msra.mxu0 %v15938_v59 }
 0xaef   :  { %9769 = vmatprep.subr.mxu0 %v15939_v16 }
 0xaf0   :  { %9770 = vmatpush3.msra.mxu0 %v15939_v16  ;;  %v6916_v16 = vadd.f32 %v6915_v60, %v6914_v41 }
 0xaf1   :  { %9771 = vmatprep.subr.mxu0 %v15940_v39 }
 0xaf2   :  { %9772 = vmatpush3.msra.mxu0 %v15940_v39 }
 0xaf3   :  { %9773 = vmatprep.subr.mxu0 %v15941_v15 }
 0xaf4   :  { %9774 = vmatpush3.msra.mxu0 %v15941_v15 }
 0xaf5   :  { %9775 = vmatprep.subr.mxu0 %v15942_v61 }
 0xaf6   :  { %9776 = vmatpush3.msra.mxu0 %v15942_v61 }
 0xaf7   :  { %9777 = vmatprep.subr.mxu0 %v15943_v42 }
 0xaf8   :  { %9778 = vmatpush3.msra.mxu0 %v15943_v42  ;;  %v6719_v42 = vrot.slane %v6718_v19, 1 }
 0xaf9   :  { %9780 = vmatmul.mubr.msk.f32.vlgmr.msra.gmra.mxu0 %vm2472_vm1, %v14598_v52  ;;  %9801 = vmatprep.subr.mxu0 %v15944_v24 }
 0xafa   :  { %9802 = vmatpush3.msra.mxu0 %v15944_v24  ;;  %9817 = vmatprep.mubr.msk.f32.mxu0 %vm2472_vm1, %v10994_v3  ;;  %v6926_v24 = vadd.f32 %v6925_v17, %v6924_v2 }
 0xafb   :  { %9803 = vmatprep.subr.mxu0 %v15945_v48 }
 0xafc   :  { %9804 = vmatpush3.msra.mxu0 %v15945_v48 }
 0xafd   :  { %9805 = vmatprep.subr.mxu0 %v15946_v62 }
 0xafe   :  { %9806 = vmatpush3.msra.mxu0 %v15946_v62 }
 0xaff   :  { %9807 = vmatprep.subr.mxu0 %v15947_v50 }
 0xb00   :  { %9808 = vmatpush3.msra.mxu0 %v15947_v50 }
 0xb01   :  { %9809 = vmatprep.subr.mxu0 %v14444_v25 }
 0xb02   :  { %9810 = vmatpush3.msra.mxu0 %v14444_v25 }
 0xb03   :  { %9811 = vmatprep.subr.mxu0 %v14447_v32 }
 0xb04   :  { %9812 = vmatpush3.msra.mxu0 %v14447_v32 }
 0xb05   :  { %9813 = vmatprep.subr.mxu0 %v14451_v9 }
 0xb06   :  { %9814 = vmatpush3.msra.mxu0 %v14451_v9 }
 0xb07   :  { %9815 = vmatprep.subr.mxu0 %v14455_v8 }
 0xb08   :  { %9816 = vmatpush3.msra.mxu0 %v14455_v8 }
 0xb09   :  { %9818 = vmatmul.mubr.msk.f32.vlgmr.msra.gmra.mxu0 %vm2472_vm1, %v14598_v52 }
 0xb68   :  { %v9838_v33 = vpop.f32.mrf.mxu1 }
 0xb69   :  { %v7322_v28 = vadd.f32 %v9838_v33, %v14719_v29  ;;  %v6917_v33 = vrot.slane %v6916_v16, 1 }
 0xb6a   :  { %v7316_v43 = vpop.f32.mrf.mxu1 }
 0xb6b   :  { %8107 = vst [vmem:[%s14907_s6 + $0x78] sm:$0xff] %v7322_v28  ;;  %v7317_v25 = vadd.f32 %v7316_v43, %v14722_v53  ;;  %v7337_v32 = vmul.f32 %v7322_v28, %v7322_v28  ;;  %v6710_v43 = vadd.f32 %v6709_v51, %v6708_v36 }
 0xb6d   :  { %8106 = vst [vmem:[%s14907_s6 + $0x70] sm:$0xff] %v7317_v25  ;;  %v14843_v9 = vadd.f32 %v7322_v28, %v7317_v25  ;;  %v7336_v8 = vmul.f32 %v7317_v25, %v7317_v25  ;;  %v7121_v28 = vrot.slane %v14761_v49, 4 }
 0xb6f   :  { %v14845_v26 = vadd.f32 %v7337_v32, %v7336_v8  ;;  %v7122_v45 = vadd.f32 %v7121_v28, %v14761_v49 }
 0xb71   :  { %v7123_v41 = vrot.slane %v7122_v45, 2  ;;  %v7339_v17 = vrot.slane %v14845_v26, 4 }
 0xb99   :  { %v9705_v52 = vpop.f32.mrf.mxu0 }
 0xb9a   :  { %v6595_v23 = vadd.f32 %v9705_v52, %v14719_v29  ;;  %v6720_v52 = vadd.f32 %v6719_v42, %v6718_v19 }
 0xb9b   :  { %v6589_v5 = vpop.f32.mrf.mxu0 }
 0xb9c   :  { %6599 = vst [vmem:[%s14907_s6 + $0x8] sm:$0xff] %v6595_v23  ;;  %v6590_v46 = vadd.f32 %v6589_v5, %v14722_v53  ;;  %v6609_v12 = vmul.f32 %v6595_v23, %v6595_v23  ;;  %v7131_v5 = vrot.slane %v14763_v1, 4 }
 0xb9e   :  { %6598 = vst [vmem:[%s14907_s6] sm:$0xff] %v6590_v46  ;;  %v6600_v0 = vadd.f32 %v6595_v23, %v6590_v46  ;;  %v6608_v10 = vmul.f32 %v6590_v46, %v6590_v46  ;;  %v6927_v23 = vrot.slane %v6926_v24, 1  ;;  %v7132_v54 = vadd.f32 %v7131_v5, %v14763_v1 }
 0xba0   :  { %v6610_v30 = vadd.f32 %v6609_v12, %v6608_v10  ;;  %v6601_v14 = vrot.slane %v6600_v0, 4 }
 0xba2   :  { %v6611_v4 = vrot.slane %v6610_v30, 4  ;;  %v6602_v7 = vadd.f32 %v6601_v14, %v6600_v0  ;;  %v6918_v14 = vadd.f32 %v6917_v33, %v6916_v16 }
 0xba4   :  { %v6612_v56 = vadd.f32 %v6611_v4, %v6610_v30  ;;  %v6603_v18 = vrot.slane %v6602_v7, 2 }
 0xba6   :  { %v6613_v57 = vrot.slane %v6612_v56, 2  ;;  %v6604_v31 = vadd.f32 %v6603_v18, %v6602_v7 }
 0xba8   :  { %v6614_v35 = vadd.f32 %v6613_v57, %v6612_v56  ;;  %v6605_v44 = vrot.slane %v6604_v31, 1  ;;  %v6928_v56 = vadd.f32 %v6927_v23, %v6926_v24 }
 0xba9   :  { %v9743_v13 = vpop.f32.mrf.mxu0 }
 0xbaa   :  { %v6802_v34 = vadd.f32 %v9743_v13, %v14719_v29  ;;  %v6615_v39 = vrot.slane %v6614_v35, 1  ;;  %v6606_v48 = vadd.f32 %v6605_v44, %v6604_v31  ;;  %v7124_v31 = vadd.f32 %v7123_v41, %v7122_v45 }
 0xbab   :  { %v6796_v38 = vpop.f32.mrf.mxu0 }
 0xbac   :  { %8087 = vst [vmem:[%s14907_s6 + $0x28] sm:$0xff] %v6802_v34  ;;  %v6797_v27 = vadd.f32 %v6796_v38, %v14722_v53  ;;  %v6817_v40 = vmul.f32 %v6802_v34, %v6802_v34  ;;  %v6616_v25 = vadd.f32 %v6615_v39, %v6614_v35  ;;  %v6711_v12 = vadd.f32 %v6710_v43, %v6606_v48 }
 0xbad   :  { %v7125_v36 = vrot.slane %v7124_v31, 1  ;;  %v7329_v35 = vrot.slane %v14843_v9, 4 }
 0xbae   :  { %8086 = vst [vmem:[%s14907_s6 + $0x20] sm:$0xff] %v6797_v27  ;;  %v6808_v3 = vadd.f32 %v6802_v34, %v6797_v27  ;;  %v6816_v20 = vmul.f32 %v6797_v27, %v6797_v27  ;;  %v6721_v37 = vadd.f32 %v6720_v52, %v6616_v25  ;;  %v7133_v27 = vrot.slane %v7132_v54, 2 }
 0xbaf   :  { %v7126_v51 = vadd.f32 %v7125_v36, %v7124_v31 }
 0xbb0   :  { %v6809_v55 = vrot.slane %v6808_v3, 4  ;;  %v6818_v6 = vadd.f32 %v6817_v40, %v6816_v20  ;;  %v7134_v1 = vadd.f32 %v7133_v27, %v7132_v54 }
 0xbb2   :  { %v6810_v22 = vadd.f32 %v6809_v55, %v6808_v3  ;;  %v6819_v59 = vrot.slane %v6818_v6, 4  ;;  %v7135_v19 = vrot.slane %v7134_v1, 1 }
 0xbb4   :  { %v6811_v15 = vrot.slane %v6810_v22, 2  ;;  %v6820_v61 = vadd.f32 %v6819_v59, %v6818_v6  ;;  %v7136_v48 = vadd.f32 %v7135_v19, %v7134_v1 }
 0xbb6   :  { %v6812_v62 = vadd.f32 %v6811_v15, %v6810_v22  ;;  %v6821_v50 = vrot.slane %v6820_v61, 2  ;;  %v7330_v15 = vadd.f32 %v7329_v35, %v14843_v9 }
 0xbb8   :  { %v6813_v32 = vrot.slane %v6812_v62, 1  ;;  %v6822_v8 = vadd.f32 %v6821_v50, %v6820_v61  ;;  %v7331_v43 = vrot.slane %v7330_v15, 2 }
 0xbb9   :  { %v9781_v46 = vpop.f32.mrf.mxu0 }
 0xbba   :  { %v6814_v0 = vadd.f32 %v6813_v32, %v6812_v62  ;;  %v6823_v10 = vrot.slane %v6822_v8, 1  ;;  %v7010_v30 = vadd.f32 %v9781_v46, %v14719_v29  ;;  %v7340_v62 = vadd.f32 %v7339_v17, %v14845_v26 }
 0xbbb   :  { %v7004_v4 = vpop.f32.mrf.mxu0 }
 0xbbc   :  { %v6815_v7 = vadd.f32 %v6814_v0, %v6711_v12  ;;  %v6824_v47 = vadd.f32 %v6823_v10, %v6822_v8  ;;  %8095 = vst [vmem:[%s14907_s6 + $0x48] sm:$0xff] %v7010_v30  ;;  %v7005_v58 = vadd.f32 %v7004_v4, %v14722_v53  ;;  %v7025_v11 = vmul.f32 %v7010_v30, %v7010_v30 }
 0xbbd   :  { %v7341_v52 = vrot.slane %v7340_v62, 2 }
 0xbbe   :  { %v6825_v13 = vadd.f32 %v6824_v47, %v6721_v37  ;;  %v6919_v18 = vadd.f32 %v6918_v14, %v6815_v7  ;;  %8094 = vst [vmem:[%s14907_s6 + $0x40] sm:$0xff] %v7005_v58  ;;  %v7016_v49 = vadd.f32 %v7010_v30, %v7005_v58  ;;  %v7024_v34 = vmul.f32 %v7005_v58, %v7005_v58 }
 0xbbf   :  { %v7342_v26 = vadd.f32 %v7341_v52, %v7340_v62 }
 0xbc0   :  { %v6929_v38 = vadd.f32 %v6928_v56, %v6825_v13  ;;  %v7017_v63 = vrot.slane %v7016_v49, 4  ;;  %v7026_v57 = vadd.f32 %v7025_v11, %v7024_v34 }
 0xbc1   :  { %v7343_v4 = vrot.slane %v7342_v26, 1 }
 0xbc2   :  { %v7018_v21 = vadd.f32 %v7017_v63, %v7016_v49  ;;  %v7027_v2 = vrot.slane %v7026_v57, 4 }
 0xbc3   :  { %v7344_v54 = vadd.f32 %v7343_v4, %v7342_v26 }
 0xbc4   :  { %v7019_v40 = vrot.slane %v7018_v21, 2  ;;  %v7028_v3 = vadd.f32 %v7027_v2, %v7026_v57 }
 0xbc6   :  { %v7020_v20 = vadd.f32 %v7019_v40, %v7018_v21  ;;  %v7029_v60 = vrot.slane %v7028_v3, 2 }
 0xbc8   :  { %v7021_v55 = vrot.slane %v7020_v20, 1  ;;  %v7030_v6 = vadd.f32 %v7029_v60, %v7028_v3 }
 0xbc9   :  { %v9819_v44 = vpop.f32.mrf.mxu0 }
 0xbca   :  { %v7022_v22 = vadd.f32 %v7021_v55, %v7020_v20  ;;  %v7031_v59 = vrot.slane %v7030_v6, 1  ;;  %v7218_v16 = vadd.f32 %v9819_v44, %v14719_v29 }
 0xbcb   :  { %v7212_v39 = vpop.f32.mrf.mxu0 }
 0xbcc   :  { %v7023_v61 = vadd.f32 %v7022_v22, %v6919_v18  ;;  %v7032_v42 = vadd.f32 %v7031_v59, %v7030_v6  ;;  %8103 = vst [vmem:[%s14907_s6 + $0x68] sm:$0xff] %v7218_v16  ;;  %v7213_v24 = vadd.f32 %v7212_v39, %v14722_v53  ;;  %v7233_v50 = vmul.f32 %v7218_v16, %v7218_v16 }
 0xbcd   :  { %v7332_v53 = vadd.f32 %v7331_v43, %v7330_v15 }
 0xbce   :  { %v7033_v33 = vadd.f32 %v7032_v42, %v6929_v38  ;;  %v7127_v28 = vadd.f32 %v7126_v51, %v7023_v61  ;;  %8102 = vst [vmem:[%s14907_s6 + $0x60] sm:$0xff] %v7213_v24  ;;  %v7224_v29 = vadd.f32 %v7218_v16, %v7213_v24  ;;  %v7232_v9 = vmul.f32 %v7213_v24, %v7213_v24 }
 0xbcf   :  { %v7333_v30 = vrot.slane %v7332_v53, 1 }
 0xbd0   :  { %v7137_v25 = vadd.f32 %v7136_v48, %v7033_v33  ;;  %v7225_v32 = vrot.slane %v7224_v29, 4  ;;  %v7234_v8 = vadd.f32 %v7233_v50, %v7232_v9 }
 0xbd1   :  { %v7334_v47 = vadd.f32 %v7333_v30, %v7332_v53 }
 0xbd2   :  { %v7226_v23 = vadd.f32 %v7225_v32, %v7224_v29  ;;  %v7235_v5 = vrot.slane %v7234_v8, 4 }
 0xbd4   :  { %v7227_v46 = vrot.slane %v7226_v23, 2  ;;  %v7236_v12 = vadd.f32 %v7235_v5, %v7234_v8 }
 0xbd6   :  { %v7228_v0 = vadd.f32 %v7227_v46, %v7226_v23  ;;  %v7237_v10 = vrot.slane %v7236_v12, 2 }
 0xbd8   :  { %v7229_v14 = vrot.slane %v7228_v0, 1  ;;  %v7238_v45 = vadd.f32 %v7237_v10, %v7236_v12 }
 0xbda   :  { %v7230_v37 = vadd.f32 %v7229_v14, %v7228_v0  ;;  %v7239_v7 = vrot.slane %v7238_v45, 1 }
 0xbdc   :  { %v7231_v58 = vadd.f32 %v7230_v37, %v7127_v28  ;;  %v7240_v56 = vadd.f32 %v7239_v7, %v7238_v45 }
 0xbde   :  { %v7241_v11 = vadd.f32 %v7240_v56, %v7137_v25  ;;  %v7335_v13 = vadd.f32 %v7334_v47, %v7231_v58 }
 0xbe0   :  { %v7345_v18 = vadd.f32 %v7344_v54, %v7241_v11  ;;  %7346 = vst [vmem:[%s14908_s7] sm:$0x1] %v7335_v13 }
 0xbe2   :  { %7347 = vst [vmem:[%s14909_s8] sm:$0x1] %v7345_v18 }

</bundles_post_ra>
